<compile_context>
chip_gen: v6e
topology: v6e:2x2x1
jax: 0.10.0
libtpu: 0.0.40
codegen_flags: <defaults>
</compile_context>

<pallas_src>
import jax
import jax.numpy as jnp
from jax.experimental import pallas as pl
from jax.experimental.pallas import tpu as pltpu


def fused_kernel(x_ref, w1_ref, gb_ref, res_ref, w2_ref, out_ref, x_bf16_ref):
    """One Cmid tile of: conv1x1 -> BN(batch stats) -> +res -> ReLU -> conv1x1.

    x_ref:     (Cin,  HW)      f32   resident across the grid
    w1_ref:    (TCmid, Cin)    f32   conv1 weight tile (OI layout)
    gb_ref:    (Cmid, 2)       f32   resident [gamma | beta]
    res_ref:   (TCmid, HW)     f32   residual tile
    w2_ref:    (Cout, Cmid)    f32   resident conv2 weight (OI layout)
    out_ref:   (Cout, HW)      f32   accumulated over the Cmid grid axis
    x_bf16_ref:(Cin,  HW)      bf16  scratch: x cast once on step 0
    """
    c = pl.program_id(0)
    tcm = w1_ref.shape[0]                     # cmid tile size (static)

    @pl.when(c == 0)
    def _():
        # One-time work: cast the resident activation to bf16 for the MXU and
        # zero the resident output accumulator.
        x_bf16_ref[...] = x_ref[...].astype(jnp.bfloat16)
        out_ref[...] = jnp.zeros_like(out_ref)

    # conv1 (1x1) == matmul on the MXU (bf16 in, f32 accumulate).
    w1 = w1_ref[...].astype(jnp.bfloat16)                       # (TCmid, Cin)
    y = jnp.dot(w1, x_bf16_ref[...], preferred_element_type=jnp.float32)  # (TCmid, HW)

    # BatchNorm training statistics per channel over HW (complete within this
    # Cmid tile), single pass: var = E[y^2] - mean^2, folded to scale + shift.
    inv_hw = 1.0 / y.shape[1]
    mean = jnp.sum(y, axis=1, keepdims=True) * inv_hw
    mean_sq = jnp.sum(y * y, axis=1, keepdims=True) * inv_hw
    var = jnp.maximum(mean_sq - mean * mean, 0.0)  # clamp: cancellation guard
    inv_std = jax.lax.rsqrt(var + 1e-5)

    off = pl.multiple_of(c * tcm, tcm)
    gb = gb_ref[pl.ds(off, tcm), :]                             # (TCmid, 2)
    gamma = gb[:, 0:1]
    beta = gb[:, 1:2]
    scale = gamma * inv_std                                     # (TCmid, 1)
    shift = beta - mean * scale                                 # (TCmid, 1)

    # normalize + residual add + ReLU in f32 on the VPU, then bf16 for the MXU.
    z = jnp.maximum(y * scale + shift + res_ref[...], 0.0).astype(jnp.bfloat16)

    # conv2 (1x1): accumulate partial products over Cmid tiles.
    w2 = w2_ref[:, pl.ds(off, tcm)].astype(jnp.bfloat16)        # (Cout, TCmid)
    out_ref[...] += jnp.dot(w2, z, preferred_element_type=jnp.float32)


def fused_forward(x104, x98, w1, gamma, beta, w2, *, cmid_tile=256):
    """x104: (1,Cin,H,W), x98: (1,Cmid,H,W), w1: (Cmid,Cin,1,1), w2: (Cout,Cmid,1,1)."""
    N, Cin, H, W = x104.shape
    Cmid = w1.shape[0]
    Cout = w2.shape[0]
    assert N == 1, "channel-major reshape path assumes batch == 1"
    assert Cmid % cmid_tile == 0
    HW = N * H * W

    # Channel-major views: pure reshapes, no transposes, no activation/weight casts.
    x_t = x104.reshape(Cin, HW)                      # (Cin, HW)   f32
    res_t = x98.reshape(Cmid, HW)                    # (Cmid, HW)  f32
    w1_m = w1[:, :, 0, 0]                            # (Cmid, Cin) f32
    w2_m = w2[:, :, 0, 0]                            # (Cout, Cmid) f32
    gb = jnp.concatenate(
        [gamma.reshape(Cmid, 1), beta.reshape(Cmid, 1)], axis=1
    )                                                # (Cmid, 2)   f32

    # TODO(synk): BatchNorm running_mean/running_var updates are not emitted
    # (the module's forward only returns x109, so they are not needed here).

    out_t = pl.pallas_call(
        fused_kernel,
        out_shape=jax.ShapeDtypeStruct((Cout, HW), jnp.float32),
        grid_spec=pltpu.PrefetchScalarGridSpec(
            num_scalar_prefetch=0,
            grid=(Cmid // cmid_tile,),
            in_specs=[
                pl.BlockSpec((Cin, HW), lambda c: (0, 0)),          # x (resident)
                pl.BlockSpec((cmid_tile, Cin), lambda c: (c, 0)),   # w1 tile
                pl.BlockSpec((Cmid, 2), lambda c: (0, 0)),          # gamma|beta (resident)
                pl.BlockSpec((cmid_tile, HW), lambda c: (c, 0)),    # residual tile
                pl.BlockSpec((Cout, Cmid), lambda c: (0, 0)),       # w2 (resident)
            ],
            out_specs=pl.BlockSpec((Cout, HW), lambda c: (0, 0)),   # accumulator
            scratch_shapes=[pltpu.VMEM((Cin, HW), jnp.bfloat16)],   # x cast once
        ),
        compiler_params=pltpu.CompilerParams(
            # Cmid grid axis is a reduction (output accumulation) -> arbitrary.
            dimension_semantics=("arbitrary",),
        ),
    )(x_t, w1_m, gb, res_t, w2_m)

    # (Cout, HW) is already channel-major: reshape straight back to NCHW.
    return out_t.reshape(N, Cout, H, W)


def reference_forward(x104, x98, w1, gamma, beta, w2):
    dn = ("NCHW", "OIHW", "NCHW")
    y = jax.lax.conv_general_dilated(x104, w1, (1, 1), "VALID", dimension_numbers=dn)
    mean = jnp.mean(y, axis=(0, 2, 3), keepdims=True)
    var = jnp.var(y, axis=(0, 2, 3), keepdims=True)
    y_bn = (y - mean) * jax.lax.rsqrt(var + 1e-5) * gamma.reshape(1, -1, 1, 1) + beta.reshape(1, -1, 1, 1)
    z = jnp.maximum(y_bn + x98, 0.0)
    return jax.lax.conv_general_dilated(z, w2, (1, 1), "VALID", dimension_numbers=dn)


if __name__ == "__main__":
    key = jax.random.PRNGKey(0)
    k1, k2, k3, k4 = jax.random.split(key, 4)

    N, H, W = 1, 28, 28
    Cin, Cmid, Cout = 128, 512, 128

    # Inputs (match the module's forward signature shapes)
    x104 = jax.random.normal(k1, (N, Cin, H, W), dtype=jnp.float32)
    x98 = jax.random.normal(k2, (N, Cmid, H, W), dtype=jnp.float32)

    # Deterministic parameter init (conv weights ~ small normals, BN affine = default 1/0)
    w1 = jax.random.normal(k3, (Cmid, Cin, 1, 1), dtype=jnp.float32) * 0.05   # conv2d32
    w2 = jax.random.normal(k4, (Cout, Cmid, 1, 1), dtype=jnp.float32) * 0.05  # conv2d33
    gamma = jnp.ones((Cmid,), dtype=jnp.float32)   # batchnorm2d32 weight
    beta = jnp.zeros((Cmid,), dtype=jnp.float32)   # batchnorm2d32 bias

    out = jax.block_until_ready(fused_forward(x104, x98, w1, gamma, beta, w2))
    ref = jax.block_until_ready(reference_forward(x104, x98, w1, gamma, beta, w2))

    assert out.shape == (N, Cout, H, W), out.shape
    max_err = float(jnp.max(jnp.abs(out - ref)))
    assert jnp.allclose(out, ref, rtol=2e-2, atol=2e-2), max_err

    print("KERNEL_OK")
</pallas_src>

<mosaic_0001>
module attributes {stable_mosaic.version = 11 : i64} {
  func.func @fused_kernel(%arg0: i32, %arg1: memref<128x784xf32, #tpu.memory_space<vmem>>, %arg2: memref<256x128xf32, #tpu.memory_space<vmem>>, %arg3: memref<512x2xf32, #tpu.memory_space<vmem>>, %arg4: memref<256x784xf32, #tpu.memory_space<vmem>>, %arg5: memref<128x512xf32, #tpu.memory_space<vmem>>, %arg6: memref<128x784xf32, #tpu.memory_space<vmem>>, %arg7: memref<128x784xbf16, #tpu.memory_space<vmem>>) attributes {dimension_semantics = [#tpu.dimension_semantics<arbitrary>], iteration_bounds = array<i64: 2>, scalar_prefetch = 0 : i64, scratch_operands = 1 : i64, tpu.core_type = #tpu.core_type<tc>, window_params = [{pipeline_mode = #tpu.pipeline_mode<synchronous>, transform_indices = @transform_0, window_bounds = array<i64: 128, 784>}, {transform_indices = @transform_1, window_bounds = array<i64: 256, 128>}, {pipeline_mode = #tpu.pipeline_mode<synchronous>, transform_indices = @transform_2, window_bounds = array<i64: 512, 2>}, {transform_indices = @transform_3, window_bounds = array<i64: 256, 784>}, {pipeline_mode = #tpu.pipeline_mode<synchronous>, transform_indices = @transform_4, window_bounds = array<i64: 128, 512>}, {pipeline_mode = #tpu.pipeline_mode<synchronous>, transform_indices = @transform_5, window_bounds = array<i64: 128, 784>}]} {
    %c0_i32 = arith.constant 0 : i32
    %0 = arith.cmpi eq, %arg0, %c0_i32 : i32
    %1 = arith.extui %0 : i1 to i32
    %c0_i32_0 = arith.constant 0 : i32
    %2 = arith.cmpi ne, %1, %c0_i32_0 : i32
    scf.if %2 {
      %c0_20 = arith.constant 0 : index
      %c0_21 = arith.constant 0 : index
      %48 = vector.load %arg1[%c0_20, %c0_21] : memref<128x784xf32, #tpu.memory_space<vmem>>, vector<128x784xf32>
      %49 = arith.truncf %48 : vector<128x784xf32> to vector<128x784xbf16>
      %c0_22 = arith.constant 0 : index
      %c0_23 = arith.constant 0 : index
      %50 = vector.load %arg7[%c0_22, %c0_23] : memref<128x784xbf16, #tpu.memory_space<vmem>>, vector<128x784xbf16>
      tpu.vector_store %arg7[%c0_22, %c0_23], %49 {strides = array<i32>} : memref<128x784xbf16, #tpu.memory_space<vmem>>, vector<128x784xbf16>,
      %cst_24 = arith.constant 0.000000e+00 : f32
      %51 = vector.broadcast %cst_24 : f32 to vector<128x784xf32>
      %c0_25 = arith.constant 0 : index
      %c0_26 = arith.constant 0 : index
      %52 = vector.load %arg6[%c0_25, %c0_26] : memref<128x784xf32, #tpu.memory_space<vmem>>, vector<128x784xf32>
      tpu.vector_store %arg6[%c0_25, %c0_26], %51 {strides = array<i32>} : memref<128x784xf32, #tpu.memory_space<vmem>>, vector<128x784xf32>,
    } else {
    }
    %c0 = arith.constant 0 : index
    %c0_1 = arith.constant 0 : index
    %3 = vector.load %arg2[%c0, %c0_1] : memref<256x128xf32, #tpu.memory_space<vmem>>, vector<256x128xf32>
    %4 = arith.truncf %3 : vector<256x128xf32> to vector<256x128xbf16>
    %c0_2 = arith.constant 0 : index
    %c0_3 = arith.constant 0 : index
    %5 = vector.load %arg7[%c0_2, %c0_3] : memref<128x784xbf16, #tpu.memory_space<vmem>>, vector<128x784xbf16>
    %cst = arith.constant dense<0.000000e+00> : vector<256x784xf32>
    %6 = tpu.matmul %4, %5, %cst {dimension_numbers = #tpu.dot_dimension_numbers<[1], [0], [0], [1], [0, 0, 1, 1], [], []>} : vector<256x128xbf16>, vector<128x784xbf16>, vector<256x784xf32> -> vector<256x784xf32>
    %cst_4 = arith.constant dense<0.000000e+00> : vector<256xf32>
    %7 = vector.multi_reduction <add>, %6, %cst_4 [1] : vector<256x784xf32> to vector<256xf32>
    %8 = vector.shape_cast %7 : vector<256xf32> to vector<256x1xf32>
    %cst_5 = arith.constant 0.00127551018 : f32
    %9 = vector.broadcast %cst_5 : f32 to vector<256x1xf32>
    %10 = arith.mulf %8, %9 : vector<256x1xf32>
    %11 = arith.mulf %6, %6 : vector<256x784xf32>
    %cst_6 = arith.constant dense<0.000000e+00> : vector<256xf32>
    %12 = vector.multi_reduction <add>, %11, %cst_6 [1] : vector<256x784xf32> to vector<256xf32>
    %13 = vector.shape_cast %12 : vector<256xf32> to vector<256x1xf32>
    %cst_7 = arith.constant 0.00127551018 : f32
    %14 = vector.broadcast %cst_7 : f32 to vector<256x1xf32>
    %15 = arith.mulf %13, %14 : vector<256x1xf32>
    %16 = arith.mulf %10, %10 : vector<256x1xf32>
    %17 = arith.subf %15, %16 : vector<256x1xf32>
    %cst_8 = arith.constant 0.000000e+00 : f32
    %18 = vector.broadcast %cst_8 : f32 to vector<256x1xf32>
    %19 = arith.maximumf %17, %18 : vector<256x1xf32>
    %cst_9 = arith.constant 9.99999974E-6 : f32
    %20 = vector.broadcast %cst_9 : f32 to vector<256x1xf32>
    %21 = arith.addf %19, %20 : vector<256x1xf32>
    %22 = math.rsqrt %21 : vector<256x1xf32>
    %c256_i32 = arith.constant 256 : i32
    %23 = arith.muli %arg0, %c256_i32 : i32
    %24 = tpu.assume_multiple %23, 256 : i32
    %25 = arith.index_cast %24 : i32 to index
    %c0_10 = arith.constant 0 : index
    %26 = vector.load %arg3[%25, %c0_10] : memref<512x2xf32, #tpu.memory_space<vmem>>, vector<256x2xf32>
    %27 = vector.extract_strided_slice %26 {offsets = [0, 0], sizes = [256, 1], strides = [1, 1]} : vector<256x2xf32> to vector<256x1xf32>
    %28 = vector.extract_strided_slice %26 {offsets = [0, 1], sizes = [256, 1], strides = [1, 1]} : vector<256x2xf32> to vector<256x1xf32>
    %29 = arith.mulf %27, %22 : vector<256x1xf32>
    %30 = arith.mulf %10, %29 : vector<256x1xf32>
    %31 = arith.subf %28, %30 : vector<256x1xf32>
    %32 = vector.broadcast %29 : vector<256x1xf32> to vector<256x784xf32>
    %33 = arith.mulf %6, %32 : vector<256x784xf32>
    %34 = vector.broadcast %31 : vector<256x1xf32> to vector<256x784xf32>
    %35 = arith.addf %33, %34 : vector<256x784xf32>
    %c0_11 = arith.constant 0 : index
    %c0_12 = arith.constant 0 : index
    %36 = vector.load %arg4[%c0_11, %c0_12] : memref<256x784xf32, #tpu.memory_space<vmem>>, vector<256x784xf32>
    %37 = arith.addf %35, %36 : vector<256x784xf32>
    %cst_13 = arith.constant 0.000000e+00 : f32
    %38 = vector.broadcast %cst_13 : f32 to vector<256x784xf32>
    %39 = arith.maximumf %37, %38 : vector<256x784xf32>
    %40 = arith.truncf %39 : vector<256x784xf32> to vector<256x784xbf16>
    %c0_14 = arith.constant 0 : index
    %41 = arith.index_cast %24 : i32 to index
    %42 = vector.load %arg5[%c0_14, %41] : memref<128x512xf32, #tpu.memory_space<vmem>>, vector<128x256xf32>
    %43 = arith.truncf %42 : vector<128x256xf32> to vector<128x256xbf16>
    %c0_15 = arith.constant 0 : index
    %c0_16 = arith.constant 0 : index
    %44 = vector.load %arg6[%c0_15, %c0_16] : memref<128x784xf32, #tpu.memory_space<vmem>>, vector<128x784xf32>
    %cst_17 = arith.constant dense<0.000000e+00> : vector<128x784xf32>
    %45 = tpu.matmul %43, %40, %cst_17 {dimension_numbers = #tpu.dot_dimension_numbers<[1], [0], [0], [1], [0, 0, 1, 1], [], []>} : vector<128x256xbf16>, vector<256x784xbf16>, vector<128x784xf32> -> vector<128x784xf32>
    %46 = arith.addf %44, %45 : vector<128x784xf32>
    %c0_18 = arith.constant 0 : index
    %c0_19 = arith.constant 0 : index
    %47 = vector.load %arg6[%c0_18, %c0_19] : memref<128x784xf32, #tpu.memory_space<vmem>>, vector<128x784xf32>
    tpu.vector_store %arg6[%c0_18, %c0_19], %46 {strides = array<i32>} : memref<128x784xf32, #tpu.memory_space<vmem>>, vector<128x784xf32>,
    return
  }
  func.func @transform_0(%arg0: i32) -> (i32, i32) {
    %c0_i32 = arith.constant 0 : i32
    %c0_i32_0 = arith.constant 0 : i32
    %c0_i32_1 = arith.constant 0 : i32
    return %c0_i32, %c0_i32_0 : i32, i32
  }
  func.func @transform_1(%arg0: i32) -> (i32, i32) {
    %c0_i32 = arith.constant 0 : i32
    %c0_i32_0 = arith.constant 0 : i32
    return %arg0, %c0_i32 : i32, i32
  }
  func.func @transform_2(%arg0: i32) -> (i32, i32) {
    %c0_i32 = arith.constant 0 : i32
    %c0_i32_0 = arith.constant 0 : i32
    %c0_i32_1 = arith.constant 0 : i32
    return %c0_i32, %c0_i32_0 : i32, i32
  }
  func.func @transform_3(%arg0: i32) -> (i32, i32) {
    %c0_i32 = arith.constant 0 : i32
    %c0_i32_0 = arith.constant 0 : i32
    return %arg0, %c0_i32 : i32, i32
  }
  func.func @transform_4(%arg0: i32) -> (i32, i32) {
    %c0_i32 = arith.constant 0 : i32
    %c0_i32_0 = arith.constant 0 : i32
    %c0_i32_1 = arith.constant 0 : i32
    return %c0_i32, %c0_i32_0 : i32, i32
  }
  func.func @transform_5(%arg0: i32) -> (i32, i32) {
    %c0_i32 = arith.constant 0 : i32
    %c0_i32_0 = arith.constant 0 : i32
    %c0_i32_1 = arith.constant 0 : i32
    return %c0_i32, %c0_i32_0 : i32, i32
  }
}

</mosaic_0001>

<bundles_post_ra>
// kernel: tpu_custom_call.1
= control target key start
LH: loop header
LB: loop body
LE: loop exit
PB: predicated region body
PF: predicated region fallthrough
CT: control target
= control target key end

     0   :  { %s6285_s18 = smov 0   ;;  %s12160_s0 = inlined_call_operand.vmem [shape: f32[128,784], index: 0, kind: input, shape index: {}]   ;;  %s12161_s1 = inlined_call_operand.vmem [shape: f32[512,128], index: 1, kind: input, shape index: {}]   ;;  %s12162_s2 = inlined_call_operand.vmem [shape: f32[512,2], index: 2, kind: input, shape index: {}]   ;;  %s12163_s3 = inlined_call_operand.vmem [shape: f32[512,784], index: 3, kind: input, shape index: {}]   ;;  %s12164_s4 = inlined_call_operand.vmem [shape: f32[128,512], index: 4, kind: input, shape index: {}]   ;;  %s12165_s5 = inlined_call_operand.vmem [shape: f32[128,784], index: 5, kind: output, shape index: {}]  }
   0x1 LB: > { %s6291_s19 = sadd.s32 4294967295, %s6249_s18   ;;  %p5730_p0 = scmp.ge.s32.totalorder %s6249_s18, 1  ;;  %s6249_s18 = sphi %s6285_s18, %s15_s18  }
   0x2   : > { %p195_p1 = scmp.lt.s32.totalorder %s6249_s18, 3 }
   0x4   : > { %p196_p2 = pnand %p5730_p0, %p195_p1 }
   0x6   : > { %199 = sbr.rel (%p196_p2) target bundleno = 1491 (0x5d3), region = 40 }
   0xb   : > { %s5731_s20 = sshll.u32 %s6291_s19, 5  ;;  %p5735_p4 = scmp.ne.s32.totalorder %s6291_s19, 0 }
   0xc   : > { %p225_p3 = scmp.lt.s32.totalorder %s5731_s20, 63 }
   0xd   : > { %241 = sbr.rel (%p5735_p4) target bundleno = 108 (0x6c), region = 44 }
   0xe   : > { %s13670_s20 = smov (!%p225_p3, %s5731_s20), 63 }
   0xf   : > { %s5732_s21 = sshll.u32 %s13670_s20, 3  ;;  %s6076_s22 = smul.u32 56, %s13670_s20 }
  0x10   : > { %s6299_s25 = scalar_lea.vmem %s12161_s1, %s5732_s21 }
  0x11   : > { %s6304_s28 = scalar_lea.vmem %s12163_s3, %s6076_s22 }
  0x12   : > { %v6310_v0 = vld [vmem:[%s12160_s0] sm:$0xff]  ;;  %v6315_v1 = vld [vmem:[%s12160_s0 + $0x8] sm:$0xff]  ;;  %v6320_v2 = vld [vmem:[%s12160_s0 + $0x10] sm:$0xff]  ;;  %vm777_vm0 = vcmask 130048   ;;  %v6251_v7 = vmov 0.0   ;;  %vm709_vm1 = vcmask 125952  }
  0x13   : > { %v5860_v3 = vpack.c.bf16 %v6315_v1, %v6310_v0  ;;  %v6327_v4 = vld [vmem:[%s12160_s0 + $0x18] sm:$0xff]  ;;  %v6332_v5 = vld [vmem:[%s12160_s0 + $0x20] sm:$0xff]  ;;  %v6337_v6 = vld [vmem:[%s12160_s0 + $0x28] sm:$0xff]  ;;  %771 = vst [vmem:[%s12165_s5] sm:$0xff] %v6251_v7 }
  0x14   : > { %772 = vst [vmem:[%s12165_s5 + $0x8] sm:$0xff] %v6251_v7  ;;  %773 = vst [vmem:[%s12165_s5 + $0x10] sm:$0xff] %v6251_v7  ;;  %v5861_v8 = vpack.c.bf16 %v6327_v4, %v6320_v2  ;;  %v5862_v9 = vpack.c.bf16 %v6337_v6, %v6332_v5  ;;  %v248_v10 = vld [vmem:[%s12160_s0 + $0x30] sm:$0xff]  ;;  %v249_v11 = vld [vmem:[%s12160_s0 + $0x38] sm:$0xff] }
  0x15   : > { %774 = vst [vmem:[%s12165_s5 + $0x18] sm:$0xff] %v6251_v7  ;;  %775 = vst [vmem:[%s12165_s5 + $0x20] sm:$0xff] %v6251_v7  ;;  %v250_v12 = vld [vmem:[%s12160_s0 + $0x40] sm:$0xff]  ;;  %v5863_v13 = vpack.c.bf16 %v248_v10, %v248_v10  ;;  %v251_v15 = vld [vmem:[%s12160_s0 + $0x48] sm:$0xff] }
  0x16   : > { %776 = vst [vmem:[%s12165_s5 + $0x28] sm:$0xff] %v6251_v7  ;;  %779 = vst [vmem:[%s12165_s5 + $0x38] sm:$0xff] %v6251_v7  ;;  %v5864_v14 = vpack.c.bf16 %v250_v12, %v249_v11  ;;  %v252_v16 = vld [vmem:[%s12160_s0 + $0x50] sm:$0xff]  ;;  %v253_v17 = vld [vmem:[%s12160_s0 + $0x58] sm:$0xff] }
  0x17   : > { %780 = vst [vmem:[%s12165_s5 + $0x40] sm:$0xff] %v6251_v7  ;;  %781 = vst [vmem:[%s12165_s5 + $0x48] sm:$0xff] %v6251_v7  ;;  %v5865_v18 = vpack.c.bf16 %v252_v16, %v251_v15  ;;  %v254_v19 = vld [vmem:[%s12160_s0 + $0x60] sm:$0xff]  ;;  %v255_v20 = vld [vmem:[%s12160_s0 + $0x68] sm:$0xff] }
  0x18   : > { %782 = vst [vmem:[%s12165_s5 + $0x50] sm:$0xff] %v6251_v7  ;;  %783 = vst [vmem:[%s12165_s5 + $0x58] sm:$0xff] %v6251_v7  ;;  %v256_v21 = vld [vmem:[%s12160_s0 + $0x70] sm:$0xff]  ;;  %v5866_v22 = vpack.c.bf16 %v254_v19, %v253_v17  ;;  %v5867_v23 = vpack.c.bf16 %v255_v20, %v255_v20  ;;  %v257_v24 = vld [vmem:[%s12160_s0 + $0x78] sm:$0xff] }
  0x19   : > { %784 = vst [vmem:[%s12165_s5 + $0x60] sm:$0xff] %v6251_v7  ;;  %786 = vst [vmem:[%s12165_s5 + $0x70] sm:$0xff] %v6251_v7  ;;  %v258_v25 = vld [vmem:[%s12160_s0 + $0x80] sm:$0xff]  ;;  %v259_v26 = vld [vmem:[%s12160_s0 + $0x88] sm:$0xff]  ;;  %v5868_v27 = vpack.c.bf16 %v257_v24, %v256_v21 }
  0x1a   : > { %787 = vst [vmem:[%s12165_s5 + $0x78] sm:$0xff] %v6251_v7  ;;  %788 = vst [vmem:[%s12165_s5 + $0x80] sm:$0xff] %v6251_v7  ;;  %v5869_v28 = vpack.c.bf16 %v259_v26, %v258_v25  ;;  %v260_v29 = vld [vmem:[%s12160_s0 + $0x90] sm:$0xff]  ;;  %v261_v30 = vld [vmem:[%s12160_s0 + $0x98] sm:$0xff] }
  0x1b   : > { %789 = vst [vmem:[%s12165_s5 + $0x88] sm:$0xff] %v6251_v7  ;;  %790 = vst [vmem:[%s12165_s5 + $0x90] sm:$0xff] %v6251_v7  ;;  %v262_v31 = vld [vmem:[%s12160_s0 + $0xa0] sm:$0xff]  ;;  %v5870_v32 = vpack.c.bf16 %v261_v30, %v260_v29  ;;  %v263_v34 = vld [vmem:[%s12160_s0 + $0xa8] sm:$0xff] }
  0x1c   : > { %791 = vst [vmem:[%s12165_s5 + $0x98] sm:$0xff] %v6251_v7  ;;  %793 = vst [vmem:[%s12165_s5 + $0xa8] sm:$0xff] %v6251_v7  ;;  %v5871_v33 = vpack.c.bf16 %v262_v31, %v262_v31  ;;  %v264_v35 = vld [vmem:[%s12160_s0 + $0xb0] sm:$0xff]  ;;  %v265_v36 = vld [vmem:[%s12160_s0 + $0xb8] sm:$0xff] }
  0x1d   : > { %794 = vst [vmem:[%s12165_s5 + $0xb0] sm:$0xff] %v6251_v7  ;;  %795 = vst [vmem:[%s12165_s5 + $0xb8] sm:$0xff] %v6251_v7  ;;  %v5872_v37 = vpack.c.bf16 %v264_v35, %v263_v34  ;;  %v266_v38 = vld [vmem:[%s12160_s0 + $0xc0] sm:$0xff]  ;;  %v267_v39 = vld [vmem:[%s12160_s0 + $0xc8] sm:$0xff] }
  0x1e   : > { %796 = vst [vmem:[%s12165_s5 + $0xc0] sm:$0xff] %v6251_v7  ;;  %797 = vst [vmem:[%s12165_s5 + $0xc8] sm:$0xff] %v6251_v7  ;;  %v268_v40 = vld [vmem:[%s12160_s0 + $0xd0] sm:$0xff]  ;;  %v5873_v41 = vpack.c.bf16 %v266_v38, %v265_v36  ;;  %v269_v43 = vld [vmem:[%s12160_s0 + $0xd8] sm:$0xff] }
  0x1f   : > { %798 = vst [vmem:[%s12165_s5 + $0xd0] sm:$0xff] %v6251_v7  ;;  %800 = vst [vmem:[%s12165_s5 + $0xe0] sm:$0xff] %v6251_v7  ;;  %v5874_v42 = vpack.c.bf16 %v268_v40, %v267_v39  ;;  %v270_v44 = vld [vmem:[%s12160_s0 + $0xe0] sm:$0xff]  ;;  %v271_v45 = vld [vmem:[%s12160_s0 + $0xe8] sm:$0xff]  ;;  %v5875_v46 = vpack.c.bf16 %v269_v43, %v269_v43 }
  0x20   : > { %801 = vst [vmem:[%s12165_s5 + $0xe8] sm:$0xff] %v6251_v7  ;;  %802 = vst [vmem:[%s12165_s5 + $0xf0] sm:$0xff] %v6251_v7  ;;  %v5876_v47 = vpack.c.bf16 %v271_v45, %v270_v44  ;;  %v272_v48 = vld [vmem:[%s12160_s0 + $0xf0] sm:$0xff]  ;;  %v273_v49 = vld [vmem:[%s12160_s0 + $0xf8] sm:$0xff] }
  0x21   : > { %803 = vst [vmem:[%s12165_s5 + $0xf8] sm:$0xff] %v6251_v7  ;;  %804 = vst [vmem:[%s12165_s5 + $0x100] sm:$0xff] %v6251_v7  ;;  %v274_v50 = vld [vmem:[%s12160_s0 + $0x100] sm:$0xff]  ;;  %v5877_v51 = vpack.c.bf16 %v273_v49, %v272_v48  ;;  %v275_v52 = vld [vmem:[%s12160_s0 + $0x108] sm:$0xff] }
  0x22   : > { %805 = vst [vmem:[%s12165_s5 + $0x108] sm:$0xff] %v6251_v7  ;;  %807 = vst [vmem:[%s12165_s5 + $0x118] sm:$0xff] %v6251_v7  ;;  %v276_v53 = vld [vmem:[%s12160_s0 + $0x110] sm:$0xff]  ;;  %v277_v54 = vld [vmem:[%s12160_s0 + $0x118] sm:$0xff]  ;;  %v5878_v55 = vpack.c.bf16 %v275_v52, %v274_v50 }
  0x23   : > { %808 = vst [vmem:[%s12165_s5 + $0x120] sm:$0xff] %v6251_v7  ;;  %809 = vst [vmem:[%s12165_s5 + $0x128] sm:$0xff] %v6251_v7  ;;  %v5879_v56 = vpack.c.bf16 %v276_v53, %v276_v53  ;;  %v278_v57 = vld [vmem:[%s12160_s0 + $0x120] sm:$0xff]  ;;  %v279_v58 = vld [vmem:[%s12160_s0 + $0x128] sm:$0xff] }
  0x24   : > { %810 = vst [vmem:[%s12165_s5 + $0x130] sm:$0xff] %v6251_v7  ;;  %811 = vst [vmem:[%s12165_s5 + $0x138] sm:$0xff] %v6251_v7  ;;  %v280_v59 = vld [vmem:[%s12160_s0 + $0x130] sm:$0xff]  ;;  %v5880_v60 = vpack.c.bf16 %v278_v57, %v277_v54  ;;  %v281_v62 = vld [vmem:[%s12160_s0 + $0x138] sm:$0xff] }
  0x25   : > { %812 = vst [vmem:[%s12165_s5 + $0x140] sm:$0xff] %v6251_v7  ;;  %814 = vst [vmem:[%s12165_s5 + $0x150] sm:$0xff] %v6251_v7  ;;  %v5881_v61 = vpack.c.bf16 %v280_v59, %v279_v58  ;;  %v282_v63 = vld [vmem:[%s12160_s0 + $0x140] sm:$0xff]  ;;  %v283_v0 = vld [vmem:[%s12160_s0 + $0x148] sm:$0xff] }
  0x26   : > { %815 = vst [vmem:[%s12165_s5 + $0x158] sm:$0xff] %v6251_v7  ;;  %816 = vst [vmem:[%s12165_s5 + $0x160] sm:$0xff] %v6251_v7  ;;  %v5882_v1 = vpack.c.bf16 %v282_v63, %v281_v62  ;;  %v5883_v2 = vpack.c.bf16 %v283_v0, %v283_v0  ;;  %v285_v4 = vld [vmem:[%s12160_s0 + $0x158] sm:$0xff]  ;;  %v286_v5 = vld [vmem:[%s12160_s0 + $0x160] sm:$0xff] }
  0x27   : > { %817 = vst [vmem:[%s12165_s5 + $0x168] sm:$0xff] %v6251_v7  ;;  %818 = vst [vmem:[%s12165_s5 + $0x170] sm:$0xff] %v6251_v7  ;;  %v290_v12 = vld [vmem:[%s12160_s0 + $0x180] sm:$0xff]  ;;  %v293_v17 = vld [vmem:[%s12160_s0 + $0x198] sm:$0xff] }
  0x28   : > { %819 = vst [vmem:[%s12165_s5 + $0x178] sm:$0xff] %v6251_v7  ;;  %821 = vst [vmem:[%s12165_s5 + $0x188] sm:$0xff] %v6251_v7  ;;  %v5887_v15 = vpack.c.bf16 %v290_v12, %v290_v12  ;;  %v295_v19 = vld [vmem:[%s12160_s0 + $0x1a8] sm:$0xff]  ;;  %v296_v21 = vld [vmem:[%s12160_s0 + $0x1b0] sm:$0xff] }
  0x29   : > { %822 = vst [vmem:[%s12165_s5 + $0x190] sm:$0xff] %v6251_v7  ;;  %823 = vst [vmem:[%s12165_s5 + $0x198] sm:$0xff] %v6251_v7  ;;  %v5890_v24 = vpack.c.bf16 %v296_v21, %v295_v19  ;;  %v299_v26 = vld [vmem:[%s12160_s0 + $0x1c8] sm:$0xff]  ;;  %v302_v31 = vld [vmem:[%s12160_s0 + $0x1e0] sm:$0xff] }
  0x2a   : > { %824 = vst [vmem:[%s12165_s5 + $0x1a0] sm:$0xff] %v6251_v7  ;;  %825 = vst [vmem:[%s12165_s5 + $0x1a8] sm:$0xff] %v6251_v7  ;;  %v305_v36 = vld [vmem:[%s12160_s0 + $0x1f8] sm:$0xff]  ;;  %v307_v38 = vld [vmem:[%s12160_s0 + $0x208] sm:$0xff] }
  0x2b   : > { %826 = vst [vmem:[%s12165_s5 + $0x1b0] sm:$0xff] %v6251_v7  ;;  %828 = vst [vmem:[%s12165_s5 + $0x1c0] sm:$0xff] %v6251_v7  ;;  %v308_v40 = vld [vmem:[%s12160_s0 + $0x210] sm:$0xff]  ;;  %v311_v45 = vld [vmem:[%s12160_s0 + $0x228] sm:$0xff] }
  0x2c   : > { %829 = vst [vmem:[%s12165_s5 + $0x1c8] sm:$0xff] %v6251_v7  ;;  %830 = vst [vmem:[%s12165_s5 + $0x1d0] sm:$0xff] %v6251_v7  ;;  %v5897_v43 = vpack.c.bf16 %v308_v40, %v307_v38  ;;  %v5899_v48 = vpack.c.bf16 %v311_v45, %v311_v45  ;;  %v314_v50 = vld [vmem:[%s12160_s0 + $0x240] sm:$0xff]  ;;  %v316_v52 = vld [vmem:[%s12160_s0 + $0x250] sm:$0xff] }
  0x2d   : > { %831 = vst [vmem:[%s12165_s5 + $0x1d8] sm:$0xff] %v6251_v7  ;;  %832 = vst [vmem:[%s12165_s5 + $0x1e0] sm:$0xff] %v6251_v7  ;;  %v317_v54 = vld [vmem:[%s12160_s0 + $0x258] sm:$0xff]  ;;  %v320_v59 = vld [vmem:[%s12160_s0 + $0x270] sm:$0xff] }
  0x2e   : > { %833 = vst [vmem:[%s12165_s5 + $0x1e8] sm:$0xff] %v6251_v7  ;;  %835 = vst [vmem:[%s12165_s5 + $0x1f8] sm:$0xff] %v6251_v7  ;;  %v5902_v57 = vpack.c.bf16 %v317_v54, %v316_v52  ;;  %v323_v0 = vld [vmem:[%s12160_s0 + $0x288] sm:$0xff]  ;;  %v337_v21 = vld [vmem:[%s12160_s0 + $0x2f8] sm:$0xff] }
  0x2f   : > { %836 = vst [vmem:[%s12165_s5 + $0x200] sm:$0xff] %v6251_v7  ;;  %837 = vst [vmem:[%s12165_s5 + $0x208] sm:$0xff] %v6251_v7  ;;  %v335_v19 = vld [vmem:[%s12160_s0 + $0x2e8] sm:$0xff]  ;;  %v349_v40 = vld [vmem:[%s12160_s0 + $0x358] sm:$0xff] }
  0x30   : > { %838 = vst [vmem:[%s12165_s5 + $0x210] sm:$0xff] %v6251_v7  ;;  %839 = vst [vmem:[%s12165_s5 + $0x218] sm:$0xff] %v6251_v7  ;;  %v347_v38 = vld [vmem:[%s12160_s0 + $0x348] sm:$0xff] }
  0x31   : > { %840 = vst [vmem:[%s12165_s5 + $0x220] sm:$0xff] %v6251_v7  ;;  %842 = vst [vmem:[%s12165_s5 + $0x230] sm:$0xff] %v6251_v7 }
  0x32   : > { %843 = vst [vmem:[%s12165_s5 + $0x238] sm:$0xff] %v6251_v7  ;;  %844 = vst [vmem:[%s12165_s5 + $0x240] sm:$0xff] %v6251_v7 }
  0x33   : > { %845 = vst [vmem:[%s12165_s5 + $0x248] sm:$0xff] %v6251_v7  ;;  %846 = vst [vmem:[%s12165_s5 + $0x250] sm:$0xff] %v6251_v7 }
  0x34   : > { %847 = vst [vmem:[%s12165_s5 + $0x258] sm:$0xff] %v6251_v7  ;;  %849 = vst [vmem:[%s12165_s5 + $0x268] sm:$0xff] %v6251_v7 }
  0x35   : > { %850 = vst [vmem:[%s12165_s5 + $0x270] sm:$0xff] %v6251_v7  ;;  %851 = vst [vmem:[%s12165_s5 + $0x278] sm:$0xff] %v6251_v7 }
  0x36   : > { %852 = vst [vmem:[%s12165_s5 + $0x280] sm:$0xff] %v6251_v7  ;;  %853 = vst [vmem:[%s12165_s5 + $0x288] sm:$0xff] %v6251_v7 }
  0x37   : > { %854 = vst [vmem:[%s12165_s5 + $0x290] sm:$0xff] %v6251_v7  ;;  %856 = vst [vmem:[%s12165_s5 + $0x2a0] sm:$0xff] %v6251_v7 }
  0x38   : > { %857 = vst [vmem:[%s12165_s5 + $0x2a8] sm:$0xff] %v6251_v7  ;;  %858 = vst [vmem:[%s12165_s5 + $0x2b0] sm:$0xff] %v6251_v7 }
  0x39   : > { %859 = vst [vmem:[%s12165_s5 + $0x2b8] sm:$0xff] %v6251_v7  ;;  %860 = vst [vmem:[%s12165_s5 + $0x2c0] sm:$0xff] %v6251_v7 }
  0x3a   : > { %861 = vst [vmem:[%s12165_s5 + $0x2c8] sm:$0xff] %v6251_v7  ;;  %863 = vst [vmem:[%s12165_s5 + $0x2d8] sm:$0xff] %v6251_v7 }
  0x3b   : > { %864 = vst [vmem:[%s12165_s5 + $0x2e0] sm:$0xff] %v6251_v7  ;;  %865 = vst [vmem:[%s12165_s5 + $0x2e8] sm:$0xff] %v6251_v7 }
  0x3c   : > { %866 = vst [vmem:[%s12165_s5 + $0x2f0] sm:$0xff] %v6251_v7  ;;  %867 = vst [vmem:[%s12165_s5 + $0x2f8] sm:$0xff] %v6251_v7 }
  0x3d   : > { %868 = vst [vmem:[%s12165_s5 + $0x300] sm:$0xff] %v6251_v7  ;;  %870 = vst [vmem:[%s12165_s5 + $0x310] sm:$0xff] %v6251_v7 }
  0x3e   : > { %871 = vst [vmem:[%s12165_s5 + $0x318] sm:$0xff] %v6251_v7  ;;  %872 = vst [vmem:[%s12165_s5 + $0x320] sm:$0xff] %v6251_v7 }
  0x3f   : > { %873 = vst [vmem:[%s12165_s5 + $0x328] sm:$0xff] %v6251_v7  ;;  %874 = vst [vmem:[%s12165_s5 + $0x330] sm:$0xff] %v6251_v7 }
  0x40   : > { %875 = vst [vmem:[%s12165_s5 + $0x338] sm:$0xff] %v6251_v7  ;;  %877 = vst [vmem:[%s12165_s5 + $0x348] sm:$0xff] %v6251_v7 }
  0x41   : > { %878 = vst [vmem:[%s12165_s5 + $0x350] sm:$0xff] %v6251_v7  ;;  %879 = vst [vmem:[%s12165_s5 + $0x358] sm:$0xff] %v6251_v7 }
  0x42   : > { %880 = vst [vmem:[%s12165_s5 + $0x360] sm:$0xff] %v6251_v7  ;;  %881 = vst [vmem:[%s12165_s5 + $0x368] sm:$0xff] %v6251_v7 }
  0x43   : > { %882 = vst [vmem:[%s12165_s5 + $0x370] sm:$0xff] %v6251_v7  ;;  %778 = vst.msk [vmem:[%s12165_s5 + $0x30] sm:$0xff] %vm777_vm0, %v6251_v7 }
  0x44   : > { %785 = vst.msk [vmem:[%s12165_s5 + $0x68] sm:$0xff] %vm777_vm0, %v6251_v7  ;;  %792 = vst.msk [vmem:[%s12165_s5 + $0xa0] sm:$0xff] %vm777_vm0, %v6251_v7 }
  0x45   : > { %799 = vst.msk [vmem:[%s12165_s5 + $0xd8] sm:$0xff] %vm777_vm0, %v6251_v7  ;;  %806 = vst.msk [vmem:[%s12165_s5 + $0x110] sm:$0xff] %vm777_vm0, %v6251_v7 }
  0x46   : > { %813 = vst.msk [vmem:[%s12165_s5 + $0x148] sm:$0xff] %vm777_vm0, %v6251_v7  ;;  %820 = vst.msk [vmem:[%s12165_s5 + $0x180] sm:$0xff] %vm777_vm0, %v6251_v7 }
  0x47   : > { %827 = vst.msk [vmem:[%s12165_s5 + $0x1b8] sm:$0xff] %vm777_vm0, %v6251_v7  ;;  %834 = vst.msk [vmem:[%s12165_s5 + $0x1f0] sm:$0xff] %vm777_vm0, %v6251_v7 }
  0x48   : > { %841 = vst.msk [vmem:[%s12165_s5 + $0x228] sm:$0xff] %vm777_vm0, %v6251_v7  ;;  %848 = vst.msk [vmem:[%s12165_s5 + $0x260] sm:$0xff] %vm777_vm0, %v6251_v7 }
  0x49   : > { %855 = vst.msk [vmem:[%s12165_s5 + $0x298] sm:$0xff] %vm777_vm0, %v6251_v7  ;;  %862 = vst.msk [vmem:[%s12165_s5 + $0x2d0] sm:$0xff] %vm777_vm0, %v6251_v7 }
  0x4a   : > { %869 = vst.msk [vmem:[%s12165_s5 + $0x308] sm:$0xff] %vm777_vm0, %v6251_v7  ;;  %876 = vst.msk [vmem:[%s12165_s5 + $0x340] sm:$0xff] %vm777_vm0, %v6251_v7 }
  0x4b   : > { %883 = vst.msk [vmem:[%s12165_s5 + $0x378] sm:$0xff] %vm777_vm0, %v6251_v7  ;;  %706 = vst [vmem:[#allocation2] sm:$0xff] %v5860_v3  ;;  %v284_v3 = vld [vmem:[%s12160_s0 + $0x150] sm:$0xff]  ;;  %v287_v7 = vld [vmem:[%s12160_s0 + $0x168] sm:$0xff] }
  0x4c   : > { %707 = vst [vmem:[#allocation2 + $0x8] sm:$0xff] %v5861_v8  ;;  %708 = vst [vmem:[#allocation2 + $0x10] sm:$0xff] %v5862_v9  ;;  %v5884_v6 = vpack.c.bf16 %v285_v4, %v284_v3  ;;  %v288_v8 = vld [vmem:[%s12160_s0 + $0x170] sm:$0xff]  ;;  %v289_v9 = vld [vmem:[%s12160_s0 + $0x178] sm:$0xff]  ;;  %v5885_v10 = vpack.c.bf16 %v287_v7, %v286_v5 }
  0x4d   : > { %710 = vst.msk [vmem:[#allocation2 + $0x18] sm:$0xf] %vm709_vm1, %v5863_v13  ;;  %711 = vst [vmem:[#allocation2 + $0x1c] sm:$0xff] %v5864_v14  ;;  %v5886_v11 = vpack.c.bf16 %v289_v9, %v288_v8  ;;  %v291_v13 = vld [vmem:[%s12160_s0 + $0x188] sm:$0xff]  ;;  %v292_v14 = vld [vmem:[%s12160_s0 + $0x190] sm:$0xff] }
  0x4e   : > { %712 = vst [vmem:[#allocation2 + $0x24] sm:$0xff] %v5865_v18  ;;  %713 = vst [vmem:[#allocation2 + $0x2c] sm:$0xff] %v5866_v22  ;;  %v5888_v16 = vpack.c.bf16 %v292_v14, %v291_v13  ;;  %v294_v18 = vld [vmem:[%s12160_s0 + $0x1a0] sm:$0xff]  ;;  %v297_v22 = vld [vmem:[%s12160_s0 + $0x1b8] sm:$0xff] }
  0x4f   : > { %714 = vst.msk [vmem:[#allocation2 + $0x34] sm:$0xf] %vm709_vm1, %v5867_v23  ;;  %715 = vst [vmem:[#allocation2 + $0x38] sm:$0xff] %v5868_v27  ;;  %v5889_v20 = vpack.c.bf16 %v294_v18, %v293_v17  ;;  %v298_v23 = vld [vmem:[%s12160_s0 + $0x1c0] sm:$0xff]  ;;  %v5891_v25 = vpack.c.bf16 %v297_v22, %v297_v22  ;;  %v300_v27 = vld [vmem:[%s12160_s0 + $0x1d0] sm:$0xff] }
  0x50   : > { %716 = vst [vmem:[#allocation2 + $0x40] sm:$0xff] %v5869_v28  ;;  %717 = vst [vmem:[#allocation2 + $0x48] sm:$0xff] %v5870_v32  ;;  %v301_v28 = vld [vmem:[%s12160_s0 + $0x1d8] sm:$0xff]  ;;  %v5892_v29 = vpack.c.bf16 %v299_v26, %v298_v23  ;;  %v303_v32 = vld [vmem:[%s12160_s0 + $0x1e8] sm:$0xff] }
  0x51   : > { %718 = vst.msk [vmem:[#allocation2 + $0x50] sm:$0xf] %vm709_vm1, %v5871_v33  ;;  %719 = vst [vmem:[#allocation2 + $0x54] sm:$0xff] %v5872_v37  ;;  %v5893_v30 = vpack.c.bf16 %v301_v28, %v300_v27  ;;  %v304_v33 = vld [vmem:[%s12160_s0 + $0x1f0] sm:$0xff]  ;;  %v5894_v34 = vpack.c.bf16 %v303_v32, %v302_v31  ;;  %v306_v37 = vld [vmem:[%s12160_s0 + $0x200] sm:$0xff] }
  0x52   : > { %720 = vst [vmem:[#allocation2 + $0x5c] sm:$0xff] %v5873_v41  ;;  %721 = vst [vmem:[#allocation2 + $0x64] sm:$0xff] %v5874_v42  ;;  %v5895_v35 = vpack.c.bf16 %v304_v33, %v304_v33  ;;  %v5896_v39 = vpack.c.bf16 %v306_v37, %v305_v36  ;;  %v309_v41 = vld [vmem:[%s12160_s0 + $0x218] sm:$0xff]  ;;  %v310_v42 = vld [vmem:[%s12160_s0 + $0x220] sm:$0xff] }
  0x53   : > { %722 = vst.msk [vmem:[#allocation2 + $0x6c] sm:$0xf] %vm709_vm1, %v5875_v46  ;;  %723 = vst [vmem:[#allocation2 + $0x70] sm:$0xff] %v5876_v47  ;;  %v5898_v44 = vpack.c.bf16 %v310_v42, %v309_v41  ;;  %v312_v46 = vld [vmem:[%s12160_s0 + $0x230] sm:$0xff]  ;;  %v313_v47 = vld [vmem:[%s12160_s0 + $0x238] sm:$0xff] }
  0x54   : > { %724 = vst [vmem:[#allocation2 + $0x78] sm:$0xff] %v5877_v51  ;;  %725 = vst [vmem:[#allocation2 + $0x80] sm:$0xff] %v5878_v55  ;;  %v5900_v49 = vpack.c.bf16 %v313_v47, %v312_v46  ;;  %v315_v51 = vld [vmem:[%s12160_s0 + $0x248] sm:$0xff]  ;;  %v318_v55 = vld [vmem:[%s12160_s0 + $0x260] sm:$0xff] }
  0x55   : > { %726 = vst.msk [vmem:[#allocation2 + $0x88] sm:$0xf] %vm709_vm1, %v5879_v56  ;;  %727 = vst [vmem:[#allocation2 + $0x8c] sm:$0xff] %v5880_v60  ;;  %v5901_v53 = vpack.c.bf16 %v315_v51, %v314_v50  ;;  %v319_v56 = vld [vmem:[%s12160_s0 + $0x268] sm:$0xff]  ;;  %v5903_v58 = vpack.c.bf16 %v318_v55, %v318_v55  ;;  %v321_v60 = vld [vmem:[%s12160_s0 + $0x278] sm:$0xff] }
  0x56   : > { %728 = vst [vmem:[#allocation2 + $0x94] sm:$0xff] %v5881_v61  ;;  %729 = vst [vmem:[#allocation2 + $0x9c] sm:$0xff] %v5882_v1  ;;  %v322_v61 = vld [vmem:[%s12160_s0 + $0x280] sm:$0xff]  ;;  %v5904_v62 = vpack.c.bf16 %v320_v59, %v319_v56  ;;  %v324_v1 = vld [vmem:[%s12160_s0 + $0x290] sm:$0xff] }
  0x57   : > { %730 = vst.msk [vmem:[#allocation2 + $0xa4] sm:$0xf] %vm709_vm1, %v5883_v2  ;;  %731 = vst [vmem:[#allocation2 + $0xa8] sm:$0xff] %v5884_v6  ;;  %v5905_v63 = vpack.c.bf16 %v322_v61, %v321_v60  ;;  %v325_v2 = vld [vmem:[%s12160_s0 + $0x298] sm:$0xff]  ;;  %v5906_v3 = vpack.c.bf16 %v324_v1, %v323_v0  ;;  %v326_v5 = vld [vmem:[%s12160_s0 + $0x2a0] sm:$0xff] }
  0x58   : > { %732 = vst [vmem:[#allocation2 + $0xb0] sm:$0xff] %v5885_v10  ;;  %733 = vst [vmem:[#allocation2 + $0xb8] sm:$0xff] %v5886_v11  ;;  %v5907_v4 = vpack.c.bf16 %v325_v2, %v325_v2  ;;  %v327_v6 = vld [vmem:[%s12160_s0 + $0x2a8] sm:$0xff]  ;;  %v328_v7 = vld [vmem:[%s12160_s0 + $0x2b0] sm:$0xff] }
  0x59   : > { %734 = vst.msk [vmem:[#allocation2 + $0xc0] sm:$0xf] %vm709_vm1, %v5887_v15  ;;  %735 = vst [vmem:[#allocation2 + $0xc4] sm:$0xff] %v5888_v16  ;;  %v5908_v8 = vpack.c.bf16 %v327_v6, %v326_v5  ;;  %v329_v9 = vld [vmem:[%s12160_s0 + $0x2b8] sm:$0xff]  ;;  %v330_v10 = vld [vmem:[%s12160_s0 + $0x2c0] sm:$0xff] }
  0x5a   : > { %736 = vst [vmem:[#allocation2 + $0xcc] sm:$0xff] %v5889_v20  ;;  %737 = vst [vmem:[#allocation2 + $0xd4] sm:$0xff] %v5890_v24  ;;  %v331_v11 = vld [vmem:[%s12160_s0 + $0x2c8] sm:$0xff]  ;;  %v5909_v12 = vpack.c.bf16 %v329_v9, %v328_v7  ;;  %v332_v14 = vld [vmem:[%s12160_s0 + $0x2d0] sm:$0xff] }
  0x5b   : > { %738 = vst.msk [vmem:[#allocation2 + $0xdc] sm:$0xf] %vm709_vm1, %v5891_v25  ;;  %739 = vst [vmem:[#allocation2 + $0xe0] sm:$0xff] %v5892_v29  ;;  %v5910_v13 = vpack.c.bf16 %v331_v11, %v330_v10  ;;  %v333_v15 = vld [vmem:[%s12160_s0 + $0x2d8] sm:$0xff]  ;;  %v334_v16 = vld [vmem:[%s12160_s0 + $0x2e0] sm:$0xff]  ;;  %v5911_v17 = vpack.c.bf16 %v332_v14, %v332_v14 }
  0x5c   : > { %740 = vst [vmem:[#allocation2 + $0xe8] sm:$0xff] %v5893_v30  ;;  %741 = vst [vmem:[#allocation2 + $0xf0] sm:$0xff] %v5894_v34  ;;  %v5912_v18 = vpack.c.bf16 %v334_v16, %v333_v15  ;;  %v336_v20 = vld [vmem:[%s12160_s0 + $0x2f0] sm:$0xff]  ;;  %v338_v23 = vld [vmem:[%s12160_s0 + $0x300] sm:$0xff] }
  0x5d   : > { %742 = vst.msk [vmem:[#allocation2 + $0xf8] sm:$0xf] %vm709_vm1, %v5895_v35  ;;  %743 = vst [vmem:[#allocation2 + $0xfc] sm:$0xff] %v5896_v39  ;;  %v5913_v22 = vpack.c.bf16 %v336_v20, %v335_v19  ;;  %v339_v24 = vld [vmem:[%s12160_s0 + $0x308] sm:$0xff]  ;;  %v340_v25 = vld [vmem:[%s12160_s0 + $0x310] sm:$0xff]  ;;  %v5914_v26 = vpack.c.bf16 %v338_v23, %v337_v21 }
  0x5e   : > { %744 = vst [vmem:[#allocation2 + $0x104] sm:$0xff] %v5897_v43  ;;  %745 = vst [vmem:[#allocation2 + $0x10c] sm:$0xff] %v5898_v44  ;;  %v5915_v27 = vpack.c.bf16 %v339_v24, %v339_v24  ;;  %v341_v28 = vld [vmem:[%s12160_s0 + $0x318] sm:$0xff]  ;;  %v342_v29 = vld [vmem:[%s12160_s0 + $0x320] sm:$0xff] }
  0x5f   : > { %746 = vst.msk [vmem:[#allocation2 + $0x114] sm:$0xf] %vm709_vm1, %v5899_v48  ;;  %747 = vst [vmem:[#allocation2 + $0x118] sm:$0xff] %v5900_v49  ;;  %v343_v30 = vld [vmem:[%s12160_s0 + $0x328] sm:$0xff]  ;;  %v5916_v31 = vpack.c.bf16 %v341_v28, %v340_v25  ;;  %v344_v33 = vld [vmem:[%s12160_s0 + $0x330] sm:$0xff] }
  0x60   : > { %748 = vst [vmem:[#allocation2 + $0x120] sm:$0xff] %v5901_v53  ;;  %749 = vst [vmem:[#allocation2 + $0x128] sm:$0xff] %v5902_v57  ;;  %v5917_v32 = vpack.c.bf16 %v343_v30, %v342_v29  ;;  %v345_v34 = vld [vmem:[%s12160_s0 + $0x338] sm:$0xff]  ;;  %v346_v35 = vld [vmem:[%s12160_s0 + $0x340] sm:$0xff] }
  0x61   : > { %750 = vst.msk [vmem:[#allocation2 + $0x130] sm:$0xf] %vm709_vm1, %v5903_v58  ;;  %751 = vst [vmem:[#allocation2 + $0x134] sm:$0xff] %v5904_v62  ;;  %v5918_v36 = vpack.c.bf16 %v345_v34, %v344_v33  ;;  %v5919_v37 = vpack.c.bf16 %v346_v35, %v346_v35  ;;  %v348_v39 = vld [vmem:[%s12160_s0 + $0x350] sm:$0xff]  ;;  %v350_v42 = vld [vmem:[%s12160_s0 + $0x360] sm:$0xff] }
  0x62   : > { %752 = vst [vmem:[#allocation2 + $0x13c] sm:$0xff] %v5905_v63  ;;  %753 = vst [vmem:[#allocation2 + $0x144] sm:$0xff] %v5906_v3  ;;  %v5920_v41 = vpack.c.bf16 %v348_v39, %v347_v38  ;;  %v351_v43 = vld [vmem:[%s12160_s0 + $0x368] sm:$0xff]  ;;  %v352_v44 = vld [vmem:[%s12160_s0 + $0x370] sm:$0xff]  ;;  %v5921_v45 = vpack.c.bf16 %v350_v42, %v349_v40 }
  0x63   : > { %754 = vst.msk [vmem:[#allocation2 + $0x14c] sm:$0xf] %vm709_vm1, %v5907_v4  ;;  %755 = vst [vmem:[#allocation2 + $0x150] sm:$0xff] %v5908_v8  ;;  %v5922_v46 = vpack.c.bf16 %v352_v44, %v351_v43  ;;  %v353_v47 = vld [vmem:[%s12160_s0 + $0x378] sm:$0xff] }
  0x64   : > { %756 = vst [vmem:[#allocation2 + $0x158] sm:$0xff] %v5909_v12  ;;  %757 = vst [vmem:[#allocation2 + $0x160] sm:$0xff] %v5910_v13  ;;  %v5923_v48 = vpack.c.bf16 %v353_v47, %v353_v47 }
  0x65   : > { %758 = vst.msk [vmem:[#allocation2 + $0x168] sm:$0xf] %vm709_vm1, %v5911_v17  ;;  %759 = vst [vmem:[#allocation2 + $0x16c] sm:$0xff] %v5912_v18 }
  0x66   : > { %760 = vst [vmem:[#allocation2 + $0x174] sm:$0xff] %v5913_v22  ;;  %761 = vst [vmem:[#allocation2 + $0x17c] sm:$0xff] %v5914_v26 }
  0x67   : > { %762 = vst.msk [vmem:[#allocation2 + $0x184] sm:$0xf] %vm709_vm1, %v5915_v27  ;;  %763 = vst [vmem:[#allocation2 + $0x188] sm:$0xff] %v5916_v31 }
  0x68   : > { %764 = vst [vmem:[#allocation2 + $0x190] sm:$0xff] %v5917_v32  ;;  %765 = vst [vmem:[#allocation2 + $0x198] sm:$0xff] %v5918_v36 }
  0x69   : > { %766 = vst.msk [vmem:[#allocation2 + $0x1a0] sm:$0xf] %vm709_vm1, %v5919_v37  ;;  %767 = vst [vmem:[#allocation2 + $0x1a4] sm:$0xff] %v5920_v41 }
  0x6a   : > { %768 = vst [vmem:[#allocation2 + $0x1ac] sm:$0xff] %v5921_v45  ;;  %769 = vst [vmem:[#allocation2 + $0x1b4] sm:$0xff] %v5922_v46 }
  0x6b   : > { %770 = vst.msk [vmem:[#allocation2 + $0x1bc] sm:$0xf] %vm709_vm1, %v5923_v48 }
  0x6c PF: > { %v12166_v51 = vmov 0   ;;  %v6102_v52 = vld [vmem:[#allocation2 + $0x154] ss:$28 sps:$4 sm:$0xff]   ;;  %v6105_v54 = vld [vmem:[#allocation2 + $0x11c] ss:$28 sps:$4 sm:$0xff]   ;;  %v884_v2 = vld [vmem:[%s6299_s25] sm:$0xff] }
  0x6d   : > { %1316 = vmatprep.mubr.bf16.mxu0 %v12166_v51  ;;  %1436 = vmatprep.mubr.bf16.mxu1 %v12166_v51  ;;  %v6104_v53 = vld [vmem:[#allocation2 + $0x150] ss:$28 sps:$4 sm:$0xff]   ;;  %v6107_v55 = vld [vmem:[#allocation2 + $0x118] ss:$28 sps:$4 sm:$0xff]   ;;  %v6108_v56 = vld [vmem:[#allocation2 + $0xe4] ss:$28 sps:$4 sm:$0xff]  }
  0x6e   : > { %6089 = vset.pattern.permute.xlu0 %v12166_v51  ;;  %6090 = vset.pattern.permute.xlu1 %v12166_v51  ;;  %v6110_v57 = vld [vmem:[#allocation2 + $0xe0] ss:$28 sps:$4 sm:$0xff]   ;;  %v6111_v58 = vld [vmem:[#allocation2 + $0xac] ss:$28 sps:$4 sm:$0xff]   ;;  %v6114_v60 = vld [vmem:[#allocation2 + $0x74] ss:$28 sps:$4 sm:$0xff]  }
  0x6f   : > { %v6113_v59 = vld [vmem:[#allocation2 + $0xa8] ss:$28 sps:$4 sm:$0xff]   ;;  %v6116_v61 = vld [vmem:[#allocation2 + $0x70] ss:$28 sps:$4 sm:$0xff]   ;;  %v6117_v62 = vld [vmem:[#allocation2 + $0x3c] ss:$28 sps:$4 sm:$0xff]  }
  0x70   : > { %v6099_v49 = vld [vmem:[#allocation2 + $0x18c] ss:$28 sps:$4 sm:$0xff]   ;;  %v6119_v63 = vld [vmem:[#allocation2 + $0x38] ss:$28 sps:$4 sm:$0xff]   ;;  %v6120_v0 = vld [vmem:[#allocation2 + $0x4] ss:$28 sps:$4 sm:$0xff]  }
  0x71   : > { %v6101_v50 = vld [vmem:[#allocation2 + $0x188] ss:$28 sps:$4 sm:$0xff]   ;;  %1284 = vmatprep.subr.bf16.mxu0 %v6099_v49  ;;  %6060 = vmatprep.subr.bf16.mxu1 %v6099_v49  ;;  %v6122_v1 = vld [vmem:[#allocation2] ss:$28 sps:$4 sm:$0xff]   ;;  %v6125_v6 = vld [vmem:[#allocation2 + $0x194] ss:$28 sps:$4 sm:$0xff]  }
  0x72   : > { %1285 = vmatpush1.bf16.msra.mxu0 %v6101_v50  ;;  %6068 = vmatpush1.bf16.msra.mxu1 %v6101_v50  ;;  %v885_v3 = vld [vmem:[%s6299_s25 + $0x8] sm:$0xff]  ;;  %v908_v4 = vld [vmem:[%s6299_s25 + $0xc0] sm:$0xff]  ;;  %v6149_v10 = vld [vmem:[#allocation2 + $0x19c] ss:$28 sps:$4 sm:$0xff]   ;;  %vm2029_vm2 = vcmask 130048   ;;  %s6253_s14 = smov 1  }
  0x73   : > { %1286 = vmatprep.subr.bf16.mxu0 %v6102_v52  ;;  %6061 = vmatprep.subr.bf16.mxu1 %v6102_v52  ;;  %v909_v5 = vld [vmem:[%s6299_s25 + $0xc8] sm:$0xff]  ;;  %v7152_v7 = vpack.c.bf16 %v885_v3, %v884_v2  ;;  %v6128_v11 = vld [vmem:[#allocation2 + $0x15c] ss:$28 sps:$4 sm:$0xff]   ;;  %v886_v13 = vld [vmem:[%s6299_s25 + $0x10] sm:$0xff] }
  0x74   : > { %v7154_v8 = vpack.c.bf16 %v909_v5, %v908_v4  ;;  %v6123_v9 = vld [vmem:[#allocation2 + $0x190] ss:$28 sps:$4 sm:$0xff]   ;;  %v6126_v12 = vld [vmem:[#allocation2 + $0x158] ss:$28 sps:$4 sm:$0xff]   ;;  %v6153_v16 = vld [vmem:[#allocation2 + $0x164] ss:$28 sps:$4 sm:$0xff]  }
  0x75   : > { %v887_v14 = vld [vmem:[%s6299_s25 + $0x18] sm:$0xff]  ;;  %v910_v17 = vld [vmem:[%s6299_s25 + $0xd0] sm:$0xff]  ;;  %v6131_v19 = vld [vmem:[#allocation2 + $0x124] ss:$28 sps:$4 sm:$0xff]  }
  0x76   : > { %1287 = vmatpush1.bf16.msra.mxu0 %v6104_v53  ;;  %6069 = vmatpush1.bf16.msra.mxu1 %v6104_v53  ;;  %v6147_v15 = vld [vmem:[#allocation2 + $0x198] ss:$28 sps:$4 sm:$0xff]   ;;  %v6151_v20 = vld [vmem:[#allocation2 + $0x160] ss:$28 sps:$4 sm:$0xff]   ;;  %v7164_v21 = vpack.c.bf16 %v887_v14, %v886_v13  ;;  %v6134_v24 = vld [vmem:[#allocation2 + $0xec] ss:$28 sps:$4 sm:$0xff]  }
  0x77   : > { %1288 = vmatprep.subr.bf16.mxu0 %v6105_v54  ;;  %6062 = vmatprep.subr.bf16.mxu1 %v6105_v54  ;;  %v911_v18 = vld [vmem:[%s6299_s25 + $0xd8] sm:$0xff]  ;;  %v6132_v25 = vld [vmem:[#allocation2 + $0xe8] ss:$28 sps:$4 sm:$0xff]   ;;  %v6159_v32 = vld [vmem:[#allocation2 + $0xf4] ss:$28 sps:$4 sm:$0xff]  }
  0x78   : > { %v7166_v22 = vpack.c.bf16 %v911_v18, %v910_v17  ;;  %v6129_v23 = vld [vmem:[#allocation2 + $0x120] ss:$28 sps:$4 sm:$0xff]   ;;  %v889_v27 = vld [vmem:[%s6299_s25 + $0x28] sm:$0xff]  ;;  %v6137_v33 = vld [vmem:[#allocation2 + $0xb4] ss:$28 sps:$4 sm:$0xff]  }
  0x79   : > { %v888_v26 = vld [vmem:[%s6299_s25 + $0x20] sm:$0xff]  ;;  %v913_v29 = vld [vmem:[%s6299_s25 + $0xe8] sm:$0xff]  ;;  %v6140_v37 = vld [vmem:[#allocation2 + $0x7c] ss:$28 sps:$4 sm:$0xff]  }
  0x7a   : > { %1289 = vmatpush1.bf16.msra.mxu0 %v6107_v55  ;;  %6070 = vmatpush1.bf16.msra.mxu1 %v6107_v55  ;;  %v912_v28 = vld [vmem:[%s6299_s25 + $0xe0] sm:$0xff]  ;;  %v6156_v30 = vld [vmem:[#allocation2 + $0x12c] ss:$28 sps:$4 sm:$0xff]   ;;  %v7176_v34 = vpack.c.bf16 %v889_v27, %v888_v26  ;;  %v6138_v39 = vld [vmem:[#allocation2 + $0x78] ss:$28 sps:$4 sm:$0xff]  }
  0x7b   : > { %1290 = vmatprep.subr.bf16.mxu0 %v6108_v56  ;;  %6063 = vmatprep.subr.bf16.mxu1 %v6108_v56  ;;  %v6154_v31 = vld [vmem:[#allocation2 + $0x128] ss:$28 sps:$4 sm:$0xff]   ;;  %v7178_v35 = vpack.c.bf16 %v913_v29, %v912_v28  ;;  %v6135_v36 = vld [vmem:[#allocation2 + $0xb0] ss:$28 sps:$4 sm:$0xff]   ;;  %v6162_v41 = vld [vmem:[#allocation2 + $0xbc] ss:$28 sps:$4 sm:$0xff]  }
  0x7c   : > { %v6157_v38 = vld [vmem:[#allocation2 + $0xf0] ss:$28 sps:$4 sm:$0xff]   ;;  %v891_v42 = vld [vmem:[%s6299_s25 + $0x38] sm:$0xff]  ;;  %v6143_v45 = vld [vmem:[#allocation2 + $0x44] ss:$28 sps:$4 sm:$0xff]  }
  0x7d   : > { %v890_v40 = vld [vmem:[%s6299_s25 + $0x30] sm:$0xff]  ;;  %v915_v44 = vld [vmem:[%s6299_s25 + $0xf8] sm:$0xff]  ;;  %v6146_v50 = vld [vmem:[#allocation2 + $0xc] ss:$28 sps:$4 sm:$0xff]  }
  0x7e   : > { %1291 = vmatpush1.bf16.msra.mxu0 %v6110_v57  ;;  %6071 = vmatpush1.bf16.msra.mxu1 %v6110_v57  ;;  %v914_v43 = vld [vmem:[%s6299_s25 + $0xf0] sm:$0xff]  ;;  %v7188_v47 = vpack.c.bf16 %v891_v42, %v890_v40  ;;  %v6141_v49 = vld [vmem:[#allocation2 + $0x40] ss:$28 sps:$4 sm:$0xff]   ;;  %v6144_v53 = vld [vmem:[#allocation2 + $0x8] ss:$28 sps:$4 sm:$0xff]  }
  0x7f   : > { %1292 = vmatprep.subr.bf16.mxu0 %v6111_v58  ;;  %6064 = vmatprep.subr.bf16.mxu1 %v6111_v58  ;;  %v6160_v46 = vld [vmem:[#allocation2 + $0xb8] ss:$28 sps:$4 sm:$0xff]   ;;  %v7190_v48 = vpack.c.bf16 %v915_v44, %v914_v43  ;;  %v6166_v52 = vld [vmem:[#allocation2 + $0x84] ss:$28 sps:$4 sm:$0xff]   ;;  %v893_v56 = vld [vmem:[%s6299_s25 + $0x48] sm:$0xff] }
  0x80   : > { %v6164_v54 = vld [vmem:[#allocation2 + $0x80] ss:$28 sps:$4 sm:$0xff]   ;;  %v6169_v57 = vld [vmem:[#allocation2 + $0x4c] ss:$28 sps:$4 sm:$0xff]   ;;  %v6174_v4 = vld [vmem:[#allocation2 + $0xf8] ss:$28 sps:$4 sm:$0xff]  }
  0x81   : > { %v892_v55 = vld [vmem:[%s6299_s25 + $0x40] sm:$0xff]  ;;  %v6173_v2 = vld [vmem:[#allocation2 + $0x130] ss:$28 sps:$4 sm:$0xff]   ;;  %v899_v13 = vld [vmem:[%s6299_s25 + $0x78] sm:$0xff] }
  0x82   : > { %1293 = vmatpush1.bf16.msra.mxu0 %v6113_v59  ;;  %6072 = vmatpush1.bf16.msra.mxu1 %v6113_v59  ;;  %v6150_v58 = vld [vmem:[#allocation2 + $0x1a0] ss:$28 sps:$4 sm:$0xff]   ;;  %v7198_v59 = vpack.c.bf16 %v893_v56, %v892_v55  ;;  %v6177_v14 = vld [vmem:[#allocation2 + $0x50] ss:$28 sps:$4 sm:$0xff]  }
  0x83   : > { %1294 = vmatprep.subr.bf16.mxu0 %v6114_v60  ;;  %6065 = vmatprep.subr.bf16.mxu1 %v6114_v60  ;;  %v6167_v60 = vld [vmem:[#allocation2 + $0x48] ss:$28 sps:$4 sm:$0xff]   ;;  %v906_v28 = vld [vmem:[%s6299_s25 + $0xb0] sm:$0xff]  ;;  %v907_v29 = vld [vmem:[%s6299_s25 + $0xb8] sm:$0xff] }
  0x84   : > { %v896_v5 = vld [vmem:[%s6299_s25 + $0x60] sm:$0xff]  ;;  %v901_v18 = vld [vmem:[%s6299_s25 + $0x88] sm:$0xff] }
  0x85   : > { %v900_v17 = vld [vmem:[%s6299_s25 + $0x80] sm:$0xff]  ;;  %v905_v26 = vld [vmem:[%s6299_s25 + $0xa8] sm:$0xff] }
  0x86   : > { %1295 = vmatpush1.bf16.msra.mxu0 %v6116_v61  ;;  %6073 = vmatpush1.bf16.msra.mxu1 %v6116_v61  ;;  %v6163_v61 = vld [vmem:[#allocation2 + $0x168] ss:$28 sps:$4 sm:$0xff]  }
  0x87   : > { %1296 = vmatprep.subr.bf16.mxu0 %v6117_v62  ;;  %6066 = vmatprep.subr.bf16.mxu1 %v6117_v62  ;;  %v6172_v62 = vld [vmem:[#allocation2 + $0x14] ss:$28 sps:$4 sm:$0xff]  }
  0x8a   : > { %1297 = vmatpush1.bf16.msra.mxu0 %v6119_v63  ;;  %6074 = vmatpush1.bf16.msra.mxu1 %v6119_v63  ;;  %v894_v63 = vld [vmem:[%s6299_s25 + $0x50] sm:$0xff] }
  0x8b   : > { %1298 = vmatprep.subr.bf16.mxu0 %v6120_v0  ;;  %6067 = vmatprep.subr.bf16.mxu1 %v6120_v0  ;;  %v895_v0 = vld [vmem:[%s6299_s25 + $0x58] sm:$0xff] }
  0x8c   : > { %v7206_v3 = vpack.c.bf16 %v895_v0, %v894_v63 }
  0x8e   : > { %1299 = vmatpush1.bf16.msra.mxu0 %v6122_v1  ;;  %6075 = vmatpush1.bf16.msra.mxu1 %v6122_v1  ;;  %v6170_v1 = vld [vmem:[#allocation2 + $0x10] ss:$28 sps:$4 sm:$0xff]  }
  0x8f   : > { %1477 = vmatprep.subr.bf16.mxu1 %v6125_v6  ;;  %1670 = vmatprep.subr.bf16.mxu0 %v6149_v10  ;;  %v897_v6 = vld [vmem:[%s6299_s25 + $0x68] sm:$0xff] }
  0x90   : > { %v7214_v10 = vpack.c.bf16 %v897_v6, %v896_v5 }
  0x91   : > { %1317 = vmatmul.mubr.bf16.vlgmr.msra.gmra.mxu0 %v7152_v7  ;;  %1437 = vmatmul.mubr.bf16.vlgmr.msra.gmra.mxu1 %v7154_v8 }
  0x92   : > { %1478 = vmatpush1.bf16.msra.mxu1 %v6123_v9  ;;  %1326 = vmatprep.mubr.bf16.mxu0 %v12166_v51  ;;  %v6175_v9 = vld [vmem:[#allocation2 + $0xc0] ss:$28 sps:$4 sm:$0xff]  }
  0x93   : > { %1479 = vmatprep.subr.bf16.mxu1 %v6128_v11  ;;  %1446 = vmatprep.mubr.bf16.mxu1 %v12166_v51  ;;  %v6176_v11 = vld [vmem:[#allocation2 + $0x88] ss:$28 sps:$4 sm:$0xff]  }
  0x94   : > { %1671 = vmatpush1.bf16.msra.mxu0 %v6147_v15 }
  0x95   : > { %1672 = vmatprep.subr.bf16.mxu0 %v6153_v16  ;;  %v6178_v16 = vld [vmem:[#allocation2 + $0x18] ss:$28 sps:$4 sm:$0xff]  }
  0x96   : > { %1480 = vmatpush1.bf16.msra.mxu1 %v6126_v12  ;;  %v898_v12 = vld [vmem:[%s6299_s25 + $0x70] sm:$0xff] }
  0x97   : > { %1481 = vmatprep.subr.bf16.mxu1 %v6131_v19  ;;  %v7222_v15 = vpack.c.bf16 %v899_v13, %v898_v12  ;;  %v7230_v19 = vpack.c.bf16 %v901_v18, %v900_v17 }
  0x98   : > { %1673 = vmatpush1.bf16.msra.mxu0 %v6151_v20  ;;  %v902_v20 = vld [vmem:[%s6299_s25 + $0x90] sm:$0xff] }
  0x99   : > { %1327 = vmatmul.mubr.bf16.gmra.mxu0 %v7164_v21  ;;  %1447 = vmatmul.mubr.bf16.gmra.mxu1 %v7166_v22 }
  0x9a   : > { %1482 = vmatpush1.bf16.msra.mxu1 %v6129_v23  ;;  %1336 = vmatprep.mubr.bf16.mxu0 %v12166_v51  ;;  %v903_v23 = vld [vmem:[%s6299_s25 + $0x98] sm:$0xff] }
  0x9b   : > { %1483 = vmatprep.subr.bf16.mxu1 %v6134_v24  ;;  %1456 = vmatprep.mubr.bf16.mxu1 %v12166_v51  ;;  %v7238_v24 = vpack.c.bf16 %v903_v23, %v902_v20 }
  0x9c   : > { %1674 = vmatprep.subr.bf16.mxu0 %v6156_v30  ;;  %v7254_v30 = vpack.c.bf16 %v907_v29, %v906_v28 }
  0x9d   : > { %1675 = vmatpush1.bf16.msra.mxu0 %v6154_v31 }
  0x9e   : > { %1484 = vmatpush1.bf16.msra.mxu1 %v6132_v25  ;;  %1676 = vmatprep.subr.bf16.mxu0 %v6159_v32  ;;  %v904_v25 = vld [vmem:[%s6299_s25 + $0xa0] sm:$0xff]  ;;  %s5856_s25 = sshll.u32 %s6291_s19, 8 }
  0x9f   : > { %1485 = vmatprep.subr.bf16.mxu1 %v6137_v33  ;;  %v7246_v27 = vpack.c.bf16 %v905_v26, %v904_v25  ;;  %s8843_s13 = scalar_lea.vmem %s12162_s2, %s5856_s25  ;;  %s10552_s15 = sshra.s32 %s5856_s25, 7 }
  0xa0   : > { %s5857_s19 = sshll.u32 %s10552_s15, 3 }
  0xa1   : > { %1337 = vmatmul.mubr.bf16.gmra.mxu0 %v7176_v34  ;;  %1457 = vmatmul.mubr.bf16.gmra.mxu1 %v7178_v35  ;;  %s10607_s20 = scalar_lea.vmem %s12164_s4, %s5857_s19 }
  0xa2   : > { %1486 = vmatpush1.bf16.msra.mxu1 %v6135_v36  ;;  %1346 = vmatprep.mubr.bf16.mxu0 %v12166_v51 }
  0xa3   : > { %1487 = vmatprep.subr.bf16.mxu1 %v6140_v37  ;;  %1466 = vmatprep.mubr.bf16.mxu1 %v12166_v51 }
  0xa4   : > { %1677 = vmatpush1.bf16.msra.mxu0 %v6157_v38 }
  0xa5   : > { %1678 = vmatprep.subr.bf16.mxu0 %v6162_v41 }
  0xa6   : > { %1488 = vmatpush1.bf16.msra.mxu1 %v6138_v39 }
  0xa7   : > { %1489 = vmatprep.subr.bf16.mxu1 %v6143_v45 }
  0xa8   : > { %1679 = vmatpush1.bf16.msra.mxu0 %v6160_v46 }
  0xa9   : > { %1347 = vmatmul.mubr.bf16.gmra.mxu0 %v7188_v47  ;;  %1467 = vmatmul.mubr.bf16.gmra.mxu1 %v7190_v48 }
  0xaa   : > { %1490 = vmatpush1.bf16.msra.mxu1 %v6141_v49  ;;  %1356 = vmatprep.mubr.bf16.mxu0 %v12166_v51 }
  0xab   : > { %1491 = vmatprep.subr.bf16.mxu1 %v6146_v50  ;;  %1509 = vmatprep.mubr.bf16.mxu1 %v12166_v51 }
  0xac   : > { %1680 = vmatprep.subr.bf16.mxu0 %v6166_v52 }
  0xad   : > { %1681 = vmatpush1.bf16.msra.mxu0 %v6164_v54 }
  0xae   : > { %1492 = vmatpush1.bf16.msra.mxu1 %v6144_v53  ;;  %1682 = vmatprep.subr.bf16.mxu0 %v6169_v57 }
  0xaf   : > { %6012 = vmatprep.subr.bf16.mxu1 %v6150_v58 }
  0xb1   : > { %1357 = vmatmul.mubr.bf16.gmra.mxu0 %v7198_v59  ;;  %1510 = vmatmul.mubr.bf16.vlgmr.msra.gmra.mxu1 %v7152_v7 }
  0xb2   : > { %1366 = vmatprep.mubr.bf16.mxu0 %v12166_v51  ;;  %1519 = vmatprep.mubr.bf16.mxu1 %v12166_v51 }
  0xb3   : > { %6013 = vmatpush3.bf16.msra.mxu1 %v6150_v58  ;;  %1683 = vmatpush1.bf16.msra.mxu0 %v6167_v60 }
  0xb4   : > { %6014 = vmatprep.subr.bf16.mxu1 %v6163_v61  ;;  %1684 = vmatprep.subr.bf16.mxu0 %v6172_v62 }
  0xb7   : > { %6015 = vmatpush3.bf16.msra.mxu1 %v6163_v61  ;;  %1685 = vmatpush1.bf16.msra.mxu0 %v6170_v1 }
  0xb8   : > { %6016 = vmatprep.subr.bf16.mxu1 %v6173_v2 }
  0xb9   : > { %1367 = vmatmul.mubr.bf16.gmra.mxu0 %v7206_v3  ;;  %1520 = vmatmul.mubr.bf16.gmra.mxu1 %v7164_v21 }
  0xba   : > { %1376 = vmatprep.mubr.bf16.mxu0 %v12166_v51  ;;  %1529 = vmatprep.mubr.bf16.mxu1 %v12166_v51 }
  0xbb   : > { %6017 = vmatpush3.bf16.msra.mxu1 %v6173_v2 }
  0xbc   : > { %6018 = vmatprep.subr.bf16.mxu1 %v6174_v4 }
  0xbf   : > { %6019 = vmatpush3.bf16.msra.mxu1 %v6174_v4 }
  0xc0   : > { %6020 = vmatprep.subr.bf16.mxu1 %v6175_v9 }
  0xc1   : > { %1377 = vmatmul.mubr.bf16.gmra.mxu0 %v7214_v10  ;;  %1530 = vmatmul.mubr.bf16.gmra.mxu1 %v7176_v34 }
  0xc2   : > { %1386 = vmatprep.mubr.bf16.mxu0 %v12166_v51  ;;  %1539 = vmatprep.mubr.bf16.mxu1 %v12166_v51 }
  0xc3   : > { %6021 = vmatpush3.bf16.msra.mxu1 %v6175_v9 }
  0xc4   : > { %6022 = vmatprep.subr.bf16.mxu1 %v6176_v11 }
  0xc7   : > { %6023 = vmatpush3.bf16.msra.mxu1 %v6176_v11 }
  0xc8   : > { %6024 = vmatprep.subr.bf16.mxu1 %v6177_v14 }
  0xc9   : > { %1387 = vmatmul.mubr.bf16.gmra.mxu0 %v7222_v15  ;;  %1540 = vmatmul.mubr.bf16.gmra.mxu1 %v7188_v47 }
  0xca   : > { %1396 = vmatprep.mubr.bf16.mxu0 %v12166_v51  ;;  %1549 = vmatprep.mubr.bf16.mxu1 %v12166_v51 }
  0xcb   : > { %6025 = vmatpush3.bf16.msra.mxu1 %v6177_v14 }
  0xcc   : > { %6026 = vmatprep.subr.bf16.mxu1 %v6178_v16 }
  0xcf   : > { %6027 = vmatpush3.bf16.msra.mxu1 %v6178_v16 }
  0xd1   : > { %1397 = vmatmul.mubr.bf16.gmra.mxu0 %v7230_v19  ;;  %1550 = vmatmul.mubr.bf16.gmra.mxu1 %v7198_v59 }
  0xd2   : > { %1406 = vmatprep.mubr.bf16.mxu0 %v12166_v51  ;;  %1559 = vmatprep.mubr.bf16.mxu1 %v12166_v51 }
  0xd9   : > { %1407 = vmatmul.mubr.bf16.gmra.mxu0 %v7238_v24  ;;  %1560 = vmatmul.mubr.bf16.gmra.mxu1 %v7206_v3 }
  0xda   : > { %1416 = vmatprep.mubr.bf16.mxu0 %v12166_v51  ;;  %1569 = vmatprep.mubr.bf16.mxu1 %v12166_v51 }
  0xe1   : > { %1417 = vmatmul.mubr.bf16.gmra.mxu0 %v7246_v27  ;;  %1570 = vmatmul.mubr.bf16.gmra.mxu1 %v7214_v10 }
  0xe2   : > { %1426 = vmatprep.mubr.bf16.mxu0 %v12166_v51  ;;  %1579 = vmatprep.mubr.bf16.mxu1 %v12166_v51 }
  0xe9   : > { %1427 = vmatmul.mubr.bf16.gmra.mxu0 %v7254_v30  ;;  %1580 = vmatmul.mubr.bf16.gmra.mxu1 %v7222_v15 }
  0xea   : > { %1589 = vmatprep.mubr.bf16.mxu1 %v12166_v51  ;;  %1702 = vmatprep.mubr.bf16.mxu0 %v12166_v51 }
  0xf1   : > { %1590 = vmatmul.mubr.bf16.gmra.mxu1 %v7230_v19  ;;  %1703 = vmatmul.mubr.bf16.vlgmr.msra.gmra.mxu0 %v7152_v7 }
  0xf2   : > { %1599 = vmatprep.mubr.bf16.mxu1 %v12166_v51  ;;  %1712 = vmatprep.mubr.bf16.mxu0 %v12166_v51 }
  0xf9   : > { %1600 = vmatmul.mubr.bf16.gmra.mxu1 %v7238_v24  ;;  %1713 = vmatmul.mubr.bf16.gmra.mxu0 %v7164_v21 }
  0xfa   : > { %1609 = vmatprep.mubr.bf16.mxu1 %v12166_v51  ;;  %1722 = vmatprep.mubr.bf16.mxu0 %v12166_v51 }
 0x101   : > { %1610 = vmatmul.mubr.bf16.gmra.mxu1 %v7246_v27  ;;  %1723 = vmatmul.mubr.bf16.gmra.mxu0 %v7176_v34 }
 0x102   : > { %1619 = vmatprep.mubr.bf16.mxu1 %v12166_v51  ;;  %1732 = vmatprep.mubr.bf16.mxu0 %v12166_v51 }
 0x109   : > { %1620 = vmatmul.mubr.bf16.gmra.mxu1 %v7254_v30  ;;  %1733 = vmatmul.mubr.bf16.gmra.mxu0 %v7188_v47 }
 0x10a   : > { %1629 = vmatprep.mubr.bf16.mxu1 %v12166_v51  ;;  %1742 = vmatprep.mubr.bf16.mxu0 %v12166_v51 }
 0x111   : > { %1630 = vmatmul.mubr.bf16.gmra.mxu1 %v7154_v8  ;;  %1743 = vmatmul.mubr.bf16.gmra.mxu0 %v7198_v59 }
 0x112   : > { %1639 = vmatprep.mubr.bf16.mxu1 %v12166_v51  ;;  %1752 = vmatprep.mubr.bf16.mxu0 %v12166_v51 }
 0x119   : > { %1640 = vmatmul.mubr.bf16.gmra.mxu1 %v7166_v22  ;;  %1753 = vmatmul.mubr.bf16.gmra.mxu0 %v7206_v3 }
 0x11a   : > { %1649 = vmatprep.mubr.bf16.mxu1 %v12166_v51  ;;  %1762 = vmatprep.mubr.bf16.mxu0 %v12166_v51 }
 0x121   : > { %1650 = vmatmul.mubr.bf16.gmra.mxu1 %v7178_v35  ;;  %1763 = vmatmul.mubr.bf16.gmra.mxu0 %v7214_v10 }
 0x122   : > { %1659 = vmatprep.mubr.bf16.mxu1 %v12166_v51  ;;  %1772 = vmatprep.mubr.bf16.mxu0 %v12166_v51 }
 0x129   : > { %1660 = vmatmul.mubr.bf16.gmra.mxu1 %v7190_v48  ;;  %1773 = vmatmul.mubr.bf16.gmra.mxu0 %v7222_v15 }
 0x12a   : > { %1782 = vmatprep.mubr.bf16.mxu0 %v12166_v51  ;;  %6028 = vmatprep.mubr.bf16.mxu1 %v7152_v7 }
 0x131   : > { %1783 = vmatmul.mubr.bf16.gmra.mxu0 %v7230_v19  ;;  %6029 = vmatmul.mubr.bf16.vlgmr.msra.gmra.mxu1 %v7164_v21 }
 0x132   : > { %1792 = vmatprep.mubr.bf16.mxu0 %v12166_v51  ;;  %6032 = vmatprep.mubr.bf16.mxu1 %v7176_v34 }
 0x139   : > { %1793 = vmatmul.mubr.bf16.gmra.mxu0 %v7238_v24  ;;  %6033 = vmatmul.mubr.bf16.gmra.mxu1 %v7188_v47 }
 0x13a   : > { %1802 = vmatprep.mubr.bf16.mxu0 %v12166_v51  ;;  %6036 = vmatprep.mubr.bf16.mxu1 %v7198_v59 }
 0x141   : > { %1803 = vmatmul.mubr.bf16.gmra.mxu0 %v7246_v27  ;;  %6037 = vmatmul.mubr.bf16.gmra.mxu1 %v7206_v3 }
 0x142   : > { %1812 = vmatprep.mubr.bf16.mxu0 %v12166_v51  ;;  %6040 = vmatprep.mubr.bf16.mxu1 %v7214_v10 }
 0x149   : > { %1813 = vmatmul.mubr.bf16.gmra.mxu0 %v7254_v30  ;;  %6041 = vmatmul.mubr.bf16.gmra.mxu1 %v7222_v15 }
 0x14a   : > { %1822 = vmatprep.mubr.bf16.mxu0 %v12166_v51  ;;  %6044 = vmatprep.mubr.bf16.mxu1 %v7230_v19 }
 0x151   : > { %v7308_v7 = vpop.f32.mrf.mxu0  ;;  %v7310_v21 = vpop.f32.mrf.mxu1  ;;  %1823 = vmatmul.mubr.bf16.gmra.mxu0 %v7154_v8  ;;  %6045 = vmatmul.mubr.bf16.gmra.mxu1 %v7238_v24 }
 0x152   : > { %12562 = vst [vmem:[#allocation3_spill] sm:$0xff] %v7308_v7  ;;  %12563 = vst [vmem:[#allocation4_spill] sm:$0xff] %v7310_v21  ;;  %1832 = vmatprep.mubr.bf16.mxu0 %v12166_v51  ;;  %6048 = vmatprep.mubr.bf16.mxu1 %v7246_v27 }
 0x153   : > { %v7316_v31 = vpop.f32.mrf.mxu0  ;;  %v7318_v32 = vpop.f32.mrf.mxu1 }
 0x154   : > { %12564 = vst [vmem:[#allocation5_spill] sm:$0xff] %v7316_v31  ;;  %12565 = vst [vmem:[#allocation6_spill] sm:$0xff] %v7318_v32 }
 0x155   : > { %v7320_v33 = vpop.f32.mrf.mxu0  ;;  %v7322_v34 = vpop.f32.mrf.mxu1 }
 0x156   : > { %12566 = vst [vmem:[#allocation7_spill] sm:$0xff] %v7320_v33  ;;  %12567 = vst [vmem:[#allocation8_spill] sm:$0xff] %v7322_v34 }
 0x157   : > { %v7324_v36 = vpop.f32.mrf.mxu0  ;;  %v7326_v37 = vpop.f32.mrf.mxu1 }
 0x158   : > { %12568 = vst [vmem:[#allocation9_spill] sm:$0xff] %v7324_v36  ;;  %12569 = vst [vmem:[#allocation10_spill] sm:$0xff] %v7326_v37 }
 0x159   : > { %v7328_v38 = vpop.f32.mrf.mxu0  ;;  %v7330_v39 = vpop.f32.mrf.mxu1  ;;  %1833 = vmatmul.mubr.bf16.gmra.mxu0 %v7166_v22  ;;  %6049 = vmatmul.mubr.bf16.gmra.mxu1 %v7254_v30 }
 0x15a   : > { %12570 = vst [vmem:[#allocation11_spill] sm:$0xff] %v7328_v38  ;;  %12571 = vst [vmem:[#allocation12_spill] sm:$0xff] %v7330_v39  ;;  %1842 = vmatprep.mubr.bf16.mxu0 %v12166_v51  ;;  %6052 = vmatprep.mubr.bf16.mxu1 %v7154_v8 }
 0x15b   : > { %v7336_v40 = vpop.f32.mrf.mxu0  ;;  %v7338_v41 = vpop.f32.mrf.mxu1 }
 0x15c   : > { %12572 = vst [vmem:[#allocation13_spill] sm:$0xff] %v7336_v40  ;;  %12573 = vst [vmem:[#allocation14_spill] sm:$0xff] %v7338_v41 }
 0x15d   : > { %v7340_v42 = vpop.f32.mrf.mxu0  ;;  %v7342_v43 = vpop.f32.mrf.mxu1 }
 0x15e   : > { %12574 = vst [vmem:[#allocation15_spill] sm:$0xff] %v7340_v42  ;;  %12575 = vst [vmem:[#allocation16_spill] sm:$0xff] %v7342_v43 }
 0x15f   : > { %v7344_v44 = vpop.f32.mrf.mxu0  ;;  %v7346_v45 = vpop.f32.mrf.mxu1 }
 0x160   : > { %12576 = vst [vmem:[#allocation17_spill] sm:$0xff] %v7344_v44  ;;  %12577 = vst [vmem:[#allocation18_spill] sm:$0xff] %v7346_v45 }
 0x161   : > { %v7348_v46 = vpop.f32.mrf.mxu0  ;;  %v7350_v47 = vpop.f32.mrf.mxu1  ;;  %1843 = vmatmul.mubr.bf16.gmra.mxu0 %v7178_v35  ;;  %6053 = vmatmul.mubr.bf16.gmra.mxu1 %v7166_v22 }
 0x162   : > { %12578 = vst [vmem:[#allocation19_spill] sm:$0xff] %v7348_v46  ;;  %12579 = vst [vmem:[#allocation20_spill] sm:$0xff] %v7350_v47  ;;  %1852 = vmatprep.mubr.bf16.mxu0 %v12166_v51  ;;  %6056 = vmatprep.mubr.bf16.mxu1 %v7178_v35 }
 0x163   : > { %v7356_v8 = vpop.f32.mrf.mxu0  ;;  %v7358_v49 = vpop.f32.mrf.mxu1 }
 0x164   : > { %12580 = vst [vmem:[#allocation21_spill] sm:$0xff] %v7356_v8  ;;  %12581 = vst [vmem:[#allocation22_spill] sm:$0xff] %v7358_v49 }
 0x165   : > { %v7360_v50 = vpop.f32.mrf.mxu0  ;;  %v7362_v52 = vpop.f32.mrf.mxu1 }
 0x166   : > { %12582 = vst [vmem:[#allocation23_spill] sm:$0xff] %v7360_v50  ;;  %12583 = vst [vmem:[#allocation24_spill] sm:$0xff] %v7362_v52 }
 0x167   : > { %v7364_v53 = vpop.f32.mrf.mxu0  ;;  %v7366_v54 = vpop.f32.mrf.mxu1 }
 0x168   : > { %12584 = vst [vmem:[#allocation25_spill] sm:$0xff] %v7364_v53  ;;  %12585 = vst [vmem:[#allocation26_spill] sm:$0xff] %v7366_v54 }
 0x169   : > { %v7368_v55 = vpop.f32.mrf.mxu0  ;;  %v7370_v56 = vpop.f32.mrf.mxu1  ;;  %1853 = vmatmul.mubr.bf16.gmra.mxu0 %v7190_v48  ;;  %6057 = vmatmul.mubr.bf16.gmra.mxu1 %v7190_v48 }
 0x16a   : > { %12586 = vst [vmem:[#allocation27_spill] sm:$0xff] %v7368_v55  ;;  %12587 = vst [vmem:[#allocation28_spill] sm:$0xff] %v7370_v56 }
 0x16b   : > { %v7374_v22 = vpop.f32.mrf.mxu0  ;;  %v7376_v35 = vpop.f32.mrf.mxu1 }
 0x16c   : > { %12588 = vst [vmem:[#allocation29_spill] sm:$0xff] %v7374_v22  ;;  %12589 = vst [vmem:[#allocation30_spill] sm:$0xff] %v7376_v35 }
 0x16d   : > { %v7378_v57 = vpop.f32.mrf.mxu0  ;;  %v7380_v58 = vpop.f32.mrf.mxu1 }
 0x16e   : > { %12590 = vst [vmem:[#allocation31_spill] sm:$0xff] %v7378_v57  ;;  %12591 = vst [vmem:[#allocation32_spill] sm:$0xff] %v7380_v58 }
 0x16f   : > { %v7382_v59 = vpop.f32.mrf.mxu0  ;;  %v7384_v60 = vpop.f32.mrf.mxu1 }
 0x170   : > { %12592 = vst [vmem:[#allocation33_spill] sm:$0xff] %v7382_v59  ;;  %12593 = vst [vmem:[#allocation34_spill] sm:$0xff] %v7384_v60 }
 0x171   : > { %v7386_v61 = vpop.f32.mrf.mxu0  ;;  %v7388_v62 = vpop.f32.mrf.mxu1 }
 0x172   : > { %12594 = vst [vmem:[#allocation35_spill] sm:$0xff] %v7386_v61  ;;  %12595 = vst [vmem:[#allocation36_spill] sm:$0xff] %v7388_v62 }
 0x173   : > { %v7390_v63 = vpop.f32.mrf.mxu0  ;;  %v7392_v0 = vpop.f32.mrf.mxu1 }
 0x174   : > { %12596 = vst [vmem:[#allocation37_spill] sm:$0xff] %v7390_v63  ;;  %12597 = vst [vmem:[#allocation38_spill] sm:$0xff] %v7392_v0 }
 0x175   : > { %v7394_v48 = vpop.f32.mrf.mxu0  ;;  %v7396_v1 = vpop.f32.mrf.mxu1 }
 0x176   : > { %12598 = vst [vmem:[#allocation39_spill] sm:$0xff] %v7394_v48  ;;  %12599 = vst [vmem:[#allocation40_spill] sm:$0xff] %v7396_v1 }
 0x177   : > { %v7398_v2 = vpop.f32.mrf.mxu0  ;;  %v7400_v3 = vpop.f32.mrf.mxu1 }
 0x178   : > { %12600 = vst [vmem:[#allocation41_spill] sm:$0xff] %v7398_v2  ;;  %12601 = vst [vmem:[#allocation42_spill] sm:$0xff] %v7400_v3 }
 0x179   : > { %v7402_v4 = vpop.f32.mrf.mxu0  ;;  %v7404_v5 = vpop.f32.mrf.mxu1 }
 0x17a   : > { %12602 = vst [vmem:[#allocation43_spill] sm:$0xff] %v7402_v4  ;;  %12603 = vst [vmem:[#allocation44_spill] sm:$0xff] %v7404_v5 }
 0x17b   : > { %v7406_v6 = vpop.f32.mrf.mxu0  ;;  %v7408_v9 = vpop.f32.mrf.mxu1 }
 0x17c   : > { %12604 = vst [vmem:[#allocation45_spill] sm:$0xff] %v7406_v6  ;;  %12605 = vst [vmem:[#allocation46_spill] sm:$0xff] %v7408_v9 }
 0x17d   : > { %v7410_v10 = vpop.f32.mrf.mxu0  ;;  %v7412_v11 = vpop.f32.mrf.mxu1 }
 0x17e   : > { %12606 = vst [vmem:[#allocation47_spill] sm:$0xff] %v7410_v10  ;;  %12607 = vst [vmem:[#allocation48_spill] sm:$0xff] %v7412_v11 }
 0x17f   : > { %v7414_v12 = vpop.f32.mrf.mxu0  ;;  %v7416_v13 = vpop.f32.mrf.mxu1 }
 0x180   : > { %12608 = vst [vmem:[#allocation49_spill] sm:$0xff] %v7414_v12  ;;  %12609 = vst [vmem:[#allocation50_spill] sm:$0xff] %v7416_v13 }
 0x181   : > { %v7418_v14 = vpop.f32.mrf.mxu0  ;;  %v7420_v15 = vpop.f32.mrf.mxu1 }
 0x182   : > { %12610 = vst [vmem:[#allocation51_spill] sm:$0xff] %v7418_v14  ;;  %12611 = vst [vmem:[#allocation52_spill] sm:$0xff] %v7420_v15  ;;  %v2360_v14 = vmul.f32 %v7336_v40, %v7336_v40 }
 0x183   : > { %v7422_v16 = vpop.f32.mrf.mxu0  ;;  %v7424_v17 = vpop.f32.mrf.mxu1 }
 0x184   : > { %12612 = vst [vmem:[#allocation53_spill] sm:$0xff] %v7422_v16  ;;  %12613 = vst [vmem:[#allocation54_spill] sm:$0xff] %v7424_v17  ;;  %v2520_v17 = vmul.f32 %v7322_v34, %v7322_v34  ;;  %v2359_v16 = vmul.f32 %v7328_v38, %v7328_v38 }
 0x185   : > { %v7426_v18 = vpop.f32.mrf.mxu0  ;;  %v7428_v19 = vpop.f32.mrf.mxu1 }
 0x186   : > { %12614 = vst [vmem:[#allocation55_spill] sm:$0xff] %v7426_v18  ;;  %12615 = vst [vmem:[#allocation56_spill] sm:$0xff] %v7428_v19  ;;  %v2527_v19 = vmul.f32 %v7330_v39, %v7330_v39 }
 0x187   : > { %v7430_v20 = vpop.f32.mrf.mxu0  ;;  %v7432_v23 = vpop.f32.mrf.mxu1 }
 0x188   : > { %12616 = vst [vmem:[#allocation57_spill] sm:$0xff] %v7430_v20  ;;  %12617 = vst [vmem:[#allocation58_spill] sm:$0xff] %v7432_v23 }
 0x189   : > { %v7434_v24 = vpop.f32.mrf.mxu0  ;;  %v7436_v25 = vpop.f32.mrf.mxu1 }
 0x18a   : > { %12618 = vst [vmem:[#allocation59_spill] sm:$0xff] %v7434_v24  ;;  %12619 = vst [vmem:[#allocation60_spill] sm:$0xff] %v7436_v25 }
 0x18b   : > { %v7438_v26 = vpop.f32.mrf.mxu0  ;;  %v7440_v27 = vpop.f32.mrf.mxu1 }
 0x18c   : > { %12620 = vst [vmem:[#allocation61_spill] sm:$0xff] %v7438_v26  ;;  %12621 = vst [vmem:[#allocation62_spill] sm:$0xff] %v7440_v27 }
 0x18d   : > { %v7442_v28 = vpop.f32.mrf.mxu0  ;;  %v7444_v29 = vpop.f32.mrf.mxu1 }
 0x18e   : > { %12622 = vst [vmem:[#allocation63_spill] sm:$0xff] %v7442_v28  ;;  %12623 = vst [vmem:[#allocation64_spill] sm:$0xff] %v7444_v29 }
 0x18f   : > { %v7446_v30 = vpop.f32.mrf.mxu0  ;;  %v7448_v51 = vpop.f32.mrf.mxu1 }
 0x190   : > { %12624 = vst [vmem:[#allocation65_spill] sm:$0xff] %v7446_v30  ;;  %12625 = vst [vmem:[#allocation66_spill] sm:$0xff] %v7448_v51 }
 0x191   : > { %v7450_v18 = vpop.f32.mrf.mxu0  ;;  %v7452_v20 = vpop.f32.mrf.mxu1 }
 0x192   : > { %12626 = vst [vmem:[#allocation67_spill] sm:$0xff] %v7450_v18  ;;  %12627 = vst [vmem:[#allocation68_spill] sm:$0xff] %v7452_v20 }
 0x193   : > { %v7454_v23 = vpop.f32.mrf.mxu0  ;;  %v7456_v24 = vpop.f32.mrf.mxu1 }
 0x194   : > { %12628 = vst [vmem:[#allocation69_spill] sm:$0xff] %v7454_v23  ;;  %12629 = vst [vmem:[#allocation70_spill] sm:$0xff] %v7456_v24 }
 0x195   : > { %v7458_v25 = vpop.f32.mrf.mxu0  ;;  %v7460_v26 = vpop.f32.mrf.mxu1 }
 0x196   : > { %12630 = vst [vmem:[#allocation71_spill] sm:$0xff] %v7458_v25  ;;  %12631 = vst [vmem:[#allocation72_spill] sm:$0xff] %v7460_v26 }
 0x197   : > { %v7462_v27 = vpop.f32.mrf.mxu0  ;;  %v7464_v28 = vpop.f32.mrf.mxu1 }
 0x198   : > { %12632 = vst [vmem:[#allocation73_spill] sm:$0xff] %v7462_v27  ;;  %12633 = vst [vmem:[#allocation74_spill] sm:$0xff] %v7464_v28 }
 0x199   : > { %v7466_v29 = vpop.f32.mrf.mxu0  ;;  %v7468_v30 = vpop.f32.mrf.mxu1 }
 0x19a   : > { %12634 = vst [vmem:[#allocation75_spill] sm:$0xff] %v7466_v29  ;;  %12635 = vst [vmem:[#allocation76_spill] sm:$0xff] %v7468_v30 }
 0x19b   : > { %v7470_v51 = vpop.f32.mrf.mxu0  ;;  %v7472_v18 = vpop.f32.mrf.mxu1 }
 0x19c   : > { %12636 = vst [vmem:[#allocation77_spill] sm:$0xff] %v7470_v51  ;;  %12637 = vst [vmem:[#allocation78_spill] sm:$0xff] %v7472_v18 }
 0x19d   : > { %v7474_v20 = vpop.f32.mrf.mxu0  ;;  %v7476_v23 = vpop.f32.mrf.mxu1 }
 0x19e   : > { %12638 = vst [vmem:[#allocation79_spill] sm:$0xff] %v7474_v20  ;;  %12639 = vst [vmem:[#allocation80_spill] sm:$0xff] %v7476_v23 }
 0x19f   : > { %v7478_v24 = vpop.f32.mrf.mxu0  ;;  %v7480_v25 = vpop.f32.mrf.mxu1 }
 0x1a0   : > { %12640 = vst [vmem:[#allocation81_spill] sm:$0xff] %v7478_v24  ;;  %12641 = vst [vmem:[#allocation82_spill] sm:$0xff] %v7480_v25 }
 0x1a1   : > { %v7482_v26 = vpop.f32.mrf.mxu0  ;;  %v7484_v27 = vpop.f32.mrf.mxu1 }
 0x1a2   : > { %12642 = vst [vmem:[#allocation83_spill] sm:$0xff] %v7482_v26  ;;  %12643 = vst [vmem:[#allocation84_spill] sm:$0xff] %v7484_v27 }
 0x1a3   : > { %v7486_v28 = vpop.f32.mrf.mxu0  ;;  %v7488_v29 = vpop.f32.mrf.mxu1 }
 0x1a4   : > { %12644 = vst [vmem:[#allocation85_spill] sm:$0xff] %v7486_v28  ;;  %12645 = vst [vmem:[#allocation86_spill] sm:$0xff] %v7488_v29 }
 0x1a5   : > { %v7490_v30 = vpop.f32.mrf.mxu0  ;;  %v7492_v51 = vpop.f32.mrf.mxu1 }
 0x1a6   : > { %12646 = vst [vmem:[#allocation87_spill] sm:$0xff] %v7490_v30  ;;  %12647 = vst [vmem:[#allocation88_spill] sm:$0xff] %v7492_v51 }
 0x1a7   : > { %v7494_v18 = vpop.f32.mrf.mxu0  ;;  %v7496_v20 = vpop.f32.mrf.mxu1 }
 0x1a8   : > { %12648 = vst [vmem:[#allocation89_spill] sm:$0xff] %v7494_v18  ;;  %12649 = vst [vmem:[#allocation90_spill] sm:$0xff] %v7496_v20 }
 0x1a9   : > { %v7498_v23 = vpop.f32.mrf.mxu0  ;;  %v7500_v24 = vpop.f32.mrf.mxu1 }
 0x1aa   : > { %12650 = vst [vmem:[#allocation91_spill] sm:$0xff] %v7498_v23  ;;  %12651 = vst [vmem:[#allocation92_spill] sm:$0xff] %v7500_v24 }
 0x1ab   : > { %v7502_v25 = vpop.f32.mrf.mxu0  ;;  %v7504_v26 = vpop.f32.mrf.mxu1 }
 0x1ac   : > { %12652 = vst [vmem:[#allocation93_spill] sm:$0xff] %v7502_v25  ;;  %12653 = vst [vmem:[#allocation94_spill] sm:$0xff] %v7504_v26 }
 0x1ad   : > { %v7506_v27 = vpop.f32.mrf.mxu0  ;;  %v7508_v28 = vpop.f32.mrf.mxu1 }
 0x1ae   : > { %12654 = vst [vmem:[#allocation95_spill] sm:$0xff] %v7506_v27  ;;  %12655 = vst [vmem:[#allocation96_spill] sm:$0xff] %v7508_v28 }
 0x1af   : > { %v7510_v29 = vpop.f32.mrf.mxu0  ;;  %v7512_v30 = vpop.f32.mrf.mxu1 }
 0x1b0   : > { %12656 = vst [vmem:[#allocation97_spill] sm:$0xff] %v7510_v29  ;;  %12657 = vst [vmem:[#allocation98_spill] sm:$0xff] %v7512_v30 }
 0x1b1   : > { %v7514_v51 = vpop.f32.mrf.mxu1  ;;  %v7516_v18 = vpop.f32.mrf.mxu0 }
 0x1b2   : > { %12658 = vst [vmem:[#allocation99_spill] sm:$0xff] %v7514_v51  ;;  %12659 = vst [vmem:[#allocation100_spill] sm:$0xff] %v7516_v18 }
 0x1b3   : > { %v7518_v20 = vpop.f32.mrf.mxu1  ;;  %v7520_v23 = vpop.f32.mrf.mxu0 }
 0x1b4   : > { %12660 = vst [vmem:[#allocation101_spill] sm:$0xff] %v7518_v20  ;;  %12661 = vst [vmem:[#allocation102_spill] sm:$0xff] %v7520_v23 }
 0x1b5   : > { %v7522_v24 = vpop.f32.mrf.mxu1  ;;  %v7524_v25 = vpop.f32.mrf.mxu0 }
 0x1b6   : > { %12662 = vst [vmem:[#allocation103_spill] sm:$0xff] %v7522_v24  ;;  %12663 = vst [vmem:[#allocation104_spill] sm:$0xff] %v7524_v25 }
 0x1b7   : > { %v7526_v26 = vpop.f32.mrf.mxu1  ;;  %v7528_v27 = vpop.f32.mrf.mxu0 }
 0x1b8   : > { %12664 = vst [vmem:[#allocation105_spill] sm:$0xff] %v7526_v26  ;;  %12665 = vst [vmem:[#allocation106_spill] sm:$0xff] %v7528_v27 }
 0x1b9   : > { %v7530_v28 = vpop.f32.mrf.mxu1  ;;  %v7532_v29 = vpop.f32.mrf.mxu0 }
 0x1ba   : > { %12666 = vst [vmem:[#allocation107_spill] sm:$0xff] %v7530_v28  ;;  %12667 = vst [vmem:[#allocation108_spill] sm:$0xff] %v7532_v29 }
 0x1bb   : > { %v7534_v30 = vpop.f32.mrf.mxu1  ;;  %v7536_v51 = vpop.f32.mrf.mxu0 }
 0x1bc   : > { %12668 = vst [vmem:[#allocation109_spill] sm:$0xff] %v7534_v30  ;;  %12669 = vst [vmem:[#allocation110_spill] sm:$0xff] %v7536_v51  ;;  %v2345_v30 = vmul.f32 %v7308_v7, %v7308_v7  ;;  %v2514_v51 = vmul.f32 %v7318_v32, %v7318_v32 }
 0x1bd   : > { %v7538_v18 = vpop.f32.mrf.mxu1  ;;  %v7540_v20 = vpop.f32.mrf.mxu0 }
 0x1be   : > { %12670 = vst [vmem:[#allocation111_spill] sm:$0xff] %v7538_v18  ;;  %12671 = vst [vmem:[#allocation112_spill] sm:$0xff] %v7540_v20  ;;  %v2346_v18 = vmul.f32 %v7316_v31, %v7316_v31  ;;  %v7574_v20 = vadd.f32 %v7316_v31, %v7308_v7  ;;  %v2528_v7 = vmul.f32 %v7338_v41, %v7338_v41 }
 0x1bf   : > { %v7542_v23 = vpop.f32.mrf.mxu1  ;;  %v7544_v24 = vpop.f32.mrf.mxu0 }
 0x1c0   : > { %12672 = vst [vmem:[#allocation113_spill] sm:$0xff] %v7542_v23  ;;  %12673 = vst [vmem:[#allocation114_spill] sm:$0xff] %v7544_v24  ;;  %v7592_v31 = vadd.f32 %v2346_v18, %v2345_v30  ;;  %v7612_v18 = vadd.f32 %v7336_v40, %v7328_v38  ;;  %v7620_v30 = vadd.f32 %v7338_v41, %v7330_v39 }
 0x1c1   : > { %v7546_v25 = vpop.f32.mrf.mxu1  ;;  %v7548_v26 = vpop.f32.mrf.mxu0  ;;  %v2373_v39 = vmul.f32 %v7348_v46, %v7348_v46  ;;  %v2374_v41 = vmul.f32 %v7356_v8, %v7356_v8  ;;  %v2542_v40 = vmul.f32 %v7358_v49, %v7358_v49 }
 0x1c2   : > { %12674 = vst [vmem:[#allocation115_spill] sm:$0xff] %v7546_v25  ;;  %12675 = vst [vmem:[#allocation116_spill] sm:$0xff] %v7548_v26  ;;  %v2352_v25 = vmul.f32 %v7320_v33, %v7320_v33  ;;  %v2513_v26 = vmul.f32 %v7310_v21, %v7310_v21 }
 0x1c3   : > { %v7550_v27 = vpop.f32.mrf.mxu1  ;;  %v7552_v28 = vpop.f32.mrf.mxu0  ;;  %12687 = vst [vmem:[#allocation128_spill] sm:$0xff] %v7620_v30 }
 0x1c4   : > { %12676 = vst [vmem:[#allocation117_spill] sm:$0xff] %v7550_v27  ;;  %12677 = vst [vmem:[#allocation118_spill] sm:$0xff] %v7552_v28  ;;  %v2353_v27 = vmul.f32 %v7324_v36, %v7324_v36  ;;  %v2521_v28 = vmul.f32 %v7326_v37, %v7326_v37 }
 0x1c5   : > { %v7560_v23 = vpop.f32.mrf.mxu1  ;;  %v7562_v24 = vpop.f32.mrf.mxu0 }
 0x1c6   : > { %12678 = vst [vmem:[#allocation119_spill] sm:$0xff] %v7560_v23  ;;  %12679 = vst [vmem:[#allocation120_spill] sm:$0xff] %v7562_v24  ;;  %v7578_v23 = vadd.f32 %v7318_v32, %v7310_v21  ;;  %v7594_v21 = vadd.f32 %v2514_v51, %v2513_v26  ;;  %v7598_v32 = vadd.f32 %v7324_v36, %v7320_v33 }
 0x1c7   : > { %v7580_v24 = vpop.f32.mrf.mxu1  ;;  %v7582_v29 = vpop.f32.mrf.mxu0  ;;  %v7614_v51 = vadd.f32 %v2353_v27, %v2352_v25  ;;  %v7616_v26 = vadd.f32 %v2521_v28, %v2520_v17  ;;  %v2366_v33 = vmul.f32 %v7340_v42, %v7340_v42  ;;  %v7632_v25 = vadd.f32 %v2360_v14, %v2359_v16 }
 0x1c8   : > { %12680 = vst [vmem:[#allocation121_spill] sm:$0xff] %v7578_v23  ;;  %12681 = vst [vmem:[#allocation122_spill] sm:$0xff] %v7580_v24  ;;  %v7634_v17 = vadd.f32 %v2528_v7, %v2527_v19  ;;  %v2534_v27 = vmul.f32 %v7342_v43, %v7342_v43  ;;  %v7640_v28 = vadd.f32 %v7344_v44, %v7340_v42 }
 0x1c9   : > { %12682 = vst [vmem:[#allocation123_spill] sm:$0xff] %v7582_v29  ;;  %12683 = vst [vmem:[#allocation124_spill] sm:$0xff] %v7594_v21  ;;  %v7600_v23 = vpop.f32.mrf.mxu1  ;;  %v7602_v24 = vpop.f32.mrf.mxu0  ;;  %v7606_v29 = vadd.f32 %v7326_v37, %v7322_v34  ;;  %v2367_v34 = vmul.f32 %v7344_v44, %v7344_v44  ;;  %v2535_v37 = vmul.f32 %v7346_v45, %v7346_v45 }
 0x1ca   : > { %12684 = vst [vmem:[#allocation125_spill] sm:$0xff] %v7600_v23  ;;  %12686 = vst [vmem:[#allocation127_spill] sm:$0xff] %v7616_v26  ;;  %v7654_v16 = vadd.f32 %v7346_v45, %v7342_v43  ;;  %v2541_v19 = vmul.f32 %v7350_v47, %v7350_v47  ;;  %v2380_v42 = vmul.f32 %v7360_v50, %v7360_v50 }
 0x1cb   : > { %12685 = vst [vmem:[#allocation126_spill] sm:$0xff] %v7606_v29  ;;  %v7628_v36 = vpop.f32.mrf.mxu1  ;;  %v7630_v38 = vpop.f32.mrf.mxu0  ;;  %12689 = vst [vmem:[#allocation130_spill] sm:$0xff] %v7634_v17  ;;  %v2381_v44 = vmul.f32 %v7364_v53, %v7364_v53  ;;  %v2549_v26 = vmul.f32 %v7366_v54, %v7366_v54  ;;  %v7666_v29 = vadd.f32 %v7356_v8, %v7348_v46 }
 0x1cc   : > { %12688 = vst [vmem:[#allocation129_spill] sm:$0xff] %v7628_v36  ;;  %12692 = vst [vmem:[#allocation133_spill] sm:$0xff] %v7654_v16  ;;  %v7670_v43 = vadd.f32 %v7358_v49, %v7350_v47  ;;  %v7672_v45 = vadd.f32 %v2367_v34, %v2366_v33  ;;  %v7678_v30 = vadd.f32 %v2535_v37, %v2534_v27 }
 0x1cd   : > { %v7648_v14 = vpop.f32.mrf.mxu1  ;;  %v7650_v7 = vpop.f32.mrf.mxu0  ;;  %v2548_v21 = vmul.f32 %v7362_v52, %v7362_v52  ;;  %v2388_v46 = vmul.f32 %v7374_v22, %v7374_v22  ;;  %v2556_v47 = vmul.f32 %v7376_v35, %v7376_v35  ;;  %v7688_v33 = vadd.f32 %v2374_v41, %v2373_v39 }
 0x1ce   : > { %12690 = vst [vmem:[#allocation131_spill] sm:$0xff] %v7648_v14  ;;  %12691 = vst [vmem:[#allocation132_spill] sm:$0xff] %v7650_v7  ;;  %v2387_v14 = vmul.f32 %v7368_v55, %v7368_v55  ;;  %v7690_v34 = vadd.f32 %v2542_v40, %v2541_v19  ;;  %v7694_v37 = vadd.f32 %v7364_v53, %v7360_v50 }
 0x1cf   : > { %12693 = vst [vmem:[#allocation134_spill] sm:$0xff] %v7670_v43  ;;  %v7674_v16 = vpop.f32.mrf.mxu1  ;;  %v7676_v17 = vpop.f32.mrf.mxu0  ;;  %12696 = vst [vmem:[#allocation137_spill] sm:$0xff] %v7678_v30  ;;  %v7702_v8 = vadd.f32 %v7366_v54, %v7362_v52  ;;  %v2555_v43 = vmul.f32 %v7370_v56, %v7370_v56  ;;  %v2347_v39 = vmul.f32 %v7388_v62, %v7388_v62  ;;  %v12720_v30 = vld [vmem:[#allocation53_spill] sm:$0xff] }
 0x1d0   : > { %12694 = vst [vmem:[#allocation135_spill] sm:$0xff] %v7674_v16  ;;  %12695 = vst [vmem:[#allocation136_spill] sm:$0xff] %v7676_v17  ;;  %v7708_v40 = vadd.f32 %v2381_v44, %v2380_v42  ;;  %v7710_v41 = vadd.f32 %v2549_v26, %v2548_v21  ;;  %v7714_v19 = vadd.f32 %v7374_v22, %v7368_v55  ;;  %v12738_v16 = vld [vmem:[#allocation68_spill] sm:$0xff] }
 0x1d1   : > { %12697 = vst [vmem:[#allocation138_spill] sm:$0xff] %v7690_v34  ;;  %v7696_v27 = vpop.f32.mrf.mxu1  ;;  %v7698_v49 = vpop.f32.mrf.mxu0  ;;  %12700 = vst [vmem:[#allocation141_spill] sm:$0xff] %v7702_v8  ;;  %v2394_v50 = vmul.f32 %v7378_v57, %v7378_v57  ;;  %v2395_v52 = vmul.f32 %v7382_v59, %v7382_v59  ;;  %v2563_v54 = vmul.f32 %v7384_v60, %v7384_v60 }
 0x1d2   : > { %12698 = vst [vmem:[#allocation139_spill] sm:$0xff] %v7696_v27  ;;  %12699 = vst [vmem:[#allocation140_spill] sm:$0xff] %v7698_v49  ;;  %v7726_v42 = vadd.f32 %v2388_v46, %v2387_v14  ;;  %v7730_v21 = vadd.f32 %v7376_v35, %v7370_v56  ;;  %v7732_v44 = vadd.f32 %v2556_v47, %v2555_v43  ;;  %v12733_v27 = vld [vmem:[#allocation61_spill] sm:$0xff] }
 0x1d3   : > { %12701 = vst [vmem:[#allocation142_spill] sm:$0xff] %v7710_v41  ;;  %v7722_v53 = vpop.f32.mrf.mxu1  ;;  %v7724_v8 = vpop.f32.mrf.mxu0  ;;  %v2354_v26 = vmul.f32 %v7396_v1, %v7396_v1  ;;  %v2562_v55 = vmul.f32 %v7380_v58, %v7380_v58  ;;  %v2401_v22 = vmul.f32 %v7386_v61, %v7386_v61  ;;  %v2025_v41 = vadd.f32 %v7574_v20, %v7388_v62 }
 0x1d4   : > { %12702 = vst [vmem:[#allocation143_spill] sm:$0xff] %v7722_v53  ;;  %12703 = vst [vmem:[#allocation144_spill] sm:$0xff] %v7724_v8  ;;  %v2402_v46 = vmul.f32 %v7390_v63, %v7390_v63  ;;  %v2570_v43 = vadd.f32 %v7592_v31, %v2347_v39  ;;  %v2348_v47 = vmul.f32 %v7392_v0, %v7392_v0  ;;  %v12732_v53 = vld [vmem:[#allocation59_spill] sm:$0xff] }
 0x1d5   : > { %12704 = vst [vmem:[#allocation145_spill] sm:$0xff] %v7730_v21  ;;  %12705 = vst [vmem:[#allocation146_spill] sm:$0xff] %v7732_v44  ;;  %v7744_v14 = vpop.f32.mrf.mxu1  ;;  %v7746_v56 = vpop.f32.mrf.mxu0  ;;  %v7753_v35 = vadd.f32 %v7382_v59, %v7378_v57  ;;  %v7757_v44 = vadd.f32 %v7384_v60, %v7380_v58  ;;  %v2035_v20 = vadd.f32 %v7598_v32, %v7396_v1 }
 0x1d6   : > { %12706 = vst [vmem:[#allocation147_spill] sm:$0xff] %v7744_v14  ;;  %12707 = vst [vmem:[#allocation148_spill] sm:$0xff] %v7746_v56  ;;  %v2361_v62 = vmul.f32 %v7404_v5, %v7404_v5  ;;  %v7763_v21 = vadd.f32 %v2395_v52, %v2394_v50  ;;  %v7769_v34 = vadd.f32 %v2563_v54, %v2562_v55  ;;  %v12727_v14 = vld [vmem:[#allocation55_spill] sm:$0xff] }
 0x1d7   : > { %12708 = vst [vmem:[#allocation149_spill] sm:$0xff] %v7757_v44  ;;  %v7765_v31 = vpop.f32.mrf.mxu1  ;;  %v7767_v39 = vpop.f32.mrf.mxu0  ;;  %v2408_v57 = vmul.f32 %v7394_v48, %v7394_v48  ;;  %v2579_v58 = vadd.f32 %v7614_v51, %v2354_v26  ;;  %v2409_v60 = vmul.f32 %v7398_v2, %v7398_v2  ;;  %v2355_v32 = vmul.f32 %v7400_v3, %v7400_v3 }
 0x1d8   : > { %12709 = vst [vmem:[#allocation150_spill] sm:$0xff] %v7765_v31  ;;  %12710 = vst [vmem:[#allocation151_spill] sm:$0xff] %v7767_v39  ;;  %v7780_v50 = vadd.f32 %v7390_v63, %v7386_v61  ;;  %v7782_v52 = vadd.f32 %v2402_v46, %v2401_v22  ;;  %v7785_v54 = vadd.f32 %v2025_v41, %v7392_v0  ;;  %v12751_v39 = vld [vmem:[#allocation73_spill] sm:$0xff] }
 0x1d9   : > { %12711 = vst [vmem:[#allocation152_spill] sm:$0xff] %v7769_v34  ;;  %v2368_v55 = vmul.f32 %v7412_v11, %v7412_v11  ;;  %v7789_v1 = vpop.f32.mrf.mxu1  ;;  %v7791_v51 = vpop.f32.mrf.mxu0  ;;  %v7793_v26 = vadd.f32 %v2570_v43, %v2348_v47  ;;  %v2415_v59 = vmul.f32 %v7402_v4, %v7402_v4  ;;  %v2044_v61 = vadd.f32 %v7612_v18, %v7404_v5 }
 0x1da   : > { %12712 = vst [vmem:[#allocation153_spill] sm:$0xff] %v7789_v1  ;;  %12713 = vst [vmem:[#allocation154_spill] sm:$0xff] %v7791_v51  ;;  %v2416_v22 = vmul.f32 %v7406_v6, %v7406_v6  ;;  %v2588_v41 = vadd.f32 %v7632_v25, %v2361_v62  ;;  %v2362_v46 = vmul.f32 %v7408_v9, %v7408_v9 }
 0x1db   : > { %v7806_v0 = vadd.f32 %v7398_v2, %v7394_v48  ;;  %v7809_v43 = vadd.f32 %v2035_v20, %v7400_v3  ;;  %v7811_v47 = vpop.f32.mrf.mxu1  ;;  %v7813_v63 = vpop.f32.mrf.mxu0  ;;  %v2053_v18 = vadd.f32 %v7640_v28, %v7412_v11  ;;  %v2375_v62 = vmul.f32 %v7420_v15, %v7420_v15  ;;  %v12719_v11 = vld [vmem:[#allocation51_spill] sm:$0xff] }
 0x1dc   : > { %12714 = vst [vmem:[#allocation155_spill] sm:$0xff] %v7811_v47  ;;  %12715 = vst [vmem:[#allocation156_spill] sm:$0xff] %v7813_v63  ;;  %v7819_v25 = vadd.f32 %v2409_v60, %v2408_v57  ;;  %v7821_v5 = vadd.f32 %v2579_v58, %v2355_v32  ;;  %v2422_v48 = vmul.f32 %v7410_v10, %v7410_v10 }
 0x1dd   : > { %v2597_v20 = vadd.f32 %v7672_v45, %v2368_v55  ;;  %v2423_v3 = vmul.f32 %v7414_v12, %v7414_v12  ;;  %v2369_v2 = vmul.f32 %v7416_v13, %v7416_v13  ;;  %v7830_v34 = vpop.f32.mrf.mxu1  ;;  %v7832_v28 = vpop.f32.mrf.mxu0  ;;  %v7836_v57 = vadd.f32 %v7406_v6, %v7402_v4  ;;  %v12718_v45 = vld [vmem:[#allocation56_spill] sm:$0xff] }
 0x1de   : > { %12716 = vst [vmem:[#allocation157_spill] sm:$0xff] %v7830_v34  ;;  %12717 = vst [vmem:[#allocation158_spill] sm:$0xff] %v7832_v28  ;;  %v7838_v58 = vadd.f32 %v2416_v22, %v2415_v59  ;;  %v7841_v60 = vadd.f32 %v2044_v61, %v7408_v9  ;;  %v2382_v32 = vmul.f32 %v12718_v45, %v12718_v45  ;;  %v12723_v22 = vld [vmem:[#allocation54_spill] sm:$0xff] }
 0x1df   : > { %v7845_v55 = vadd.f32 %v2588_v41, %v2362_v46  ;;  %v2429_v44 = vmul.f32 %v12719_v11, %v12719_v11  ;;  %v2062_v31 = vadd.f32 %v7666_v29, %v7420_v15  ;;  %v2430_v4 = vmul.f32 %v12720_v30, %v12720_v30  ;;  %v7853_v6 = vpop.f32.mrf.mxu1  ;;  %v7855_v59 = vpop.f32.mrf.mxu0  ;;  %v12724_v15 = vld [vmem:[#allocation60_spill] sm:$0xff] }
 0x1e0   : > { %12721 = vst [vmem:[#allocation159_spill] sm:$0xff] %v7853_v6  ;;  %12722 = vst [vmem:[#allocation160_spill] sm:$0xff] %v7855_v59  ;;  %v2606_v61 = vadd.f32 %v7688_v33, %v2375_v62  ;;  %v2376_v9 = vmul.f32 %v12723_v22, %v12723_v22  ;;  %v7862_v41 = vadd.f32 %v7414_v12, %v7410_v10 }
 0x1e1   : > { %v7865_v46 = vadd.f32 %v2053_v18, %v7416_v13  ;;  %v2071_v29 = vadd.f32 %v7694_v37, %v12718_v45  ;;  %v2389_v6 = vmul.f32 %v12724_v15, %v12724_v15  ;;  %v7871_v34 = vadd.f32 %v2423_v3, %v2422_v48  ;;  %v7873_v47 = vpop.f32.mrf.mxu1  ;;  %v7875_v33 = vpop.f32.mrf.mxu0  ;;  %v12728_v13 = vld [vmem:[#allocation57_spill] sm:$0xff]  ;;  %v12729_v37 = vld [vmem:[#allocation58_spill] sm:$0xff] }
 0x1e2   : > { %12725 = vst [vmem:[#allocation161_spill] sm:$0xff] %v7873_v47  ;;  %12726 = vst [vmem:[#allocation162_spill] sm:$0xff] %v7875_v33  ;;  %v7877_v62 = vadd.f32 %v2597_v20, %v2369_v2  ;;  %v2436_v10 = vmul.f32 %v12727_v14, %v12727_v14  ;;  %v2615_v18 = vadd.f32 %v7708_v40, %v2382_v32 }
 0x1e3   : > { %v2437_v12 = vmul.f32 %v12728_v13, %v12728_v13  ;;  %v2383_v45 = vmul.f32 %v12729_v37, %v12729_v37  ;;  %v7888_v48 = vadd.f32 %v12720_v30, %v12719_v11  ;;  %v7890_v3 = vadd.f32 %v2430_v4, %v2429_v44  ;;  %v7897_v47 = vpop.f32.mrf.mxu1  ;;  %v7899_v40 = vpop.f32.mrf.mxu0  ;;  %v12734_v4 = vld [vmem:[#allocation64_spill] sm:$0xff]  ;;  %v12735_v30 = vld [vmem:[#allocation62_spill] sm:$0xff] }
 0x1e4   : > { %v7893_v2 = vadd.f32 %v2062_v31, %v12723_v22  ;;  %v2080_v20 = vadd.f32 %v7714_v19, %v12724_v15  ;;  %12730 = vst [vmem:[#allocation163_spill] sm:$0xff] %v7897_v47  ;;  %12731 = vst [vmem:[#allocation164_spill] sm:$0xff] %v7899_v40  ;;  %v7901_v32 = vadd.f32 %v2606_v61, %v2376_v9  ;;  %v12749_v40 = vld [vmem:[#allocation70_spill] sm:$0xff] }
 0x1e5   : > { %v2443_v1 = vmul.f32 %v12732_v53, %v12732_v53  ;;  %v2444_v11 = vmul.f32 %v12733_v27, %v12733_v27  ;;  %v2396_v44 = vmul.f32 %v12734_v4, %v12734_v4  ;;  %v2624_v31 = vadd.f32 %v7726_v42, %v2389_v6  ;;  %v7919_v61 = vpop.f32.mrf.mxu1  ;;  %v7921_v15 = vpop.f32.mrf.mxu0 }
 0x1e6   : > { %v2390_v19 = vmul.f32 %v12735_v30, %v12735_v30  ;;  %v7914_v22 = vadd.f32 %v12728_v13, %v12727_v14  ;;  %v7917_v9 = vadd.f32 %v2071_v29, %v12729_v37  ;;  %12736 = vst [vmem:[#allocation165_spill] sm:$0xff] %v7919_v61  ;;  %12737 = vst [vmem:[#allocation166_spill] sm:$0xff] %v7921_v15  ;;  %v12739_v13 = vld [vmem:[#allocation63_spill] sm:$0xff]  ;;  %v12740_v61 = vld [vmem:[#allocation65_spill] sm:$0xff] }
 0x1e7   : > { %v2089_v47 = vadd.f32 %v7753_v35, %v12734_v4  ;;  %v2403_v6 = vmul.f32 %v12738_v16, %v12738_v16  ;;  %v7927_v42 = vadd.f32 %v2437_v12, %v2436_v10  ;;  %v7929_v36 = vadd.f32 %v2615_v18, %v2383_v45  ;;  %v7942_v4 = vpop.f32.mrf.mxu1  ;;  %v7944_v23 = vpop.f32.mrf.mxu0  ;;  %v12743_v45 = vld [vmem:[#allocation66_spill] sm:$0xff] }
 0x1e8   : > { %v7933_v14 = vadd.f32 %v12733_v27, %v12732_v53  ;;  %v7936_v29 = vadd.f32 %v2080_v20, %v12735_v30  ;;  %v2450_v37 = vmul.f32 %v12739_v13, %v12739_v13  ;;  %v2451_v35 = vmul.f32 %v12740_v61, %v12740_v61  ;;  %12741 = vst [vmem:[#allocation167_spill] sm:$0xff] %v7942_v4  ;;  %v12744_v53 = vld [vmem:[#allocation72_spill] sm:$0xff]  ;;  %v12745_v30 = vld [vmem:[#allocation67_spill] sm:$0xff] }
 0x1e9   : > { %12742 = vst [vmem:[#allocation168_spill] sm:$0xff] %v7944_v23  ;;  %v7946_v10 = vadd.f32 %v2444_v11, %v2443_v1  ;;  %v2633_v12 = vadd.f32 %v7763_v21, %v2396_v44  ;;  %v2397_v18 = vmul.f32 %v12743_v45, %v12743_v45  ;;  %v2410_v20 = vmul.f32 %v12744_v53, %v12744_v53  ;;  %v12746_v23 = vld [vmem:[#allocation69_spill] sm:$0xff]  ;;  %v7961_v11 = vpop.f32.mrf.mxu1  ;;  %v7963_v21 = vpop.f32.mrf.mxu0 }
 0x1ea   : > { %v7953_v27 = vadd.f32 %v2624_v31, %v2390_v19  ;;  %v2457_v15 = vmul.f32 %v12745_v30, %v12745_v30  ;;  %v2098_v4 = vadd.f32 %v7780_v50, %v12738_v16  ;;  %v2458_v1 = vmul.f32 %v12746_v23, %v12746_v23  ;;  %12747 = vst [vmem:[#allocation169_spill] sm:$0xff] %v7961_v11  ;;  %v12750_v50 = vld [vmem:[#allocation71_spill] sm:$0xff] }
 0x1eb   : > { %12748 = vst [vmem:[#allocation170_spill] sm:$0xff] %v7963_v21  ;;  %v2642_v44 = vadd.f32 %v7782_v52, %v2403_v6  ;;  %v2404_v33 = vmul.f32 %v12749_v40, %v12749_v40  ;;  %v7970_v31 = vadd.f32 %v12740_v61, %v12739_v13  ;;  %v7973_v19 = vadd.f32 %v2089_v47, %v12743_v45  ;;  %v7983_v6 = vpop.f32.mrf.mxu1  ;;  %v7985_v8 = vpop.f32.mrf.mxu0  ;;  %v12754_v61 = vld [vmem:[#allocation74_spill] sm:$0xff]  ;;  %v12755_v45 = vld [vmem:[#allocation76_spill] sm:$0xff] }
 0x1ec   : > { %v2464_v16 = vmul.f32 %v12750_v50, %v12750_v50  ;;  %v2107_v11 = vadd.f32 %v7806_v0, %v12744_v53  ;;  %v2465_v21 = vmul.f32 %v12751_v39, %v12751_v39  ;;  %v7981_v52 = vadd.f32 %v2451_v35, %v2450_v37  ;;  %12752 = vst [vmem:[#allocation171_spill] sm:$0xff] %v7983_v6 }
 0x1ed   : > { %12753 = vst [vmem:[#allocation172_spill] sm:$0xff] %v7985_v8  ;;  %v2651_v13 = vadd.f32 %v7819_v25, %v2410_v20  ;;  %v2411_v47 = vmul.f32 %v12754_v61, %v12754_v61  ;;  %v2417_v56 = vmul.f32 %v12755_v45, %v12755_v45  ;;  %v7992_v49 = vadd.f32 %v2633_v12, %v2397_v18  ;;  %v8005_v20 = vpop.f32.mrf.mxu1  ;;  %v8007_v53 = vpop.f32.mrf.mxu0  ;;  %v12760_v18 = vld [vmem:[#allocation108_spill] sm:$0xff] }
 0x1ee   : > { %v7996_v0 = vadd.f32 %v12746_v23, %v12745_v30  ;;  %v7998_v37 = vadd.f32 %v2458_v1, %v2457_v15  ;;  %v8001_v35 = vadd.f32 %v2098_v4, %v12749_v40  ;;  %v2116_v25 = vadd.f32 %v7836_v57, %v12755_v45  ;;  %12757 = vst [vmem:[#allocation174_spill] sm:$0xff] %v8005_v20  ;;  %v12761_v1 = vld [vmem:[#allocation75_spill] sm:$0xff]  ;;  %v12762_v57 = vld [vmem:[#allocation77_spill] sm:$0xff]  ;;  %v12767_v45 = vld [vmem:[#allocation80_spill] sm:$0xff] }
 0x1ef   : > { %12758 = vst [vmem:[#allocation175_spill] sm:$0xff] %v8007_v53  ;;  %v8009_v6 = vadd.f32 %v2642_v44, %v2404_v33  ;;  %v8013_v12 = vadd.f32 %v12751_v39, %v12750_v50  ;;  %v2046_v15 = vadd.f32 %v7841_v60, %v12760_v18  ;;  %v2363_v4 = vmul.f32 %v12760_v18, %v12760_v18  ;;  %v8028_v44 = vpop.f32.mrf.mxu1  ;;  %v8030_v39 = vpop.f32.mrf.mxu0  ;;  %v12766_v50 = vld [vmem:[#allocation78_spill] sm:$0xff] }
 0x1f0   : > { %12756 = vst [vmem:[#allocation173_spill] sm:$0xff] %v7998_v37  ;;  %v2471_v23 = vmul.f32 %v12761_v1, %v12761_v1  ;;  %v2472_v30 = vmul.f32 %v12762_v57, %v12762_v57  ;;  %v8023_v40 = vadd.f32 %v2465_v21, %v2464_v16  ;;  %v8026_v33 = vadd.f32 %v2107_v11, %v12754_v61  ;;  %v12769_v21 = vld [vmem:[#allocation112_spill] sm:$0xff] }
 0x1f1   : > { %12759 = vst [vmem:[#allocation176_spill] sm:$0xff] %v8013_v12  ;;  %12764 = vst [vmem:[#allocation178_spill] sm:$0xff] %v8028_v44  ;;  %v2660_v60 = vadd.f32 %v7838_v58, %v2417_v56  ;;  %v2418_v18 = vmul.f32 %v12766_v50, %v12766_v50  ;;  %v2424_v20 = vmul.f32 %v12767_v45, %v12767_v45  ;;  %v8050_v58 = vpop.f32.mrf.mxu0  ;;  %v8052_v44 = vpop.f32.mrf.mxu1 }
 0x1f2   : > { %12763 = vst [vmem:[#allocation177_spill] sm:$0xff] %v8023_v40  ;;  %12765 = vst [vmem:[#allocation179_spill] sm:$0xff] %v8030_v39  ;;  %v8037_v53 = vadd.f32 %v2651_v13, %v2411_v47  ;;  %v8041_v16 = vadd.f32 %v12762_v57, %v12761_v1  ;;  %v8044_v11 = vadd.f32 %v2116_v25, %v12766_v50  ;;  %v12772_v39 = vld [vmem:[#allocation110_spill] sm:$0xff]  ;;  %v2048_v40 = vsel %vm2029_vm2, %v8052_v44, 0.0 }
 0x1f3   : > { %v2055_v61 = vadd.f32 %v7865_v46, %v12769_v21  ;;  %v2370_v56 = vmul.f32 %v12769_v21, %v12769_v21  ;;  %12770 = vst [vmem:[#allocation181_spill] sm:$0xff] %v8050_v58  ;;  %12771 = vst [vmem:[#allocation182_spill] sm:$0xff] %v8052_v44  ;;  %v2364_v13 = vmul.f32 %v12772_v39, %v12772_v39  ;;  %v12774_v46 = vld [vmem:[#allocation79_spill] sm:$0xff]  ;;  %v8066_v58 = vpop.f32.mrf.mxu0 }
 0x1f4   : > { %12768 = vst [vmem:[#allocation180_spill] sm:$0xff] %v8041_v16  ;;  %v2365_v47 = vmul.f32 %v8052_v44, %v8052_v44  ;;  %v2047_v1 = vadd.f32 %v2046_v15, %v12772_v39  ;;  %v2590_v25 = vadd.f32 %v7845_v55, %v2363_v4  ;;  %v8060_v57 = vadd.f32 %v2472_v30, %v2471_v23  ;;  %v8068_v16 = vpop.f32.mrf.mxu1  ;;  %v12777_v55 = vld [vmem:[#allocation100_spill] sm:$0xff] }
 0x1f5   : > { %v2478_v50 = vmul.f32 %v12774_v46, %v12774_v46  ;;  %v2125_v21 = vadd.f32 %v7862_v41, %v12767_v45  ;;  %12775 = vst [vmem:[#allocation184_spill] sm:$0xff] %v8066_v58  ;;  %12776 = vst [vmem:[#allocation185_spill] sm:$0xff] %v8068_v16  ;;  %v8072_v8 = vadd.f32 %v2660_v60, %v2418_v18  ;;  %v8079_v39 = vpop.f32.mrf.mxu0  ;;  %v12780_v45 = vld [vmem:[#allocation114_spill] sm:$0xff] }
 0x1f6   : > { %12773 = vst [vmem:[#allocation183_spill] sm:$0xff] %v8060_v57  ;;  %v2669_v15 = vadd.f32 %v7871_v34, %v2424_v20  ;;  %v2027_v23 = vadd.f32 %v7785_v54, %v12777_v55  ;;  %v2049_v30 = vadd.f32 %v2048_v40, %v2047_v1  ;;  %v8077_v4 = vpop.f32.mrf.mxu1  ;;  %12779 = vst [vmem:[#allocation187_spill] sm:$0xff] %v8079_v39  ;;  %v2592_v41 = vsel %vm2029_vm2, %v2365_v47, 0.0  ;;  %v12781_v1 = vld [vmem:[#allocation81_spill] sm:$0xff] }
 0x1f7   : > { %12778 = vst [vmem:[#allocation186_spill] sm:$0xff] %v8077_v4  ;;  %v2056_v58 = vadd.f32 %v2055_v61, %v12780_v45  ;;  %v2371_v57 = vmul.f32 %v12780_v45, %v12780_v45  ;;  %v2599_v18 = vadd.f32 %v7877_v62, %v2370_v56  ;;  %v2349_v34 = vmul.f32 %v12777_v55, %v12777_v55  ;;  %v12782_v61 = vld [vmem:[#allocation82_spill] sm:$0xff]  ;;  %v8100_v56 = vpop.f32.mrf.mxu0 }
 0x1f8   : > { %v2372_v54 = vmul.f32 %v8077_v4, %v8077_v4  ;;  %2050 = vadd.xlane.f32.xlu0 %v2049_v30  ;;  %v2591_v40 = vadd.f32 %v2590_v25, %v2364_v13  ;;  %v2057_v20 = vsel %vm2029_vm2, %v8077_v4, 0.0  ;;  %v2479_v60 = vmul.f32 %v12781_v1, %v12781_v1  ;;  %12784 = vst [vmem:[#allocation189_spill] sm:$0xff] %v8100_v56  ;;  %v8102_v44 = vpop.f32.mrf.mxu1  ;;  %v12786_v30 = vld [vmem:[#allocation104_spill] sm:$0xff] }
 0x1f9   : > { %v2425_v47 = vmul.f32 %v12782_v61, %v12782_v61  ;;  %v8098_v62 = vadd.f32 %v12781_v1, %v12774_v46  ;;  %12785 = vst [vmem:[#allocation190_spill] sm:$0xff] %v8102_v44  ;;  %v2058_v55 = vadd.f32 %v2057_v20, %v2056_v58  ;;  %v2356_v13 = vmul.f32 %v12786_v30, %v12786_v30  ;;  %v8116_v56 = vpop.f32.mrf.mxu0 }
 0x1fa   : > { %v8107_v25 = vadd.f32 %v2125_v21, %v12782_v61  ;;  %v2593_v4 = vadd.f32 %v2592_v41, %v2591_v40  ;;  %v2601_v45 = vsel %vm2029_vm2, %v2372_v54, 0.0  ;;  %v2037_v39 = vadd.f32 %v7809_v43, %v12786_v30  ;;  %v8114_v1 = vpop.f32.mrf.mxu1  ;;  %12788 = vst [vmem:[#allocation192_spill] sm:$0xff] %v8116_v56  ;;  %v12789_v21 = vld [vmem:[#allocation84_spill] sm:$0xff]  ;;  %v12790_v40 = vld [vmem:[#allocation102_spill] sm:$0xff]  ;;  %v12791_v61 = vld [vmem:[#allocation83_spill] sm:$0xff] }
 0x1fb   : > { %12783 = vst [vmem:[#allocation188_spill] sm:$0xff] %v8098_v62  ;;  %v2351_v46 = vmul.f32 %v8068_v16, %v8068_v16  ;;  %12787 = vst [vmem:[#allocation191_spill] sm:$0xff] %v8114_v1  ;;  %2059 = vadd.xlane.f32.xlu1 %v2058_v55  ;;  %v2030_v58 = vsel %vm2029_vm2, %v8068_v16, 0.0  ;;  %v2600_v20 = vadd.f32 %v2599_v18, %v2371_v57  ;;  %v12793_v18 = vld [vmem:[#allocation106_spill] sm:$0xff] }
 0x1fc   : > { %v2431_v41 = vmul.f32 %v12789_v21, %v12789_v21  ;;  %v2350_v54 = vmul.f32 %v12790_v40, %v12790_v40  ;;  %2594 = vadd.xlane.f32.xlu0 %v2593_v4  ;;  %v2028_v43 = vadd.f32 %v2027_v23, %v12790_v40  ;;  %v2572_v30 = vadd.f32 %v7793_v26, %v2349_v34  ;;  %v8130_v62 = vpop.f32.mrf.mxu1  ;;  %v8136_v4 = vpop.f32.mrf.mxu0 }
 0x1fd   : > { %v2485_v55 = vmul.f32 %v12791_v61, %v12791_v61  ;;  %v2134_v56 = vadd.f32 %v7888_v48, %v12789_v21  ;;  %12792 = vst [vmem:[#allocation193_spill] sm:$0xff] %v8130_v62  ;;  %v2602_v57 = vadd.f32 %v2601_v45, %v2600_v20  ;;  %v2357_v16 = vmul.f32 %v12793_v18, %v12793_v18 }
 0x1fe   : > { %v2358_v12 = vmul.f32 %v8102_v44, %v8102_v44  ;;  %12794 = vst [vmem:[#allocation194_spill] sm:$0xff] %v8136_v4  ;;  %v2031_v23 = vadd.f32 %v2030_v58, %v2028_v43  ;;  %v2039_v26 = vsel %vm2029_vm2, %v8102_v44, 0.0  ;;  %v2581_v34 = vadd.f32 %v7821_v5, %v2356_v13  ;;  %v8143_v48 = vpop.f32.mrf.mxu1 }
 0x1ff   : > { %v8141_v40 = vadd.f32 %v2479_v60, %v2478_v50  ;;  %12795 = vst [vmem:[#allocation195_spill] sm:$0xff] %v8143_v48  ;;  %2603 = vadd.xlane.f32.xlu1 %v2602_v57  ;;  %v2574_v45 = vsel %vm2029_vm2, %v2351_v46, 0.0  ;;  %v2038_v20 = vadd.f32 %v2037_v39, %v12793_v18  ;;  %v8147_v21 = vadd.f32 %v2669_v15, %v2425_v47  ;;  %v12796_v50 = vld [vmem:[#allocation85_spill] sm:$0xff]  ;;  %v12797_v39 = vld [vmem:[#allocation86_spill] sm:$0xff] }
 0x200   : > { %v2678_v37 = vadd.f32 %v7890_v3, %v2431_v41  ;;  %v2082_v58 = vadd.f32 %v7936_v29, %v7602_v24  ;;  %v2391_v43 = vmul.f32 %v7602_v24, %v7602_v24  ;;  %2032 = vadd.xlane.f32.xlu0 %v2031_v23  ;;  %v2573_v5 = vadd.f32 %v2572_v30, %v2350_v54  ;;  %v8165_v29 = vpop.f32.mrf.mxu0  ;;  %v8174_v23 = vpop.f32.mrf.mxu1 }
 0x201   : > { %v8156_v60 = vadd.f32 %v12796_v50, %v12791_v61  ;;  %v2486_v46 = vmul.f32 %v12796_v50, %v12796_v50  ;;  %v8161_v15 = vadd.f32 %v2134_v56, %v12797_v39  ;;  %v2040_v47 = vadd.f32 %v2039_v26, %v2038_v20  ;;  %12798 = vst [vmem:[#allocation196_spill] sm:$0xff] %v8165_v29  ;;  %v12800_v20 = vld [vmem:[#allocation88_spill] sm:$0xff] }
 0x202   : > { %v2432_v3 = vmul.f32 %v12797_v39, %v12797_v39  ;;  %v2575_v13 = vadd.f32 %v2574_v45, %v2573_v5  ;;  %v2582_v41 = vadd.f32 %v2581_v34, %v2357_v16  ;;  %v2583_v30 = vsel %vm2029_vm2, %v2358_v12, 0.0  ;;  %12799 = vst [vmem:[#allocation197_spill] sm:$0xff] %v8174_v23  ;;  %v12801_v5 = vld [vmem:[#allocation87_spill] sm:$0xff]  ;;  %v8194_v39 = vpop.f32.mrf.mxu0 }
 0x203   : > { %v2091_v54 = vadd.f32 %v7973_v19, %v7650_v7  ;;  %v2398_v57 = vmul.f32 %v7650_v7, %v7650_v7  ;;  %v2393_v56 = vmul.f32 %v8114_v1, %v8114_v1  ;;  %2041 = vadd.xlane.f32.xlu1 %v2040_v47  ;;  %v2084_v26 = vsel %vm2029_vm2, %v8114_v1, 0.0  ;;  %12802 = vst [vmem:[#allocation198_spill] sm:$0xff] %v8194_v39 }
 0x204   : > { %v2438_v16 = vmul.f32 %v12800_v20, %v12800_v20  ;;  %v2392_v12 = vmul.f32 %v7630_v38, %v7630_v38  ;;  %2576 = vadd.xlane.f32.xlu0 %v2575_v13  ;;  %v2083_v19 = vadd.f32 %v2082_v58, %v7630_v38  ;;  %v2626_v34 = vadd.f32 %v7953_v27, %v2391_v43 }
 0x205   : > { %v8184_v45 = vadd.f32 %v2486_v46, %v2485_v55  ;;  %v2492_v61 = vmul.f32 %v12801_v5, %v12801_v5  ;;  %v2143_v47 = vadd.f32 %v7914_v22, %v12800_v20  ;;  %v2584_v50 = vadd.f32 %v2583_v30, %v2582_v41  ;;  %v8198_v55 = vpop.f32.mrf.mxu1 }
 0x206   : > { %v8190_v44 = vadd.f32 %v2678_v37, %v2432_v3  ;;  %v2400_v18 = vmul.f32 %v8143_v48, %v8143_v48  ;;  %v2085_v13 = vadd.f32 %v2084_v26, %v2083_v19  ;;  %v2093_v27 = vsel %vm2029_vm2, %v8143_v48, 0.0  ;;  %12803 = vst [vmem:[#allocation199_spill] sm:$0xff] %v8198_v55  ;;  %v12804_v3 = vld [vmem:[#allocation116_spill] sm:$0xff]  ;;  %v12806_v19 = vld [vmem:[#allocation90_spill] sm:$0xff] }
 0x207   : > { %2585 = vadd.xlane.f32.xlu1 %v2584_v50  ;;  %v2628_v58 = vsel %vm2029_vm2, %v2393_v56, 0.0  ;;  %v2092_v43 = vadd.f32 %v2091_v54, %v7676_v17  ;;  %v2399_v22 = vmul.f32 %v7676_v17, %v7676_v17  ;;  %v2635_v37 = vadd.f32 %v7992_v49, %v2398_v57  ;;  %v12805_v50 = vld [vmem:[#allocation89_spill] sm:$0xff]  ;;  %v12813_v17 = vld [vmem:[#allocation123_spill] sm:$0xff] }
 0x208   : > { %v2687_v46 = vadd.f32 %v7927_v42, %v2438_v16  ;;  %v2064_v41 = vadd.f32 %v7893_v2, %v12804_v3  ;;  %v2377_v30 = vmul.f32 %v12804_v3, %v12804_v3  ;;  %2086 = vadd.xlane.f32.xlu0 %v2085_v13  ;;  %v2627_v26 = vadd.f32 %v2626_v34, %v2392_v12  ;;  %v12807_v42 = vld [vmem:[#allocation120_spill] sm:$0xff]  ;;  %v8223_v16 = vpop.f32.mrf.mxu0 }
 0x209   : > { %v2493_v56 = vmul.f32 %v12805_v50, %v12805_v50  ;;  %v2439_v54 = vmul.f32 %v12806_v19, %v12806_v19  ;;  %v8216_v20 = vadd.f32 %v12805_v50, %v12801_v5  ;;  %v2094_v49 = vadd.f32 %v2093_v27, %v2092_v43  ;;  %12808 = vst [vmem:[#allocation200_spill] sm:$0xff] %v8223_v16  ;;  %v8230_v5 = vpop.f32.mrf.mxu1 }
 0x20a   : > { %v2384_v57 = vmul.f32 %v12807_v42, %v12807_v42  ;;  %v8221_v2 = vadd.f32 %v2143_v47, %v12806_v19  ;;  %v2629_v12 = vadd.f32 %v2628_v58, %v2627_v26  ;;  %v2637_v34 = vsel %vm2029_vm2, %v2400_v18, 0.0  ;;  %12809 = vst [vmem:[#allocation201_spill] sm:$0xff] %v8230_v5  ;;  %v12810_v47 = vld [vmem:[#allocation92_spill] sm:$0xff]  ;;  %v12811_v19 = vld [vmem:[#allocation118_spill] sm:$0xff]  ;;  %v12812_v26 = vld [vmem:[#allocation91_spill] sm:$0xff] }
 0x20b   : > { %v2073_v13 = vadd.f32 %v7917_v9, %v12807_v42  ;;  %v2379_v48 = vmul.f32 %v8130_v62, %v8130_v62  ;;  %2095 = vadd.xlane.f32.xlu1 %v2094_v49  ;;  %v2066_v27 = vsel %vm2029_vm2, %v8130_v62, 0.0  ;;  %v2636_v43 = vadd.f32 %v2635_v37, %v2399_v22  ;;  %v8248_v62 = vpop.f32.mrf.mxu0  ;;  %v8255_v3 = vpop.f32.mrf.mxu1 }
 0x20c   : > { %v2445_v50 = vmul.f32 %v12810_v47, %v12810_v47  ;;  %v2378_v58 = vmul.f32 %v12811_v19, %v12811_v19  ;;  %2630 = vadd.xlane.f32.xlu0 %v2629_v12  ;;  %v2065_v18 = vadd.f32 %v2064_v41, %v12811_v19  ;;  %v2608_v9 = vadd.f32 %v7901_v32, %v2377_v30  ;;  %v12855_v19 = vld [vmem:[#allocation166_spill] sm:$0xff] }
 0x20d   : > { %v2499_v42 = vmul.f32 %v12812_v26, %v12812_v26  ;;  %v2152_v49 = vadd.f32 %v7933_v14, %v12810_v47  ;;  %v2638_v7 = vadd.f32 %v2637_v34, %v2636_v43  ;;  %v2385_v22 = vmul.f32 %v12813_v17, %v12813_v17  ;;  %12814 = vst [vmem:[#allocation202_spill] sm:$0xff] %v8248_v62 }
 0x20e   : > { %v2386_v37 = vmul.f32 %v8174_v23, %v8174_v23  ;;  %v2067_v12 = vadd.f32 %v2066_v27, %v2065_v18  ;;  %v2075_v41 = vsel %vm2029_vm2, %v8174_v23, 0.0  ;;  %v2617_v32 = vadd.f32 %v7929_v36, %v2384_v57  ;;  %12815 = vst [vmem:[#allocation203_spill] sm:$0xff] %v8255_v3 }
 0x20f   : > { %v8253_v30 = vadd.f32 %v2493_v56, %v2492_v61  ;;  %2639 = vadd.xlane.f32.xlu1 %v2638_v7  ;;  %v2610_v14 = vsel %vm2029_vm2, %v2379_v48, 0.0  ;;  %v2074_v34 = vadd.f32 %v2073_v13, %v12813_v17  ;;  %v8259_v43 = vadd.f32 %v2687_v46, %v2439_v54  ;;  %v12816_v61 = vld [vmem:[#allocation93_spill] sm:$0xff]  ;;  %v12817_v48 = vld [vmem:[#allocation94_spill] sm:$0xff] }
 0x210   : > { %v2696_v47 = vadd.f32 %v7946_v10, %v2445_v50  ;;  %v2118_v27 = vadd.f32 %v8044_v11, %v7791_v51  ;;  %v2419_v18 = vmul.f32 %v7791_v51, %v7791_v51  ;;  %2068 = vadd.xlane.f32.xlu0 %v2067_v12  ;;  %v2609_v36 = vadd.f32 %v2608_v9, %v2378_v58  ;;  %v8277_v11 = vpop.f32.mrf.mxu0  ;;  %v8286_v12 = vpop.f32.mrf.mxu1 }
 0x211   : > { %v8268_v56 = vadd.f32 %v12816_v61, %v12812_v26  ;;  %v2500_v7 = vmul.f32 %v12816_v61, %v12816_v61  ;;  %v8273_v46 = vadd.f32 %v2152_v49, %v12817_v48  ;;  %v2076_v54 = vadd.f32 %v2075_v41, %v2074_v34  ;;  %12818 = vst [vmem:[#allocation204_spill] sm:$0xff] %v8277_v11  ;;  %v12820_v34 = vld [vmem:[#allocation96_spill] sm:$0xff] }
 0x212   : > { %v2446_v10 = vmul.f32 %v12817_v48, %v12817_v48  ;;  %v2611_v50 = vadd.f32 %v2610_v14, %v2609_v36  ;;  %v2618_v57 = vadd.f32 %v2617_v32, %v2385_v22  ;;  %v2619_v13 = vsel %vm2029_vm2, %v2386_v37, 0.0  ;;  %12819 = vst [vmem:[#allocation205_spill] sm:$0xff] %v8286_v12  ;;  %v12821_v36 = vld [vmem:[#allocation95_spill] sm:$0xff]  ;;  %v8306_v23 = vpop.f32.mrf.mxu0 }
 0x213   : > { %v2127_v58 = vadd.f32 %v8107_v25, %v7832_v28  ;;  %v2426_v9 = vmul.f32 %v7832_v28, %v7832_v28  ;;  %v2421_v49 = vmul.f32 %v8198_v55, %v8198_v55  ;;  %2077 = vadd.xlane.f32.xlu1 %v2076_v54  ;;  %v2120_v41 = vsel %vm2029_vm2, %v8198_v55, 0.0  ;;  %12822 = vst [vmem:[#allocation206_spill] sm:$0xff] %v8306_v23 }
 0x214   : > { %v2452_v22 = vmul.f32 %v12820_v34, %v12820_v34  ;;  %v2420_v37 = vmul.f32 %v7813_v63, %v7813_v63  ;;  %2612 = vadd.xlane.f32.xlu0 %v2611_v50  ;;  %v2119_v25 = vadd.f32 %v2118_v27, %v7813_v63  ;;  %v2662_v32 = vadd.f32 %v8072_v8, %v2419_v18  ;;  %v8312_v27 = vpop.f32.mrf.mxu1  ;;  %v12853_v63 = vld [vmem:[#allocation109_spill] sm:$0xff] }
 0x215   : > { %v8296_v14 = vadd.f32 %v2500_v7, %v2499_v42  ;;  %v2506_v26 = vmul.f32 %v12821_v36, %v12821_v36  ;;  %v2161_v54 = vadd.f32 %v7970_v31, %v12820_v34  ;;  %v2620_v61 = vadd.f32 %v2619_v13, %v2618_v57  ;;  %12823 = vst [vmem:[#allocation207_spill] sm:$0xff] %v8312_v27 }
 0x216   : > { %v8302_v28 = vadd.f32 %v2696_v47, %v2446_v10  ;;  %v2428_v48 = vmul.f32 %v8255_v3, %v8255_v3  ;;  %v2121_v50 = vadd.f32 %v2120_v41, %v2119_v25  ;;  %v2129_v8 = vsel %vm2029_vm2, %v8255_v3, 0.0  ;;  %v12824_v10 = vld [vmem:[#allocation140_spill] sm:$0xff]  ;;  %v12825_v25 = vld [vmem:[#allocation97_spill] sm:$0xff]  ;;  %v8334_v3 = vpop.f32.mrf.mxu0 }
 0x217   : > { %v2427_v42 = vmul.f32 %v7855_v59, %v7855_v59  ;;  %2621 = vadd.xlane.f32.xlu1 %v2620_v61  ;;  %v2664_v31 = vsel %vm2029_vm2, %v2421_v49, 0.0  ;;  %v2128_v47 = vadd.f32 %v2127_v58, %v7855_v59  ;;  %v2671_v18 = vadd.f32 %v8147_v21, %v2426_v9  ;;  %v12826_v61 = vld [vmem:[#allocation98_spill] sm:$0xff]  ;;  %12829 = vst [vmem:[#allocation208_spill] sm:$0xff] %v8334_v3 }
 0x218   : > { %v2705_v7 = vadd.f32 %v7981_v52, %v2452_v22  ;;  %v2100_v57 = vadd.f32 %v8001_v35, %v12824_v10  ;;  %v2405_v13 = vmul.f32 %v12824_v10, %v12824_v10  ;;  %2122 = vadd.xlane.f32.xlu0 %v2121_v50  ;;  %v2663_v41 = vadd.f32 %v2662_v32, %v2420_v37  ;;  %v12827_v52 = vld [vmem:[#allocation99_spill] sm:$0xff]  ;;  %v12828_v35 = vld [vmem:[#allocation148_spill] sm:$0xff] }
 0x219   : > { %v2507_v34 = vmul.f32 %v12825_v25, %v12825_v25  ;;  %v2453_v49 = vmul.f32 %v12826_v61, %v12826_v61  ;;  %v8328_v58 = vadd.f32 %v12825_v25, %v12821_v36  ;;  %v2130_v21 = vadd.f32 %v2129_v8, %v2128_v47  ;;  %v8341_v36 = vpop.f32.mrf.mxu1  ;;  %v12830_v25 = vld [vmem:[#allocation144_spill] sm:$0xff] }
 0x21a   : > { %v2459_v9 = vmul.f32 %v12827_v52, %v12827_v52  ;;  %v2412_v22 = vmul.f32 %v12828_v35, %v12828_v35  ;;  %v2665_v37 = vadd.f32 %v2664_v31, %v2663_v41  ;;  %v2673_v32 = vsel %vm2029_vm2, %v2428_v48, 0.0 }
 0x21b   : > { %v2109_v50 = vadd.f32 %v8026_v33, %v12828_v35  ;;  %v2407_v59 = vmul.f32 %v8230_v5, %v8230_v5  ;;  %2131 = vadd.xlane.f32.xlu1 %v2130_v21  ;;  %v2102_v8 = vsel %vm2029_vm2, %v8230_v5, 0.0  ;;  %v2672_v47 = vadd.f32 %v2671_v18, %v2427_v42  ;;  %v12831_v21 = vld [vmem:[#allocation151_spill] sm:$0xff]  ;;  %v8358_v18 = vpop.f32.mrf.mxu0 }
 0x21c   : > { %v2406_v10 = vmul.f32 %v12830_v25, %v12830_v25  ;;  %v2162_v31 = vadd.f32 %v2161_v54, %v12826_v61  ;;  %2666 = vadd.xlane.f32.xlu0 %v2665_v37  ;;  %v2101_v48 = vadd.f32 %v2100_v57, %v12830_v25  ;;  %v2644_v33 = vadd.f32 %v8009_v6, %v2405_v13  ;;  %v12833_v13 = vld [vmem:[#allocation173_spill] sm:$0xff] }
 0x21d   : > { %v2170_v41 = vadd.f32 %v7996_v0, %v12827_v52  ;;  %v8352_v35 = vadd.f32 %v2507_v34, %v2506_v26  ;;  %v2413_v17 = vmul.f32 %v12831_v21, %v12831_v21  ;;  %v2674_v5 = vadd.f32 %v2673_v32, %v2672_v47  ;;  %12832 = vst [vmem:[#allocation209_spill] sm:$0xff] %v8358_v18  ;;  %v12834_v0 = vld [vmem:[#allocation170_spill] sm:$0xff]  ;;  %v8366_v34 = vpop.f32.mrf.mxu1  ;;  %v12836_v52 = vld [vmem:[#allocation101_spill] sm:$0xff] }
 0x21e   : > { %v2414_v42 = vmul.f32 %v8286_v12, %v8286_v12  ;;  %v2103_v54 = vadd.f32 %v2102_v8, %v2101_v48  ;;  %v2111_v57 = vsel %vm2029_vm2, %v8286_v12, 0.0  ;;  %v2653_v6 = vadd.f32 %v8037_v53, %v2412_v22  ;;  %12835 = vst [vmem:[#allocation173_spill] sm:$0xff] %v8366_v34  ;;  %v12837_v48 = vld [vmem:[#allocation103_spill] sm:$0xff] }
 0x21f   : > { %v2714_v37 = vadd.f32 %v12833_v13, %v2459_v9  ;;  %v2447_v26 = vmul.f32 %v12834_v0, %v12834_v0  ;;  %2675 = vadd.xlane.f32.xlu1 %v2674_v5  ;;  %v2646_v32 = vsel %vm2029_vm2, %v2407_v59, 0.0  ;;  %v2110_v47 = vadd.f32 %v2109_v50, %v12831_v21  ;;  %v12838_v5 = vld [vmem:[#allocation176_spill] sm:$0xff]  ;;  %v8383_v21 = vpop.f32.mrf.mxu0 }
 0x220   : > { %v2460_v8 = vmul.f32 %v12836_v52, %v12836_v52  ;;  %v2466_v61 = vmul.f32 %v12837_v48, %v12837_v48  ;;  %v2154_v53 = vadd.f32 %v8273_v46, %v12834_v0  ;;  %2104 = vadd.xlane.f32.xlu0 %v2103_v54  ;;  %v2645_v9 = vadd.f32 %v2644_v33, %v2406_v10  ;;  %v12840_v46 = vld [vmem:[#allocation172_spill] sm:$0xff]  ;;  %v12841_v33 = vld [vmem:[#allocation175_spill] sm:$0xff]  ;;  %v8390_v54 = vpop.f32.mrf.mxu1 }
 0x221   : > { %v8377_v22 = vadd.f32 %v2170_v41, %v12836_v52  ;;  %v2179_v13 = vadd.f32 %v12838_v5, %v12837_v48  ;;  %v2112_v59 = vadd.f32 %v2111_v57, %v2110_v47  ;;  %v2706_v12 = vadd.f32 %v2705_v7, %v2453_v49  ;;  %12839 = vst [vmem:[#allocation176_spill] sm:$0xff] %v8383_v21  ;;  %v12845_v52 = vld [vmem:[#allocation107_spill] sm:$0xff] }
 0x222   : > { %v2449_v50 = vmul.f32 %v8312_v27, %v8312_v27  ;;  %v2647_v25 = vadd.f32 %v2646_v32, %v2645_v9  ;;  %v2654_v55 = vadd.f32 %v2653_v6, %v2413_v17  ;;  %v2655_v51 = vsel %vm2029_vm2, %v2414_v42, 0.0  ;;  %v12842_v32 = vld [vmem:[#allocation177_spill] sm:$0xff]  ;;  %v12843_v6 = vld [vmem:[#allocation162_spill] sm:$0xff]  ;;  %v12852_v0 = vld [vmem:[#allocation183_spill] sm:$0xff] }
 0x223   : > { %v2448_v10 = vmul.f32 %v12840_v46, %v12840_v46  ;;  %v2454_v41 = vmul.f32 %v12841_v33, %v12841_v33  ;;  %2113 = vadd.xlane.f32.xlu1 %v2112_v59  ;;  %v2156_v7 = vsel %vm2029_vm2, %v8312_v27, 0.0  ;;  %v2698_v49 = vadd.f32 %v8302_v28, %v2447_v26  ;;  %v12844_v9 = vld [vmem:[#allocation105_spill] sm:$0xff]  ;;  %v12846_v59 = vld [vmem:[#allocation180_spill] sm:$0xff] }
 0x224   : > { %v8395_v57 = vadd.f32 %v2714_v37, %v2460_v8  ;;  %v2723_v17 = vadd.f32 %v12842_v32, %v2466_v61  ;;  %v2136_v42 = vadd.f32 %v8161_v15, %v12843_v6  ;;  %2648 = vadd.xlane.f32.xlu0 %v2647_v25  ;;  %v2155_v47 = vadd.f32 %v2154_v53, %v12840_v46  ;;  %v8412_v15 = vpop.f32.mrf.mxu0  ;;  %v12848_v8 = vld [vmem:[#allocation179_spill] sm:$0xff]  ;;  %v8417_v32 = vpop.f32.mrf.mxu1 }
 0x225   : > { %v2467_v5 = vmul.f32 %v12844_v9, %v12844_v9  ;;  %v2188_v48 = vadd.f32 %v12846_v59, %v12845_v52  ;;  %v2473_v27 = vmul.f32 %v12845_v52, %v12845_v52  ;;  %v2656_v28 = vadd.f32 %v2655_v51, %v2654_v55  ;;  %12847 = vst [vmem:[#allocation177_spill] sm:$0xff] %v8412_v15 }
 0x226   : > { %v8408_v37 = vadd.f32 %v2179_v13, %v12844_v9  ;;  %v2456_v61 = vmul.f32 %v8366_v34, %v8366_v34  ;;  %v2157_v25 = vadd.f32 %v2156_v7, %v2155_v47  ;;  %v2700_v26 = vsel %vm2029_vm2, %v2449_v50, 0.0  ;;  %12849 = vst [vmem:[#allocation180_spill] sm:$0xff] %v8417_v32  ;;  %v12850_v13 = vld [vmem:[#allocation111_spill] sm:$0xff]  ;;  %v12851_v50 = vld [vmem:[#allocation164_spill] sm:$0xff] }
 0x227   : > { %v2455_v53 = vmul.f32 %v12848_v8, %v12848_v8  ;;  %2657 = vadd.xlane.f32.xlu1 %v2656_v28  ;;  %v2699_v59 = vadd.f32 %v2698_v49, %v2448_v10  ;;  %v2138_v51 = vsel %vm2029_vm2, %v8341_v36, 0.0  ;;  %v2707_v55 = vadd.f32 %v2706_v12, %v2454_v41  ;;  %v12854_v12 = vld [vmem:[#allocation188_spill] sm:$0xff] }
 0x228   : > { %v2480_v9 = vmul.f32 %v12850_v13, %v12850_v13  ;;  %v2433_v52 = vmul.f32 %v12843_v6, %v12843_v6  ;;  %v2163_v7 = vadd.f32 %v2162_v31, %v12841_v33  ;;  %2158 = vadd.xlane.f32.xlu0 %v2157_v25  ;;  %v2137_v47 = vadd.f32 %v2136_v42, %v12851_v50  ;;  %v8435_v6 = vpop.f32.mrf.mxu0 }
 0x229   : > { %v2732_v46 = vadd.f32 %v12852_v0, %v2473_v27  ;;  %v2189_v28 = vadd.f32 %v2188_v48, %v12853_v63  ;;  %v2474_v10 = vmul.f32 %v12853_v63, %v12853_v63  ;;  %v2701_v49 = vadd.f32 %v2700_v26, %v2699_v59  ;;  %12856 = vst [vmem:[#allocation164_spill] sm:$0xff] %v8435_v6  ;;  %v8442_v48 = vpop.f32.mrf.mxu1 }
 0x22a   : > { %v2197_v41 = vadd.f32 %v12854_v12, %v12850_v13  ;;  %v2440_v1 = vmul.f32 %v12855_v19, %v12855_v19  ;;  %v2139_v31 = vadd.f32 %v2138_v51, %v2137_v47  ;;  %v2709_v25 = vsel %vm2029_vm2, %v2456_v61, 0.0  ;;  %12857 = vst [vmem:[#allocation183_spill] sm:$0xff] %v8442_v48  ;;  %v12858_v47 = vld [vmem:[#allocation113_spill] sm:$0xff]  ;;  %v12859_v13 = vld [vmem:[#allocation115_spill] sm:$0xff] }
 0x22b   : > { %v2145_v27 = vadd.f32 %v8221_v2, %v12855_v19  ;;  %v2435_v0 = vmul.f32 %v8341_v36, %v8341_v36  ;;  %2702 = vadd.xlane.f32.xlu1 %v2701_v49  ;;  %v2708_v42 = vadd.f32 %v2707_v55, %v2455_v53  ;;  %v2165_v26 = vsel %vm2029_vm2, %v8366_v34, 0.0  ;;  %v12860_v53 = vld [vmem:[#allocation168_spill] sm:$0xff]  ;;  %v8464_v19 = vpop.f32.mrf.mxu1 }
 0x22c   : > { %v2741_v59 = vadd.f32 %v8141_v40, %v2480_v9  ;;  %v2434_v51 = vmul.f32 %v12851_v50, %v12851_v50  ;;  %2140 = vadd.xlane.f32.xlu0 %v2139_v31  ;;  %v2164_v61 = vadd.f32 %v2163_v7, %v12848_v8  ;;  %v2680_v2 = vadd.f32 %v8190_v44, %v2433_v52  ;;  %v8459_v9 = vpop.f32.mrf.mxu0  ;;  %v12863_v8 = vld [vmem:[#allocation192_spill] sm:$0xff] }
 0x22d   : > { %v2481_v12 = vmul.f32 %v12858_v47, %v12858_v47  ;;  %v2487_v49 = vmul.f32 %v12859_v13, %v12859_v13  ;;  %v2441_v55 = vmul.f32 %v12860_v53, %v12860_v53  ;;  %v2710_v63 = vadd.f32 %v2709_v25, %v2708_v42  ;;  %12861 = vst [vmem:[#allocation188_spill] sm:$0xff] %v8459_v9 }
 0x22e   : > { %v2442_v40 = vmul.f32 %v8390_v54, %v8390_v54  ;;  %v2166_v31 = vadd.f32 %v2165_v26, %v2164_v61  ;;  %v2147_v7 = vsel %vm2029_vm2, %v8390_v54, 0.0  ;;  %v2689_v44 = vadd.f32 %v8259_v43, %v2440_v1  ;;  %12862 = vst [vmem:[#allocation168_spill] sm:$0xff] %v8464_v19 }
 0x22f   : > { %v2733_v52 = vadd.f32 %v2732_v46, %v2474_v10  ;;  %2711 = vadd.xlane.f32.xlu1 %v2710_v63  ;;  %v2146_v34 = vadd.f32 %v2145_v27, %v12860_v53  ;;  %v2682_v33 = vsel %vm2029_vm2, %v2435_v0, 0.0  ;;  %v8468_v25 = vadd.f32 %v2723_v17, %v2467_v5  ;;  %v12864_v46 = vld [vmem:[#allocation117_spill] sm:$0xff]  ;;  %v8479_v17 = vpop.f32.mrf.mxu0 }
 0x230   : > { %v2206_v42 = vadd.f32 %v8156_v60, %v12859_v13  ;;  %v2190_v26 = vadd.f32 %v2189_v28, %v12863_v8  ;;  %v2475_v61 = vmul.f32 %v12863_v8, %v12863_v8  ;;  %2167 = vadd.xlane.f32.xlu0 %v2166_v31  ;;  %v2681_v1 = vadd.f32 %v2680_v2, %v2434_v51  ;;  %v8487_v2 = vpop.f32.mrf.mxu1  ;;  %v12868_v31 = vld [vmem:[#allocation125_spill] sm:$0xff]  ;;  %v12872_v8 = vld [vmem:[#allocation122_spill] sm:$0xff] }
 0x231   : > { %v2750_v43 = vadd.f32 %v8184_v45, %v2487_v49  ;;  %v2488_v63 = vmul.f32 %v12864_v46, %v12864_v46  ;;  %v2198_v10 = vadd.f32 %v2197_v41, %v12858_v47  ;;  %v2148_v27 = vadd.f32 %v2147_v7, %v2146_v34  ;;  %12865 = vst [vmem:[#allocation210_spill] sm:$0xff] %v8479_v17 }
 0x232   : > { %v2683_v5 = vadd.f32 %v2682_v33, %v2681_v1  ;;  %v2690_v0 = vadd.f32 %v2689_v44, %v2441_v55  ;;  %v2691_v60 = vsel %vm2029_vm2, %v2442_v40, 0.0  ;;  %v2742_v28 = vadd.f32 %v2741_v59, %v2481_v12  ;;  %12866 = vst [vmem:[#allocation211_spill] sm:$0xff] %v8487_v2  ;;  %v12867_v55 = vld [vmem:[#allocation119_spill] sm:$0xff] }
 0x233   : > { %v2199_v13 = vadd.f32 %v2198_v10, %v8165_v29  ;;  %v2482_v51 = vmul.f32 %v8165_v29, %v8165_v29  ;;  %v2477_v45 = vmul.f32 %v8417_v32, %v8417_v32  ;;  %2149 = vadd.xlane.f32.xlu1 %v2148_v27  ;;  %v2192_v34 = vsel %vm2029_vm2, %v8417_v32, 0.0  ;;  %v8507_v10 = vpop.f32.mrf.mxu0  ;;  %v12914_v32 = vld [vmem:[#allocation163_spill] sm:$0xff] }
 0x234   : > { %v8492_v33 = vadd.f32 %v2206_v42, %v12864_v46  ;;  %v2476_v41 = vmul.f32 %v8136_v4, %v8136_v4  ;;  %2684 = vadd.xlane.f32.xlu0 %v2683_v5  ;;  %v2191_v59 = vadd.f32 %v2190_v26, %v8136_v4  ;;  %v2734_v12 = vadd.f32 %v2733_v52, %v2475_v61  ;;  %v8513_v61 = vpop.f32.mrf.mxu1 }
 0x235   : > { %v8497_v49 = vadd.f32 %v2750_v43, %v2488_v63  ;;  %v2494_v40 = vmul.f32 %v12867_v55, %v12867_v55  ;;  %v2501_v7 = vmul.f32 %v12868_v31, %v12868_v31  ;;  %v2692_v44 = vadd.f32 %v2691_v60, %v2690_v0  ;;  %12869 = vst [vmem:[#allocation212_spill] sm:$0xff] %v8507_v10  ;;  %v12871_v0 = vld [vmem:[#allocation181_spill] sm:$0xff]  ;;  %v8530_v4 = vpop.f32.mrf.mxu0 }
 0x236   : > { %v2224_v42 = vadd.f32 %v8268_v56, %v12868_v31  ;;  %v2484_v1 = vmul.f32 %v8464_v19, %v8464_v19  ;;  %v2193_v27 = vadd.f32 %v2192_v34, %v2191_v59  ;;  %v2201_v52 = vsel %vm2029_vm2, %v8464_v19, 0.0  ;;  %12870 = vst [vmem:[#allocation213_spill] sm:$0xff] %v8513_v61  ;;  %12875 = vst [vmem:[#allocation214_spill] sm:$0xff] %v8530_v4 }
 0x237   : > { %v2483_v26 = vmul.f32 %v8194_v39, %v8194_v39  ;;  %2693 = vadd.xlane.f32.xlu1 %v2692_v44  ;;  %v2736_v43 = vsel %vm2029_vm2, %v2477_v45, 0.0  ;;  %v2200_v63 = vadd.f32 %v2199_v13, %v8194_v39  ;;  %v2743_v56 = vadd.f32 %v2742_v28, %v2482_v51  ;;  %v12873_v28 = vld [vmem:[#allocation129_spill] sm:$0xff]  ;;  %v12874_v39 = vld [vmem:[#allocation187_spill] sm:$0xff] }
 0x238   : > { %v2215_v5 = vadd.f32 %v8216_v20, %v12867_v55  ;;  %v2172_v60 = vadd.f32 %v8377_v22, %v12871_v0  ;;  %v2461_v34 = vmul.f32 %v12871_v0, %v12871_v0  ;;  %2194 = vadd.xlane.f32.xlu0 %v2193_v27  ;;  %v2735_v59 = vadd.f32 %v2734_v12, %v2476_v41  ;;  %v8537_v12 = vpop.f32.mrf.mxu1  ;;  %v12878_v27 = vld [vmem:[#allocation184_spill] sm:$0xff] }
 0x239   : > { %v2759_v29 = vadd.f32 %v8253_v30, %v2494_v40  ;;  %v2495_v44 = vmul.f32 %v12872_v8, %v12872_v8  ;;  %v2768_v45 = vadd.f32 %v8296_v14, %v2501_v7  ;;  %v2202_v13 = vadd.f32 %v2201_v52, %v2200_v63  ;;  %12876 = vst [vmem:[#allocation215_spill] sm:$0xff] %v8537_v12  ;;  %v12877_v7 = vld [vmem:[#allocation131_spill] sm:$0xff] }
 0x23a   : > { %v2225_v51 = vadd.f32 %v2224_v42, %v12873_v28  ;;  %v2468_v20 = vmul.f32 %v12874_v39, %v12874_v39  ;;  %v2737_v22 = vadd.f32 %v2736_v43, %v2735_v59  ;;  %v2745_v0 = vsel %vm2029_vm2, %v2484_v1, 0.0  ;;  %v12879_v59 = vld [vmem:[#allocation189_spill] sm:$0xff] }
 0x23b   : > { %v2181_v41 = vadd.f32 %v8408_v37, %v12874_v39  ;;  %v2463_v30 = vmul.f32 %v8442_v48, %v8442_v48  ;;  %2203 = vadd.xlane.f32.xlu1 %v2202_v13  ;;  %v2174_v14 = vsel %vm2029_vm2, %v8442_v48, 0.0  ;;  %v2744_v40 = vadd.f32 %v2743_v56, %v2483_v26  ;;  %v8555_v39 = vpop.f32.mrf.mxu0 }
 0x23c   : > { %v2508_v42 = vmul.f32 %v12877_v7, %v12877_v7  ;;  %v2462_v52 = vmul.f32 %v12878_v27, %v12878_v27  ;;  %2738 = vadd.xlane.f32.xlu0 %v2737_v22  ;;  %v2173_v1 = vadd.f32 %v2172_v60, %v12878_v27  ;;  %v2716_v37 = vadd.f32 %v8395_v57, %v2461_v34  ;;  %v8561_v27 = vpop.f32.mrf.mxu1 }
 0x23d   : > { %v2502_v43 = vmul.f32 %v12873_v28, %v12873_v28  ;;  %v2233_v63 = vadd.f32 %v8328_v58, %v12877_v7  ;;  %v2469_v26 = vmul.f32 %v12879_v59, %v12879_v59  ;;  %v2746_v56 = vadd.f32 %v2745_v0, %v2744_v40  ;;  %12880 = vst [vmem:[#allocation216_spill] sm:$0xff] %v8555_v39  ;;  %v12923_v28 = vld [vmem:[#allocation149_spill] sm:$0xff] }
 0x23e   : > { %v2470_v13 = vmul.f32 %v8487_v2, %v8487_v2  ;;  %v2175_v22 = vadd.f32 %v2174_v14, %v2173_v1  ;;  %v2183_v60 = vsel %vm2029_vm2, %v8487_v2, 0.0  ;;  %v2725_v57 = vadd.f32 %v8468_v25, %v2468_v20  ;;  %12881 = vst [vmem:[#allocation217_spill] sm:$0xff] %v8561_v27  ;;  %v12882_v20 = vld [vmem:[#allocation135_spill] sm:$0xff] }
 0x23f   : > { %v2216_v34 = vadd.f32 %v2215_v5, %v12872_v8  ;;  %2747 = vadd.xlane.f32.xlu1 %v2746_v56  ;;  %v2718_v58 = vsel %vm2029_vm2, %v2463_v30, 0.0  ;;  %v2182_v0 = vadd.f32 %v2181_v41, %v12879_v59  ;;  %v8565_v40 = vadd.f32 %v2759_v29, %v2495_v44  ;;  %v12883_v2 = vld [vmem:[#allocation139_spill] sm:$0xff]  ;;  %v8576_v44 = vpop.f32.mrf.mxu0 }
 0x240   : > { %v2777_v48 = vadd.f32 %v8352_v35, %v2508_v42  ;;  %v2226_v14 = vadd.f32 %v2225_v51, %v8334_v3  ;;  %v2503_v1 = vmul.f32 %v8334_v3, %v8334_v3  ;;  %2176 = vadd.xlane.f32.xlu0 %v2175_v22  ;;  %v2717_v25 = vadd.f32 %v2716_v37, %v2462_v52  ;;  %v8584_v22 = vpop.f32.mrf.mxu1  ;;  %v12903_v8 = vld [vmem:[#allocation127_spill] sm:$0xff] }
 0x241   : > { %v2509_v5 = vmul.f32 %v12882_v20, %v12882_v20  ;;  %v2515_v56 = vmul.f32 %v12883_v2, %v12883_v2  ;;  %v2234_v30 = vadd.f32 %v2233_v63, %v12882_v20  ;;  %v2184_v41 = vadd.f32 %v2183_v60, %v2182_v0  ;;  %12884 = vst [vmem:[#allocation218_spill] sm:$0xff] %v8576_v44  ;;  %v12888_v0 = vld [vmem:[#allocation153_spill] sm:$0xff]  ;;  %v8600_v19 = vpop.f32.mrf.mxu0 }
 0x242   : > { %v2769_v29 = vadd.f32 %v2768_v45, %v2502_v43  ;;  %v2719_v35 = vadd.f32 %v2718_v58, %v2717_v25  ;;  %v2726_v42 = vadd.f32 %v2725_v57, %v2469_v26  ;;  %v2727_v51 = vsel %vm2029_vm2, %v2470_v13, 0.0  ;;  %12885 = vst [vmem:[#allocation219_spill] sm:$0xff] %v8584_v22  ;;  %v12886_v43 = vld [vmem:[#allocation121_spill] sm:$0xff]  ;;  %v12887_v57 = vld [vmem:[#allocation124_spill] sm:$0xff] }
 0x243   : > { %v2235_v59 = vadd.f32 %v2234_v30, %v8383_v21  ;;  %v2510_v52 = vmul.f32 %v8383_v21, %v8383_v21  ;;  %v2505_v37 = vmul.f32 %v8513_v61, %v8513_v61  ;;  %2185 = vadd.xlane.f32.xlu1 %v2184_v41  ;;  %v2228_v45 = vsel %vm2029_vm2, %v8513_v61, 0.0  ;;  %v12889_v21 = vld [vmem:[#allocation128_spill] sm:$0xff]  ;;  %12890 = vst [vmem:[#allocation121_spill] sm:$0xff] %v8600_v19  ;;  %v12915_v61 = vld [vmem:[#allocation165_spill] sm:$0xff] }
 0x244   : > { %v2242_v63 = vadd.f32 %v12886_v43, %v12883_v2  ;;  %v2504_v26 = vmul.f32 %v8358_v18, %v8358_v18  ;;  %2720 = vadd.xlane.f32.xlu0 %v2719_v35  ;;  %v2227_v13 = vadd.f32 %v2226_v14, %v8358_v18  ;;  %v2770_v60 = vadd.f32 %v2769_v29, %v2503_v1  ;;  %v12892_v29 = vld [vmem:[#allocation143_spill] sm:$0xff] }
 0x245   : > { %v2786_v58 = vadd.f32 %v12887_v57, %v2515_v56  ;;  %v2529_v25 = vmul.f32 %v12888_v0, %v12888_v0  ;;  %v2728_v30 = vadd.f32 %v2727_v51, %v2726_v42  ;;  %v2778_v41 = vadd.f32 %v2777_v48, %v2509_v5  ;;  %v8606_v56 = vpop.f32.mrf.mxu1  ;;  %v12893_v57 = vld [vmem:[#allocation147_spill] sm:$0xff] }
 0x246   : > { %v2260_v3 = vadd.f32 %v12889_v21, %v12888_v0  ;;  %v2512_v43 = vmul.f32 %v8561_v27, %v8561_v27  ;;  %v2229_v47 = vadd.f32 %v2228_v45, %v2227_v13  ;;  %v2237_v14 = vsel %vm2029_vm2, %v8561_v27, 0.0  ;;  %12891 = vst [vmem:[#allocation124_spill] sm:$0xff] %v8606_v56 }
 0x247   : > { %v2511_v1 = vmul.f32 %v8412_v15, %v8412_v15  ;;  %2729 = vadd.xlane.f32.xlu1 %v2728_v30  ;;  %v2772_v48 = vsel %vm2029_vm2, %v2505_v37, 0.0  ;;  %v2236_v5 = vadd.f32 %v2235_v59, %v8412_v15  ;;  %v2779_v21 = vadd.f32 %v2778_v41, %v2510_v52  ;;  %v12894_v30 = vld [vmem:[#allocation130_spill] sm:$0xff]  ;;  %v12895_v41 = vld [vmem:[#allocation155_spill] sm:$0xff] }
 0x248   : > { %v8611_v35 = vadd.f32 %v2242_v63, %v12892_v29  ;;  %v2208_v42 = vadd.f32 %v8492_v33, %v8223_v16  ;;  %v2489_v51 = vmul.f32 %v8223_v16, %v8223_v16  ;;  %2230 = vadd.xlane.f32.xlu0 %v2229_v47  ;;  %v2771_v45 = vadd.f32 %v2770_v60, %v2504_v26  ;;  %v8625_v33 = vpop.f32.mrf.mxu0  ;;  %v8631_v16 = vpop.f32.mrf.mxu1 }
 0x249   : > { %v2516_v13 = vmul.f32 %v12892_v29, %v12892_v29  ;;  %v2522_v37 = vmul.f32 %v12893_v57, %v12893_v57  ;;  %v2804_v59 = vadd.f32 %v12894_v30, %v2529_v25  ;;  %v2238_v52 = vadd.f32 %v2237_v14, %v2236_v5  ;;  %12896 = vst [vmem:[#allocation128_spill] sm:$0xff] %v8625_v33  ;;  %v12898_v5 = vld [vmem:[#allocation157_spill] sm:$0xff] }
 0x24a   : > { %v2261_v63 = vadd.f32 %v2260_v3, %v12895_v41  ;;  %v2496_v15 = vmul.f32 %v8277_v11, %v8277_v11  ;;  %v2773_v27 = vadd.f32 %v2772_v48, %v2771_v45  ;;  %v2781_v47 = vsel %vm2029_vm2, %v2512_v43, 0.0  ;;  %12897 = vst [vmem:[#allocation130_spill] sm:$0xff] %v8631_v16  ;;  %v12899_v45 = vld [vmem:[#allocation133_spill] sm:$0xff]  ;;  %v8658_v55 = vpop.f32.mrf.mxu1 }
 0x24b   : > { %v2217_v26 = vadd.f32 %v2216_v34, %v8277_v11  ;;  %v2491_v60 = vmul.f32 %v8537_v12, %v8537_v12  ;;  %2239 = vadd.xlane.f32.xlu1 %v2238_v52  ;;  %v2210_v25 = vsel %vm2029_vm2, %v8537_v12, 0.0  ;;  %v2780_v3 = vadd.f32 %v2779_v21, %v2511_v1  ;;  %v8649_v12 = vpop.f32.mrf.mxu0 }
 0x24c   : > { %v2530_v14 = vmul.f32 %v12895_v41, %v12895_v41  ;;  %v2490_v48 = vmul.f32 %v8248_v62, %v8248_v62  ;;  %2774 = vadd.xlane.f32.xlu0 %v2773_v27  ;;  %v2209_v43 = vadd.f32 %v2208_v42, %v8248_v62  ;;  %v2752_v34 = vadd.f32 %v8497_v49, %v2489_v51  ;;  %v8965_v41 = vld [vmem:[%s8843_s13 + $0x58] sm:$0xff] }
 0x24d   : > { %v2269_v30 = vadd.f32 %v12899_v45, %v12898_v5  ;;  %v2536_v52 = vmul.f32 %v12898_v5, %v12898_v5  ;;  %v2497_v1 = vmul.f32 %v8306_v23, %v8306_v23  ;;  %v2782_v21 = vadd.f32 %v2781_v47, %v2780_v3  ;;  %12900 = vst [vmem:[#allocation133_spill] sm:$0xff] %v8649_v12  ;;  %v12901_v45 = vld [vmem:[#allocation126_spill] sm:$0xff]  ;;  %v8670_v7 = vpop.f32.mrf.mxu0  ;;  %v9049_v5 = vld [vmem:[%s8843_s13 + $0xb0] sm:$0xff] }
 0x24e   : > { %v2498_v11 = vmul.f32 %v8584_v22, %v8584_v22  ;;  %v2211_v27 = vadd.f32 %v2210_v25, %v2209_v43  ;;  %v2219_v42 = vsel %vm2029_vm2, %v8584_v22, 0.0  ;;  %v2761_v49 = vadd.f32 %v8565_v40, %v2496_v15  ;;  %12902 = vst [vmem:[#allocation126_spill] sm:$0xff] %v8658_v55  ;;  %v12904_v40 = vld [vmem:[#allocation137_spill] sm:$0xff]  ;;  %12906 = vst [vmem:[#allocation127_spill] sm:$0xff] %v8670_v7 }
 0x24f   : > { %v8654_v51 = vadd.f32 %v2786_v58, %v2516_v13  ;;  %v2251_v62 = vadd.f32 %v12901_v45, %v12893_v57  ;;  %2783 = vadd.xlane.f32.xlu1 %v2782_v21  ;;  %v2754_v47 = vsel %vm2029_vm2, %v2491_v60, 0.0  ;;  %v2218_v3 = vadd.f32 %v2217_v26, %v8306_v23  ;;  %v12905_v13 = vld [vmem:[#allocation159_spill] sm:$0xff]  ;;  %v8694_v23 = vpop.f32.mrf.mxu0 }
 0x250   : > { %v2795_v46 = vadd.f32 %v12903_v8, %v2522_v37  ;;  %v2262_v25 = vadd.f32 %v2261_v63, %v8530_v4  ;;  %v2531_v43 = vmul.f32 %v8530_v4, %v8530_v4  ;;  %2212 = vadd.xlane.f32.xlu0 %v2211_v27  ;;  %v2753_v15 = vadd.f32 %v2752_v34, %v2490_v48 }
 0x251   : > { %v2813_v58 = vadd.f32 %v12904_v40, %v2536_v52  ;;  %v2270_v45 = vadd.f32 %v2269_v30, %v12905_v13  ;;  %v2537_v21 = vmul.f32 %v12905_v13, %v12905_v13  ;;  %v2220_v22 = vadd.f32 %v2219_v42, %v2218_v3  ;;  %v8678_v30 = vpop.f32.mrf.mxu1 }
 0x252   : > { %v2805_v60 = vadd.f32 %v2804_v59, %v2530_v14  ;;  %v2755_v26 = vadd.f32 %v2754_v47, %v2753_v15  ;;  %v2762_v8 = vadd.f32 %v2761_v49, %v2497_v1  ;;  %v2763_v37 = vsel %vm2029_vm2, %v2498_v11, 0.0  ;;  %12907 = vst [vmem:[#allocation137_spill] sm:$0xff] %v8678_v30  ;;  %v12908_v14 = vld [vmem:[#allocation150_spill] sm:$0xff]  ;;  %v12909_v49 = vld [vmem:[#allocation161_spill] sm:$0xff] }
 0x253   : > { %v2271_v63 = vadd.f32 %v2270_v45, %v8576_v44  ;;  %v2538_v48 = vmul.f32 %v8576_v44, %v8576_v44  ;;  %v2533_v34 = vmul.f32 %v8606_v56, %v8606_v56  ;;  %2221 = vadd.xlane.f32.xlu1 %v2220_v22  ;;  %v2264_v59 = vsel %vm2029_vm2, %v8606_v56, 0.0  ;;  %v12910_v47 = vld [vmem:[#allocation134_spill] sm:$0xff] }
 0x254   : > { %v2523_v52 = vmul.f32 %v12908_v14, %v12908_v14  ;;  %v2532_v11 = vmul.f32 %v8555_v39, %v8555_v39  ;;  %2756 = vadd.xlane.f32.xlu0 %v2755_v26  ;;  %v2263_v1 = vadd.f32 %v2262_v25, %v8555_v39  ;;  %v2806_v27 = vadd.f32 %v2805_v60, %v2531_v43 }
 0x255   : > { %v2814_v42 = vadd.f32 %v2813_v58, %v2537_v21  ;;  %v2278_v3 = vadd.f32 %v12910_v47, %v12909_v49  ;;  %v2543_v22 = vmul.f32 %v12909_v49, %v12909_v49  ;;  %v2764_v15 = vadd.f32 %v2763_v37, %v2762_v8  ;;  %12911 = vst [vmem:[#allocation134_spill] sm:$0xff] %v8694_v23  ;;  %v8700_v58 = vpop.f32.mrf.mxu1 }
 0x256   : > { %v2252_v40 = vadd.f32 %v2251_v62, %v12908_v14  ;;  %v2540_v45 = vmul.f32 %v8658_v55, %v8658_v55  ;;  %v2265_v20 = vadd.f32 %v2264_v59, %v2263_v1  ;;  %v2273_v25 = vsel %vm2029_vm2, %v8658_v55, 0.0  ;;  %12912 = vst [vmem:[#allocation220_spill] sm:$0xff] %v8700_v58  ;;  %v12913_v1 = vld [vmem:[#allocation138_spill] sm:$0xff]  ;;  %v8999_v55 = vld [vmem:[%s8843_s13 + $0x60] sm:$0xff] }
 0x257   : > { %v2539_v43 = vmul.f32 %v8600_v19, %v8600_v19  ;;  %2765 = vadd.xlane.f32.xlu1 %v2764_v15  ;;  %v2808_v21 = vsel %vm2029_vm2, %v2533_v34, 0.0  ;;  %v2272_v60 = vadd.f32 %v2271_v63, %v8600_v19  ;;  %v2815_v62 = vadd.f32 %v2814_v42, %v2538_v48  ;;  %v8715_v48 = vpop.f32.mrf.mxu0 }
 0x258   : > { %v2796_v26 = vadd.f32 %v2795_v46, %v2523_v52  ;;  %v2244_v8 = vadd.f32 %v8611_v35, %v8435_v6  ;;  %v2517_v37 = vmul.f32 %v8435_v6, %v8435_v6  ;;  %2266 = vadd.xlane.f32.xlu0 %v2265_v20  ;;  %v2807_v59 = vadd.f32 %v2806_v27, %v2532_v11  ;;  %v8722_v27 = vpop.f32.mrf.mxu1 }
 0x259   : > { %v2822_v47 = vadd.f32 %v12913_v1, %v2543_v22  ;;  %v2279_v18 = vadd.f32 %v2278_v3, %v12914_v32  ;;  %v2550_v15 = vmul.f32 %v12915_v61, %v12915_v61  ;;  %v2274_v34 = vadd.f32 %v2273_v25, %v2272_v60  ;;  %12916 = vst [vmem:[#allocation138_spill] sm:$0xff] %v8715_v48  ;;  %v12918_v22 = vld [vmem:[#allocation169_spill] sm:$0xff] }
 0x25a   : > { %v2544_v63 = vmul.f32 %v12914_v32, %v12914_v32  ;;  %v2253_v46 = vadd.f32 %v2252_v40, %v8479_v17  ;;  %v2809_v35 = vadd.f32 %v2808_v21, %v2807_v59  ;;  %v2817_v52 = vsel %vm2029_vm2, %v2540_v45, 0.0  ;;  %12917 = vst [vmem:[#allocation221_spill] sm:$0xff] %v8722_v27  ;;  %v12919_v40 = vld [vmem:[#allocation145_spill] sm:$0xff]  ;;  %v9132_v32 = vld [vmem:[%s8843_s13 + $0xc0] sm:$0xff] }
 0x25b   : > { %v2524_v20 = vmul.f32 %v8479_v17, %v8479_v17  ;;  %v2519_v11 = vmul.f32 %v8631_v16, %v8631_v16  ;;  %2275 = vadd.xlane.f32.xlu1 %v2274_v34  ;;  %v2246_v42 = vsel %vm2029_vm2, %v8631_v16, 0.0  ;;  %v2816_v3 = vadd.f32 %v2815_v62, %v2539_v43  ;;  %v12920_v59 = vld [vmem:[#allocation141_spill] sm:$0xff]  ;;  %v12921_v17 = vld [vmem:[#allocation142_spill] sm:$0xff]  ;;  %12940 = vst [vmem:[#allocation227_spill] sm:$0xff] %v9132_v32 }
 0x25c   : > { %v2296_v25 = vadd.f32 %v12919_v40, %v12918_v22  ;;  %v2518_v21 = vmul.f32 %v8459_v9, %v8459_v9  ;;  %2810 = vadd.xlane.f32.xlu0 %v2809_v35  ;;  %v2245_v45 = vadd.f32 %v2244_v8, %v8459_v9  ;;  %v2788_v60 = vadd.f32 %v8654_v51, %v2517_v37  ;;  %v12922_v62 = vld [vmem:[#allocation174_spill] sm:$0xff]  ;;  %v8741_v35 = vpop.f32.mrf.mxu0  ;;  %v8928_v16 = vld [vmem:[%s8843_s13 + $0x50] sm:$0xff] }
 0x25d   : > { %v2287_v1 = vadd.f32 %v12920_v59, %v12915_v61  ;;  %v2831_v34 = vadd.f32 %v12921_v17, %v2550_v15  ;;  %v2557_v31 = vmul.f32 %v12918_v22, %v12918_v22  ;;  %v2818_v43 = vadd.f32 %v2817_v52, %v2816_v3  ;;  %12924 = vst [vmem:[#allocation145_spill] sm:$0xff] %v8741_v35  ;;  %v8747_v17 = vpop.f32.mrf.mxu1  ;;  %v12926_v3 = vld [vmem:[#allocation171_spill] sm:$0xff] }
 0x25e   : > { %v2305_v40 = vadd.f32 %v12923_v28, %v12922_v62  ;;  %v2526_v57 = vmul.f32 %v8678_v30, %v8678_v30  ;;  %v2247_v8 = vadd.f32 %v2246_v42, %v2245_v45  ;;  %v2255_v51 = vsel %vm2029_vm2, %v8678_v30, 0.0  ;;  %12925 = vst [vmem:[#allocation141_spill] sm:$0xff] %v8747_v17  ;;  %v12927_v30 = vld [vmem:[#allocation167_spill] sm:$0xff] }
 0x25f   : > { %v2525_v37 = vmul.f32 %v8507_v10, %v8507_v10  ;;  %2819 = vadd.xlane.f32.xlu1 %v2818_v43  ;;  %v2790_v15 = vsel %vm2029_vm2, %v2519_v11, 0.0  ;;  %v2254_v52 = vadd.f32 %v2253_v46, %v8507_v10  ;;  %v2797_v28 = vadd.f32 %v2796_v26, %v2524_v20  ;;  %v12928_v43 = vld [vmem:[#allocation146_spill] sm:$0xff]  ;;  %v8762_v20 = vpop.f32.mrf.mxu0 }
 0x260   : > { %v2297_v59 = vadd.f32 %v2296_v25, %v12926_v3  ;;  %v2564_v61 = vmul.f32 %v12922_v62, %v12922_v62  ;;  %v2280_v42 = vadd.f32 %v2279_v18, %v8625_v33  ;;  %2248 = vadd.xlane.f32.xlu0 %v2247_v8  ;;  %v2789_v45 = vadd.f32 %v2788_v60, %v2518_v21  ;;  %v12930_v8 = vld [vmem:[#allocation178_spill] sm:$0xff] }
 0x261   : > { %v2288_v14 = vadd.f32 %v2287_v1, %v12927_v30  ;;  %v2551_v6 = vmul.f32 %v12927_v30, %v12927_v30  ;;  %v2840_v9 = vadd.f32 %v12928_v43, %v2557_v31  ;;  %v2256_v11 = vadd.f32 %v2255_v51, %v2254_v52  ;;  %12929 = vst [vmem:[#allocation142_spill] sm:$0xff] %v8762_v20  ;;  %v8767_v1 = vpop.f32.mrf.mxu1  ;;  %v12932_v51 = vld [vmem:[#allocation152_spill] sm:$0xff] }
 0x262   : > { %v2558_v26 = vmul.f32 %v12926_v3, %v12926_v3  ;;  %v2298_v46 = vadd.f32 %v2297_v59, %v8715_v48  ;;  %v2791_v25 = vadd.f32 %v2790_v15, %v2789_v45  ;;  %v2799_v18 = vsel %vm2029_vm2, %v2526_v57, 0.0  ;;  %12931 = vst [vmem:[#allocation149_spill] sm:$0xff] %v8767_v1 }
 0x263   : > { %v2306_v21 = vadd.f32 %v2305_v40, %v12930_v8  ;;  %v2289_v60 = vadd.f32 %v2288_v14, %v8670_v7  ;;  %2257 = vadd.xlane.f32.xlu1 %v2256_v11  ;;  %v2798_v62 = vadd.f32 %v2797_v28, %v2525_v37  ;;  %v2282_v31 = vsel %vm2029_vm2, %v8722_v27, 0.0  ;;  %v8780_v28 = vpop.f32.mrf.mxu0 }
 0x264   : > { %v2849_v52 = vadd.f32 %v12932_v51, %v2564_v61  ;;  %v2565_v59 = vmul.f32 %v12930_v8, %v12930_v8  ;;  %v2545_v15 = vmul.f32 %v8625_v33, %v8625_v33  ;;  %2792 = vadd.xlane.f32.xlu0 %v2791_v25  ;;  %v2281_v57 = vadd.f32 %v2280_v42, %v8649_v12  ;;  %v9076_v33 = vld [vmem:[%s8843_s13 + $0xa0] sm:$0xff] }
 0x265   : > { %v2823_v40 = vadd.f32 %v2822_v47, %v2544_v63  ;;  %v2832_v14 = vadd.f32 %v2831_v34, %v2551_v6  ;;  %v2307_v45 = vadd.f32 %v2306_v21, %v8762_v20  ;;  %v2800_v43 = vadd.f32 %v2799_v18, %v2798_v62  ;;  %12933 = vst [vmem:[#allocation146_spill] sm:$0xff] %v8780_v28 }
 0x266   : > { %v2559_v37 = vmul.f32 %v8715_v48, %v8715_v48  ;;  %v2283_v61 = vadd.f32 %v2282_v31, %v2281_v57  ;;  %v2291_v11 = vsel %vm2029_vm2, %v8767_v1, 0.0  ;;  %v2299_v51 = vadd.f32 %v2298_v46, %v8741_v35 }
 0x267   : > { %v2552_v25 = vmul.f32 %v8670_v7, %v8670_v7  ;;  %v2547_v6 = vmul.f32 %v8722_v27, %v8722_v27  ;;  %2801 = vadd.xlane.f32.xlu1 %v2800_v43  ;;  %v2290_v47 = vadd.f32 %v2289_v60, %v8694_v23  ;;  %v2300_v63 = vsel %vm2029_vm2, %v8700_v58, 0.0 }
 0x268   : > { %v2841_v34 = vadd.f32 %v2840_v9, %v2558_v26  ;;  %v2850_v62 = vadd.f32 %v2849_v52, %v2565_v59  ;;  %v2546_v42 = vmul.f32 %v8649_v12, %v8649_v12  ;;  %2284 = vadd.xlane.f32.xlu0 %v2283_v61  ;;  %v2824_v18 = vadd.f32 %v2823_v40, %v2545_v15  ;;  %v9122_v12 = vld [vmem:[%s8843_s13 + $0xd8] sm:$0xff] }
 0x269   : > { %v2560_v46 = vmul.f32 %v8741_v35, %v8741_v35  ;;  %v2566_v21 = vmul.f32 %v8762_v20, %v8762_v20  ;;  %v2292_v31 = vadd.f32 %v2291_v11, %v2290_v47  ;;  %v2308_v57 = vadd.f32 %v2307_v45, %v8780_v28  ;;  %12939 = vst [vmem:[#allocation226_spill] sm:$0xff] %v9122_v12 }
 0x26a   : > { %v2554_v60 = vmul.f32 %v8767_v1, %v8767_v1  ;;  %v2301_v43 = vadd.f32 %v2300_v63, %v2299_v51  ;;  %v2309_v9 = vsel %vm2029_vm2, %v8747_v17, 0.0  ;;  %v2842_v26 = vadd.f32 %v2841_v34, %v2559_v37 }
 0x26b   : > { %v2553_v52 = vmul.f32 %v8694_v23, %v8694_v23  ;;  %v2561_v59 = vmul.f32 %v8700_v58, %v8700_v58  ;;  %2293 = vadd.xlane.f32.xlu1 %v2292_v31  ;;  %v2826_v15 = vsel %vm2029_vm2, %v2547_v6, 0.0  ;;  %v2833_v40 = vadd.f32 %v2832_v14, %v2552_v25  ;;  %v9002_v58 = vld [vmem:[%s8843_s13 + $0x90] sm:$0xff] }
 0x26c   : > { %2302 = vadd.xlane.f32.xlu0 %v2301_v43  ;;  %v2825_v45 = vadd.f32 %v2824_v18, %v2546_v42  ;;  %v2567_v61 = vmul.f32 %v8780_v28, %v8780_v28  ;;  %v2310_v11 = vadd.f32 %v2309_v9, %v2308_v57  ;;  %v2851_v51 = vadd.f32 %v2850_v62, %v2566_v21 }
 0x26d   : > { %v2568_v37 = vmul.f32 %v8747_v17, %v8747_v17  ;;  %v2843_v63 = vadd.f32 %v2842_v26, %v2560_v46  ;;  %v2835_v34 = vsel %vm2029_vm2, %v2554_v60, 0.0  ;;  %v2844_v31 = vsel %vm2029_vm2, %v2561_v59, 0.0  ;;  %v8895_v17 = vld [vmem:[%s8843_s13 + $0x30] sm:$0xff] }
 0x26e   : > { %v2827_v47 = vadd.f32 %v2826_v15, %v2825_v45  ;;  %v2834_v20 = vadd.f32 %v2833_v40, %v2553_v52  ;;  %v2852_v25 = vadd.f32 %v2851_v51, %v2567_v61 }
 0x26f   : > { %2311 = vadd.xlane.f32.xlu1 %v2310_v11  ;;  %v2845_v6 = vadd.f32 %v2844_v31, %v2843_v63  ;;  %v2853_v42 = vsel %vm2029_vm2, %v2568_v37, 0.0 }
 0x270   : > { %2828 = vadd.xlane.f32.xlu0 %v2827_v47  ;;  %v2836_v14 = vadd.f32 %v2835_v34, %v2834_v20  ;;  %v2854_v62 = vadd.f32 %v2853_v42, %v2852_v25 }
 0x273   : > { %2837 = vadd.xlane.f32.xlu1 %v2836_v14 }
 0x274   : > { %2846 = vadd.xlane.f32.xlu0 %v2845_v6 }
 0x277   : > { %2855 = vadd.xlane.f32.xlu1 %v2854_v62 }
 0x281   : > { %v2051_v18 = vpop.xlane.xlu0 %2050 }
 0x282   : > { %v8815_v21 = vmul.f32 0.0012755102, %v2051_v18 }
 0x284   : > { %v2060_v46 = vpop.xlane.xlu1 %2059  ;;  %v2891_v43 = vmul.f32 %v8815_v21, %v8815_v21 }
 0x285   : > { %v2595_v57 = vpop.xlane.xlu0 %2594  ;;  %v8817_v60 = vmul.f32 0.0012755102, %v2060_v46 }
 0x286   : > { %v2859_v9 = vmul.f32 0.0012755102, %v2595_v57 }
 0x287   : > { %v2892_v52 = vmul.f32 %v8817_v60, %v8817_v60 }
 0x288   : > { %v2923_v20 = vsub.f32 %v2859_v9, %v2891_v43  ;;  %v2604_v26 = vpop.xlane.xlu1 %2603 }
 0x289   : > { %v2033_v59 = vpop.xlane.xlu0 %2032  ;;  %v2860_v15 = vmul.f32 0.0012755102, %v2604_v26 }
 0x28a   : > { %v2955_v40 = vmax.f32 %v2923_v20, 0.0  ;;  %v8823_v45 = vmul.f32 0.0012755102, %v2033_v59 }
 0x28b   : > { %v2924_v61 = vsub.f32 %v2860_v15, %v2892_v52 }
 0x28c   : > { %v2987_v11 = vadd.f32 1e-05, %v2955_v40  ;;  %v2042_v51 = vpop.xlane.xlu1 %2041  ;;  %v2889_v34 = vmul.f32 %v8823_v45, %v8823_v45 }
 0x28d   : > { %v2956_v37 = vmax.f32 %v2924_v61, 0.0  ;;  %v2577_v47 = vpop.xlane.xlu0 %2576  ;;  %v8825_v63 = vmul.f32 0.0012755102, %v2042_v51 }
 0x28e   : > { %6179 = vrsqrt.f32 %v2987_v11  ;;  %v2857_v31 = vmul.f32 0.0012755102, %v2577_v47 }
 0x28f   : > { %v2988_v14 = vadd.f32 1e-05, %v2956_v37  ;;  %v2890_v42 = vmul.f32 %v8825_v63, %v8825_v63 }
 0x290   : > { %v2921_v25 = vsub.f32 %v2857_v31, %v2889_v34  ;;  %v2586_v6 = vpop.xlane.xlu1 %2585  ;;  %v8846_v34 = vld [vmem:[%s8843_s13 + $0x10] sm:$0xff] }
 0x291   : > { %6181 = vrsqrt.f32 %v2988_v14  ;;  %v2858_v62 = vmul.f32 0.0012755102, %v2586_v6  ;;  %v2087_v18 = vpop.xlane.xlu0 %2086 }
 0x292   : > { %v2953_v46 = vmax.f32 %v2921_v25, 0.0  ;;  %v8831_v57 = vmul.f32 0.0012755102, %v2087_v18 }
 0x293   : > { %v2922_v43 = vsub.f32 %v2858_v62, %v2890_v42 }
 0x294   : > { %v2985_v9 = vadd.f32 1e-05, %v2953_v46  ;;  %v2096_v20 = vpop.xlane.xlu1 %2095  ;;  %v2895_v59 = vmul.f32 %v8831_v57, %v8831_v57 }
 0x295   : > { %v2954_v26 = vmax.f32 %v2922_v43, 0.0  ;;  %v2631_v52 = vpop.xlane.xlu0 %2630  ;;  %v8836_v40 = vmul.f32 0.0012755102, %v2096_v20  ;;  %v8856_v43 = vld [vmem:[%s8843_s13 + $0x18] sm:$0xff] }
 0x296   : > { %6183 = vrsqrt.f32 %v2985_v9  ;;  %v2863_v15 = vmul.f32 0.0012755102, %v2631_v52 }
 0x297   : > { %v2986_v61 = vadd.f32 1e-05, %v2954_v26  ;;  %v2896_v14 = vmul.f32 %v8836_v40, %v8836_v40 }
 0x298   : > { %v2927_v11 = vsub.f32 %v2863_v15, %v2895_v59  ;;  %v2640_v51 = vpop.xlane.xlu1 %2639 }
 0x299   : > { %6185 = vrsqrt.f32 %v2986_v61  ;;  %v2069_v37 = vpop.xlane.xlu0 %2068  ;;  %v2864_v47 = vmul.f32 0.0012755102, %v2640_v51 }
 0x29a   : > { %v2959_v31 = vmax.f32 %v2927_v11, 0.0  ;;  %v8850_v25 = vmul.f32 0.0012755102, %v2069_v37 }
 0x29b   : > { %v6180_v6 = vpop.eup %6179  ;;  %v2928_v62 = vsub.f32 %v2864_v47, %v2896_v14 }
 0x29c   : > { %v2991_v42 = vadd.f32 1e-05, %v2959_v31  ;;  %v2078_v18 = vpop.xlane.xlu1 %2077  ;;  %v8853_v46 = vmul.f32 %v6180_v6, %v8846_v34  ;;  %v2893_v9 = vmul.f32 %v8850_v25, %v8850_v25  ;;  %v8871_v6 = vld [vmem:[%s8843_s13] sm:$0xff] }
 0x29d   : > { %v2613_v20 = vpop.xlane.xlu0 %2612  ;;  %v8860_v59 = vmul.f32 0.0012755102, %v2078_v18  ;;  %v2960_v11 = vmax.f32 %v2928_v62, 0.0 }
 0x29e   : > { %v6182_v26 = vpop.eup %6181  ;;  %6187 = vrsqrt.f32 %v2991_v42  ;;  %v2861_v52 = vmul.f32 0.0012755102, %v2613_v20  ;;  %v3117_v15 = vmul.f32 %v8853_v46, %v8815_v21 }
 0x29f   : > { %v8865_v61 = vmul.f32 %v6182_v26, %v8856_v43  ;;  %v2894_v21 = vmul.f32 %v8860_v59, %v8860_v59 }
 0x2a0   : > { %v2925_v51 = vsub.f32 %v2861_v52, %v2893_v9  ;;  %3183 = vrot.lane.b32.xlu0 %v3117_v15, %s6253_s14  ;;  %v2622_v37 = vpop.xlane.xlu1 %2621  ;;  %v2992_v9 = vadd.f32 1e-05, %v2960_v11 }
 0x2a1   : > { %v2862_v47 = vmul.f32 0.0012755102, %v2622_v37  ;;  %v2123_v31 = vpop.xlane.xlu0 %2122  ;;  %v3118_v14 = vmul.f32 %v8865_v61, %v8817_v60  ;;  %v8882_v60 = vld [vmem:[%s8843_s13 + $0x8] sm:$0xff] }
 0x2a2   : > { %v2957_v42 = vmax.f32 %v2925_v51, 0.0  ;;  %v8875_v18 = vmul.f32 0.0012755102, %v2123_v31 }
 0x2a3   : > { %v6184_v62 = vpop.eup %6183  ;;  %3185 = vrot.lane.b32.xlu1 %v3118_v14, %s6253_s14  ;;  %v2926_v26 = vsub.f32 %v2862_v47, %v2894_v21 }
 0x2a4   : > { %v2989_v20 = vadd.f32 1e-05, %v2957_v42  ;;  %v2132_v52 = vpop.xlane.xlu1 %2131  ;;  %v8879_v15 = vmul.f32 %v6184_v62, %v8871_v6  ;;  %v2899_v31 = vmul.f32 %v8875_v18, %v8875_v18 }
 0x2a5   : > { %v2667_v37 = vpop.xlane.xlu0 %2666  ;;  %v2958_v47 = vmax.f32 %v2926_v26, 0.0 }
 0x2a6   : > { %v6186_v51 = vpop.eup %6185  ;;  %6189 = vrsqrt.f32 %v2989_v20  ;;  %v2867_v28 = vmul.f32 0.0012755102, %v2667_v37  ;;  %v3115_v14 = vmul.f32 %v8879_v15, %v8823_v45  ;;  %v8897_v37 = vmul.f32 0.0012755102, %v2132_v52 }
 0x2a7   : > { %v8889_v11 = vmul.f32 %v6186_v51, %v8882_v60  ;;  %6191 = vrsqrt.f32 %v2992_v9  ;;  %v2990_v9 = vadd.f32 1e-05, %v2958_v47 }
 0x2a8   : > { %v2931_v42 = vsub.f32 %v2867_v28, %v2899_v31  ;;  %3179 = vrot.lane.b32.xlu0 %v3115_v14, %s6253_s14  ;;  %v2676_v21 = vpop.xlane.xlu1 %2675 }
 0x2a9   : > { %v2105_v62 = vpop.xlane.xlu0 %2104  ;;  %v3116_v20 = vmul.f32 %v8889_v11, %v8825_v63  ;;  %v2868_v28 = vmul.f32 0.0012755102, %v2676_v21  ;;  %v2900_v63 = vmul.f32 %v8897_v37, %v8897_v37 }
 0x2aa   : > { %v2963_v8 = vmax.f32 %v2931_v42, 0.0  ;;  %v8899_v7 = vmul.f32 0.0012755102, %v2105_v62 }
 0x2ab   : > { %v6188_v45 = vpop.eup %6187  ;;  %3181 = vrot.lane.b32.xlu1 %v3116_v20, %s6253_s14  ;;  %v2932_v62 = vsub.f32 %v2868_v28, %v2900_v63 }
 0x2ac   : > { %v2995_v26 = vadd.f32 1e-05, %v2963_v8  ;;  %v2114_v51 = vpop.xlane.xlu1 %2113  ;;  %v3089_v31 = vmul.f32 %v6188_v45, %v8895_v17  ;;  %v2897_v52 = vmul.f32 %v8899_v7, %v8899_v7  ;;  %v8911_v45 = vld [vmem:[%s8843_s13 + $0x20] sm:$0xff] }
 0x2ad   : > { %v2649_v14 = vpop.xlane.xlu0 %2648  ;;  %v8908_v21 = vmul.f32 0.0012755102, %v2114_v51  ;;  %v2964_v10 = vmax.f32 %v2932_v62, 0.0 }
 0x2ae   : > { %6193 = vrsqrt.f32 %v2995_v26  ;;  %v2865_v42 = vmul.f32 0.0012755102, %v2649_v14  ;;  %3339 = vperm.xlu0 %6089, %v3089_v31   ;;  %v3121_v8 = vmul.f32 %v3089_v31, %v8831_v57 }
 0x2af   : > { %6195 = vrsqrt.f32 %v2990_v9  ;;  %v2898_v57 = vmul.f32 %v8908_v21, %v8908_v21 }
 0x2b0   : > { %v2929_v20 = vsub.f32 %v2865_v42, %v2897_v52  ;;  %v2658_v47 = vpop.xlane.xlu1 %2657  ;;  %v8922_v42 = vld [vmem:[%s8843_s13 + $0x38] sm:$0xff] }
 0x2b1   : > { %v2159_v23 = vpop.xlane.xlu0 %2158  ;;  %v2866_v14 = vmul.f32 0.0012755102, %v2658_v47 }
 0x2b2   : > { %v2961_v26 = vmax.f32 %v2929_v20, 0.0  ;;  %v8913_v1 = vmul.f32 0.0012755102, %v2159_v23  ;;  %3191 = vrot.lane.b32.xlu0 %v3121_v8, %s6253_s14  ;;  %v2996_v8 = vadd.f32 1e-05, %v2964_v10 }
 0x2b3   : > { %v6190_v30 = vpop.eup %6189  ;;  %v2930_v20 = vsub.f32 %v2866_v14, %v2898_v57  ;;  %v8935_v57 = vld [vmem:[%s8843_s13 + $0x28] sm:$0xff] }
 0x2b4   : > { %v2993_v9 = vadd.f32 1e-05, %v2961_v26  ;;  %v2703_v28 = vpop.xlane.xlu1 %2702  ;;  %v3087_v63 = vmul.f32 %v6190_v30, %v8911_v45  ;;  %v6192_v52 = vpop.eup %6191  ;;  %v2903_v51 = vmul.f32 %v8913_v1, %v8913_v1 }
 0x2b5   : > { %v2871_v31 = vmul.f32 0.0012755102, %v2703_v28  ;;  %v2141_v23 = vpop.xlane.xlu0 %2140  ;;  %v3090_v26 = vmul.f32 %v6192_v52, %v8922_v42  ;;  %v2962_v56 = vmax.f32 %v2930_v20, 0.0 }
 0x2b6   : > { %6197 = vrsqrt.f32 %v2993_v9  ;;  %3329 = vperm.xlu1 %6090, %v3087_v63   ;;  %v3119_v62 = vmul.f32 %v3087_v63, %v8850_v25  ;;  %v8930_v28 = vmul.f32 0.0012755102, %v2141_v23 }
 0x2b7   : > { %v2935_v47 = vsub.f32 %v2871_v31, %v2903_v51  ;;  %6199 = vrsqrt.f32 %v2996_v8  ;;  %v3122_v14 = vmul.f32 %v3090_v26, %v8836_v40  ;;  %v8945_v8 = vld [vmem:[%s8843_s13 + $0x40] sm:$0xff] }
 0x2b8   : > { %3187 = vrot.lane.b32.xlu0 %v3119_v62, %s6253_s14  ;;  %v2712_v30 = vpop.xlane.xlu1 %2711  ;;  %v2901_v51 = vmul.f32 %v8930_v28, %v8930_v28 }
 0x2b9   : > { %v2967_v4 = vmax.f32 %v2935_v47, 0.0  ;;  %v2168_v39 = vpop.xlane.xlu0 %2167 }
 0x2ba   : > { %3344 = vperm.xlu1 %6090, %v3090_v26   ;;  %v8940_v23 = vmul.f32 0.0012755102, %v2168_v39 }
 0x2bb   : > { %v6194_v9 = vpop.eup %6193  ;;  %v2999_v0 = vadd.f32 1e-05, %v2967_v4  ;;  %v2994_v4 = vadd.f32 1e-05, %v2962_v56 }
 0x2bc   : > { %v2150_v25 = vpop.xlane.xlu1 %2149  ;;  %v3093_v10 = vmul.f32 %v6194_v9, %v8928_v16  ;;  %v6196_v63 = vpop.eup %6195  ;;  %v2904_v39 = vmul.f32 %v8940_v23, %v8940_v23 }
 0x2bd   : > { %6201 = vrsqrt.f32 %v2999_v0  ;;  %v2685_v52 = vpop.xlane.xlu0 %2684  ;;  %v3088_v47 = vmul.f32 %v6196_v63, %v8935_v57 }
 0x2be   : > { %v2869_v31 = vmul.f32 0.0012755102, %v2685_v52  ;;  %3359 = vperm.xlu0 %6089, %v3093_v10   ;;  %3193 = vrot.lane.b32.xlu1 %v3122_v14, %s6253_s14  ;;  %v3125_v40 = vmul.f32 %v3093_v10, %v8875_v18  ;;  %6203 = vrsqrt.f32 %v2994_v4  ;;  %v2872_v52 = vmul.f32 0.0012755102, %v2712_v30 }
 0x2bf   : > { %v3120_v18 = vmul.f32 %v3088_v47, %v8860_v59  ;;  %v8960_v59 = vld [vmem:[%s8843_s13 + $0x70] sm:$0xff] }
 0x2c0   : > { %v2933_v62 = vsub.f32 %v2869_v31, %v2901_v51  ;;  %v2694_v20 = vpop.xlane.xlu1 %2693 }
 0x2c1   : > { %v2195_v0 = vpop.xlane.xlu0 %2194 }
 0x2c2   : > { %v8947_v26 = vmul.f32 0.0012755102, %v2195_v0  ;;  %3199 = vrot.lane.b32.xlu0 %v3125_v40, %s6253_s14  ;;  %3334 = vperm.xlu1 %6090, %v3088_v47   ;;  %v2965_v56 = vmax.f32 %v2933_v62, 0.0  ;;  %v2936_v40 = vsub.f32 %v2872_v52, %v2904_v39 }
 0x2c3   : > { %v6198_v9 = vpop.eup %6197 }
 0x2c4   : > { %v2204_v14 = vpop.xlane.xlu1 %2203  ;;  %v3091_v10 = vmul.f32 %v6198_v9, %v8945_v8  ;;  %v2907_v51 = vmul.f32 %v8947_v26, %v8947_v26  ;;  %v2997_v0 = vadd.f32 1e-05, %v2965_v56  ;;  %v6200_v47 = vpop.eup %6199  ;;  %v8962_v9 = vmul.f32 0.0012755102, %v2150_v25 }
 0x2c5   : > { %v2739_v63 = vpop.xlane.xlu0 %2738  ;;  %v2968_v39 = vmax.f32 %v2936_v40, 0.0 }
 0x2c6   : > { %v2875_v31 = vmul.f32 0.0012755102, %v2739_v63  ;;  %3189 = vrot.lane.b32.xlu1 %v3120_v18, %s6253_s14  ;;  %v3123_v4 = vmul.f32 %v3091_v10, %v8899_v7  ;;  %v2870_v18 = vmul.f32 0.0012755102, %v2694_v20  ;;  %6205 = vrsqrt.f32 %v2997_v0 }
 0x2c7   : > { %v3000_v40 = vadd.f32 1e-05, %v2968_v39 }
 0x2c8   : > { %v2939_v2 = vsub.f32 %v2875_v31, %v2907_v51  ;;  %3195 = vrot.lane.b32.xlu0 %v3123_v4, %s6253_s14  ;;  %v2748_v62 = vpop.xlane.xlu1 %2747  ;;  %v3094_v51 = vmul.f32 %v6200_v47, %v8965_v41  ;;  %v2902_v31 = vmul.f32 %v8962_v9, %v8962_v9 }
 0x2c9   : > { %v2177_v30 = vpop.xlane.xlu0 %2176 }
 0x2ca   : > { %v6202_v44 = vpop.eup %6201  ;;  %v2971_v63 = vmax.f32 %v2939_v2, 0.0  ;;  %3349 = vperm.xlu1 %6090, %v3091_v10   ;;  %v8971_v25 = vmul.f32 0.0012755102, %v2177_v30  ;;  %v2934_v2 = vsub.f32 %v2870_v18, %v2902_v31  ;;  %v3126_v47 = vmul.f32 %v3094_v51, %v8897_v37  ;;  %v8985_v18 = vld [vmem:[%s8843_s13 + $0x48] sm:$0xff] }
 0x2cb   : > { %v3097_v7 = vmul.f32 %v6202_v44, %v8960_v59  ;;  %v6204_v10 = vpop.eup %6203  ;;  %v2876_v37 = vmul.f32 0.0012755102, %v2748_v62 }
 0x2cc   : > { %v3003_v56 = vadd.f32 1e-05, %v2971_v63  ;;  %v2186_v52 = vpop.xlane.xlu1 %2185  ;;  %v8977_v63 = vmul.f32 0.0012755102, %v2204_v14  ;;  %v2905_v30 = vmul.f32 %v8971_v25, %v8971_v25  ;;  %v3092_v31 = vmul.f32 %v6204_v10, %v8985_v18 }
 0x2cd   : > { %v2721_v4 = vpop.xlane.xlu0 %2720  ;;  %v8973_v29 = vmul.f32 0.0012755102, %v2186_v52  ;;  %3379 = vperm.xlu0 %6089, %v3097_v7   ;;  %v3129_v20 = vmul.f32 %v3097_v7, %v8913_v1  ;;  %v2966_v7 = vmax.f32 %v2934_v2, 0.0 }
 0x2ce   : > { %6207 = vrsqrt.f32 %v3003_v56  ;;  %3364 = vperm.xlu1 %6090, %v3094_v51   ;;  %v2873_v44 = vmul.f32 0.0012755102, %v2721_v4  ;;  %v2908_v4 = vmul.f32 %v8977_v63, %v8977_v63 }
 0x2cf   : > { %v2906_v52 = vmul.f32 %v8973_v29, %v8973_v29  ;;  %6209 = vrsqrt.f32 %v3000_v40  ;;  %v2998_v62 = vadd.f32 1e-05, %v2966_v7 }
 0x2d0   : > { %v2730_v0 = vpop.xlane.xlu1 %2729  ;;  %v2937_v14 = vsub.f32 %v2873_v44, %v2905_v30  ;;  %v3124_v30 = vmul.f32 %v3092_v31, %v8908_v21 }
 0x2d1   : > { %v2874_v19 = vmul.f32 0.0012755102, %v2730_v0  ;;  %v2231_v56 = vpop.xlane.xlu0 %2230  ;;  %3207 = vrot.lane.b32.xlu0 %v3129_v20, %s6253_s14 }
 0x2d2   : > { %v8987_v1 = vmul.f32 0.0012755102, %v2231_v56  ;;  %3201 = vrot.lane.b32.xlu1 %v3126_v47, %s6253_s14  ;;  %v2969_v2 = vmax.f32 %v2937_v14, 0.0 }
 0x2d3   : > { %v2938_v39 = vsub.f32 %v2874_v19, %v2906_v52  ;;  %v2940_v19 = vsub.f32 %v2876_v37, %v2908_v4  ;;  %v6206_v52 = vpop.eup %6205 }
 0x2d4   : > { %v2240_v51 = vpop.xlane.xlu1 %2239  ;;  %v2911_v20 = vmul.f32 %v8987_v1, %v8987_v1  ;;  %v3001_v21 = vadd.f32 1e-05, %v2969_v2 }
 0x2d5   : > { %v2970_v0 = vmax.f32 %v2938_v39, 0.0  ;;  %v2775_v48 = vpop.xlane.xlu0 %2774  ;;  %v8995_v47 = vmul.f32 0.0012755102, %v2240_v51  ;;  %v2972_v14 = vmax.f32 %v2940_v19, 0.0 }
 0x2d6   : > { %v2879_v56 = vmul.f32 0.0012755102, %v2775_v48  ;;  %3354 = vperm.xlu1 %6090, %v3092_v31  }
 0x2d7   : > { %v3002_v44 = vadd.f32 1e-05, %v2970_v0  ;;  %v2912_v51 = vmul.f32 %v8995_v47, %v8995_v47 }
 0x2d8   : > { %v2943_v40 = vsub.f32 %v2879_v56, %v2911_v20  ;;  %v2784_v10 = vpop.xlane.xlu1 %2783  ;;  %v3095_v20 = vmul.f32 %v6206_v52, %v8999_v55 }
 0x2d9   : > { %6211 = vrsqrt.f32 %v3002_v44  ;;  %v2213_v39 = vpop.xlane.xlu0 %2212  ;;  %v2880_v35 = vmul.f32 0.0012755102, %v2784_v10 }
 0x2da   : > { %v2975_v48 = vmax.f32 %v2943_v40, 0.0  ;;  %v9006_v7 = vmul.f32 0.0012755102, %v2213_v39  ;;  %3197 = vrot.lane.b32.xlu1 %v3124_v30, %s6253_s14  ;;  %6213 = vrsqrt.f32 %v2998_v62  ;;  %v3127_v39 = vmul.f32 %v3095_v20, %v8930_v28 }
 0x2db   : > { %v6208_v37 = vpop.eup %6207  ;;  %v2944_v4 = vsub.f32 %v2880_v35, %v2912_v51  ;;  %v3004_v35 = vadd.f32 1e-05, %v2972_v14  ;;  %v9022_v51 = vld [vmem:[%s8843_s13 + $0x78] sm:$0xff] }
 0x2dc   : > { %v3007_v31 = vadd.f32 1e-05, %v2975_v48  ;;  %v2222_v0 = vpop.xlane.xlu1 %2221  ;;  %v9011_v56 = vmul.f32 %v6208_v37, %v9002_v58  ;;  %v2909_v10 = vmul.f32 %v9006_v7, %v9006_v7  ;;  %v6210_v48 = vpop.eup %6209 }
 0x2dd   : > { %v2757_v44 = vpop.xlane.xlu0 %2756  ;;  %v9013_v40 = vmul.f32 0.0012755102, %v2222_v0  ;;  %v2976_v19 = vmax.f32 %v2944_v4, 0.0 }
 0x2de   : > { %6215 = vrsqrt.f32 %v3007_v31  ;;  %v2877_v30 = vmul.f32 0.0012755102, %v2757_v44  ;;  %3369 = vperm.xlu1 %6090, %v3095_v20   ;;  %v3133_v62 = vmul.f32 %v9011_v56, %v8947_v26  ;;  %v9031_v20 = vld [vmem:[%s8843_s13 + $0x88] sm:$0xff] }
 0x2df   : > { %6217 = vrsqrt.f32 %v3001_v21  ;;  %v2910_v37 = vmul.f32 %v9013_v40, %v9013_v40  ;;  %v3098_v21 = vmul.f32 %v6210_v48, %v9022_v51  ;;  %v3008_v4 = vadd.f32 1e-05, %v2976_v19 }
 0x2e0   : > { %v2941_v2 = vsub.f32 %v2877_v30, %v2909_v10  ;;  %3215 = vrot.lane.b32.xlu0 %v3133_v62, %s6253_s14  ;;  %v2766_v52 = vpop.xlane.xlu1 %2765  ;;  %6219 = vrsqrt.f32 %v3004_v35 }
 0x2e1   : > { %v2878_v31 = vmul.f32 0.0012755102, %v2766_v52  ;;  %v2267_v0 = vpop.xlane.xlu0 %2266  ;;  %v3130_v48 = vmul.f32 %v3098_v21, %v8940_v23 }
 0x2e2   : > { %v2973_v44 = vmax.f32 %v2941_v2, 0.0  ;;  %v9026_v26 = vmul.f32 0.0012755102, %v2267_v0  ;;  %3203 = vrot.lane.b32.xlu1 %v3127_v39, %s6253_s14 }
 0x2e3   : > { %v2942_v14 = vsub.f32 %v2878_v31, %v2910_v37 }
 0x2e4   : > { %v3005_v10 = vadd.f32 1e-05, %v2973_v44  ;;  %v2276_v28 = vpop.xlane.xlu1 %2275  ;;  %v2915_v2 = vmul.f32 %v9026_v26, %v9026_v26 }
 0x2e5   : > { %v2974_v30 = vmax.f32 %v2942_v14, 0.0  ;;  %v2811_v62 = vpop.xlane.xlu0 %2810  ;;  %v9033_v22 = vmul.f32 0.0012755102, %v2276_v28 }
 0x2e6   : > { %v6212_v52 = vpop.eup %6211  ;;  %6221 = vrsqrt.f32 %v3005_v10  ;;  %v2883_v39 = vmul.f32 0.0012755102, %v2811_v62  ;;  %3384 = vperm.xlu1 %6090, %v3098_v21   ;;  %v9046_v62 = vld [vmem:[%s8843_s13 + $0x68] sm:$0xff] }
 0x2e7   : > { %v9038_v35 = vmul.f32 %v6212_v52, %v9031_v20  ;;  %v6214_v19 = vpop.eup %6213  ;;  %6223 = vrsqrt.f32 %v3008_v4  ;;  %v3006_v37 = vadd.f32 1e-05, %v2974_v30  ;;  %v2916_v44 = vmul.f32 %v9033_v22, %v9033_v22 }
 0x2e8   : > { %v2947_v31 = vsub.f32 %v2883_v39, %v2915_v2  ;;  %v2820_v0 = vpop.xlane.xlu1 %2819  ;;  %v3096_v2 = vmul.f32 %v6214_v19, %v9046_v62 }
 0x2e9   : > { %12934 = vst [vmem:[#allocation152_spill] sm:$0xff] %v9038_v35  ;;  %v2249_v14 = vpop.xlane.xlu0 %2248  ;;  %v2884_v10 = vmul.f32 0.0012755102, %v2820_v0  ;;  %v3132_v28 = vmul.f32 %v9038_v35, %v8973_v29  ;;  %6225 = vrsqrt.f32 %v3006_v37 }
 0x2ea   : > { %v2979_v52 = vmax.f32 %v2947_v31, 0.0  ;;  %v9051_v3 = vmul.f32 0.0012755102, %v2249_v14  ;;  %3209 = vrot.lane.b32.xlu1 %v3130_v48, %s6253_s14  ;;  %v9062_v14 = vld [vmem:[%s8843_s13 + $0x80] sm:$0xff] }
 0x2eb   : > { %v6216_v23 = vpop.eup %6215  ;;  %v2948_v21 = vsub.f32 %v2884_v10, %v2916_v44  ;;  %3213 = vrot.lane.b32.xlu0 %v3132_v28, %s6253_s14  ;;  %12935 = vst [vmem:[#allocation222_spill] sm:$0xff] %v9062_v14  ;;  %v3128_v28 = vmul.f32 %v3096_v2, %v8962_v9 }
 0x2ec   : > { %v3011_v4 = vadd.f32 1e-05, %v2979_v52  ;;  %v2258_v30 = vpop.xlane.xlu1 %2257  ;;  %v9057_v29 = vmul.f32 %v6216_v23, %v9049_v5  ;;  %v6218_v39 = vpop.eup %6217  ;;  %v2913_v48 = vmul.f32 %v9051_v3, %v9051_v3 }
 0x2ed   : > { %v2980_v0 = vmax.f32 %v2948_v21, 0.0  ;;  %v2793_v35 = vpop.xlane.xlu0 %2792  ;;  %v9059_v31 = vmul.f32 0.0012755102, %v2258_v30  ;;  %v9071_v23 = vmul.f32 %v6218_v39, %v9062_v14  ;;  %v6220_v21 = vpop.eup %6219 }
 0x2ee   : > { %6227 = vrsqrt.f32 %v3011_v4  ;;  %v2881_v37 = vmul.f32 0.0012755102, %v2793_v35  ;;  %3374 = vperm.xlu1 %6090, %v3096_v2   ;;  %v3137_v19 = vmul.f32 %v9057_v29, %v8987_v1  ;;  %v9079_v1 = vld [vmem:[%s8843_s13 + $0x98] sm:$0xff] }
 0x2ef   : > { %v3012_v44 = vadd.f32 1e-05, %v2980_v0  ;;  %12936 = vst [vmem:[#allocation223_spill] sm:$0xff] %v9071_v23  ;;  %v2914_v4 = vmul.f32 %v9059_v31, %v9059_v31  ;;  %v3131_v39 = vmul.f32 %v9071_v23, %v8971_v25 }
 0x2f0   : > { %v2945_v10 = vsub.f32 %v2881_v37, %v2913_v48  ;;  %3223 = vrot.lane.b32.xlu0 %v3137_v19, %s6253_s14  ;;  %v2802_v52 = vpop.xlane.xlu1 %2801  ;;  %v9088_v19 = vmul.f32 %v6220_v21, %v9079_v1 }
 0x2f1   : > { %6229 = vrsqrt.f32 %v3012_v44  ;;  %v2882_v35 = vmul.f32 0.0012755102, %v2802_v52  ;;  %v2285_v30 = vpop.xlane.xlu0 %2284 }
 0x2f2   : > { %v2977_v0 = vmax.f32 %v2945_v10, 0.0  ;;  %3205 = vrot.lane.b32.xlu1 %v3128_v28, %s6253_s14  ;;  %12937 = vst [vmem:[#allocation224_spill] sm:$0xff] %v9088_v19  ;;  %v9091_v10 = vld [vmem:[%s8843_s13 + $0xb8] sm:$0xff]  ;;  %v9093_v28 = vmul.f32 0.0012755102, %v2285_v30  ;;  %v3134_v21 = vmul.f32 %v9088_v19, %v8977_v63 }
 0x2f3   : > { %v6222_v9 = vpop.eup %6221  ;;  %v2946_v2 = vsub.f32 %v2882_v35, %v2914_v4 }
 0x2f4   : > { %v3009_v48 = vadd.f32 1e-05, %v2977_v0  ;;  %v9085_v37 = vmul.f32 %v6222_v9, %v9076_v33  ;;  %v6224_v44 = vpop.eup %6223  ;;  %v2294_v35 = vpop.xlane.xlu1 %2293 }
 0x2f5   : > { %v2978_v52 = vmax.f32 %v2946_v2, 0.0  ;;  %v2303_v13 = vpop.xlane.xlu0 %2302  ;;  %v9102_v0 = vmul.f32 %v6224_v44, %v9091_v10  ;;  %v9105_v2 = vld [vmem:[%s8843_s13 + $0xd0] sm:$0xff] }
 0x2f6   : > { %6231 = vrsqrt.f32 %v3009_v48  ;;  %3211 = vrot.lane.b32.xlu1 %v3131_v39, %s6253_s14  ;;  %v3135_v25 = vmul.f32 %v9085_v37, %v9006_v7  ;;  %v6226_v9 = vpop.eup %6225  ;;  %v9108_v48 = vld [vmem:[%s8843_s13 + $0xa8] sm:$0xff]  ;;  %v2917_v7 = vmul.f32 %v9093_v28, %v9093_v28  ;;  %v2343_v39 = vmul.f32 0.0012755102, %v2303_v13 }
 0x2f7   : > { %v3010_v4 = vadd.f32 1e-05, %v2978_v52  ;;  %12938 = vst [vmem:[#allocation225_spill] sm:$0xff] %v9108_v48  ;;  %v3138_v44 = vmul.f32 %v9102_v0, %v8995_v47 }
 0x2f8   : > { %3219 = vrot.lane.b32.xlu0 %v3135_v25, %s6253_s14  ;;  %v2919_v13 = vmul.f32 %v2343_v39, %v2343_v39  ;;  %v2312_v49 = vpop.xlane.xlu1 %2311 }
 0x2f9   : > { %6233 = vrsqrt.f32 %v3010_v4  ;;  %v2829_v30 = vpop.xlane.xlu0 %2828  ;;  %v9119_v4 = vmul.f32 %v6226_v9, %v9108_v48 }
 0x2fa   : > { %v2885_v52 = vmul.f32 0.0012755102, %v2829_v30  ;;  %3217 = vrot.lane.b32.xlu1 %v3134_v21, %s6253_s14 }
 0x2fb   : > { %v6228_v25 = vpop.eup %6227  ;;  %v3136_v9 = vmul.f32 %v9119_v4, %v9013_v40  ;;  %v2342_v40 = vmul.f32 0.0012755102, %v2294_v35 }
 0x2fc   : > { %v2949_v63 = vsub.f32 %v2885_v52, %v2917_v7  ;;  %v9116_v23 = vmul.f32 %v6228_v25, %v9105_v2  ;;  %v2838_v48 = vpop.xlane.xlu1 %2837 }
 0x2fd   : > { %v2847_v19 = vpop.xlane.xlu0 %2846 }
 0x2fe   : > { %v6230_v27 = vpop.eup %6229  ;;  %v2981_v30 = vmax.f32 %v2949_v63, 0.0  ;;  %v2887_v21 = vmul.f32 0.0012755102, %v2847_v19  ;;  %3225 = vrot.lane.b32.xlu1 %v3138_v44, %s6253_s14  ;;  %v3141_v47 = vmul.f32 %v9116_v23, %v9026_v26 }
 0x2ff   : > { %v3110_v25 = vmul.f32 %v6230_v27, %v9122_v12  ;;  %v9147_v12 = vld [vmem:[%s8843_s13 + $0xe0] sm:$0xff] }
 0x300   : > { %v3013_v7 = vadd.f32 1e-05, %v2981_v30  ;;  %v2951_v52 = vsub.f32 %v2887_v21, %v2919_v13  ;;  %3231 = vrot.lane.b32.xlu0 %v3141_v47, %s6253_s14  ;;  %v9138_v30 = vld [vmem:[%s8843_s13 + $0xc8] sm:$0xff] }
 0x301   : > { %v3142_v26 = vmul.f32 %v3110_v25, %v9033_v22 }
 0x302   : > { %6235 = vrsqrt.f32 %v3013_v7  ;;  %v2983_v63 = vmax.f32 %v2951_v52, 0.0  ;;  %3221 = vrot.lane.b32.xlu1 %v3136_v9, %s6253_s14  ;;  %v2886_v7 = vmul.f32 0.0012755102, %v2838_v48  ;;  %v2856_v52 = vpop.xlane.xlu1 %2855  ;;  %v2918_v9 = vmul.f32 %v2342_v40, %v2342_v40  ;;  %v9152_v48 = vld [vmem:[%s8843_s13 + $0xf0] sm:$0xff] }
 0x303   : > { %v6232_v19 = vpop.eup %6231 }
 0x304   : > { %v3015_v44 = vadd.f32 1e-05, %v2983_v63  ;;  %v3107_v13 = vmul.f32 %v6232_v19, %v9132_v32  ;;  %v2344_v63 = vmul.f32 0.0012755102, %v2312_v49  ;;  %v2950_v19 = vsub.f32 %v2886_v7, %v2918_v9 }
 0x306   : > { %v6234_v21 = vpop.eup %6233  ;;  %6237 = vrsqrt.f32 %v3015_v44  ;;  %3233 = vrot.lane.b32.xlu1 %v3142_v26, %s6253_s14  ;;  %v3139_v27 = vmul.f32 %v3107_v13, %v9051_v3  ;;  %v2888_v44 = vmul.f32 0.0012755102, %v2856_v52  ;;  %v2920_v3 = vmul.f32 %v2344_v63, %v2344_v63 }
 0x307   : > { %v3108_v47 = vmul.f32 %v6234_v21, %v9138_v30  ;;  %v2982_v21 = vmax.f32 %v2950_v19, 0.0  ;;  %v9170_v19 = vld [vmem:[%s8843_s13 + $0xf8] sm:$0xff] }
 0x308   : > { %3227 = vrot.lane.b32.xlu0 %v3139_v27, %s6253_s14  ;;  %v2952_v27 = vsub.f32 %v2888_v44, %v2920_v3 }
 0x309   : > { %v3140_v22 = vmul.f32 %v3108_v47, %v9059_v31  ;;  %v3014_v7 = vadd.f32 1e-05, %v2982_v21 }
 0x30b   : > { %3229 = vrot.lane.b32.xlu1 %v3140_v22, %s6253_s14  ;;  %v2984_v22 = vmax.f32 %v2952_v27, 0.0  ;;  %6239 = vrsqrt.f32 %v3014_v7 }
 0x30f   : > { %v6236_v26 = vpop.eup %6235  ;;  %3324 = vperm.xlu1 %6090, %v8865_v61   ;;  %v3016_v61 = vadd.f32 1e-05, %v2984_v22 }
 0x310   : > { %v3111_v35 = vmul.f32 %v6236_v26, %v9147_v12 }
 0x311   : > { %6241 = vrsqrt.f32 %v3016_v61 }
 0x312   : > { %v3143_v31 = vmul.f32 %v3111_v35, %v9093_v28  ;;  %v3184_v28 = vpop.permute.xlu0 %3183 }
 0x313   : > { %v6238_v32 = vpop.eup %6237  ;;  %3309 = vperm.xlu1 %6090, %v8879_v15   ;;  %v9163_v15 = vld [vmem:[%s8843_s13 + $0xe8] sm:$0xff] }
 0x314   : > { %3235 = vrot.lane.b32.xlu0 %v3143_v31, %s6253_s14  ;;  %v3113_v49 = vmul.f32 %v6238_v32, %v9152_v48 }
 0x316   : > { %v3145_v52 = vmul.f32 %v3113_v49, %v2343_v39 }
 0x317   : > { %3314 = vperm.xlu1 %6090, %v8889_v11   ;;  %v9166_v11 = vpop.permute.xlu1 %3185 }
 0x318   : > { %3239 = vrot.lane.b32.xlu0 %v3145_v52, %s6253_s14  ;;  %v6240_v32 = vpop.eup %6239 }
 0x319   : > { %v3112_v39 = vmul.f32 %v6240_v32, %v9163_v15 }
 0x31b   : > { %3449 = vperm.xlu1 %6090, %v3111_v35   ;;  %v3144_v44 = vmul.f32 %v3112_v39, %v2342_v40  ;;  %v3277_v35 = vsub.f32 %v8846_v34, %v3184_v28 }
 0x31c   : > { %3319 = vperm.xlu0 %6089, %v8853_v46   ;;  %v9172_v46 = vpop.permute.xlu0 %3179 }
 0x31e   : > { %v6242_v9 = vpop.eup %6241 }
 0x31f   : > { %3444 = vperm.xlu1 %6090, %v3110_v25   ;;  %v3114_v25 = vmul.f32 %v6242_v9, %v9170_v19 }
 0x320   : > { %3459 = vperm.xlu0 %6089, %v3113_v49  }
 0x321   : > { %v3146_v3 = vmul.f32 %v3114_v25, %v2344_v63 }
 0x323   : > { %3429 = vperm.xlu1 %6090, %v3107_v13  }
 0x324   : > { %3439 = vperm.xlu0 %6089, %v9116_v23   ;;  %v3182_v23 = vpop.permute.xlu1 %3181 }
 0x325   : > { %v3276_v31 = vsub.f32 %v8882_v60, %v3182_v23 }
 0x327   : > { %3434 = vperm.xlu1 %6090, %v3108_v47   ;;  %v12502_v47 = vmov 1  }
 0x328   : > { %3419 = vperm.xlu0 %6089, %v9057_v29  }
 0x329   : > { %v9176_v13 = vpop.permute.xlu0 %3339 }
 0x32b   : > { %3454 = vperm.xlu1 %6090, %v3112_v39  }
 0x32c   : > { %3399 = vperm.xlu0 %6089, %v9011_v56  }
 0x32d   : > { %v3192_v56 = vpop.permute.xlu0 %3191 }
 0x32e   : > { %v3281_v7 = vsub.f32 %v8895_v17, %v3192_v56 }
 0x32f   : > { %3464 = vperm.xlu1 %6090, %v3114_v25  }
 0x330   : > { %6094 = vset.pattern.permute.xlu0 %v12502_v47 }
 0x331   : > { %v9179_v29 = vpop.permute.xlu1 %3329  ;;  %v3188_v27 = vpop.permute.xlu0 %3187 }
 0x333   : > { %3237 = vrot.lane.b32.xlu1 %v3144_v44, %s6253_s14 }
 0x334   : > { %6091 = vset.pattern.permute.xlu1 %v12502_v47 }
 0x335   : > { %v9183_v26 = vpop.permute.xlu1 %3344 }
 0x337   : > { %3241 = vrot.lane.b32.xlu1 %v3146_v3, %s6253_s14 }
 0x339   : > { %v3194_v21 = vpop.permute.xlu1 %3193  ;;  %v9190_v40 = vpop.permute.xlu0 %3359 }
 0x33b   : > { %3703 = vperm.xlu1 %6091, %v3277_v35  }
 0x33d   : > { %v9188_v49 = vpop.permute.xlu1 %3334  ;;  %v3200_v61 = vpop.permute.xlu0 %3199 }
 0x33e   : > { %v3285_v34 = vsub.f32 %v8928_v16, %v3200_v61 }
 0x33f   : > { %3698 = vperm.xlu1 %6091, %v3276_v31  }
 0x341   : > { %v3190_v22 = vpop.permute.xlu1 %3189  ;;  %v3196_v60 = vpop.permute.xlu0 %3195 }
 0x342   : > { %v3280_v63 = vsub.f32 %v8935_v57, %v3190_v22 }
 0x343   : > { %3723 = vperm.xlu1 %6091, %v3281_v7  }
 0x345   : > { %v9194_v52 = vpop.permute.xlu1 %3349 }
 0x347   : > { %3718 = vperm.xlu1 %6091, %v3280_v63  }
 0x348   : > { %v9199_v39 = vpop.permute.xlu0 %3379 }
 0x349   : > { %v9197_v32 = vpop.permute.xlu1 %3364 }
 0x34b   : > { %3743 = vperm.xlu1 %6091, %v3285_v34  }
 0x34c   : > { %v3208_v25 = vpop.permute.xlu0 %3207 }
 0x34d   : > { %v3202_v28 = vpop.permute.xlu1 %3201  ;;  %v3289_v44 = vsub.f32 %v8960_v59, %v3208_v25 }
 0x34e   : > { %v3286_v63 = vsub.f32 %v8965_v41, %v3202_v28  ;;  %v3279_v28 = vsub.f32 %v8911_v45, %v3188_v27  ;;  %v3275_v45 = vsub.f32 %v8871_v6, %v9172_v46  ;;  %v12943_v46 = vld [vmem:[#allocation29_spill] sm:$0xff] }
 0x351   : > { %v9201_v9 = vpop.permute.xlu1 %3354 }
 0x352   : > { %v9213_v22 = vpop.permute.xlu0 %3215 }
 0x355   : > { %v3198_v17 = vpop.permute.xlu1 %3197 }
 0x356   : > { %v3284_v23 = vsub.f32 %v8985_v18, %v3198_v17  ;;  %v12942_v17 = vmov 0  }
 0x358   : > { %3738 = vperm.xlu1 %6091, %v3284_v23   ;;  %v3282_v23 = vsub.f32 %v8922_v42, %v3194_v21 }
 0x359   : > { %v9204_v57 = vpop.permute.xlu1 %3369 }
 0x35c   : > { %3763 = vperm.xlu1 %6091, %v3289_v44  }
 0x35d   : > { %v3204_v16 = vpop.permute.xlu1 %3203  ;;  %v9217_v61 = vpop.permute.xlu0 %3213 }
 0x35e   : > { %v3287_v7 = vsub.f32 %v8999_v55, %v3204_v16 }
 0x361   : > { %v9207_v3 = vpop.permute.xlu1 %3384 }
 0x362   : > { %v3224_v41 = vpop.permute.xlu0 %3223 }
 0x363   : > { %v3297_v42 = vsub.f32 %v9049_v5, %v3224_v41  ;;  %v12949_v41 = vld [vmem:[#allocation54_spill] sm:$0xff] }
 0x365   : > { %v3210_v56 = vpop.permute.xlu1 %3209 }
 0x366   : > { %v3290_v35 = vsub.f32 %v9022_v51, %v3210_v56  ;;  %v3283_v51 = vsub.f32 %v8945_v8, %v3196_v60  ;;  %v9257_v56 = vmul.f32 %v9176_v13, %v12943_v46  ;;  %v12960_v46 = vld [vmem:[#allocation33_spill] sm:$0xff] }
 0x368   : > { %3768 = vperm.xlu0 %6094, %v3290_v35   ;;  %v12944_v35 = vld [vmem:[#allocation62_spill] sm:$0xff] }
 0x369   : > { %v9210_v31 = vpop.permute.xlu1 %3374 }
 0x36a   : > { %v9231_v25 = vpop.permute.xlu0 %3219 }
 0x36c   : > { %3753 = vperm.xlu0 %6094, %v3287_v7   ;;  %v9263_v7 = vmul.f32 %v9176_v13, %v12944_v35  ;;  %v12962_v35 = vld [vmem:[#allocation66_spill] sm:$0xff] }
 0x36d   : > { %v3206_v18 = vpop.permute.xlu1 %3205 }
 0x36e   : > { %v3288_v59 = vsub.f32 %v9046_v62, %v3206_v18 }
 0x370   : > { %3748 = vperm.xlu0 %6094, %v3286_v63   ;;  %3758 = vperm.xlu1 %6091, %v3288_v59   ;;  %v12946_v63 = vld [vmem:[#allocation60_spill] sm:$0xff]  ;;  %v9275_v59 = vmul.f32 %v9176_v13, %v7630_v38 }
 0x371   : > { %v9219_v34 = vpop.permute.xlu1 %3211 }
 0x372   : > { %12941 = vst [vmem:[#allocation228_spill] sm:$0xff] %v9219_v34  ;;  %v3232_v60 = vpop.permute.xlu0 %3231  ;;  %v13139_v34 = vld [vmem:[#allocation20_spill] sm:$0xff] }
 0x374   : > { %3733 = vperm.xlu0 %6094, %v3283_v51   ;;  %6092 = vset.pattern.permute.xlu1 %v12942_v17  ;;  %v12947_v51 = vld [vmem:[#allocation21_spill] sm:$0xff] }
 0x375   : > { %3424 = vperm.xlu1 %6092, %v9102_v0   ;;  %v9224_v55 = vpop.permute.xlu1 %3217  ;;  %v3278_v0 = vsub.f32 %v8856_v43, %v9166_v11 }
 0x378   : > { %3728 = vperm.xlu0 %6094, %v3282_v23   ;;  %v9279_v23 = vmul.f32 %v9179_v29, %v12947_v51 }
 0x379   : > { %3409 = vperm.xlu1 %6092, %v9085_v37   ;;  %v9228_v62 = vpop.permute.xlu1 %3225 }
 0x37a   : > { %v9244_v21 = vpop.permute.xlu0 %3227  ;;  %12948 = vst [vmem:[#allocation29_spill] sm:$0xff] %v9279_v23  ;;  %v12992_v23 = vld [vmem:[#allocation56_spill] sm:$0xff] }
 0x37c   : > { %3713 = vperm.xlu0 %6094, %v3279_v28   ;;  %v9283_v28 = vmul.f32 %v9179_v29, %v12949_v41  ;;  %v12966_v41 = vld [vmem:[#allocation193_spill] sm:$0xff] }
 0x37d   : > { %3414 = vperm.xlu1 %6092, %v9119_v4   ;;  %v9234_v8 = vpop.permute.xlu1 %3221  ;;  %v3301_v4 = vsub.f32 %v9105_v2, %v3232_v60  ;;  %v12951_v60 = vld [vmem:[#allocation191_spill] sm:$0xff] }
 0x37e   : > { %12950 = vst [vmem:[#allocation62_spill] sm:$0xff] %v9283_v28  ;;  %v12990_v28 = vld [vmem:[#allocation23_spill] sm:$0xff] }
 0x380   : > { %3708 = vperm.xlu0 %6094, %v3278_v0   ;;  %v9287_v0 = vmul.f32 %v9176_v13, %v7602_v24 }
 0x381   : > { %6093 = vset.pattern.permute.xlu1 %v12502_v47  ;;  %v9240_v37 = vpop.permute.xlu1 %3233 }
 0x382   : > { %3803 = vperm.xlu1 %6093, %v3297_v42   ;;  %v9291_v42 = vmul.f32 %v12951_v60, %v9176_v13  ;;  %v9323_v60 = vmul.f32 %v9179_v29, %v12966_v41 }
 0x384   : > { %3693 = vperm.xlu0 %6094, %v3275_v45   ;;  %v12952_v45 = vld [vmem:[#allocation19_spill] sm:$0xff] }
 0x385   : > { %v3230_v27 = vpop.permute.xlu1 %3229  ;;  %v9295_v38 = vmul.f32 %v9179_v29, %v12952_v45 }
 0x386   : > { %v9247_v44 = vpop.permute.xlu0 %3235  ;;  %3823 = vperm.xlu1 %6093, %v3301_v4   ;;  %v3300_v5 = vsub.f32 %v9138_v30, %v3230_v27  ;;  %v12945_v30 = vld [vmem:[#allocation27_spill] sm:$0xff]  ;;  %v12954_v4 = vld [vmem:[#allocation52_spill] sm:$0xff] }
 0x387   : > { %v9267_v18 = vmul.f32 %v9176_v13, %v12945_v30  ;;  %12953 = vst [vmem:[#allocation27_spill] sm:$0xff] %v9295_v38  ;;  %v9299_v27 = vmul.f32 %v9179_v29, %v12954_v4  ;;  %v9315_v30 = vmul.f32 %v9183_v26, %v12962_v35  ;;  %v12968_v4 = vld [vmem:[#allocation64_spill] sm:$0xff]  ;;  %v12988_v38 = vld [vmem:[#allocation58_spill] sm:$0xff] }
 0x388   : > { %v12972_v35 = vld [vmem:[#allocation132_spill] sm:$0xff] }
 0x389   : > { %12955 = vst [vmem:[#allocation60_spill] sm:$0xff] %v9299_v27  ;;  %12963 = vst [vmem:[#allocation19_spill] sm:$0xff] %v9315_v30  ;;  %v9337_v47 = vmul.f32 %v9183_v26, %v12972_v35  ;;  %v12987_v27 = vld [vmem:[#allocation199_spill] sm:$0xff] }
 0x38a   : > { %v3240_v43 = vpop.permute.xlu0 %3239  ;;  %3818 = vperm.xlu1 %6093, %v3300_v5   ;;  %v9250_v11 = vpop.permute.xlu1 %3324  ;;  %v12956_v5 = vld [vmem:[#allocation118_spill] sm:$0xff] }
 0x38b   : > { %v3305_v16 = vsub.f32 %v9152_v48, %v3240_v43  ;;  %v9271_v48 = vmul.f32 %v9176_v13, %v12946_v63  ;;  %v9303_v43 = vmul.f32 %v9179_v29, %v12956_v5  ;;  %v9311_v13 = vmul.f32 %v9183_v26, %v12960_v46  ;;  %v12964_v63 = vld [vmem:[#allocation31_spill] sm:$0xff]  ;;  %12967 = vst [vmem:[#allocation118_spill] sm:$0xff] %v9323_v60  ;;  %v12978_v60 = vld [vmem:[#allocation78_spill] sm:$0xff] }
 0x38c   : > { %v9319_v51 = vmul.f32 %v9183_v26, %v12964_v63  ;;  %v9329_v5 = vmul.f32 %v9183_v26, %v12968_v4  ;;  %12973 = vst [vmem:[#allocation66_spill] sm:$0xff] %v9337_v47  ;;  %v12974_v63 = vld [vmem:[#allocation195_spill] sm:$0xff]  ;;  %v9349_v4 = vmul.f32 %v9190_v40, %v12978_v60  ;;  %v12984_v47 = vld [vmem:[#allocation25_spill] sm:$0xff] }
 0x38d   : > { %12957 = vst [vmem:[#allocation21_spill] sm:$0xff] %v9303_v43  ;;  %12961 = vst [vmem:[#allocation191_spill] sm:$0xff] %v9311_v13  ;;  %v12980_v43 = vld [vmem:[#allocation43_spill] sm:$0xff] }
 0x38e   : > { %3843 = vperm.xlu1 %6093, %v3305_v16   ;;  %v9253_v6 = vpop.permute.xlu1 %3309  ;;  %v12958_v16 = vld [vmem:[#allocation116_spill] sm:$0xff]  ;;  %12965 = vst [vmem:[#allocation52_spill] sm:$0xff] %v9319_v51  ;;  %12979 = vst [vmem:[#allocation64_spill] sm:$0xff] %v9349_v4 }
 0x38f   : > { %v9307_v24 = vmul.f32 %v9179_v29, %v12958_v16  ;;  %12969 = vst [vmem:[#allocation116_spill] sm:$0xff] %v9329_v5  ;;  %v12970_v16 = vld [vmem:[#allocation136_spill] sm:$0xff]  ;;  %v12976_v29 = vld [vmem:[#allocation45_spill] sm:$0xff]  ;;  %v12994_v5 = vld [vmem:[#allocation123_spill] sm:$0xff] }
 0x390   : > { %v9333_v46 = vmul.f32 %v9183_v26, %v12970_v16  ;;  %v9345_v41 = vmul.f32 %v9190_v40, %v12976_v29  ;;  %v9353_v16 = vmul.f32 %v9190_v40, %v12980_v43  ;;  %v9373_v43 = vmul.f32 %v12987_v27, %v9190_v40 }
 0x391   : > { %12959 = vst [vmem:[#allocation54_spill] sm:$0xff] %v9307_v24  ;;  %v9341_v24 = vmul.f32 %v12974_v63, %v9183_v26  ;;  %v9361_v26 = vmul.f32 %v9188_v49, %v12984_v47  ;;  %v12985_v63 = vld [vmem:[#allocation156_spill] sm:$0xff]  ;;  %v9381_v47 = vmul.f32 %v9188_v49, %v12990_v28 }
 0x392   : > { %v9259_v2 = vpop.permute.xlu1 %3314  ;;  %12971 = vst [vmem:[#allocation33_spill] sm:$0xff] %v9333_v46  ;;  %12977 = vst [vmem:[#allocation193_spill] sm:$0xff] %v9345_v41  ;;  %v12982_v46 = vld [vmem:[#allocation76_spill] sm:$0xff]  ;;  %v9365_v29 = vmul.f32 %v9190_v40, %v12985_v63  ;;  %v9385_v63 = vmul.f32 %v9188_v49, %v12992_v23  ;;  %v13002_v23 = vld [vmem:[#allocation197_spill] sm:$0xff] }
 0x393   : > { %12975 = vst [vmem:[#allocation31_spill] sm:$0xff] %v9341_v24  ;;  %12981 = vst [vmem:[#allocation136_spill] sm:$0xff] %v9353_v16  ;;  %v9357_v35 = vmul.f32 %v9190_v40, %v12982_v46  ;;  %v12986_v24 = vld [vmem:[#allocation154_spill] sm:$0xff]  ;;  %v9377_v46 = vmul.f32 %v9188_v49, %v12988_v38  ;;  %v13000_v28 = vld [vmem:[#allocation120_spill] sm:$0xff] }
 0x394   : > { %v9369_v60 = vmul.f32 %v9190_v40, %v12986_v24  ;;  %12991 = vst [vmem:[#allocation45_spill] sm:$0xff] %v9381_v47  ;;  %12993 = vst [vmem:[#allocation78_spill] sm:$0xff] %v9385_v63  ;;  %v9389_v24 = vmul.f32 %v9188_v49, %v12994_v5  ;;  %v12996_v40 = vld [vmem:[#allocation37_spill] sm:$0xff]  ;;  %v12998_v38 = vld [vmem:[#allocation70_spill] sm:$0xff]  ;;  %v9403_v13 = vmul.f32 %v9188_v49, %v13000_v28 }
 0x395   : > { %12983 = vst [vmem:[#allocation132_spill] sm:$0xff] %v9357_v35  ;;  %12989 = vst [vmem:[#allocation195_spill] sm:$0xff] %v9377_v46  ;;  %v9395_v27 = vmul.f32 %v9194_v52, %v12996_v40  ;;  %v9399_v30 = vmul.f32 %v9194_v52, %v12998_v38  ;;  %v9407_v35 = vmul.f32 %v9188_v49, %v13002_v23  ;;  %v13004_v5 = vld [vmem:[#allocation35_spill] sm:$0xff]  ;;  %v13006_v16 = vld [vmem:[#allocation68_spill] sm:$0xff] }
 0x396   : > { %v9325_v45 = vpop.permute.xlu1 %3449  ;;  %12995 = vst [vmem:[#allocation43_spill] sm:$0xff] %v9389_v24  ;;  %13001 = vst [vmem:[#allocation156_spill] sm:$0xff] %v9403_v13  ;;  %v9411_v24 = vmul.f32 %v9194_v52, %v13004_v5  ;;  %v9415_v40 = vmul.f32 %v9194_v52, %v13006_v16  ;;  %v13012_v13 = vld [vmem:[#allocation61_spill] sm:$0xff]  ;;  %v13014_v23 = vld [vmem:[#allocation94_spill] sm:$0xff] }
 0x397   : > { %12997 = vst [vmem:[#allocation76_spill] sm:$0xff] %v9395_v27  ;;  %12999 = vst [vmem:[#allocation25_spill] sm:$0xff] %v9399_v30  ;;  %v13008_v27 = vld [vmem:[#allocation144_spill] sm:$0xff]  ;;  %v9427_v49 = vmul.f32 %v9199_v39, %v13012_v13  ;;  %v9431_v5 = vmul.f32 %v9199_v39, %v13014_v23  ;;  %v13151_v63 = vld [vmem:[#allocation133_spill] sm:$0xff] }
 0x398   : > { %13003 = vst [vmem:[#allocation154_spill] sm:$0xff] %v9407_v35  ;;  %13005 = vst [vmem:[#allocation199_spill] sm:$0xff] %v9411_v24  ;;  %v9419_v38 = vmul.f32 %v9194_v52, %v13008_v27  ;;  %v13010_v30 = vld [vmem:[#allocation140_spill] sm:$0xff]  ;;  %v13016_v24 = vld [vmem:[#allocation59_spill] sm:$0xff] }
 0x399   : > { %13007 = vst [vmem:[#allocation58_spill] sm:$0xff] %v9415_v40  ;;  %v9423_v28 = vmul.f32 %v9194_v52, %v13010_v30  ;;  %13013 = vst [vmem:[#allocation123_spill] sm:$0xff] %v9427_v49  ;;  %v9435_v16 = vmul.f32 %v9199_v39, %v13016_v24  ;;  %v13018_v40 = vld [vmem:[#allocation201_spill] sm:$0xff]  ;;  %v13024_v49 = vld [vmem:[#allocation82_spill] sm:$0xff] }
 0x39a   : > { %v9391_v51 = vpop.permute.xlu1 %3444  ;;  %13009 = vst [vmem:[#allocation23_spill] sm:$0xff] %v9419_v38  ;;  %13015 = vst [vmem:[#allocation37_spill] sm:$0xff] %v9431_v5  ;;  %v9439_v27 = vmul.f32 %v9194_v52, %v13018_v40  ;;  %v13020_v38 = vld [vmem:[#allocation92_spill] sm:$0xff]  ;;  %v9451_v23 = vmul.f32 %v9197_v32, %v13024_v49  ;;  %v13026_v5 = vld [vmem:[#allocation47_spill] sm:$0xff] }
 0x39b   : > { %13011 = vst [vmem:[#allocation56_spill] sm:$0xff] %v9423_v28  ;;  %13017 = vst [vmem:[#allocation70_spill] sm:$0xff] %v9435_v16  ;;  %v9443_v30 = vmul.f32 %v9199_v39, %v13020_v38  ;;  %v13022_v28 = vld [vmem:[#allocation49_spill] sm:$0xff]  ;;  %v9455_v24 = vmul.f32 %v9197_v32, %v13026_v5  ;;  %v13028_v52 = vld [vmem:[#allocation80_spill] sm:$0xff] }
 0x39c   : > { %13019 = vst [vmem:[#allocation120_spill] sm:$0xff] %v9439_v27  ;;  %v9447_v13 = vmul.f32 %v9197_v32, %v13022_v28  ;;  %13025 = vst [vmem:[#allocation68_spill] sm:$0xff] %v9451_v23  ;;  %v9461_v40 = vmul.f32 %v9197_v32, %v13028_v52  ;;  %v13030_v38 = vld [vmem:[#allocation172_spill] sm:$0xff]  ;;  %v13032_v28 = vld [vmem:[#allocation170_spill] sm:$0xff] }
 0x39d   : > { %13021 = vst [vmem:[#allocation197_spill] sm:$0xff] %v9443_v30  ;;  %13027 = vst [vmem:[#allocation144_spill] sm:$0xff] %v9455_v24  ;;  %v9465_v27 = vmul.f32 %v9199_v39, %v13030_v38  ;;  %v13034_v49 = vld [vmem:[#allocation207_spill] sm:$0xff]  ;;  %v13036_v5 = vld [vmem:[#allocation41_spill] sm:$0xff] }
 0x39e   : > { %13023 = vst [vmem:[#allocation35_spill] sm:$0xff] %v9447_v13  ;;  %v9457_v16 = vpop.permute.xlu1 %3429  ;;  %13029 = vst [vmem:[#allocation140_spill] sm:$0xff] %v9461_v40  ;;  %v9469_v13 = vmul.f32 %v9199_v39, %v13032_v28  ;;  %v9473_v23 = vmul.f32 %v13034_v49, %v9199_v39  ;;  %v9477_v24 = vmul.f32 %v9201_v9, %v13036_v5  ;;  %v13038_v30 = vld [vmem:[#allocation160_spill] sm:$0xff]  ;;  %v13040_v40 = vld [vmem:[#allocation158_spill] sm:$0xff] }
 0x39f   : > { %13031 = vst [vmem:[#allocation61_spill] sm:$0xff] %v9465_v27  ;;  %v9481_v52 = vmul.f32 %v9197_v32, %v13038_v30  ;;  %v9485_v38 = vmul.f32 %v9197_v32, %v13040_v40  ;;  %v13042_v27 = vld [vmem:[#allocation203_spill] sm:$0xff]  ;;  %v13044_v49 = vld [vmem:[#allocation74_spill] sm:$0xff]  ;;  %v13048_v30 = vld [vmem:[#allocation72_spill] sm:$0xff] }
 0x3a0   : > { %13033 = vst [vmem:[#allocation94_spill] sm:$0xff] %v9469_v13  ;;  %13035 = vst [vmem:[#allocation59_spill] sm:$0xff] %v9473_v23  ;;  %v9489_v28 = vmul.f32 %v13042_v27, %v9197_v32  ;;  %v9495_v23 = vmul.f32 %v9201_v9, %v13044_v49  ;;  %v13046_v5 = vld [vmem:[#allocation39_spill] sm:$0xff]  ;;  %v13050_v40 = vld [vmem:[#allocation53_spill] sm:$0xff] }
 0x3a1   : > { %13037 = vst [vmem:[#allocation201_spill] sm:$0xff] %v9477_v24  ;;  %13039 = vst [vmem:[#allocation92_spill] sm:$0xff] %v9481_v52  ;;  %v9499_v13 = vmul.f32 %v9201_v9, %v13046_v5  ;;  %v9503_v52 = vmul.f32 %v9201_v9, %v13048_v30  ;;  %v13052_v32 = vld [vmem:[#allocation151_spill] sm:$0xff]  ;;  %v13054_v39 = vld [vmem:[#allocation148_spill] sm:$0xff] }
 0x3a2   : > { %13041 = vst [vmem:[#allocation49_spill] sm:$0xff] %v9485_v38  ;;  %13043 = vst [vmem:[#allocation82_spill] sm:$0xff] %v9489_v28  ;;  %v9507_v38 = vmul.f32 %v9204_v57, %v13050_v40  ;;  %v9511_v27 = vmul.f32 %v9201_v9, %v13052_v32  ;;  %v9515_v49 = vmul.f32 %v9201_v9, %v13054_v39  ;;  %v13056_v28 = vld [vmem:[#allocation205_spill] sm:$0xff]  ;;  %v13058_v30 = vld [vmem:[#allocation86_spill] sm:$0xff] }
 0x3a3   : > { %13045 = vst [vmem:[#allocation47_spill] sm:$0xff] %v9495_v23  ;;  %13047 = vst [vmem:[#allocation80_spill] sm:$0xff] %v9499_v13  ;;  %v9519_v5 = vmul.f32 %v9201_v9, %v13056_v28  ;;  %v9521_v13 = vpop.permute.xlu1 %3434  ;;  %v13060_v40 = vld [vmem:[#allocation51_spill] sm:$0xff]  ;;  %v13062_v32 = vld [vmem:[#allocation84_spill] sm:$0xff]  ;;  %v9537_v39 = vmul.f32 %v9204_v57, %v12851_v50 }
 0x3a4   : > { %13049 = vst [vmem:[#allocation172_spill] sm:$0xff] %v9503_v52  ;;  %13051 = vst [vmem:[#allocation170_spill] sm:$0xff] %v9507_v38  ;;  %v9525_v52 = vmul.f32 %v9204_v57, %v13058_v30  ;;  %v9529_v38 = vmul.f32 %v9204_v57, %v13060_v40  ;;  %v9533_v23 = vmul.f32 %v9204_v57, %v13062_v32  ;;  %v13065_v28 = vld [vmem:[#allocation65_spill] sm:$0xff]  ;;  %v13067_v30 = vld [vmem:[#allocation162_spill] sm:$0xff]  ;;  %v3320_v32 = vpop.permute.xlu0 %3319 }
 0x3a5   : > { %13053 = vst [vmem:[#allocation207_spill] sm:$0xff] %v9511_v27  ;;  %13055 = vst [vmem:[#allocation41_spill] sm:$0xff] %v9515_v49  ;;  %v9543_v24 = vmul.f32 %v9207_v3, %v13065_v28  ;;  %v9551_v40 = vmul.f32 %v9204_v57, %v8341_v36  ;;  %v13130_v35 = vld [vmem:[#allocation22_spill] sm:$0xff]  ;;  %v13138_v49 = vld [vmem:[#allocation13_spill] sm:$0xff] }
 0x3a6   : > { %13057 = vst [vmem:[#allocation160_spill] sm:$0xff] %v9519_v5  ;;  %13059 = vst [vmem:[#allocation158_spill] sm:$0xff] %v9525_v52  ;;  %v9547_v52 = vmul.f32 %v9204_v57, %v13067_v30  ;;  %v13080_v57 = vld [vmem:[#allocation90_spill] sm:$0xff]  ;;  %v9719_v27 = vmul.f32 %v3320_v32, %v13138_v49  ;;  %v13146_v49 = vld [vmem:[#allocation221_spill] sm:$0xff] }
 0x3a7   : > { %13061 = vst [vmem:[#allocation203_spill] sm:$0xff] %v9529_v38  ;;  %13063 = vst [vmem:[#allocation74_spill] sm:$0xff] %v9533_v23  ;;  %v13070_v23 = vld [vmem:[#allocation98_spill] sm:$0xff]  ;;  %v13074_v38 = vld [vmem:[#allocation96_spill] sm:$0xff] }
 0x3a8   : > { %13064 = vst [vmem:[#allocation39_spill] sm:$0xff] %v9537_v39  ;;  %13066 = vst [vmem:[#allocation72_spill] sm:$0xff] %v9543_v24  ;;  %v9555_v50 = vmul.f32 %v9207_v3, %v13070_v23  ;;  %v13072_v39 = vld [vmem:[#allocation63_spill] sm:$0xff]  ;;  %v9563_v28 = vmul.f32 %v9207_v3, %v13074_v38  ;;  %v9575_v23 = vmul.f32 %v9210_v31, %v13080_v57  ;;  %v13136_v5 = vld [vmem:[#allocation190_spill] sm:$0xff] }
 0x3a9   : > { %13068 = vst [vmem:[#allocation53_spill] sm:$0xff] %v9547_v52  ;;  %13069 = vst [vmem:[#allocation151_spill] sm:$0xff] %v9551_v40  ;;  %v9559_v9 = vmul.f32 %v9207_v3, %v13072_v39  ;;  %v13076_v24 = vld [vmem:[#allocation179_spill] sm:$0xff]  ;;  %v13078_v52 = vld [vmem:[#allocation57_spill] sm:$0xff] }
 0x3aa   : > { %13071 = vst [vmem:[#allocation148_spill] sm:$0xff] %v9555_v50  ;;  %13075 = vst [vmem:[#allocation86_spill] sm:$0xff] %v9563_v28  ;;  %v9567_v30 = vmul.f32 %v9207_v3, %v13076_v24  ;;  %v9571_v36 = vmul.f32 %v9210_v31, %v13078_v52  ;;  %v13082_v40 = vld [vmem:[#allocation175_spill] sm:$0xff]  ;;  %v13091_v24 = vld [vmem:[#allocation166_spill] sm:$0xff] }
 0x3ab   : > { %13073 = vst [vmem:[#allocation205_spill] sm:$0xff] %v9559_v9  ;;  %13081 = vst [vmem:[#allocation65_spill] sm:$0xff] %v9575_v23  ;;  %v9579_v39 = vmul.f32 %v9207_v3, %v13082_v40  ;;  %v13084_v9 = vld [vmem:[#allocation173_spill] sm:$0xff]  ;;  %v13086_v28 = vld [vmem:[#allocation55_spill] sm:$0xff]  ;;  %v9599_v40 = vmul.f32 %v9210_v31, %v12860_v53  ;;  %v9607_v23 = vmul.f32 %v9210_v31, %v13091_v24 }
 0x3ac   : > { %13077 = vst [vmem:[#allocation51_spill] sm:$0xff] %v9567_v30  ;;  %13079 = vst [vmem:[#allocation84_spill] sm:$0xff] %v9571_v36  ;;  %v9583_v38 = vmul.f32 %v13084_v9, %v9207_v3  ;;  %v9587_v30 = vpop.permute.xlu1 %3454  ;;  %v9591_v52 = vmul.f32 %v9210_v31, %v13086_v28  ;;  %v13088_v36 = vld [vmem:[#allocation88_spill] sm:$0xff]  ;;  %v9611_v28 = vmul.f32 %v9210_v31, %v8390_v54  ;;  %v13094_v53 = vld [vmem:[#allocation227_spill] sm:$0xff] }
 0x3ad   : > { %13083 = vst [vmem:[#allocation162_spill] sm:$0xff] %v9579_v39  ;;  %v9595_v57 = vmul.f32 %v9210_v31, %v13088_v36  ;;  %13090 = vst [vmem:[#allocation179_spill] sm:$0xff] %v9599_v40  ;;  %v13099_v54 = vld [vmem:[#allocation50_spill] sm:$0xff]  ;;  %v13101_v36 = vld [vmem:[#allocation15_spill] sm:$0xff] }
 0x3ae   : > { %13085 = vst [vmem:[#allocation98_spill] sm:$0xff] %v9583_v38  ;;  %13087 = vst [vmem:[#allocation63_spill] sm:$0xff] %v9591_v52  ;;  %v13096_v52 = vld [vmem:[#allocation226_spill] sm:$0xff]  ;;  %v9629_v31 = vmul.f32 %v9250_v11, %v13099_v54  ;;  %v9633_v40 = vmul.f32 %v9250_v11, %v13101_v36  ;;  %v13111_v36 = vld [vmem:[#allocation5_spill] sm:$0xff] }
 0x3af   : > { %13089 = vst [vmem:[#allocation96_spill] sm:$0xff] %v9595_v57  ;;  %13092 = vst [vmem:[#allocation57_spill] sm:$0xff] %v9607_v23  ;;  %v13095_v57 = vld [vmem:[#allocation225_spill] sm:$0xff]  ;;  %v13105_v24 = vld [vmem:[#allocation114_spill] sm:$0xff] }
 0x3b0   : > { %13093 = vst [vmem:[#allocation90_spill] sm:$0xff] %v9611_v28  ;;  %v3296_v3 = vsub.f32 %v13095_v57, %v9234_v8  ;;  %v13097_v23 = vld [vmem:[#allocation17_spill] sm:$0xff]  ;;  %13100 = vst [vmem:[#allocation173_spill] sm:$0xff] %v9629_v31  ;;  %v3460_v28 = vpop.permute.xlu0 %3459  ;;  %v9635_v8 = vpop.permute.xlu1 %3464  ;;  %v13103_v57 = vld [vmem:[#allocation48_spill] sm:$0xff]  ;;  %v9643_v39 = vmul.f32 %v9250_v11, %v13105_v24 }
 0x3b1   : > { %v9625_v38 = vmul.f32 %v9250_v11, %v13097_v23  ;;  %13102 = vst [vmem:[#allocation55_spill] sm:$0xff] %v9633_v40  ;;  %v9639_v9 = vmul.f32 %v9250_v11, %v13103_v57  ;;  %v13107_v23 = vld [vmem:[#allocation112_spill] sm:$0xff]  ;;  %v13109_v54 = vld [vmem:[#allocation186_spill] sm:$0xff]  ;;  %v9655_v40 = vmul.f32 %v9253_v6, %v13111_v36  ;;  %v13155_v41 = vld [vmem:[#allocation159_spill] sm:$0xff] }
 0x3b2   : > { %13106 = vst [vmem:[#allocation166_spill] sm:$0xff] %v9643_v39  ;;  %v9651_v31 = vmul.f32 %v13109_v54, %v9250_v11  ;;  %v13113_v50 = vld [vmem:[#allocation38_spill] sm:$0xff]  ;;  %v13117_v39 = vld [vmem:[#allocation36_spill] sm:$0xff] }
 0x3b3   : > { %13098 = vst [vmem:[#allocation175_spill] sm:$0xff] %v9625_v38  ;;  %13104 = vst [vmem:[#allocation88_spill] sm:$0xff] %v9639_v9  ;;  %v9647_v38 = vmul.f32 %v9250_v11, %v13107_v23  ;;  %v9659_v57 = vmul.f32 %v9253_v6, %v13113_v50  ;;  %v13115_v9 = vld [vmem:[#allocation3_spill] sm:$0xff]  ;;  %v9667_v23 = vmul.f32 %v9253_v6, %v13117_v39  ;;  %v13120_v54 = vld [vmem:[#allocation102_spill] sm:$0xff] }
 0x3b4   : > { %13110 = vst [vmem:[#allocation225_spill] sm:$0xff] %v9651_v31  ;;  %13112 = vst [vmem:[#allocation226_spill] sm:$0xff] %v9655_v40  ;;  %v9663_v24 = vmul.f32 %v9253_v6, %v13115_v9  ;;  %v9675_v36 = vmul.f32 %v9253_v6, %v13120_v54  ;;  %v13122_v31 = vld [vmem:[#allocation100_spill] sm:$0xff]  ;;  %v13153_v47 = vld [vmem:[#allocation18_spill] sm:$0xff] }
 0x3b5   : > { %13108 = vst [vmem:[#allocation227_spill] sm:$0xff] %v9647_v38  ;;  %13114 = vst [vmem:[#allocation17_spill] sm:$0xff] %v9659_v57  ;;  %v13119_v38 = vld [vmem:[#allocation9_spill] sm:$0xff]  ;;  %v9679_v50 = vmul.f32 %v9253_v6, %v13122_v31  ;;  %v13128_v40 = vld [vmem:[#allocation40_spill] sm:$0xff] }
 0x3b6   : > { %13116 = vst [vmem:[#allocation50_spill] sm:$0xff] %v9663_v24  ;;  %13118 = vst [vmem:[#allocation15_spill] sm:$0xff] %v9667_v23  ;;  %v9671_v11 = vmul.f32 %v9259_v2, %v13119_v38  ;;  %v13124_v57 = vld [vmem:[#allocation185_spill] sm:$0xff]  ;;  %v13126_v24 = vld [vmem:[#allocation42_spill] sm:$0xff]  ;;  %v9695_v54 = vmul.f32 %v9259_v2, %v13128_v40  ;;  %v9715_v40 = vmul.f32 %v9259_v2, %v13136_v5 }
 0x3b7   : > { %13121 = vst [vmem:[#allocation48_spill] sm:$0xff] %v9675_v36  ;;  %13123 = vst [vmem:[#allocation114_spill] sm:$0xff] %v9679_v50  ;;  %v9683_v9 = vmul.f32 %v9253_v6, %v13124_v57  ;;  %v9687_v39 = vmul.f32 %v9259_v2, %v13126_v24  ;;  %v13127_v23 = vld [vmem:[#allocation7_spill] sm:$0xff]  ;;  %v13129_v36 = vld [vmem:[#allocation106_spill] sm:$0xff]  ;;  %v3238_v50 = vpop.permute.xlu1 %3237  ;;  %v9703_v6 = vmul.f32 %v9325_v45, %v13130_v35 }
 0x3b8   : > { %v9691_v38 = vmul.f32 %v9259_v2, %v13127_v23  ;;  %v9699_v31 = vmul.f32 %v9259_v2, %v13129_v36  ;;  %v13132_v57 = vld [vmem:[#allocation163_spill] sm:$0xff]  ;;  %13137 = vst [vmem:[#allocation3_spill] sm:$0xff] %v9715_v40  ;;  %v3304_v36 = vsub.f32 %v9163_v15, %v3238_v50  ;;  %v9723_v35 = vmul.f32 %v9325_v45, %v13139_v34  ;;  %v13145_v5 = vld [vmem:[#allocation44_spill] sm:$0xff]  ;;  %v13148_v34 = vld [vmem:[#allocation110_spill] sm:$0xff] }
 0x3b9   : > { %13125 = vst [vmem:[#allocation112_spill] sm:$0xff] %v9683_v9  ;;  %13131 = vst [vmem:[#allocation186_spill] sm:$0xff] %v9703_v6  ;;  %v9707_v24 = vmul.f32 %v9325_v45, %v13132_v57  ;;  %v13134_v9 = vld [vmem:[#allocation104_spill] sm:$0xff]  ;;  %v13141_v6 = vld [vmem:[#allocation161_spill] sm:$0xff]  ;;  %v9736_v15 = vmul.f32 %v3320_v32, %v13145_v5  ;;  %v9740_v50 = vmul.f32 %v9325_v45, %v13146_v49 }
 0x3ba   : > { %v9711_v23 = vmul.f32 %v9259_v2, %v13134_v9  ;;  %13140 = vst [vmem:[#allocation36_spill] sm:$0xff] %v9723_v35  ;;  %v9727_v57 = vmul.f32 %v9325_v45, %v13141_v6  ;;  %v13143_v9 = vld [vmem:[#allocation46_spill] sm:$0xff]  ;;  %3838 = vperm.xlu1 %6093, %v3304_v36   ;;  %v3486_v35 = vmul.f32 %v3320_v32, %v13148_v34  ;;  %v13149_v40 = vld [vmem:[#allocation108_spill] sm:$0xff] }
 0x3bb   : > { %13133 = vst [vmem:[#allocation5_spill] sm:$0xff] %v9707_v24  ;;  %v3440_v24 = vpop.permute.xlu0 %3439  ;;  %v9730_v14 = vmul.f32 %v3320_v32, %v13143_v9  ;;  %13147 = vst [vmem:[#allocation102_spill] sm:$0xff] %v9740_v50  ;;  %v3485_v6 = vmul.f32 %v3320_v32, %v13149_v40  ;;  %v9747_v9 = vmul.f32 %v9325_v45, %v13151_v63  ;;  %v13157_v36 = vld [vmem:[#allocation16_spill] sm:$0xff]  ;;  %v13163_v50 = vld [vmem:[#allocation171_spill] sm:$0xff] }
 0x3bc   : > { %13135 = vst [vmem:[#allocation38_spill] sm:$0xff] %v9711_v23  ;;  %13142 = vst [vmem:[#allocation9_spill] sm:$0xff] %v9727_v57  ;;  %v13144_v23 = vld [vmem:[#allocation11_spill] sm:$0xff]  ;;  %v13150_v57 = vld [vmem:[#allocation182_spill] sm:$0xff]  ;;  %v9751_v5 = vmul.f32 %v9391_v51, %v13153_v47  ;;  %v9755_v49 = vmul.f32 %v9391_v51, %v13155_v41  ;;  %v9759_v34 = vmul.f32 %v9391_v51, %v13157_v36 }
 0x3bd   : > { %v9733_v2 = vmul.f32 %v3320_v32, %v13144_v23  ;;  %v3487_v4 = vmul.f32 %v13150_v57, %v3320_v32  ;;  %13152 = vst [vmem:[#allocation100_spill] sm:$0xff] %v9747_v9  ;;  %v3242_v23 = vpop.permute.xlu1 %3241  ;;  %v13159_v40 = vld [vmem:[#allocation128_spill] sm:$0xff]  ;;  %v13161_v57 = vld [vmem:[#allocation30_spill] sm:$0xff]  ;;  %v9770_v47 = vmul.f32 %v3460_v28, %v13163_v50  ;;  %v13169_v36 = vld [vmem:[#allocation169_spill] sm:$0xff] }
 0x3be   : > { %13154 = vst [vmem:[#allocation185_spill] sm:$0xff] %v9751_v5  ;;  %13156 = vst [vmem:[#allocation42_spill] sm:$0xff] %v9755_v49  ;;  %v9763_v32 = vmul.f32 %v9325_v45, %v13159_v40  ;;  %v3306_v63 = vsub.f32 %v9170_v19, %v3242_v23  ;;  %v9767_v9 = vmul.f32 %v3460_v28, %v13161_v57  ;;  %v13165_v5 = vld [vmem:[#allocation157_spill] sm:$0xff]  ;;  %v13167_v49 = vld [vmem:[#allocation28_spill] sm:$0xff]  ;;  %3798 = vperm.xlu1 %6093, %v3296_v3  }
 0x3bf   : > { %13158 = vst [vmem:[#allocation7_spill] sm:$0xff] %v9759_v34  ;;  %13164 = vst [vmem:[#allocation22_spill] sm:$0xff] %v9770_v47  ;;  %v9774_v41 = vmul.f32 %v9391_v51, %v13165_v5  ;;  %v9777_v46 = vmul.f32 %v3460_v28, %v13167_v49  ;;  %v9780_v34 = vmul.f32 %v3460_v28, %v13169_v36  ;;  %v13171_v45 = vld [vmem:[#allocation220_spill] sm:$0xff]  ;;  %v13173_v19 = vld [vmem:[#allocation126_spill] sm:$0xff]  ;;  %v9799_v36 = vpop.permute.xlu0 %3419 }
 0x3c0   : > { %13160 = vst [vmem:[#allocation40_spill] sm:$0xff] %v9763_v32  ;;  %13162 = vst [vmem:[#allocation106_spill] sm:$0xff] %v9767_v9  ;;  %v9783_v40 = vmul.f32 %v13171_v45, %v3460_v28  ;;  %v9787_v23 = vmul.f32 %v13173_v19, %v9391_v51  ;;  %3848 = vperm.xlu0 %6094, %v3306_v63   ;;  %v13175_v50 = vld [vmem:[#allocation145_spill] sm:$0xff]  ;;  %v13177_v5 = vld [vmem:[#allocation138_spill] sm:$0xff] }
 0x3c1   : > { %13166 = vst [vmem:[#allocation163_spill] sm:$0xff] %v9774_v41  ;;  %13168 = vst [vmem:[#allocation104_spill] sm:$0xff] %v9777_v46  ;;  %v9790_v57 = vmul.f32 %v3460_v28, %v13175_v50  ;;  %v9793_v32 = vmul.f32 %v3460_v28, %v13177_v5  ;;  %v13179_v49 = vld [vmem:[#allocation121_spill] sm:$0xff]  ;;  %v3704_v45 = vpop.permute.xlu1 %3703  ;;  %v13184_v19 = vld [vmem:[#allocation143_spill] sm:$0xff] }
 0x3c2   : > { %13170 = vst [vmem:[#allocation190_spill] sm:$0xff] %v9780_v34  ;;  %13172 = vst [vmem:[#allocation13_spill] sm:$0xff] %v9783_v40  ;;  %v9797_v41 = vmul.f32 %v9391_v51, %v13179_v49  ;;  %v13182_v40 = vld [vmem:[#allocation6_spill] sm:$0xff]  ;;  %v9807_v3 = vmul.f32 %v9457_v16, %v13184_v19  ;;  %v13186_v63 = vld [vmem:[#allocation4_spill] sm:$0xff]  ;;  %6095 = vset.pattern.permute.xlu1 %v12942_v17 }
 0x3c3   : > { %13174 = vst [vmem:[#allocation20_spill] sm:$0xff] %v9787_v23  ;;  %13176 = vst [vmem:[#allocation161_spill] sm:$0xff] %v9790_v57  ;;  %v9803_v34 = vmul.f32 %v9457_v16, %v13182_v40  ;;  %v9811_v50 = vmul.f32 %v9457_v16, %v13186_v63  ;;  %v13188_v28 = vld [vmem:[#allocation218_spill] sm:$0xff]  ;;  %v13192_v40 = vld [vmem:[#allocation12_spill] sm:$0xff] }
 0x3c4   : > { %13178 = vst [vmem:[#allocation46_spill] sm:$0xff] %v9793_v32  ;;  %13180 = vst [vmem:[#allocation11_spill] sm:$0xff] %v9797_v41  ;;  %v9815_v5 = vmul.f32 %v9391_v51, %v13188_v28  ;;  %v13190_v49 = vld [vmem:[#allocation14_spill] sm:$0xff]  ;;  %v13191_v32 = vld [vmem:[#allocation155_spill] sm:$0xff]  ;;  %v9824_v23 = vmul.f32 %v3440_v24, %v13192_v40  ;;  %v9835_v51 = vadd.f32 %v3704_v45, %v3485_v6 }
 0x3c5   : > { %13181 = vst [vmem:[#allocation44_spill] sm:$0xff] %v9799_v36  ;;  %13183 = vst [vmem:[#allocation221_spill] sm:$0xff] %v9803_v34  ;;  %v9818_v41 = vmul.f32 %v3440_v24, %v13190_v49  ;;  %v9821_v57 = vmul.f32 %v3440_v24, %v13191_v32  ;;  %v13194_v34 = vld [vmem:[#allocation139_spill] sm:$0xff]  ;;  %v9837_v28 = vadd.f32 %v3704_v45, %v3487_v4  ;;  %v13199_v49 = vld [vmem:[#allocation124_spill] sm:$0xff]  ;;  %v9854_v4 = vpop.permute.xlu1 %3698 }
 0x3c6   : > { %13185 = vst [vmem:[#allocation110_spill] sm:$0xff] %v9807_v3  ;;  %13187 = vst [vmem:[#allocation108_spill] sm:$0xff] %v9811_v50  ;;  %v9828_v19 = vmul.f32 %v9457_v16, %v13194_v34  ;;  %v13196_v3 = vld [vmem:[#allocation153_spill] sm:$0xff]  ;;  %v9833_v50 = vadd.f32 %v3704_v45, %v3486_v35  ;;  %v13198_v32 = vsub.f32 %v9147_v12, %v9247_v44  ;;  %v13201_v34 = vld [vmem:[#allocation130_spill] sm:$0xff] }
 0x3c7   : > { %13189 = vst [vmem:[#allocation182_spill] sm:$0xff] %v9815_v5  ;;  %13193 = vst [vmem:[#allocation133_spill] sm:$0xff] %v9824_v23  ;;  %v9831_v63 = vmul.f32 %v3440_v24, %v13196_v3  ;;  %v9844_v40 = vmul.f32 %v13199_v49, %v3440_v24  ;;  %v9848_v5 = vmul.f32 %v9457_v16, %v13201_v34  ;;  %v13203_v3 = vld [vmem:[#allocation216_spill] sm:$0xff]  ;;  %v13208_v12 = vld [vmem:[#allocation214_spill] sm:$0xff] }
 0x3c8   : > { %13195 = vst [vmem:[#allocation18_spill] sm:$0xff] %v9828_v19  ;;  %3833 = vperm.xlu0 %6094, %v13198_v32   ;;  %v9851_v35 = vmul.f32 %v3440_v24, %v13203_v3  ;;  %v13205_v6 = vld [vmem:[#allocation224_spill] sm:$0xff]  ;;  %v13206_v19 = vld [vmem:[#allocation10_spill] sm:$0xff]  ;;  %v9861_v44 = vmul.f32 %v3440_v24, %v13208_v12  ;;  %v13220_v12 = vld [vmem:[#allocation93_spill] sm:$0xff] }
 0x3c9   : > { %13197 = vst [vmem:[#allocation159_spill] sm:$0xff] %v9831_v63  ;;  %13200 = vst [vmem:[#allocation16_spill] sm:$0xff] %v9844_v40  ;;  %3404 = vperm.xlu1 %6095, %v13205_v6   ;;  %v9858_v63 = vmul.f32 %v9521_v13, %v13206_v19  ;;  %v13210_v32 = vld [vmem:[#allocation188_spill] sm:$0xff]  ;;  %v13214_v3 = vld [vmem:[#allocation150_spill] sm:$0xff] }
 0x3ca   : > { %13202 = vst [vmem:[#allocation128_spill] sm:$0xff] %v9848_v5  ;;  %13204 = vst [vmem:[#allocation30_spill] sm:$0xff] %v9851_v35  ;;  %v9865_v49 = vmul.f32 %v9457_v16, %v13210_v32  ;;  %v13212_v34 = vld [vmem:[#allocation164_spill] sm:$0xff]  ;;  %v9873_v6 = vmul.f32 %v9521_v13, %v13214_v3  ;;  %v13218_v19 = vld [vmem:[#allocation147_spill] sm:$0xff]  ;;  %v9885_v32 = vmul.f32 %v9799_v36, %v13220_v12 }
 0x3cb   : > { %13207 = vst [vmem:[#allocation171_spill] sm:$0xff] %v9858_v63  ;;  %13209 = vst [vmem:[#allocation157_spill] sm:$0xff] %v9861_v44  ;;  %v9869_v5 = vmul.f32 %v9457_v16, %v13212_v34  ;;  %v13216_v35 = vld [vmem:[#allocation8_spill] sm:$0xff]  ;;  %v9881_v24 = vmul.f32 %v9521_v13, %v13218_v19  ;;  %v13223_v16 = vld [vmem:[#allocation129_spill] sm:$0xff]  ;;  %v13231_v12 = vsub.f32 %v13096_v52, %v9240_v37  ;;  %v13240_v37 = vmov 1   ;;  %v9925_v52 = vpop.permute.xlu1 %3723 }
 0x3cc   : > { %13211 = vst [vmem:[#allocation28_spill] sm:$0xff] %v9865_v49  ;;  %13215 = vst [vmem:[#allocation220_spill] sm:$0xff] %v9873_v6  ;;  %v9877_v40 = vmul.f32 %v9521_v13, %v13216_v35  ;;  %v9887_v49 = vpop.permute.xlu0 %3399  ;;  %v9891_v34 = vmul.f32 %v9799_v36, %v13223_v16  ;;  %v13225_v3 = vld [vmem:[#allocation91_spill] sm:$0xff]  ;;  %v13227_v35 = vld [vmem:[#allocation125_spill] sm:$0xff] }
 0x3cd   : > { %13213 = vst [vmem:[#allocation169_spill] sm:$0xff] %v9869_v5  ;;  %13219 = vst [vmem:[#allocation145_spill] sm:$0xff] %v9881_v24  ;;  %v9895_v5 = vmul.f32 %v9799_v36, %v13225_v3  ;;  %v9899_v44 = vmul.f32 %v9799_v36, %v13227_v35  ;;  %v13229_v19 = vld [vmem:[#allocation137_spill] sm:$0xff]  ;;  %3828 = vperm.xlu0 %6094, %v13231_v12   ;;  %v13236_v35 = vld [vmem:[#allocation210_spill] sm:$0xff]  ;;  %6096 = vset.pattern.permute.xlu1 %v13240_v37 }
 0x3ce   : > { %13217 = vst [vmem:[#allocation126_spill] sm:$0xff] %v9877_v40  ;;  %13221 = vst [vmem:[#allocation138_spill] sm:$0xff] %v9885_v32  ;;  %v9903_v24 = vmul.f32 %v9521_v13, %v13229_v19  ;;  %v13232_v32 = vld [vmem:[#allocation213_spill] sm:$0xff]  ;;  %v13241_v12 = vld [vmem:[#allocation26_spill] sm:$0xff] }
 0x3cf   : > { %13222 = vst [vmem:[#allocation121_spill] sm:$0xff] %v9887_v49  ;;  %13224 = vst [vmem:[#allocation6_spill] sm:$0xff] %v9891_v34  ;;  %v9910_v16 = vmul.f32 %v13232_v32, %v9799_v36  ;;  %v13234_v34 = vld [vmem:[#allocation212_spill] sm:$0xff]  ;;  %v13238_v19 = vld [vmem:[#allocation209_spill] sm:$0xff]  ;;  %v9929_v32 = vmul.f32 %v9587_v30, %v13241_v12  ;;  %v3866_v12 = vadd.f32 %v3704_v45, %v9719_v27 }
 0x3d0   : > { %13226 = vst [vmem:[#allocation143_spill] sm:$0xff] %v9895_v5  ;;  %13228 = vst [vmem:[#allocation4_spill] sm:$0xff] %v9899_v44  ;;  %v9914_v3 = vmul.f32 %v9521_v13, %v13234_v34  ;;  %v9918_v44 = vmul.f32 %v9521_v13, %v13236_v35  ;;  %v9941_v35 = vadd.f32 %v9854_v4, %v9699_v31  ;;  %v4092_v31 = vld [vmem:[%s6304_s28 + $0x88] sm:$0xff]  ;;  %v13256_v27 = vld [vmem:[#allocation107_spill] sm:$0xff] }
 0x3d1   : > { %13230 = vst [vmem:[#allocation218_spill] sm:$0xff] %v9903_v24  ;;  %13233 = vst [vmem:[#allocation14_spill] sm:$0xff] %v9910_v16  ;;  %v9922_v24 = vmul.f32 %v9799_v36, %v13238_v19  ;;  %v13243_v16 = vld [vmem:[#allocation167_spill] sm:$0xff]  ;;  %v13247_v19 = vsub.f32 %v9002_v58, %v9213_v22  ;;  %v13248_v36 = vld [vmem:[#allocation165_spill] sm:$0xff] }
 0x3d2   : > { %13235 = vst [vmem:[#allocation155_spill] sm:$0xff] %v9914_v3  ;;  %13237 = vst [vmem:[#allocation12_spill] sm:$0xff] %v9918_v44  ;;  %v9933_v34 = vmul.f32 %v9587_v30, %v13243_v16  ;;  %v13245_v3 = vld [vmem:[#allocation24_spill] sm:$0xff]  ;;  %v9950_v16 = vmul.f32 %v9587_v30, %v13248_v36  ;;  %v13250_v44 = vld [vmem:[#allocation77_spill] sm:$0xff]  ;;  %v9969_v36 = vmul.f32 %v9887_v49, %v13256_v27 }
 0x3d3   : > { %13239 = vst [vmem:[#allocation139_spill] sm:$0xff] %v9922_v24  ;;  %13242 = vst [vmem:[#allocation153_spill] sm:$0xff] %v9929_v32  ;;  %v9937_v13 = vmul.f32 %v9587_v30, %v13245_v3  ;;  %3783 = vperm.xlu1 %6096, %v13247_v19   ;;  %v3868_v24 = vadd.f32 %v3704_v45, %v9730_v14  ;;  %v9954_v3 = vmul.f32 %v9887_v49, %v13250_v44  ;;  %v13252_v32 = vld [vmem:[#allocation109_spill] sm:$0xff]  ;;  %v13254_v22 = vld [vmem:[#allocation75_spill] sm:$0xff] }
 0x3d4   : > { %13244 = vst [vmem:[#allocation124_spill] sm:$0xff] %v9933_v34  ;;  %13249 = vst [vmem:[#allocation216_spill] sm:$0xff] %v9950_v16  ;;  %v3865_v34 = vadd.f32 %v3704_v45, %v9733_v2  ;;  %v9961_v58 = vmul.f32 %v9887_v49, %v13252_v32  ;;  %v9965_v14 = vmul.f32 %v9887_v49, %v13254_v22  ;;  %v4089_v19 = vld [vmem:[%s6304_s28 + $0x70] sm:$0xff]  ;;  %v13261_v22 = vld [vmem:[#allocation180_spill] sm:$0xff] }
 0x3d5   : > { %13246 = vst [vmem:[#allocation130_spill] sm:$0xff] %v9937_v13  ;;  %13251 = vst [vmem:[#allocation224_spill] sm:$0xff] %v9954_v3  ;;  %v4090_v13 = vld [vmem:[%s6304_s28 + $0x78] sm:$0xff]  ;;  %v13258_v44 = vsub.f32 %v13094_v53, %v9244_v21  ;;  %v3867_v2 = vadd.f32 %v3704_v45, %v9736_v15  ;;  %v13259_v3 = vld [vmem:[#allocation149_spill] sm:$0xff]  ;;  %v9993_v53 = vadd.f32 %v9925_v52, %v9275_v59 }
 0x3d6   : > { %13253 = vst [vmem:[#allocation10_spill] sm:$0xff] %v9961_v58  ;;  %13255 = vst [vmem:[#allocation214_spill] sm:$0xff] %v9965_v14  ;;  %v9978_v32 = vmul.f32 %v9587_v30, %v13259_v3  ;;  %v9982_v14 = vmul.f32 %v13261_v22, %v9887_v49  ;;  %v13263_v58 = vld [vmem:[#allocation134_spill] sm:$0xff]  ;;  %v4091_v21 = vld [vmem:[%s6304_s28 + $0x80] sm:$0xff]  ;;  %v9997_v15 = vadd.f32 %v9925_v52, %v9287_v0 }
 0x3d7   : > { %13257 = vst [vmem:[#allocation188_spill] sm:$0xff] %v9969_v36  ;;  %3813 = vperm.xlu0 %6094, %v13258_v44   ;;  %v9986_v27 = vmul.f32 %v9587_v30, %v13263_v58  ;;  %v9988_v36 = vpop.permute.xlu1 %3718  ;;  %v10001_v45 = vadd.f32 %v9925_v52, %v9291_v42  ;;  %v13265_v3 = vld [vmem:[#allocation127_spill] sm:$0xff]  ;;  %6097 = vset.pattern.permute.xlu1 %v12942_v17  ;;  %v13267_v22 = vld [vmem:[#allocation34_spill] sm:$0xff]  ;;  %v4141_v16 = vld [vmem:[%s6304_s28 + $0x210] sm:$0xff] }
 0x3d8   : > { %13260 = vst [vmem:[#allocation164_spill] sm:$0xff] %v9978_v32  ;;  %13262 = vst [vmem:[#allocation150_spill] sm:$0xff] %v9982_v14  ;;  %v10005_v58 = vmul.f32 %v9587_v30, %v13265_v3  ;;  %v10008_v44 = vadd.f32 %v4090_v13, %v3866_v12  ;;  %v10010_v59 = vadd.f32 %v4092_v31, %v3868_v24  ;;  %v13269_v49 = vld [vmem:[#allocation178_spill] sm:$0xff]  ;;  %v4093_v30 = vld [vmem:[%s6304_s28 + $0x90] sm:$0xff] }
 0x3d9   : > { %13264 = vst [vmem:[#allocation8_spill] sm:$0xff] %v9986_v27  ;;  %v10014_v0 = vmul.f32 %v9635_v8, %v13267_v22  ;;  %v10018_v42 = vmul.f32 %v9635_v8, %v13269_v49  ;;  %v4094_v27 = vld [vmem:[%s6304_s28 + $0x98] sm:$0xff]  ;;  %v13271_v3 = vld [vmem:[#allocation223_spill] sm:$0xff]  ;;  %v3859_v17 = vadd.f32 %v9854_v4, %v9671_v11  ;;  %v3861_v24 = vadd.f32 %v9854_v4, %v9687_v39  ;;  %v13272_v13 = vld [vmem:[#allocation32_spill] sm:$0xff] }
 0x3da   : > { %13266 = vst [vmem:[#allocation147_spill] sm:$0xff] %v10005_v58  ;;  %3389 = vperm.xlu1 %6097, %v13271_v3   ;;  %v10023_v58 = vadd.f32 %v4089_v19, %v3865_v34  ;;  %v10031_v12 = vmul.f32 %v9635_v8, %v13272_v13  ;;  %v4095_v31 = vld [vmem:[%s6304_s28 + $0xa0] sm:$0xff]  ;;  %v13274_v49 = vsub.f32 %v9091_v10, %v9228_v62  ;;  %v4085_v34 = vld [vmem:[%s6304_s28 + $0x50] sm:$0xff]  ;;  %v13275_v11 = vld [vmem:[#allocation174_spill] sm:$0xff] }
 0x3db   : > { %13268 = vst [vmem:[#allocation93_spill] sm:$0xff] %v10014_v0  ;;  %13270 = vst [vmem:[#allocation129_spill] sm:$0xff] %v10018_v42  ;;  %v10037_v22 = vadd.f32 %v4091_v21, %v3867_v2  ;;  %v4083_v3 = vld [vmem:[%s6304_s28 + $0x40] sm:$0xff]  ;;  %v3858_v19 = vadd.f32 %v9854_v4, %v9691_v38  ;;  %v10045_v14 = vmul.f32 %v9635_v8, %v13275_v11  ;;  %v13277_v39 = vld [vmem:[#allocation141_spill] sm:$0xff]  ;;  %v3744_v11 = vpop.permute.xlu1 %3743 }
 0x3dc   : > { %13273 = vst [vmem:[#allocation91_spill] sm:$0xff] %v10031_v12  ;;  %3808 = vperm.xlu0 %6094, %v13274_v49   ;;  %v10049_v13 = vmul.f32 %v13277_v39, %v9635_v8  ;;  %v4082_v12 = vld [vmem:[%s6304_s28 + $0x38] sm:$0xff]  ;;  %v10053_v10 = vadd.f32 %v4094_v27, %v9833_v50  ;;  %v10056_v62 = vadd.f32 %v4093_v30, %v9835_v51  ;;  %v13286_v27 = vld [vmem:[#allocation152_spill] sm:$0xff]  ;;  %v13322_v42 = vld [vmem:[#allocation123_spill] sm:$0xff] }
 0x3dd   : > { %13276 = vst [vmem:[#allocation125_spill] sm:$0xff] %v10045_v14  ;;  %v13281_v2 = vld [vmem:[#allocation146_spill] sm:$0xff]  ;;  %v3860_v50 = vadd.f32 %v9854_v4, %v9695_v54  ;;  %v10071_v51 = vadd.f32 %v4095_v31, %v9837_v28  ;;  %v3894_v30 = vadd.f32 %v9925_v52, %v9257_v56  ;;  %v13289_v39 = vsub.f32 %v9076_v33, %v9231_v25  ;;  %v13323_v0 = vld [vmem:[#allocation37_spill] sm:$0xff]  ;;  %v4175_v9 = vld [vmem:[%s6304_s28 + $0x320] sm:$0xff] }
 0x3de   : > { %13278 = vst [vmem:[#allocation137_spill] sm:$0xff] %v10049_v13  ;;  %13279 = vst [vmem:[#allocation213_spill] sm:$0xff] %v10053_v10  ;;  %v10060_v38 = vmul.f32 %v9635_v8, %v13281_v2  ;;  %v13283_v21 = vld [vmem:[#allocation142_spill] sm:$0xff]  ;;  %3394 = vperm.xlu1 %6097, %v13286_v27   ;;  %v10077_v2 = vadd.f32 %v4083_v3, %v3859_v17  ;;  %v4084_v13 = vld [vmem:[%s6304_s28 + $0x48] sm:$0xff]  ;;  %v3896_v28 = vadd.f32 %v9925_v52, %v9263_v7 }
 0x3df   : > { %13280 = vst [vmem:[#allocation212_spill] sm:$0xff] %v10056_v62  ;;  %v10064_v49 = vmul.f32 %v9635_v8, %v13283_v21  ;;  %13285 = vst [vmem:[#allocation26_spill] sm:$0xff] %v10071_v51  ;;  %v10079_v21 = vadd.f32 %v4085_v34, %v3861_v24  ;;  %v4118_v54 = vld [vmem:[%s6304_s28 + $0x158] sm:$0xff]  ;;  %v3893_v31 = vadd.f32 %v9925_v52, %v9267_v18  ;;  %v4120_v17 = vld [vmem:[%s6304_s28 + $0x168] sm:$0xff] }
 0x3e0   : > { %13282 = vst [vmem:[#allocation210_spill] sm:$0xff] %v10060_v38  ;;  %13287 = vst [vmem:[#allocation167_spill] sm:$0xff] %v10077_v2  ;;  %3793 = vperm.xlu0 %6094, %v13289_v39   ;;  %v10091_v27 = vadd.f32 %v4082_v12, %v3858_v19  ;;  %v4117_v3 = vld [vmem:[%s6304_s28 + $0x150] sm:$0xff]  ;;  %v3895_v24 = vadd.f32 %v9925_v52, %v9271_v48  ;;  %v10098_v34 = vadd.f32 %v3744_v11, %v9365_v29  ;;  %v4119_v7 = vld [vmem:[%s6304_s28 + $0x160] sm:$0xff] }
 0x3e1   : > { %13284 = vst [vmem:[#allocation209_spill] sm:$0xff] %v10064_v49  ;;  %13288 = vst [vmem:[#allocation24_spill] sm:$0xff] %v10079_v21  ;;  %v10101_v33 = vadd.f32 %v3744_v11, %v9369_v60  ;;  %v10104_v25 = vadd.f32 %v3744_v11, %v9373_v43  ;;  %v10107_v18 = vadd.f32 %v4084_v13, %v3860_v50  ;;  %v4146_v19 = vld [vmem:[%s6304_s28 + $0x238] sm:$0xff]  ;;  %v13299_v52 = vld [vmem:[#allocation136_spill] sm:$0xff] }
 0x3e2   : > { %13290 = vst [vmem:[#allocation165_spill] sm:$0xff] %v10091_v27  ;;  %6098 = vset.pattern.permute.xlu1 %v13240_v37  ;;  %v10113_v29 = vadd.f32 %v4118_v54, %v3894_v30  ;;  %v3887_v60 = vadd.f32 %v9988_v36, %v9361_v26  ;;  %v13292_v13 = vsub.f32 %v9031_v20, %v9217_v61  ;;  %v4111_v26 = vld [vmem:[%s6304_s28 + $0x120] sm:$0xff]  ;;  %v13295_v61 = vld [vmem:[#allocation193_spill] sm:$0xff]  ;;  %v13300_v43 = vld [vmem:[#allocation132_spill] sm:$0xff] }
 0x3e3   : > { %13291 = vst [vmem:[#allocation77_spill] sm:$0xff] %v10107_v18  ;;  %v13293_v39 = vsub.f32 %v9079_v1, %v9224_v55  ;;  %v10125_v37 = vadd.f32 %v4120_v17, %v3896_v28  ;;  %v10127_v50 = vadd.f32 %v4117_v3, %v3893_v31  ;;  %v13294_v30 = vld [vmem:[#allocation195_spill] sm:$0xff]  ;;  %v10135_v1 = vadd.f32 %v4119_v7, %v3895_v24  ;;  %v4113_v55 = vld [vmem:[%s6304_s28 + $0x130] sm:$0xff]  ;;  %v4110_v17 = vld [vmem:[%s6304_s28 + $0x118] sm:$0xff] }
 0x3e4   : > { %3778 = vperm.xlu1 %6098, %v13292_v13   ;;  %v3889_v54 = vadd.f32 %v9988_v36, %v13294_v30  ;;  %v4087_v20 = vld [vmem:[%s6304_s28 + $0x60] sm:$0xff]  ;;  %v3922_v13 = vadd.f32 %v3744_v11, %v13295_v61  ;;  %v13296_v28 = vld [vmem:[#allocation45_spill] sm:$0xff]  ;;  %v13297_v3 = vld [vmem:[#allocation78_spill] sm:$0xff]  ;;  %v3921_v48 = vadd.f32 %v3744_v11, %v13299_v52  ;;  %v3923_v56 = vadd.f32 %v3744_v11, %v13300_v43 }
 0x3e5   : > { %3788 = vperm.xlu0 %6094, %v13293_v39   ;;  %v3886_v31 = vadd.f32 %v9988_v36, %v13296_v28  ;;  %v3888_v39 = vadd.f32 %v9988_v36, %v13297_v3  ;;  %v13298_v30 = vld [vmem:[#allocation64_spill] sm:$0xff]  ;;  %v4122_v24 = vld [vmem:[%s6304_s28 + $0x178] sm:$0xff]  ;;  %v4145_v49 = vld [vmem:[%s6304_s28 + $0x230] sm:$0xff]  ;;  %v10156_v51 = vadd.f32 %v4111_v26, %v3887_v60 }
 0x3e6   : > { %v3924_v12 = vadd.f32 %v3744_v11, %v13298_v30  ;;  %v4112_v8 = vld [vmem:[%s6304_s28 + $0x128] sm:$0xff]  ;;  %v13301_v7 = vld [vmem:[#allocation38_spill] sm:$0xff]  ;;  %v4147_v38 = vld [vmem:[%s6304_s28 + $0x240] sm:$0xff]  ;;  %v10160_v30 = vadd.f32 %v4087_v20, %v9941_v35  ;;  %v10172_v26 = vadd.f32 %v4113_v55, %v3889_v54  ;;  %v10176_v20 = vadd.f32 %v4146_v19, %v3922_v13 }
 0x3e7   : > { %v10151_v61 = vadd.f32 %v9854_v4, %v13301_v7  ;;  %v4148_v28 = vld [vmem:[%s6304_s28 + $0x248] sm:$0xff]  ;;  %v13303_v52 = vld [vmem:[#allocation3_spill] sm:$0xff]  ;;  %v13304_v43 = vld [vmem:[#allocation222_spill] sm:$0xff]  ;;  %v10187_v14 = vadd.f32 %v4145_v49, %v3921_v48  ;;  %v10189_v54 = vadd.f32 %v4147_v38, %v3923_v56 }
 0x3e8   : > { %13302 = vst [vmem:[#allocation109_spill] sm:$0xff] %v10160_v30  ;;  %v10164_v11 = vadd.f32 %v9854_v4, %v13303_v52  ;;  %v13305_v62 = vld [vmem:[#allocation228_spill] sm:$0xff]  ;;  %v4121_v3 = vld [vmem:[%s6304_s28 + $0x170] sm:$0xff]  ;;  %v4123_v35 = vld [vmem:[%s6304_s28 + $0x180] sm:$0xff]  ;;  %v10178_v4 = vadd.f32 %v4110_v17, %v3886_v31  ;;  %v10180_v52 = vadd.f32 %v4112_v8, %v3888_v39 }
 0x3e9   : > { %v13306_v10 = vsub.f32 %v13304_v43, %v13305_v62  ;;  %v3739_v62 = vpop.permute.xlu1 %3738  ;;  %v10185_v43 = vadd.f32 %v4148_v28, %v3924_v12  ;;  %v4150_v13 = vld [vmem:[%s6304_s28 + $0x258] sm:$0xff]  ;;  %v10195_v31 = vadd.f32 %v4121_v3, %v9997_v15  ;;  %v10198_v8 = vadd.f32 %v4123_v35, %v10001_v45  ;;  %v4149_v49 = vld [vmem:[%s6304_s28 + $0x250] sm:$0xff]  ;;  %v4151_v48 = vld [vmem:[%s6304_s28 + $0x260] sm:$0xff] }
 0x3ea   : > { %v13311_v38 = vld [vmem:[#allocation207_spill] sm:$0xff]  ;;  %v13312_v39 = vld [vmem:[#allocation41_spill] sm:$0xff]  ;;  %v13313_v28 = vld [vmem:[#allocation160_spill] sm:$0xff]  ;;  %v10225_v45 = vadd.f32 %v4149_v49, %v10101_v33  ;;  %v10228_v3 = vadd.f32 %v4151_v48, %v10104_v25 }
 0x3eb   : > { %3773 = vperm.xlu0 %6094, %v13306_v10   ;;  %v10183_v10 = vadd.f32 %v4122_v24, %v9993_v53  ;;  %13308 = vst [vmem:[#allocation107_spill] sm:$0xff] %v10195_v31  ;;  %13309 = vst [vmem:[#allocation149_spill] sm:$0xff] %v10198_v8  ;;  %v13310_v53 = vld [vmem:[#allocation43_spill] sm:$0xff]  ;;  %v10206_v56 = vadd.f32 %v3739_v62, %v13311_v38  ;;  %v10209_v24 = vadd.f32 %v3739_v62, %v13312_v39  ;;  %v13317_v35 = vld [vmem:[#allocation156_spill] sm:$0xff] }
 0x3ec   : > { %v3891_v17 = vadd.f32 %v9988_v36, %v13310_v53  ;;  %v10212_v19 = vadd.f32 %v3739_v62, %v13313_v28  ;;  %v10222_v28 = vadd.f32 %v4150_v13, %v10098_v34  ;;  %13315 = vst [vmem:[#allocation134_spill] sm:$0xff] %v10225_v45  ;;  %13316 = vst [vmem:[#allocation127_spill] sm:$0xff] %v10228_v3  ;;  %v13318_v60 = vld [vmem:[#allocation154_spill] sm:$0xff]  ;;  %v13319_v39 = vld [vmem:[#allocation201_spill] sm:$0xff] }
 0x3ed   : > { %13307 = vst [vmem:[#allocation75_spill] sm:$0xff] %v10183_v10  ;;  %v3764_v53 = vpop.permute.xlu1 %3763  ;;  %v3890_v55 = vadd.f32 %v9988_v36, %v13317_v35  ;;  %v3892_v7 = vadd.f32 %v9988_v36, %v13318_v60  ;;  %v3915_v12 = vadd.f32 %v3739_v62, %v13319_v39  ;;  %v13320_v38 = vld [vmem:[#allocation47_spill] sm:$0xff]  ;;  %v13321_v13 = vld [vmem:[#allocation80_spill] sm:$0xff]  ;;  %v4114_v25 = vld [vmem:[%s6304_s28 + $0x138] sm:$0xff] }
 0x3ee   : > { %13314 = vst [vmem:[#allocation180_spill] sm:$0xff] %v10222_v28  ;;  %v3917_v34 = vadd.f32 %v3739_v62, %v13320_v38  ;;  %v3914_v15 = vadd.f32 %v3739_v62, %v13321_v13  ;;  %v4115_v49 = vld [vmem:[%s6304_s28 + $0x140] sm:$0xff]  ;;  %v4116_v48 = vld [vmem:[%s6304_s28 + $0x148] sm:$0xff]  ;;  %v3950_v35 = vadd.f32 %v3764_v53, %v13322_v42  ;;  %v3952_v36 = vadd.f32 %v3764_v53, %v13323_v0  ;;  %v13324_v60 = vld [vmem:[#allocation70_spill] sm:$0xff] }
 0x3ef   : > { %v3949_v32 = vadd.f32 %v3764_v53, %v13324_v60  ;;  %v4139_v39 = vld [vmem:[%s6304_s28 + $0x200] sm:$0xff]  ;;  %v13325_v10 = vld [vmem:[#allocation172_spill] sm:$0xff]  ;;  %v4174_v5 = vld [vmem:[%s6304_s28 + $0x318] sm:$0xff]  ;;  %v10266_v27 = vadd.f32 %v4116_v48, %v3892_v7 }
 0x3f0   : > { %v3916_v38 = vadd.f32 %v3739_v62, %v13325_v10  ;;  %v13326_v13 = vld [vmem:[#allocation197_spill] sm:$0xff]  ;;  %v4138_v33 = vld [vmem:[%s6304_s28 + $0x1f8] sm:$0xff]  ;;  %v4140_v31 = vld [vmem:[%s6304_s28 + $0x208] sm:$0xff]  ;;  %v10262_v62 = vadd.f32 %v4115_v49, %v3891_v17  ;;  %v10274_v23 = vadd.f32 %v4139_v39, %v3915_v12  ;;  %v10276_v17 = vadd.f32 %v4141_v16, %v3917_v34 }
 0x3f1   : > { %v3951_v40 = vadd.f32 %v3764_v53, %v13326_v13  ;;  %v13327_v6 = vld [vmem:[#allocation61_spill] sm:$0xff]  ;;  %v13328_v18 = vld [vmem:[#allocation94_spill] sm:$0xff]  ;;  %v13329_v42 = vld [vmem:[#allocation59_spill] sm:$0xff]  ;;  %v10264_v13 = vadd.f32 %v4114_v25, %v3890_v55  ;;  %13332 = vst [vmem:[#allocation223_spill] sm:$0xff] %v10266_v27  ;;  %v10278_v55 = vadd.f32 %v4138_v33, %v3914_v15  ;;  %v4398_v10 = vadd.f32 %v4174_v5, %v3950_v35  ;;  %v3769_v35 = vpop.permute.xlu0 %3768 }
 0x3f2   : > { %v3954_v63 = vadd.f32 %v3764_v53, %v13327_v6  ;;  %v10253_v46 = vadd.f32 %v3764_v53, %v13328_v18  ;;  %v10256_v0 = vadd.f32 %v3764_v53, %v13329_v42  ;;  %v4176_v60 = vld [vmem:[%s6304_s28 + $0x328] sm:$0xff]  ;;  %v4173_v47 = vld [vmem:[%s6304_s28 + $0x310] sm:$0xff]  ;;  %13330 = vst [vmem:[#allocation34_spill] sm:$0xff] %v10262_v62  ;;  %v4143_v42 = vld [vmem:[%s6304_s28 + $0x220] sm:$0xff]  ;;  %v10280_v7 = vadd.f32 %v4140_v31, %v3916_v38 }
 0x3f3   : > { %13331 = vst [vmem:[#allocation178_spill] sm:$0xff] %v10264_v13  ;;  %v4086_v2 = vld [vmem:[%s6304_s28 + $0x58] sm:$0xff]  ;;  %v4144_v25 = vld [vmem:[%s6304_s28 + $0x228] sm:$0xff]  ;;  %v4400_v53 = vadd.f32 %v4176_v60, %v3952_v36  ;;  %v4397_v18 = vadd.f32 %v4173_v47, %v3949_v32  ;;  %v4399_v6 = vadd.f32 %v4175_v9, %v3951_v40  ;;  %v4181_v31 = vld [vmem:[%s6304_s28 + $0x350] sm:$0xff]  ;;  %v10294_v33 = vadd.f32 %v4143_v42, %v10206_v56 }
 0x3f4   : > { %v4142_v49 = vld [vmem:[%s6304_s28 + $0x218] sm:$0xff]  ;;  %v4088_v48 = vld [vmem:[%s6304_s28 + $0x68] sm:$0xff]  ;;  %v10289_v15 = vadd.f32 %v4086_v2, %v10151_v61  ;;  %v4183_v34 = vld [vmem:[%s6304_s28 + $0x360] sm:$0xff]  ;;  %v10300_v9 = vadd.f32 %v4144_v25, %v10212_v19  ;;  %v4622_v36 = vmax.f32 %v4398_v10, 0.0 }
 0x3f5   : > { %13334 = vst [vmem:[#allocation174_spill] sm:$0xff] %v10294_v33  ;;  %v10297_v47 = vadd.f32 %v4142_v49, %v10209_v24  ;;  %v10303_v5 = vadd.f32 %v4088_v48, %v10164_v11  ;;  %v4180_v40 = vld [vmem:[%s6304_s28 + $0x348] sm:$0xff]  ;;  %v4178_v24 = vld [vmem:[%s6304_s28 + $0x338] sm:$0xff]  ;;  %v4624_v19 = vmax.f32 %v4400_v53, 0.0  ;;  %v4621_v39 = vmax.f32 %v4397_v18, 0.0  ;;  %v4177_v60 = vld [vmem:[%s6304_s28 + $0x330] sm:$0xff]  ;;  %v10327_v13 = vpop.permute.xlu0 %3753 }
 0x3f6   : > { %13333 = vst [vmem:[#allocation32_spill] sm:$0xff] %v10289_v15  ;;  %v4182_v38 = vld [vmem:[%s6304_s28 + $0x358] sm:$0xff]  ;;  %v4623_v11 = vmax.f32 %v4399_v6, 0.0  ;;  %v13336_v42 = vld [vmem:[#allocation72_spill] sm:$0xff]  ;;  %v13338_v16 = vld [vmem:[#allocation205_spill] sm:$0xff]  ;;  %v10321_v53 = vadd.f32 %v4178_v24, %v3954_v63  ;;  %v10334_v63 = vadd.f32 %v4177_v60, %v10253_v46 }
 0x3f7   : > { %13335 = vst [vmem:[#allocation141_spill] sm:$0xff] %v10303_v5  ;;  %v3957_v49 = vadd.f32 %v3769_v35, %v13336_v42  ;;  %v13337_v25 = vld [vmem:[#allocation148_spill] sm:$0xff]  ;;  %v3956_v12 = vadd.f32 %v3769_v35, %v13338_v16  ;;  %v13339_v21 = vld [vmem:[#allocation86_spill] sm:$0xff]  ;;  %v4185_v2 = vld [vmem:[%s6304_s28 + $0x370] sm:$0xff] }
 0x3f8   : > { %v3959_v48 = vadd.f32 %v3769_v35, %v13337_v25  ;;  %v3958_v61 = vadd.f32 %v3769_v35, %v13339_v21  ;;  %v4184_v56 = vld [vmem:[%s6304_s28 + $0x368] sm:$0xff]  ;;  %v4179_v32 = vld [vmem:[%s6304_s28 + $0x340] sm:$0xff]  ;;  %v13341_v18 = vld [vmem:[#allocation162_spill] sm:$0xff]  ;;  %13343 = vst [vmem:[#allocation146_spill] sm:$0xff] %v10327_v13 }
 0x3f9   : > { %v13340_v30 = vld [vmem:[#allocation51_spill] sm:$0xff]  ;;  %v3960_v6 = vadd.f32 %v3769_v35, %v13341_v18  ;;  %v13342_v5 = vld [vmem:[#allocation98_spill] sm:$0xff]  ;;  %v4405_v42 = vadd.f32 %v4181_v31, %v3957_v49  ;;  %v4404_v27 = vadd.f32 %v4180_v40, %v3956_v12  ;;  %v4160_v21 = vld [vmem:[%s6304_s28 + $0x2a8] sm:$0xff]  ;;  %v10351_v18 = vpop.permute.xlu0 %3748 }
 0x3fa   : > { %v3961_v10 = vadd.f32 %v3769_v35, %v13340_v30  ;;  %v10325_v15 = vadd.f32 %v3769_v35, %v13342_v5  ;;  %v4407_v25 = vadd.f32 %v4183_v34, %v3959_v48  ;;  %v4406_v16 = vadd.f32 %v4182_v38, %v3958_v61  ;;  %v4162_v62 = vld [vmem:[%s6304_s28 + $0x2b8] sm:$0xff]  ;;  %v4159_v40 = vld [vmem:[%s6304_s28 + $0x2a0] sm:$0xff]  ;;  %v4161_v61 = vld [vmem:[%s6304_s28 + $0x2b0] sm:$0xff] }
 0x3fb   : > { %v10336_v30 = vadd.f32 %v4184_v56, %v3960_v6  ;;  %v10339_v5 = vadd.f32 %v4179_v32, %v10256_v0  ;;  %v4629_v24 = vmax.f32 %v4405_v42, 0.0  ;;  %v4628_v34 = vmax.f32 %v4404_v27, 0.0  ;;  %v13345_v35 = vld [vmem:[#allocation170_spill] sm:$0xff]  ;;  %v13347_v56 = vld [vmem:[#allocation203_spill] sm:$0xff]  ;;  %v10353_v6 = vpop.permute.xlu1 %3758 }
 0x3fc   : > { %v10331_v8 = vadd.f32 %v4185_v2, %v3961_v10  ;;  %v4631_v31 = vmax.f32 %v4407_v25, 0.0  ;;  %v4630_v12 = vmax.f32 %v4406_v16, 0.0  ;;  %v3936_v2 = vadd.f32 %v10327_v13, %v13345_v35  ;;  %v13346_v38 = vld [vmem:[#allocation158_spill] sm:$0xff]  ;;  %13349 = vst [vmem:[#allocation152_spill] sm:$0xff] %v10353_v6  ;;  %v4167_v42 = vld [vmem:[%s6304_s28 + $0x2e0] sm:$0xff]  ;;  %v4169_v16 = vld [vmem:[%s6304_s28 + $0x2f0] sm:$0xff] }
 0x3fd   : > { %13344 = vst [vmem:[#allocation142_spill] sm:$0xff] %v10336_v30  ;;  %v3938_v46 = vadd.f32 %v10327_v13, %v13346_v38  ;;  %v3935_v60 = vadd.f32 %v10327_v13, %v13347_v56  ;;  %v13348_v0 = vld [vmem:[#allocation74_spill] sm:$0xff]  ;;  %v4797_v49 = vpack.c.bf16 %v4629_v24, %v4622_v36  ;;  %v4796_v27 = vpack.c.bf16 %v4628_v34, %v4621_v39  ;;  %v13350_v56 = vld [vmem:[#allocation84_spill] sm:$0xff]  ;;  %v4131_v30 = vld [vmem:[%s6304_s28 + $0x1c0] sm:$0xff] }
 0x3fe   : > { %v3937_v32 = vadd.f32 %v10327_v13, %v13348_v0  ;;  %v4799_v48 = vpack.c.bf16 %v4631_v31, %v4624_v19  ;;  %v4798_v10 = vpack.c.bf16 %v4630_v12, %v4623_v11  ;;  %v4384_v25 = vadd.f32 %v4160_v21, %v3936_v2  ;;  %v4166_v38 = vld [vmem:[%s6304_s28 + $0x2d8] sm:$0xff]  ;;  %v13351_v19 = vld [vmem:[#allocation65_spill] sm:$0xff]  ;;  %v13352_v11 = vld [vmem:[#allocation63_spill] sm:$0xff] }
 0x3ff   : > { %v4386_v35 = vadd.f32 %v4162_v62, %v3938_v46  ;;  %v4383_v3 = vadd.f32 %v4159_v40, %v3935_v60  ;;  %5023 = vmatprep.subr.bf16.mxu1 %v4797_v49  ;;  %v3943_v36 = vadd.f32 %v10353_v6, %v13350_v56  ;;  %v3945_v39 = vadd.f32 %v10353_v6, %v13351_v19  ;;  %v4168_v21 = vld [vmem:[%s6304_s28 + $0x2e8] sm:$0xff]  ;;  %v4155_v49 = vld [vmem:[%s6304_s28 + $0x280] sm:$0xff]  ;;  %v10371_v56 = vpop.permute.xlu0 %3733 }
 0x400   : > { %v4385_v45 = vadd.f32 %v4161_v61, %v3937_v32  ;;  %5136 = vmatprep.subr.bf16.mxu0 %v4799_v48  ;;  %v3942_v24 = vadd.f32 %v10353_v6, %v13352_v11  ;;  %5024 = vmatpush1.bf16.msra.mxu1 %v4796_v27  ;;  %v4608_v31 = vmax.f32 %v4384_v25, 0.0  ;;  %v13353_v40 = vld [vmem:[#allocation96_spill] sm:$0xff]  ;;  %v4153_v32 = vld [vmem:[%s6304_s28 + $0x270] sm:$0xff]  ;;  %v13354_v11 = vld [vmem:[#allocation35_spill] sm:$0xff] }
 0x401   : > { %5137 = vmatpush1.bf16.msra.mxu0 %v4798_v10  ;;  %v4610_v34 = vmax.f32 %v4386_v35, 0.0  ;;  %v4607_v12 = vmax.f32 %v4383_v3, 0.0  ;;  %v3944_v61 = vadd.f32 %v10353_v6, %v13353_v40  ;;  %v4391_v2 = vadd.f32 %v4167_v42, %v3943_v36  ;;  %v4152_v48 = vld [vmem:[%s6304_s28 + $0x268] sm:$0xff]  ;;  %v4154_v40 = vld [vmem:[%s6304_s28 + $0x278] sm:$0xff]  ;;  %v10380_v42 = vpop.permute.xlu1 %3424 }
 0x402   : > { %v4393_v46 = vadd.f32 %v4169_v16, %v3945_v39  ;;  %v4390_v60 = vadd.f32 %v4166_v38, %v3942_v24  ;;  %v4609_v0 = vmax.f32 %v4385_v45, 0.0  ;;  %v3929_v27 = vadd.f32 %v10351_v18, %v13354_v11  ;;  %v13355_v10 = vld [vmem:[#allocation68_spill] sm:$0xff]  ;;  %13357 = vst [vmem:[#allocation195_spill] sm:$0xff] %v10380_v42  ;;  %v4134_v42 = vld [vmem:[%s6304_s28 + $0x1d8] sm:$0xff] }
 0x403   : > { %v4392_v19 = vadd.f32 %v4168_v21, %v3944_v61  ;;  %v3931_v25 = vadd.f32 %v10351_v18, %v13355_v10  ;;  %v13356_v3 = vld [vmem:[#allocation144_spill] sm:$0xff]  ;;  %v4615_v16 = vmax.f32 %v4391_v2, 0.0  ;;  %v10384_v28 = vpop.permute.xlu0 %3728 }
 0x404   : > { %v3928_v35 = vadd.f32 %v10351_v18, %v13356_v3  ;;  %v4617_v45 = vmax.f32 %v4393_v46, 0.0  ;;  %v4614_v38 = vmax.f32 %v4390_v60, 0.0  ;;  %v13358_v36 = vld [vmem:[#allocation140_spill] sm:$0xff]  ;;  %v4377_v21 = vadd.f32 %v4153_v32, %v3929_v27 }
 0x405   : > { %v3930_v39 = vadd.f32 %v10351_v18, %v13358_v36  ;;  %v4616_v24 = vmax.f32 %v4392_v19, 0.0  ;;  %v4379_v61 = vadd.f32 %v4155_v49, %v3931_v25  ;;  %v4790_v10 = vpack.c.bf16 %v4615_v16, %v4608_v31  ;;  %v4132_v60 = vld [vmem:[%s6304_s28 + $0x1c8] sm:$0xff]  ;;  %v10389_v19 = vpop.permute.xlu1 %3409  ;;  %v13362_v49 = vld [vmem:[#allocation199_spill] sm:$0xff] }
 0x406   : > { %v4376_v11 = vadd.f32 %v4152_v48, %v3928_v35  ;;  %v4792_v62 = vpack.c.bf16 %v4617_v45, %v4610_v34  ;;  %v4789_v33 = vpack.c.bf16 %v4614_v38, %v4607_v12  ;;  %v4601_v2 = vmax.f32 %v4377_v21, 0.0  ;;  %13359 = vst [vmem:[#allocation193_spill] sm:$0xff] %v10389_v19  ;;  %v13360_v31 = vld [vmem:[#allocation76_spill] sm:$0xff]  ;;  %v13361_v12 = vld [vmem:[#allocation25_spill] sm:$0xff] }
 0x407   : > { %v4378_v3 = vadd.f32 %v4154_v40, %v3930_v39  ;;  %v4791_v6 = vpack.c.bf16 %v4616_v24, %v4609_v0  ;;  %v4603_v46 = vmax.f32 %v4379_v61, 0.0  ;;  %5025 = vmatprep.subr.bf16.mxu1 %v4790_v10  ;;  %v3908_v34 = vadd.f32 %v10371_v56, %v13360_v31  ;;  %v4127_v61 = vld [vmem:[%s6304_s28 + $0x1a0] sm:$0xff] }
 0x408   : > { %v4600_v13 = vmax.f32 %v4376_v11, 0.0  ;;  %5138 = vmatprep.subr.bf16.mxu0 %v4792_v62  ;;  %v3910_v0 = vadd.f32 %v10371_v56, %v13361_v12  ;;  %v3907_v48 = vadd.f32 %v10371_v56, %v13362_v49  ;;  %5026 = vmatpush1.bf16.msra.mxu1 %v4789_v33  ;;  %v13363_v27 = vmax.f32 %v10176_v20, 0.0  ;;  %v4133_v33 = vld [vmem:[%s6304_s28 + $0x1d0] sm:$0xff]  ;;  %v10409_v20 = vpop.permute.xlu0 %3713  ;;  %v13368_v11 = vld [vmem:[#allocation191_spill] sm:$0xff] }
 0x409   : > { %v4602_v32 = vmax.f32 %v4378_v3, 0.0  ;;  %5139 = vmatpush1.bf16.msra.mxu0 %v4791_v6  ;;  %v13364_v25 = vmax.f32 %v10185_v43, 0.0  ;;  %v13365_v40 = vmax.f32 %v10187_v14, 0.0  ;;  %v13366_v38 = vmax.f32 %v10189_v54, 0.0  ;;  %v4125_v6 = vld [vmem:[%s6304_s28 + $0x190] sm:$0xff]  ;;  %v13367_v43 = vld [vmem:[#allocation58_spill] sm:$0xff] }
 0x40a   : > { %v4783_v62 = vpack.c.bf16 %v4601_v2, %v13363_v27  ;;  %v4356_v39 = vadd.f32 %v4132_v60, %v3908_v34  ;;  %v4358_v24 = vadd.f32 %v4134_v42, %v3910_v0  ;;  %v4355_v21 = vadd.f32 %v4131_v30, %v3907_v48  ;;  %v13369_v10 = vld [vmem:[#allocation19_spill] sm:$0xff]  ;;  %v4124_v3 = vld [vmem:[%s6304_s28 + $0x188] sm:$0xff]  ;;  %v10419_v30 = vpop.permute.xlu1 %3414  ;;  %v4170_v42 = vld [vmem:[%s6304_s28 + $0x2f8] sm:$0xff] }
 0x40b   : > { %v4785_v35 = vpack.c.bf16 %v4603_v46, %v13364_v25  ;;  %v4782_v16 = vpack.c.bf16 %v4600_v13, %v13365_v40  ;;  %v4784_v36 = vpack.c.bf16 %v4602_v32, %v13366_v38  ;;  %v3909_v14 = vadd.f32 %v10371_v56, %v13367_v43  ;;  %13370 = vst [vmem:[#allocation45_spill] sm:$0xff] %v10419_v30  ;;  %v13371_v32 = vld [vmem:[#allocation52_spill] sm:$0xff]  ;;  %v4106_v43 = vld [vmem:[%s6304_s28 + $0xf8] sm:$0xff] }
 0x40c   : > { %5027 = vmatprep.subr.bf16.mxu1 %v4783_v62  ;;  %v3901_v13 = vadd.f32 %v10384_v28, %v13368_v11  ;;  %v3903_v54 = vadd.f32 %v10384_v28, %v13369_v10  ;;  %v4580_v2 = vmax.f32 %v4356_v39, 0.0  ;;  %v4582_v46 = vmax.f32 %v4358_v24, 0.0  ;;  %v10431_v39 = vpop.permute.xlu0 %3708  ;;  %v13378_v11 = vld [vmem:[#allocation62_spill] sm:$0xff]  ;;  %v13379_v10 = vld [vmem:[#allocation27_spill] sm:$0xff] }
 0x40d   : > { %5140 = vmatprep.subr.bf16.mxu0 %v4785_v35  ;;  %v4579_v60 = vmax.f32 %v4355_v21, 0.0  ;;  %v3900_v31 = vadd.f32 %v10384_v28, %v13371_v32  ;;  %5028 = vmatpush1.bf16.msra.mxu1 %v4782_v16  ;;  %v4357_v34 = vadd.f32 %v4133_v33, %v3909_v14  ;;  %v4626_v49 = vmax.f32 %v10321_v53, 0.0  ;;  %v4126_v16 = vld [vmem:[%s6304_s28 + $0x198] sm:$0xff]  ;;  %13375 = vst [vmem:[#allocation78_spill] sm:$0xff] %v10431_v39  ;;  %v13376_v33 = vld [vmem:[#allocation116_spill] sm:$0xff]  ;;  %v4171_v53 = vld [vmem:[%s6304_s28 + $0x300] sm:$0xff] }
 0x40e   : > { %5141 = vmatpush1.bf16.msra.mxu0 %v4784_v36  ;;  %v4349_v12 = vadd.f32 %v4125_v6, %v3901_v13  ;;  %v4351_v0 = vadd.f32 %v4127_v61, %v3903_v54  ;;  %v13372_v48 = vmax.f32 %v10274_v23, 0.0  ;;  %v13373_v62 = vmax.f32 %v10276_v17, 0.0  ;;  %v4104_v61 = vld [vmem:[%s6304_s28 + $0xe8] sm:$0xff]  ;;  %v4103_v23 = vld [vmem:[%s6304_s28 + $0xe0] sm:$0xff] }
 0x40f   : > { %v13374_v35 = vmax.f32 %v10278_v55, 0.0  ;;  %v4348_v38 = vadd.f32 %v4124_v3, %v3900_v31  ;;  %v4581_v36 = vmax.f32 %v4357_v34, 0.0  ;;  %v3902_v6 = vadd.f32 %v10384_v28, %v13376_v33  ;;  %v13377_v55 = vld [vmem:[#allocation29_spill] sm:$0xff] }
 0x410   : > { %v4776_v27 = vpack.c.bf16 %v13372_v48, %v4580_v2  ;;  %v4778_v25 = vpack.c.bf16 %v13373_v62, %v4582_v46  ;;  %v4573_v24 = vmax.f32 %v4349_v12, 0.0  ;;  %v4575_v21 = vmax.f32 %v4351_v0, 0.0  ;;  %v10446_v46 = vpop.permute.xlu1 %3803 }
 0x411   : > { %v4775_v40 = vpack.c.bf16 %v13374_v35, %v4579_v60  ;;  %v4572_v17 = vmax.f32 %v4348_v38, 0.0  ;;  %v3880_v14 = vadd.f32 %v10409_v20, %v13377_v55  ;;  %v3882_v13 = vadd.f32 %v10409_v20, %v13378_v11  ;;  %13381 = vst [vmem:[#allocation64_spill] sm:$0xff] %v10446_v46  ;;  %v4105_v35 = vld [vmem:[%s6304_s28 + $0xf0] sm:$0xff] }
 0x412   : > { %5029 = vmatprep.subr.bf16.mxu1 %v4776_v27  ;;  %5142 = vmatprep.subr.bf16.mxu0 %v4778_v25  ;;  %v3879_v54 = vadd.f32 %v10409_v20, %v13379_v10  ;;  %v13380_v3 = vmax.f32 %v10280_v7, 0.0  ;;  %v13382_v60 = vmax.f32 %v10113_v29, 0.0  ;;  %v13383_v31 = vmax.f32 %v10125_v37, 0.0  ;;  %v4099_v7 = vld [vmem:[%s6304_s28 + $0xc0] sm:$0xff] }
 0x413   : > { %5030 = vmatpush1.bf16.msra.mxu1 %v4775_v40  ;;  %v4350_v12 = vadd.f32 %v4126_v16, %v3902_v6  ;;  %v13384_v0 = vmax.f32 %v10127_v50, 0.0  ;;  %v4328_v27 = vadd.f32 %v4104_v61, %v3880_v14  ;;  %v4330_v62 = vadd.f32 %v4106_v43, %v3882_v13  ;;  %v4097_v40 = vld [vmem:[%s6304_s28 + $0xb0] sm:$0xff]  ;;  %v4096_v50 = vld [vmem:[%s6304_s28 + $0xa8] sm:$0xff]  ;;  %v13388_v43 = vld [vmem:[#allocation55_spill] sm:$0xff] }
 0x414   : > { %v4777_v2 = vpack.c.bf16 %v13380_v3, %v4581_v36  ;;  %v4769_v32 = vpack.c.bf16 %v4573_v24, %v13382_v60  ;;  %v4771_v34 = vpack.c.bf16 %v4575_v21, %v13383_v31  ;;  %v4327_v25 = vadd.f32 %v4103_v23, %v3879_v54  ;;  %v13385_v36 = vld [vmem:[#allocation60_spill] sm:$0xff]  ;;  %v13386_v24 = vld [vmem:[#allocation175_spill] sm:$0xff]  ;;  %v13387_v21 = vld [vmem:[#allocation173_spill] sm:$0xff]  ;;  %v10470_v11 = vpop.permute.xlu1 %3823 }
 0x415   : > { %v4768_v48 = vpack.c.bf16 %v4572_v17, %v13384_v0  ;;  %v4574_v38 = vmax.f32 %v4350_v12, 0.0  ;;  %v3881_v29 = vadd.f32 %v10409_v20, %v13385_v36  ;;  %v3873_v37 = vadd.f32 %v10431_v39, %v13386_v24  ;;  %v10466_v17 = vpop.permute.xlu0 %3693  ;;  %13391 = vst [vmem:[#allocation132_spill] sm:$0xff] %v10470_v11  ;;  %v4186_v0 = vld [vmem:[%s6304_s28 + $0x378] sm:$0xff]  ;;  %v13397_v36 = vld [vmem:[#allocation17_spill] sm:$0xff] }
 0x416   : > { %5143 = vmatpush1.bf16.msra.mxu0 %v4777_v2  ;;  %5031 = vmatprep.subr.bf16.mxu1 %v4769_v32  ;;  %v3875_v16 = vadd.f32 %v10431_v39, %v13387_v21  ;;  %v4552_v33 = vmax.f32 %v4328_v27, 0.0  ;;  %v4554_v6 = vmax.f32 %v4330_v62, 0.0  ;;  %v4551_v61 = vmax.f32 %v4327_v25, 0.0  ;;  %13389 = vst [vmem:[#allocation136_spill] sm:$0xff] %v10466_v17  ;;  %v13395_v25 = vld [vmem:[#allocation88_spill] sm:$0xff]  ;;  %v13398_v24 = vld [vmem:[#allocation50_spill] sm:$0xff] }
 0x417   : > { %5144 = vmatprep.subr.bf16.mxu0 %v4771_v34  ;;  %v3872_v23 = vadd.f32 %v10431_v39, %v13388_v43  ;;  %5032 = vmatpush1.bf16.msra.mxu1 %v4768_v48  ;;  %v13390_v55 = vmax.f32 %v10135_v1, 0.0  ;;  %v4329_v13 = vadd.f32 %v4105_v35, %v3881_v29  ;;  %v4321_v10 = vadd.f32 %v4097_v40, %v3873_v37  ;;  %v4098_v1 = vld [vmem:[%s6304_s28 + $0xb8] sm:$0xff]  ;;  %v4076_v40 = vld [vmem:[%s6304_s28 + $0x8] sm:$0xff] }
 0x418   : > { %v4323_v54 = vadd.f32 %v4099_v7, %v3875_v16  ;;  %v13392_v3 = vmax.f32 %v10156_v51, 0.0  ;;  %v13393_v60 = vmax.f32 %v10172_v26, 0.0  ;;  %v13394_v31 = vmax.f32 %v10178_v4, 0.0  ;;  %v4078_v7 = vld [vmem:[%s6304_s28 + $0x18] sm:$0xff]  ;;  %v4075_v51 = vld [vmem:[%s6304_s28] sm:$0xff] }
 0x419   : > { %v4770_v14 = vpack.c.bf16 %v4574_v38, %v13390_v55  ;;  %v4320_v12 = vadd.f32 %v4096_v50, %v3872_v23  ;;  %v4553_v48 = vmax.f32 %v4329_v13, 0.0  ;;  %v4545_v27 = vmax.f32 %v4321_v10, 0.0  ;;  %v13396_v4 = vld [vmem:[#allocation226_spill] sm:$0xff]  ;;  %v10493_v50 = vpop.permute.xlu1 %3818 }
 0x41a   : > { %v4762_v2 = vpack.c.bf16 %v13392_v3, %v4552_v33  ;;  %v4764_v32 = vpack.c.bf16 %v13393_v60, %v4554_v6  ;;  %v4761_v34 = vpack.c.bf16 %v13394_v31, %v4551_v61  ;;  %v4547_v62 = vmax.f32 %v4323_v54, 0.0  ;;  %13400 = vst [vmem:[#allocation38_spill] sm:$0xff] %v10493_v50  ;;  %v4077_v54 = vld [vmem:[%s6304_s28 + $0x10] sm:$0xff]  ;;  %v4258_v3 = vld [vmem:[%s6304_s28 + $0x5b8] sm:$0xff]  ;;  %v13404_v60 = vld [vmem:[#allocation15_spill] sm:$0xff] }
 0x41b   : > { %5145 = vmatpush1.bf16.msra.mxu0 %v4770_v14  ;;  %v3874_v35 = vadd.f32 %v10431_v39, %v13395_v25  ;;  %v4544_v26 = vmax.f32 %v4320_v12, 0.0  ;;  %v3852_v38 = vadd.f32 %v10466_v17, %v13396_v4  ;;  %v3854_v29 = vadd.f32 %v10466_v17, %v13397_v36  ;;  %v13414_v36 = vld [vmem:[#allocation106_spill] sm:$0xff]  ;;  %v13457_v39 = vld [vmem:[#allocation115_spill] sm:$0xff] }
 0x41c   : > { %5033 = vmatprep.subr.bf16.mxu1 %v4762_v2  ;;  %5146 = vmatprep.subr.bf16.mxu0 %v4764_v32  ;;  %v3851_v37 = vadd.f32 %v10466_v17, %v13398_v24  ;;  %v13399_v21 = vmax.f32 %v10180_v52, 0.0  ;;  %v13401_v33 = vmax.f32 %v10008_v44, 0.0  ;;  %v10498_v43 = vadd.f32 %v4186_v0, %v10325_v15  ;;  %v4286_v24 = vld [vmem:[%s6304_s28 + $0x698] sm:$0xff] }
 0x41d   : > { %5034 = vmatpush1.bf16.msra.mxu1 %v4761_v34  ;;  %v4322_v61 = vadd.f32 %v4098_v1, %v3874_v35  ;;  %v13402_v23 = vmax.f32 %v10010_v59, 0.0  ;;  %v4300_v14 = vadd.f32 %v4076_v40, %v3852_v38  ;;  %v4302_v13 = vadd.f32 %v4078_v7, %v3854_v29  ;;  %v10514_v0 = vpop.permute.xlu1 %3843  ;;  %v13408_v35 = vld [vmem:[#allocation167_spill] sm:$0xff]  ;;  %v13410_v7 = vld [vmem:[#allocation24_spill] sm:$0xff] }
 0x41e   : > { %v4763_v16 = vpack.c.bf16 %v13399_v21, %v4553_v48  ;;  %v4755_v6 = vpack.c.bf16 %v4545_v27, %v13401_v33  ;;  %v4299_v10 = vadd.f32 %v4075_v51, %v3851_v37  ;;  %v13403_v52 = vmax.f32 %v10023_v58, 0.0  ;;  %13406 = vst [vmem:[#allocation3_spill] sm:$0xff] %v10514_v0  ;;  %v13415_v21 = vld [vmem:[#allocation22_spill] sm:$0xff]  ;;  %v4288_v33 = vld [vmem:[%s6304_s28 + $0x6a8] sm:$0xff] }
 0x41f   : > { %v4757_v55 = vpack.c.bf16 %v4547_v62, %v13402_v23  ;;  %v4546_v44 = vmax.f32 %v4322_v61, 0.0  ;;  %v3853_v32 = vadd.f32 %v10466_v17, %v13404_v60  ;;  %v4034_v15 = vadd.f32 %v10470_v11, %v9818_v41  ;;  %v4260_v41 = vld [vmem:[%s6304_s28 + $0x5c8] sm:$0xff]  ;;  %v13407_v62 = vld [vmem:[#allocation133_spill] sm:$0xff]  ;;  %v13417_v23 = vld [vmem:[#allocation190_spill] sm:$0xff] }
 0x420   : > { %5147 = vmatpush1.bf16.msra.mxu0 %v4763_v16  ;;  %5035 = vmatprep.subr.bf16.mxu1 %v4755_v6  ;;  %v4754_v2 = vpack.c.bf16 %v4544_v26, %v13403_v52  ;;  %v4524_v59 = vmax.f32 %v4300_v14, 0.0  ;;  %v4526_v31 = vmax.f32 %v4302_v13, 0.0  ;;  %v4523_v34 = vmax.f32 %v4299_v10, 0.0  ;;  %v13416_v6 = vld [vmem:[#allocation104_spill] sm:$0xff]  ;;  %v4257_v14 = vld [vmem:[%s6304_s28 + $0x5b0] sm:$0xff]  ;;  %v4287_v10 = vld [vmem:[%s6304_s28 + $0x6a0] sm:$0xff] }
 0x421   : > { %5148 = vmatprep.subr.bf16.mxu0 %v4757_v55  ;;  %v4036_v12 = vadd.f32 %v10470_v11, %v9821_v57  ;;  %v13405_v58 = vmax.f32 %v10037_v22, 0.0  ;;  %v4301_v48 = vadd.f32 %v4077_v54, %v3853_v32  ;;  %v10516_v27 = vadd.f32 %v4258_v3, %v4034_v15  ;;  %v13412_v22 = vld [vmem:[#allocation165_spill] sm:$0xff] }
 0x422   : > { %5036 = vmatpush1.bf16.msra.mxu1 %v4754_v2  ;;  %v4033_v25 = vadd.f32 %v10470_v11, %v13407_v62  ;;  %v13409_v40 = vmax.f32 %v13408_v35, 0.0  ;;  %v13411_v51 = vmax.f32 %v13410_v7, 0.0  ;;  %v13413_v4 = vmax.f32 %v13412_v22, 0.0  ;;  %v4285_v13 = vld [vmem:[%s6304_s28 + $0x690] sm:$0xff]  ;;  %v13422_v62 = vld [vmem:[#allocation171_spill] sm:$0xff]  ;;  %v13423_v22 = vld [vmem:[#allocation220_spill] sm:$0xff] }
 0x423   : > { %v4756_v1 = vpack.c.bf16 %v4546_v44, %v13405_v58  ;;  %v4062_v29 = vadd.f32 %v10514_v0, %v13414_v36  ;;  %v4525_v37 = vmax.f32 %v4301_v48, 0.0  ;;  %v4064_v16 = vadd.f32 %v10514_v0, %v13415_v21  ;;  %v13418_v44 = vld [vmem:[#allocation77_spill] sm:$0xff]  ;;  %v13421_v48 = vld [vmem:[#allocation159_spill] sm:$0xff] }
 0x424   : > { %v4748_v57 = vpack.c.bf16 %v13409_v40, %v4524_v59  ;;  %v4750_v26 = vpack.c.bf16 %v13411_v51, %v4526_v31  ;;  %v4747_v38 = vpack.c.bf16 %v13413_v4, %v4523_v34  ;;  %v4061_v61 = vadd.f32 %v10514_v0, %v13416_v6  ;;  %v4259_v59 = vld [vmem:[%s6304_s28 + $0x5c0] sm:$0xff]  ;;  %v13420_v31 = vld [vmem:[#allocation142_spill] sm:$0xff]  ;;  %v13425_v21 = vld [vmem:[#allocation145_spill] sm:$0xff] }
 0x425   : > { %5149 = vmatpush1.bf16.msra.mxu0 %v4756_v1  ;;  %v4063_v55 = vadd.f32 %v10514_v0, %v13417_v23  ;;  %v10540_v54 = vadd.f32 %v4260_v41, %v4036_v12  ;;  %v4633_v3 = vmax.f32 %v10331_v8, 0.0  ;;  %v4625_v52 = vmax.f32 %v10334_v63, 0.0  ;;  %v4251_v40 = vld [vmem:[%s6304_s28 + $0x580] sm:$0xff]  ;;  %v4250_v4 = vld [vmem:[%s6304_s28 + $0x578] sm:$0xff] }
 0x426   : > { %5037 = vmatprep.subr.bf16.mxu1 %v4748_v57  ;;  %5150 = vmatprep.subr.bf16.mxu0 %v4750_v26  ;;  %v4627_v2 = vmax.f32 %v10339_v5, 0.0  ;;  %v13419_v60 = vmax.f32 %v13418_v44, 0.0  ;;  %v10547_v15 = vadd.f32 %v4286_v24, %v4062_v29  ;;  %v4632_v34 = vmax.f32 %v13420_v31, 0.0  ;;  %v4253_v57 = vld [vmem:[%s6304_s28 + $0x590] sm:$0xff]  ;;  %v13424_v24 = vld [vmem:[#allocation126_spill] sm:$0xff]  ;;  %v13434_v36 = vld [vmem:[#allocation131_spill] sm:$0xff] }
 0x427   : > { %5038 = vmatpush1.bf16.msra.mxu1 %v4747_v38  ;;  %v4634_v12 = vmax.f32 %v10498_v43, 0.0  ;;  %v10556_v58 = vadd.f32 %v4288_v33, %v4064_v16  ;;  %v10558_v1 = vadd.f32 %v4257_v14, %v4033_v25  ;;  %v4035_v41 = vadd.f32 %v10470_v11, %v13421_v48  ;;  %v4252_v38 = vld [vmem:[%s6304_s28 + $0x588] sm:$0xff]  ;;  %v4230_v33 = vld [vmem:[%s6304_s28 + $0x4d8] sm:$0xff]  ;;  %v13437_v26 = vld [vmem:[#allocation89_spill] sm:$0xff] }
 0x428   : > { %v4749_v32 = vpack.c.bf16 %v13419_v60, %v4525_v37  ;;  %v4027_v35 = vadd.f32 %v10493_v50, %v13422_v62  ;;  %v10566_v7 = vadd.f32 %v4285_v13, %v4061_v61  ;;  %v10568_v51 = vadd.f32 %v4287_v10, %v4063_v55  ;;  %v13426_v55 = vld [vmem:[#allocation138_spill] sm:$0xff]  ;;  %v13433_v10 = vld [vmem:[#allocation95_spill] sm:$0xff]  ;;  %v13438_v48 = vld [vmem:[#allocation117_spill] sm:$0xff] }
 0x429   : > { %v4029_v25 = vadd.f32 %v10493_v50, %v13423_v22  ;;  %v10576_v29 = vadd.f32 %v4259_v59, %v4035_v41  ;;  %v4026_v37 = vadd.f32 %v10493_v50, %v13424_v24  ;;  %v4028_v16 = vadd.f32 %v10493_v50, %v13425_v21  ;;  %v13427_v62 = vld [vmem:[#allocation6_spill] sm:$0xff]  ;;  %v13429_v22 = vld [vmem:[#allocation195_spill] sm:$0xff]  ;;  %v4229_v21 = vld [vmem:[%s6304_s28 + $0x4d0] sm:$0xff] }
 0x42a   : > { %5151 = vmatpush1.bf16.msra.mxu0 %v4749_v32  ;;  %v10585_v61 = vadd.f32 %v4251_v40, %v4027_v35  ;;  %v4006_v14 = vadd.f32 %v10446_v46, %v13426_v55  ;;  %v4232_v32 = vld [vmem:[%s6304_s28 + $0x4e8] sm:$0xff]  ;;  %v4008_v35 = vadd.f32 %v10446_v46, %v13427_v62  ;;  %v13431_v24 = vld [vmem:[#allocation143_spill] sm:$0xff]  ;;  %v10654_v59 = vmul.f32 %v10389_v19, %v13438_v48  ;;  %v13440_v13 = vld [vmem:[#allocation122_spill] sm:$0xff] }
 0x42b   : > { %v10587_v23 = vadd.f32 %v4253_v57, %v4029_v25  ;;  %v10593_v44 = vadd.f32 %v4250_v4, %v4026_v37  ;;  %v10595_v60 = vadd.f32 %v4252_v38, %v4028_v16  ;;  %v13428_v57 = vld [vmem:[#allocation97_spill] sm:$0xff]  ;;  %v13430_v4 = vld [vmem:[#allocation135_spill] sm:$0xff]  ;;  %v4005_v37 = vadd.f32 %v10446_v46, %v13431_v24 }
 0x42c   : > { %v10600_v41 = vadd.f32 %v4230_v33, %v4006_v14  ;;  %v10612_v25 = vmul.f32 %v13429_v22, %v13428_v57  ;;  %v10616_v38 = vmul.f32 %v13429_v22, %v13430_v4  ;;  %v10623_v55 = vadd.f32 %v4232_v32, %v4008_v35  ;;  %v13432_v14 = vld [vmem:[#allocation4_spill] sm:$0xff]  ;;  %v4231_v16 = vld [vmem:[%s6304_s28 + $0x4e0] sm:$0xff]  ;;  %v13436_v57 = vld [vmem:[#allocation85_spill] sm:$0xff]  ;;  %13439 = vst [vmem:[#allocation228_spill] sm:$0xff] %v10654_v59 }
 0x42d   : > { %v4007_v62 = vadd.f32 %v10446_v46, %v13432_v14  ;;  %v10631_v4 = vmul.f32 %v13429_v22, %v13433_v10  ;;  %v10635_v24 = vmul.f32 %v13429_v22, %v13434_v36  ;;  %v4864_v32 = vld [vmem:[%s10607_s20 + $0x8] sm:$0xff]  ;;  %v10641_v14 = vadd.f32 %v4229_v21, %v4005_v37  ;;  %v13444_v36 = vld [vmem:[#allocation87_spill] sm:$0xff]  ;;  %v13452_v31 = vld [vmem:[#allocation13_spill] sm:$0xff] }
 0x42e   : > { %v4866_v35 = vld [vmem:[%s10607_s20 + $0x28] sm:$0xff]  ;;  %v10645_v40 = vmul.f32 %v10389_v19, %v13436_v57  ;;  %v10649_v10 = vmul.f32 %v10419_v30, %v13437_v26  ;;  %v10658_v37 = vmul.f32 %v10419_v30, %v13440_v13  ;;  %v10664_v21 = vpack.c.bf16 %v4633_v3, %v4626_v49  ;;  %v13442_v26 = vld [vmem:[#allocation83_spill] sm:$0xff]  ;;  %v13453_v5 = vld [vmem:[#allocation53_spill] sm:$0xff] }
 0x42f   : > { %13435 = vst [vmem:[#allocation222_spill] sm:$0xff] %v10641_v14  ;;  %v10666_v57 = vadd.f32 %v4231_v16, %v4007_v62  ;;  %v10670_v33 = vmul.f32 %v10389_v19, %v13442_v26  ;;  %v10674_v48 = vmul.f32 %v10419_v30, %v13444_v36  ;;  %v10676_v6 = vpack.c.bf16 %v4866_v35, %v4864_v32  ;;  %v4164_v13 = vld [vmem:[%s6304_s28 + $0x2c8] sm:$0xff]  ;;  %v13448_v3 = vld [vmem:[#allocation39_spill] sm:$0xff]  ;;  %v13449_v16 = vld [vmem:[#allocation146_spill] sm:$0xff] }
 0x430   : > { %13441 = vst [vmem:[#allocation43_spill] sm:$0xff] %v10664_v21  ;;  %v10684_v8 = vpack.c.bf16 %v4632_v34, %v4625_v52  ;;  %v10690_v49 = vpack.c.bf16 %v4634_v12, %v4627_v2  ;;  %v3940_v62 = vadd.f32 %v13449_v16, %v13448_v3  ;;  %v13450_v32 = vld [vmem:[#allocation179_spill] sm:$0xff]  ;;  %v13451_v35 = vld [vmem:[#allocation152_spill] sm:$0xff]  ;;  %v4067_v52 = vadd.f32 %v10514_v0, %v13452_v31  ;;  %v13454_v2 = vld [vmem:[#allocation57_spill] sm:$0xff] }
 0x431   : > { %13443 = vst [vmem:[#allocation207_spill] sm:$0xff] %v10670_v33  ;;  %13445 = vst [vmem:[#allocation41_spill] sm:$0xff] %v10676_v6  ;;  %v3947_v36 = vadd.f32 %v13451_v35, %v13450_v32  ;;  %v4163_v26 = vld [vmem:[%s6304_s28 + $0x2c0] sm:$0xff]  ;;  %5055 = vmatprep.mubr.bf16.mxu1 %v10676_v6  ;;  %5168 = vmatprep.mubr.bf16.mxu0 %v10676_v6  ;;  %v3939_v43 = vadd.f32 %v13449_v16, %v13453_v5  ;;  %v4165_v12 = vld [vmem:[%s6304_s28 + $0x2d0] sm:$0xff] }
 0x432   : > { %13446 = vst [vmem:[#allocation160_spill] sm:$0xff] %v10684_v8  ;;  %13447 = vst [vmem:[#allocation156_spill] sm:$0xff] %v10690_v49  ;;  %v3946_v34 = vadd.f32 %v13451_v35, %v13454_v2  ;;  %v4172_v3 = vld [vmem:[%s6304_s28 + $0x308] sm:$0xff]  ;;  %v4291_v32 = vld [vmem:[%s6304_s28 + $0x6c0] sm:$0xff]  ;;  %v4388_v45 = vadd.f32 %v4164_v13, %v3940_v62  ;;  %v10717_v5 = vmul.f32 %v10389_v19, %v13457_v39 }
 0x433   : > { %v4395_v17 = vadd.f32 %v4171_v53, %v3947_v36  ;;  %v13455_v49 = vld [vmem:[#allocation151_spill] sm:$0xff]  ;;  %v13456_v31 = vld [vmem:[#allocation90_spill] sm:$0xff]  ;;  %v4157_v6 = vld [vmem:[%s6304_s28 + $0x290] sm:$0xff]  ;;  %v4387_v2 = vadd.f32 %v4163_v26, %v3939_v43 }
 0x434   : > { %v3941_v63 = vadd.f32 %v13449_v16, %v13455_v49  ;;  %v3948_v0 = vadd.f32 %v13451_v35, %v13456_v31  ;;  %v4394_v8 = vadd.f32 %v4170_v42, %v3946_v34  ;;  %v13458_v21 = vld [vmem:[#allocation92_spill] sm:$0xff]  ;;  %v4612_v53 = vmax.f32 %v4388_v45, 0.0  ;;  %v4863_v14 = vld [vmem:[%s10607_s20] sm:$0xff] }
 0x435   : > { %v3933_v13 = vadd.f32 %v10351_v18, %v13458_v21  ;;  %v4619_v62 = vmax.f32 %v4395_v17, 0.0  ;;  %v10721_v16 = vadd.f32 %v4291_v32, %v4067_v52  ;;  %v4611_v35 = vmax.f32 %v4387_v2, 0.0  ;;  %v4156_v59 = vld [vmem:[%s6304_s28 + $0x288] sm:$0xff]  ;;  %v4865_v39 = vld [vmem:[%s10607_s20 + $0x20] sm:$0xff]  ;;  %v13461_v21 = vld [vmem:[#allocation49_spill] sm:$0xff] }
 0x436   : > { %v4389_v36 = vadd.f32 %v4165_v12, %v3941_v63  ;;  %v4396_v49 = vadd.f32 %v4172_v3, %v3948_v0  ;;  %v4618_v31 = vmax.f32 %v4394_v8, 0.0  ;;  %v3932_v45 = vadd.f32 %v10351_v18, %v13461_v21  ;;  %v4158_v17 = vld [vmem:[%s6304_s28 + $0x298] sm:$0xff]  ;;  %v13462_v0 = vld [vmem:[#allocation119_spill] sm:$0xff]  ;;  %v4136_v12 = vld [vmem:[%s6304_s28 + $0x1e8] sm:$0xff] }
 0x437   : > { %13459 = vst [vmem:[#allocation154_spill] sm:$0xff] %v10721_v16  ;;  %v4381_v33 = vadd.f32 %v4157_v6, %v3933_v13  ;;  %v10726_v26 = vpack.c.bf16 %v4619_v62, %v4612_v53  ;;  %v10733_v63 = vmul.f32 %v10419_v30, %v13462_v0  ;;  %v13464_v8 = vld [vmem:[#allocation82_spill] sm:$0xff]  ;;  %v13466_v13 = vld [vmem:[#allocation23_spill] sm:$0xff]  ;;  %v4137_v0 = vld [vmem:[%s6304_s28 + $0x1f0] sm:$0xff] }
 0x438   : > { %v4613_v42 = vmax.f32 %v4389_v36, 0.0  ;;  %v4620_v43 = vmax.f32 %v4396_v49, 0.0  ;;  %v10735_v52 = vpack.c.bf16 %v4618_v31, %v4611_v35  ;;  %v3934_v34 = vadd.f32 %v10351_v18, %v13464_v8  ;;  %v4135_v62 = vld [vmem:[%s6304_s28 + $0x1e0] sm:$0xff]  ;;  %v13468_v49 = vld [vmem:[#allocation180_spill] sm:$0xff] }
 0x439   : > { %13460 = vst [vmem:[#allocation201_spill] sm:$0xff] %v10726_v26  ;;  %v4605_v6 = vmax.f32 %v4381_v33, 0.0  ;;  %v4380_v2 = vadd.f32 %v4156_v59, %v3932_v45  ;;  %v3912_v53 = vadd.f32 %v10371_v56, %v13466_v13  ;;  %v10746_v36 = vpack.c.bf16 %v4865_v39, %v4863_v14  ;;  %v13471_v18 = vld [vmem:[#allocation56_spill] sm:$0xff]  ;;  %v4129_v14 = vld [vmem:[%s6304_s28 + $0x1b0] sm:$0xff]  ;;  %v13479_v3 = vld [vmem:[#allocation127_spill] sm:$0xff] }
 0x43a   : > { %13463 = vst [vmem:[#allocation47_spill] sm:$0xff] %v10735_v52  ;;  %v10741_v32 = vpack.c.bf16 %v4620_v43, %v4613_v42  ;;  %v13469_v35 = vmax.f32 %v13468_v49, 0.0  ;;  %v4382_v31 = vadd.f32 %v4158_v17, %v3934_v34  ;;  %v3911_v21 = vadd.f32 %v10371_v56, %v13471_v18  ;;  %v13472_v45 = vld [vmem:[#allocation120_spill] sm:$0xff]  ;;  %v13474_v34 = vld [vmem:[#allocation33_spill] sm:$0xff]  ;;  %v13475_v18 = vld [vmem:[#allocation134_spill] sm:$0xff] }
 0x43b   : > { %13467 = vst [vmem:[#allocation123_spill] sm:$0xff] %v10746_v36  ;;  %v4604_v59 = vmax.f32 %v4380_v2, 0.0  ;;  %v4360_v43 = vadd.f32 %v4136_v12, %v3912_v53  ;;  %v3913_v8 = vadd.f32 %v10371_v56, %v13472_v45  ;;  %v13473_v39 = vld [vmem:[#allocation16_spill] sm:$0xff]  ;;  %v3905_v49 = vadd.f32 %v10384_v28, %v13474_v34  ;;  %v13478_v56 = vld [vmem:[#allocation218_spill] sm:$0xff]  ;;  %v4235_v52 = vld [vmem:[%s6304_s28 + $0x500] sm:$0xff] }
 0x43c   : > { %13465 = vst [vmem:[#allocation80_spill] sm:$0xff] %v10741_v32  ;;  %v10750_v33 = vpack.c.bf16 %v4605_v6, %v13469_v35  ;;  %v4039_v6 = vadd.f32 %v10470_v11, %v13473_v39  ;;  %v4606_v13 = vmax.f32 %v4382_v31, 0.0  ;;  %v4359_v17 = vadd.f32 %v4135_v62, %v3911_v21  ;;  %v4263_v35 = vld [vmem:[%s6304_s28 + $0x5e0] sm:$0xff]  ;;  %v4256_v62 = vld [vmem:[%s6304_s28 + $0x5a8] sm:$0xff]  ;;  %v13482_v11 = vld [vmem:[#allocation14_spill] sm:$0xff] }
 0x43d   : > { %v13476_v42 = vmax.f32 %v13475_v18, 0.0  ;;  %v4584_v12 = vmax.f32 %v4360_v43, 0.0  ;;  %v4032_v53 = vadd.f32 %v10493_v50, %v13478_v56  ;;  %v4361_v45 = vadd.f32 %v4137_v0, %v3913_v8  ;;  %v4130_v18 = vld [vmem:[%s6304_s28 + $0x1b8] sm:$0xff]  ;;  %v4108_v8 = vld [vmem:[%s6304_s28 + $0x108] sm:$0xff] }
 0x43e   : > { %13470 = vst [vmem:[#allocation37_spill] sm:$0xff] %v10750_v33  ;;  %v13480_v32 = vmax.f32 %v13479_v3, 0.0  ;;  %v4583_v31 = vmax.f32 %v4359_v17, 0.0  ;;  %v4353_v21 = vadd.f32 %v4129_v14, %v3905_v49  ;;  %v4011_v34 = vadd.f32 %v10446_v46, %v13482_v11  ;;  %v4128_v33 = vld [vmem:[%s6304_s28 + $0x1a8] sm:$0xff]  ;;  %v13486_v56 = vld [vmem:[#allocation66_spill] sm:$0xff]  ;;  %v13487_v3 = vld [vmem:[#allocation31_spill] sm:$0xff] }
 0x43f   : > { %v10766_v2 = vpack.c.bf16 %v4604_v59, %v13476_v42  ;;  %v13483_v42 = vld [vmem:[#allocation174_spill] sm:$0xff]  ;;  %v4585_v43 = vmax.f32 %v4361_v45, 0.0  ;;  %v3904_v0 = vadd.f32 %v10384_v28, %v13486_v56  ;;  %v10789_v14 = vadd.f32 %v4263_v35, %v4039_v6  ;;  %v13490_v49 = vld [vmem:[#allocation21_spill] sm:$0xff] }
 0x440   : > { %v10772_v39 = vpack.c.bf16 %v4606_v13, %v13480_v32  ;;  %v13484_v59 = vmax.f32 %v13483_v42, 0.0  ;;  %v3906_v32 = vadd.f32 %v10384_v28, %v13487_v3  ;;  %v13488_v11 = vmax.f32 %v10297_v47, 0.0  ;;  %v13493_v3 = vld [vmem:[#allocation75_spill] sm:$0xff]  ;;  %v13496_v47 = vld [vmem:[#allocation217_spill] sm:$0xff]  ;;  %v4274_v26 = vld [vmem:[%s6304_s28 + $0x638] sm:$0xff] }
 0x441   : > { %13477 = vst [vmem:[#allocation70_spill] sm:$0xff] %v10766_v2  ;;  %v4577_v17 = vmax.f32 %v4353_v21, 0.0  ;;  %v10797_v45 = vadd.f32 %v4256_v62, %v4032_v53  ;;  %v13491_v42 = vmax.f32 %v10300_v9, 0.0  ;;  %v4352_v56 = vadd.f32 %v4128_v33, %v3904_v0  ;;  %v10813_v62 = vpop.permute.xlu1 %3838  ;;  %v4279_v9 = vld [vmem:[%s6304_s28 + $0x660] sm:$0xff]  ;;  %v13499_v0 = vld [vmem:[#allocation54_spill] sm:$0xff] }
 0x442   : > { %13481 = vst [vmem:[#allocation172_spill] sm:$0xff] %v10772_v39  ;;  %v10781_v2 = vpack.c.bf16 %v13484_v59, %v4584_v12  ;;  %v10793_v13 = vpack.c.bf16 %v13488_v11, %v4583_v31  ;;  %v3884_v12 = vadd.f32 %v10409_v20, %v13490_v49  ;;  %v4354_v28 = vadd.f32 %v4130_v18, %v3906_v32  ;;  %v13500_v11 = vld [vmem:[#allocation118_spill] sm:$0xff]  ;;  %v13501_v49 = vld [vmem:[#allocation153_spill] sm:$0xff] }
 0x443   : > { %v10801_v59 = vpack.c.bf16 %v13491_v42, %v4585_v43  ;;  %v13494_v6 = vmax.f32 %v13493_v3, 0.0  ;;  %v10809_v31 = vmul.f32 %v13496_v47, %v13429_v22  ;;  %v10811_v21 = vadd.f32 %v4235_v52, %v4011_v34  ;;  %13498 = vst [vmem:[#allocation148_spill] sm:$0xff] %v10813_v62  ;;  %v4281_v43 = vld [vmem:[%s6304_s28 + $0x670] sm:$0xff]  ;;  %v13502_v3 = vld [vmem:[#allocation124_spill] sm:$0xff]  ;;  %v13503_v34 = vld [vmem:[#allocation130_spill] sm:$0xff] }
 0x444   : > { %13485 = vst [vmem:[#allocation197_spill] sm:$0xff] %v10781_v2  ;;  %13489 = vst [vmem:[#allocation61_spill] sm:$0xff] %v10793_v13  ;;  %v4332_v53 = vadd.f32 %v4108_v8, %v3884_v12  ;;  %v4576_v33 = vmax.f32 %v4352_v56, 0.0  ;;  %v4578_v18 = vmax.f32 %v4354_v28, 0.0  ;;  %v3883_v32 = vadd.f32 %v10409_v20, %v13499_v0  ;;  %v4278_v12 = vld [vmem:[%s6304_s28 + $0x658] sm:$0xff]  ;;  %v13504_v56 = vld [vmem:[#allocation216_spill] sm:$0xff] }
 0x445   : > { %13492 = vst [vmem:[#allocation94_spill] sm:$0xff] %v10801_v59  ;;  %v10805_v35 = vpack.c.bf16 %v4577_v17, %v13494_v6  ;;  %13497 = vst [vmem:[#allocation72_spill] sm:$0xff] %v10809_v31  ;;  %v3885_v17 = vadd.f32 %v10409_v20, %v13500_v11  ;;  %v4055_v42 = vadd.f32 %v10813_v62, %v13501_v49  ;;  %v4280_v6 = vld [vmem:[%s6304_s28 + $0x668] sm:$0xff]  ;;  %v13506_v11 = vld [vmem:[#allocation107_spill] sm:$0xff]  ;;  %v13531_v36 = vmax.f32 %v10566_v7, 0.0 }
 0x446   : > { %v4057_v52 = vadd.f32 %v10813_v62, %v13502_v3  ;;  %v4054_v8 = vadd.f32 %v10813_v62, %v13503_v34  ;;  %v4056_v28 = vadd.f32 %v10813_v62, %v13504_v56  ;;  %v4284_v47 = vld [vmem:[%s6304_s28 + $0x688] sm:$0xff]  ;;  %v13507_v49 = vmax.f32 %v13506_v11, 0.0  ;;  %v13509_v3 = vld [vmem:[#allocation149_spill] sm:$0xff]  ;;  %v13512_v13 = vld [vmem:[#allocation215_spill] sm:$0xff] }
 0x447   : > { %13495 = vst [vmem:[#allocation59_spill] sm:$0xff] %v10805_v35  ;;  %v13505_v20 = vld [vmem:[#allocation164_spill] sm:$0xff]  ;;  %v13510_v22 = vmax.f32 %v13509_v3, 0.0  ;;  %v4556_v34 = vmax.f32 %v4332_v53, 0.0  ;;  %v4293_v59 = vld [vmem:[%s6304_s28 + $0x6d0] sm:$0xff]  ;;  %v10843_v35 = vadd.f32 %v4279_v9, %v4055_v42  ;;  %v10849_v39 = vmul.f32 %v10389_v19, %v13512_v13  ;;  %v13514_v2 = vld [vmem:[#allocation219_spill] sm:$0xff] }
 0x448   : > { %v4060_v0 = vadd.f32 %v10813_v62, %v13505_v20  ;;  %v10836_v46 = vpack.c.bf16 %v4576_v33, %v13507_v49  ;;  %v10845_v56 = vadd.f32 %v4281_v43, %v4057_v52  ;;  %v10853_v20 = vmul.f32 %v10419_v30, %v13514_v2  ;;  %v4107_v33 = vld [vmem:[%s6304_s28 + $0x100] sm:$0xff]  ;;  %v4109_v11 = vld [vmem:[%s6304_s28 + $0x110] sm:$0xff]  ;;  %v10857_v49 = vpop.permute.xlu0 %3848  ;;  %v4294_v9 = vld [vmem:[%s6304_s28 + $0x6d8] sm:$0xff] }
 0x449   : > { %v10840_v50 = vpack.c.bf16 %v4578_v18, %v13510_v22  ;;  %13513 = vst [vmem:[#allocation51_spill] sm:$0xff] %v10849_v39  ;;  %13516 = vst [vmem:[#allocation98_spill] sm:$0xff] %v10857_v49  ;;  %v10859_v22 = vpop.permute.xlu1 %3798  ;;  %v4295_v53 = vld [vmem:[%s6304_s28 + $0x6e0] sm:$0xff]  ;;  %v4292_v18 = vld [vmem:[%s6304_s28 + $0x6c8] sm:$0xff]  ;;  %v10864_v42 = vadd.f32 %v4278_v12, %v4054_v8  ;;  %v10866_v43 = vadd.f32 %v4280_v6, %v4056_v28  ;;  %v4727_v6 = vmax.f32 %v10843_v35, 0.0 }
 0x44a   : > { %13508 = vst [vmem:[#allocation205_spill] sm:$0xff] %v10836_v46  ;;  %13515 = vst [vmem:[#allocation162_spill] sm:$0xff] %v10853_v20  ;;  %v10868_v13 = vadd.f32 %v4284_v47, %v4060_v0  ;;  %v13517_v52 = vld [vmem:[#allocation34_spill] sm:$0xff]  ;;  %v13520_v30 = vld [vmem:[#allocation93_spill] sm:$0xff]  ;;  %v4729_v47 = vmax.f32 %v10845_v56, 0.0  ;;  %v10884_v0 = vadd.f32 %v4107_v33, %v3883_v32  ;;  %v10895_v35 = vadd.f32 %v10859_v22, %v10649_v10 }
 0x44b   : > { %13511 = vst [vmem:[#allocation86_spill] sm:$0xff] %v10840_v50  ;;  %v13518_v3 = vmax.f32 %v13517_v52, 0.0  ;;  %v4069_v19 = vadd.f32 %v10857_v49, %v13520_v30  ;;  %v13521_v50 = vld [vmem:[#allocation129_spill] sm:$0xff]  ;;  %v13522_v46 = vld [vmem:[#allocation91_spill] sm:$0xff]  ;;  %v10899_v32 = vadd.f32 %v10859_v22, %v10658_v37  ;;  %v13525_v10 = vld [vmem:[#allocation186_spill] sm:$0xff] }
 0x44c   : > { %v4071_v62 = vadd.f32 %v10857_v49, %v13521_v50  ;;  %v4068_v8 = vadd.f32 %v10857_v49, %v13522_v46  ;;  %v13523_v12 = vld [vmem:[#allocation125_spill] sm:$0xff]  ;;  %v4272_v46 = vld [vmem:[%s6304_s28 + $0x628] sm:$0xff] }
 0x44d   : > { %v10872_v2 = vpack.c.bf16 %v13518_v3, %v4556_v34  ;;  %v4070_v28 = vadd.f32 %v10857_v49, %v13523_v12  ;;  %v10886_v34 = vadd.f32 %v4109_v11, %v3885_v17  ;;  %v4517_v52 = vadd.f32 %v4293_v59, %v4069_v19  ;;  %v10905_v59 = vpop.permute.xlu1 %3404  ;;  %v4271_v11 = vld [vmem:[%s6304_s28 + $0x620] sm:$0xff]  ;;  %v13526_v37 = vld [vmem:[#allocation5_spill] sm:$0xff] }
 0x44e   : > { %v4519_v30 = vadd.f32 %v4295_v53, %v4071_v62  ;;  %v4516_v3 = vadd.f32 %v4292_v18, %v4068_v8  ;;  %v4726_v12 = vmax.f32 %v10864_v42, 0.0  ;;  %v10903_v19 = vadd.f32 %v10859_v22, %v10674_v48  ;;  %13524 = vst [vmem:[#allocation158_spill] sm:$0xff] %v10905_v59  ;;  %v4273_v53 = vld [vmem:[%s6304_s28 + $0x630] sm:$0xff]  ;;  %v13527_v42 = vld [vmem:[#allocation36_spill] sm:$0xff] }
 0x44f   : > { %13519 = vst [vmem:[#allocation170_spill] sm:$0xff] %v10872_v2  ;;  %v4518_v50 = vadd.f32 %v4294_v9, %v4070_v28  ;;  %v10888_v2 = vpop.permute.xlu0 %3833  ;;  %v4741_v62 = vmax.f32 %v4517_v52, 0.0  ;;  %v13528_v8 = vld [vmem:[#allocation9_spill] sm:$0xff]  ;;  %v13529_v52 = vmax.f32 %v10547_v15, 0.0  ;;  %v4264_v15 = vld [vmem:[%s6304_s28 + $0x5e8] sm:$0xff] }
 0x450   : > { %v4743_v17 = vmax.f32 %v4519_v30, 0.0  ;;  %v4740_v56 = vmax.f32 %v4516_v3, 0.0  ;;  %v4048_v18 = vadd.f32 %v10888_v2, %v13525_v10  ;;  %v4050_v9 = vadd.f32 %v10888_v2, %v13526_v37  ;;  %v4265_v59 = vld [vmem:[%s6304_s28 + $0x5f0] sm:$0xff] }
 0x451   : > { %v4742_v33 = vmax.f32 %v4518_v50, 0.0  ;;  %v4047_v48 = vadd.f32 %v10888_v2, %v13527_v42  ;;  %v4049_v28 = vadd.f32 %v10888_v2, %v13528_v8  ;;  %v4853_v30 = vpack.c.bf16 %v4741_v62, %v13529_v52  ;;  %v4267_v8 = vld [vmem:[%s6304_s28 + $0x600] sm:$0xff]  ;;  %v13533_v62 = vld [vmem:[#allocation185_spill] sm:$0xff] }
 0x452   : > { %v13530_v3 = vmax.f32 %v10556_v58, 0.0  ;;  %v4852_v16 = vpack.c.bf16 %v4740_v56, %v13531_v36  ;;  %v13532_v10 = vmax.f32 %v10568_v51, 0.0  ;;  %v4496_v37 = vadd.f32 %v4272_v46, %v4048_v18  ;;  %v13534_v36 = vld [vmem:[#allocation42_spill] sm:$0xff] }
 0x453   : > { %v10925_v39 = vpop.permute.xlu0 %3828  ;;  %v4498_v31 = vadd.f32 %v4274_v26, %v4050_v9  ;;  %v4495_v42 = vadd.f32 %v4271_v11, %v4047_v48  ;;  %v4497_v49 = vadd.f32 %v4273_v53, %v4049_v28  ;;  %5039 = vmatprep.subr.bf16.mxu1 %v4853_v30  ;;  %v4728_v58 = vmax.f32 %v10866_v43, 0.0  ;;  %v10937_v26 = vpop.permute.xlu1 %3783  ;;  %v4266_v43 = vld [vmem:[%s6304_s28 + $0x5f8] sm:$0xff]  ;;  %v13536_v28 = vld [vmem:[#allocation163_spill] sm:$0xff] }
 0x454   : > { %v4855_v50 = vpack.c.bf16 %v4743_v17, %v13530_v3  ;;  %v4854_v20 = vpack.c.bf16 %v4742_v33, %v13532_v10  ;;  %v4041_v7 = vadd.f32 %v10925_v39, %v13533_v62  ;;  %v4043_v51 = vadd.f32 %v10925_v39, %v13534_v36  ;;  %v13535_v17 = vld [vmem:[#allocation7_spill] sm:$0xff]  ;;  %5040 = vmatpush2.bf16.msra.mxu1 %v4852_v16  ;;  %v4246_v62 = vld [vmem:[%s6304_s28 + $0x558] sm:$0xff] }
 0x455   : > { %v4040_v46 = vadd.f32 %v10925_v39, %v13535_v17  ;;  %v4720_v56 = vmax.f32 %v4496_v37, 0.0  ;;  %v4722_v33 = vmax.f32 %v4498_v31, 0.0  ;;  %v4719_v11 = vmax.f32 %v4495_v42, 0.0  ;;  %v4243_v36 = vld [vmem:[%s6304_s28 + $0x540] sm:$0xff] }
 0x456   : > { %5152 = vmatprep.subr.bf16.mxu0 %v4855_v50  ;;  %v4721_v53 = vmax.f32 %v4497_v49, 0.0  ;;  %v4489_v18 = vadd.f32 %v4265_v59, %v4041_v7  ;;  %v4491_v9 = vadd.f32 %v4267_v8, %v4043_v51  ;;  %v4042_v52 = vadd.f32 %v10925_v39, %v13536_v28  ;;  %v4244_v49 = vld [vmem:[%s6304_s28 + $0x548] sm:$0xff]  ;;  %v13537_v59 = vld [vmem:[#allocation221_spill] sm:$0xff] }
 0x457   : > { %5153 = vmatpush2.bf16.msra.mxu0 %v4854_v20  ;;  %v4488_v48 = vadd.f32 %v4264_v15, %v4040_v46  ;;  %v10942_v30 = vpop.permute.xlu0 %3813  ;;  %v4846_v16 = vpack.c.bf16 %v4727_v6, %v4720_v56  ;;  %v4848_v20 = vpack.c.bf16 %v4729_v47, %v4722_v33  ;;  %v4845_v3 = vpack.c.bf16 %v4726_v12, %v4719_v11  ;;  %v13538_v15 = vld [vmem:[#allocation110_spill] sm:$0xff]  ;;  %v13539_v6 = vld [vmem:[#allocation108_spill] sm:$0xff] }
 0x458   : > { %v4847_v50 = vpack.c.bf16 %v4728_v58, %v4721_v53  ;;  %v4713_v10 = vmax.f32 %v4489_v18, 0.0  ;;  %v4715_v31 = vmax.f32 %v4491_v9, 0.0  ;;  %v4490_v42 = vadd.f32 %v4266_v43, %v4042_v52  ;;  %v10954_v58 = vpop.permute.xlu1 %3389  ;;  %v4245_v43 = vld [vmem:[%s6304_s28 + $0x550] sm:$0xff]  ;;  %v13543_v52 = vld [vmem:[#allocation18_spill] sm:$0xff] }
 0x459   : > { %v4712_v37 = vmax.f32 %v4488_v48, 0.0  ;;  %5041 = vmatprep.subr.bf16.mxu1 %v4846_v16  ;;  %5154 = vmatprep.subr.bf16.mxu0 %v4848_v20  ;;  %v4020_v8 = vadd.f32 %v10942_v30, %v13537_v59  ;;  %v4022_v7 = vadd.f32 %v10942_v30, %v13538_v15  ;;  %v4019_v47 = vadd.f32 %v10942_v30, %v13539_v6  ;;  %v4237_v20 = vld [vmem:[%s6304_s28 + $0x510] sm:$0xff] }
 0x45a   : > { %v4711_v12 = vmax.f32 %v10789_v14, 0.0  ;;  %5042 = vmatpush2.bf16.msra.mxu1 %v4845_v3  ;;  %v13540_v51 = vmax.f32 %v10516_v27, 0.0  ;;  %v13541_v46 = vmax.f32 %v10540_v54, 0.0  ;;  %v13542_v33 = vmax.f32 %v10558_v1, 0.0  ;;  %v4239_v3 = vld [vmem:[%s6304_s28 + $0x520] sm:$0xff]  ;;  %v13594_v14 = vld [vmem:[#allocation168_spill] sm:$0xff] }
 0x45b   : > { %5155 = vmatpush2.bf16.msra.mxu0 %v4847_v50  ;;  %v4714_v53 = vmax.f32 %v4490_v42, 0.0  ;;  %v10963_v18 = vpop.permute.xlu0 %3808  ;;  %v4468_v9 = vadd.f32 %v4244_v49, %v4020_v8  ;;  %v4470_v48 = vadd.f32 %v4246_v62, %v4022_v7  ;;  %v4467_v28 = vadd.f32 %v4243_v36, %v4019_v47 }
 0x45c   : > { %v4839_v17 = vpack.c.bf16 %v4713_v10, %v13540_v51  ;;  %v4841_v56 = vpack.c.bf16 %v4715_v31, %v13541_v46  ;;  %v4838_v11 = vpack.c.bf16 %v4712_v37, %v13542_v33  ;;  %v4021_v16 = vadd.f32 %v10942_v30, %v13543_v52  ;;  %v10976_v62 = vpop.permute.xlu1 %3394  ;;  %v4238_v33 = vld [vmem:[%s6304_s28 + $0x518] sm:$0xff]  ;;  %v13550_v52 = vld [vmem:[#allocation103_spill] sm:$0xff] }
 0x45d   : > { %v13544_v27 = vmax.f32 %v10576_v29, 0.0  ;;  %v4013_v1 = vadd.f32 %v10963_v18, %v10612_v25  ;;  %v4015_v50 = vadd.f32 %v10963_v18, %v10616_v38  ;;  %v4704_v10 = vmax.f32 %v10797_v45, 0.0  ;;  %v4236_v25 = vld [vmem:[%s6304_s28 + $0x508] sm:$0xff] }
 0x45e   : > { %5043 = vmatprep.subr.bf16.mxu1 %v4839_v17  ;;  %5156 = vmatprep.subr.bf16.mxu0 %v4841_v56  ;;  %v4692_v31 = vmax.f32 %v4468_v9, 0.0  ;;  %v4694_v37 = vmax.f32 %v4470_v48, 0.0  ;;  %v4691_v42 = vmax.f32 %v4467_v28, 0.0  ;;  %v4469_v49 = vadd.f32 %v4245_v43, %v4021_v16  ;;  %v4223_v48 = vld [vmem:[%s6304_s28 + $0x4a0] sm:$0xff] }
 0x45f   : > { %v4840_v54 = vpack.c.bf16 %v4714_v53, %v13544_v27  ;;  %5044 = vmatpush2.bf16.msra.mxu1 %v4838_v11  ;;  %v4461_v36 = vadd.f32 %v4237_v20, %v4013_v1  ;;  %v4463_v29 = vadd.f32 %v4239_v3, %v4015_v50  ;;  %v4012_v59 = vadd.f32 %v10963_v18, %v10631_v4  ;;  %v10982_v38 = vpop.permute.xlu0 %3793  ;;  %v13549_v28 = vld [vmem:[#allocation71_spill] sm:$0xff] }
 0x460   : > { %v4683_v8 = vmax.f32 %v10811_v21, 0.0  ;;  %v13545_v15 = vmax.f32 %v10585_v61, 0.0  ;;  %v13546_v6 = vmax.f32 %v10587_v23, 0.0  ;;  %v13547_v51 = vmax.f32 %v10593_v44, 0.0  ;;  %v13598_v21 = vld [vmem:[#allocation225_spill] sm:$0xff] }
 0x461   : > { %5157 = vmatpush2.bf16.msra.mxu0 %v4840_v54  ;;  %v4693_v46 = vmax.f32 %v4469_v49, 0.0  ;;  %v4685_v56 = vmax.f32 %v4461_v36, 0.0  ;;  %v4000_v4 = vadd.f32 %v10859_v22, %v10733_v63  ;;  %v4732_v11 = vmax.f32 %v10868_v13, 0.0  ;;  %v4225_v49 = vld [vmem:[%s6304_s28 + $0x4b0] sm:$0xff] }
 0x462   : > { %v4832_v7 = vpack.c.bf16 %v13545_v15, %v4692_v31  ;;  %v4834_v47 = vpack.c.bf16 %v13546_v6, %v4694_v37  ;;  %v4831_v17 = vpack.c.bf16 %v13547_v51, %v4691_v42  ;;  %v4555_v53 = vmax.f32 %v10884_v0, 0.0  ;;  %v13555_v6 = vld [vmem:[#allocation222_spill] sm:$0xff]  ;;  %v13590_v13 = vld [vmem:[#allocation201_spill] sm:$0xff] }
 0x463   : > { %v13548_v61 = vmax.f32 %v10595_v60, 0.0  ;;  %v4687_v43 = vmax.f32 %v4463_v29, 0.0  ;;  %v4460_v9 = vadd.f32 %v4236_v25, %v4012_v59  ;;  %v4014_v44 = vadd.f32 %v10963_v18, %v10635_v24  ;;  %v4216_v60 = vld [vmem:[%s6304_s28 + $0x468] sm:$0xff]  ;;  %v11008_v54 = vpop.permute.xlu0 %3788  ;;  %v11010_v24 = vpop.permute.xlu1 %3778  ;;  %v13553_v29 = vld [vmem:[#allocation67_spill] sm:$0xff] }
 0x464   : > { %5045 = vmatprep.subr.bf16.mxu1 %v4832_v7  ;;  %5158 = vmatprep.subr.bf16.mxu0 %v4834_v47  ;;  %v3586_v63 = vmul.f32 %v10976_v62, %v13549_v28  ;;  %v3588_v16 = vmul.f32 %v10976_v62, %v13550_v52  ;;  %v13551_v20 = vmax.f32 %v10600_v41, 0.0  ;;  %v4557_v27 = vmax.f32 %v10886_v34, 0.0  ;;  %v4222_v41 = vld [vmem:[%s6304_s28 + $0x498] sm:$0xff]  ;;  %v13554_v25 = vld [vmem:[#allocation99_spill] sm:$0xff] }
 0x465   : > { %v4833_v23 = vpack.c.bf16 %v13548_v61, %v4693_v46  ;;  %5046 = vmatpush2.bf16.msra.mxu1 %v4831_v17  ;;  %v13552_v1 = vmax.f32 %v10623_v55, 0.0  ;;  %v4684_v31 = vmax.f32 %v4460_v9, 0.0  ;;  %v4462_v37 = vadd.f32 %v4238_v33, %v4014_v44  ;;  %v4218_v7 = vld [vmem:[%s6304_s28 + $0x478] sm:$0xff]  ;;  %v13557_v46 = vld [vmem:[#allocation228_spill] sm:$0xff]  ;;  %v4215_v9 = vld [vmem:[%s6304_s28 + $0x460] sm:$0xff] }
 0x466   : > { %v4825_v3 = vpack.c.bf16 %v4685_v56, %v13551_v20  ;;  %v3992_v42 = vadd.f32 %v10982_v38, %v10645_v40  ;;  %v11019_v36 = vadd.f32 %v11010_v24, %v3586_v63  ;;  %v3579_v59 = vmul.f32 %v10954_v58, %v13553_v29  ;;  %v13560_v29 = vld [vmem:[#allocation81_spill] sm:$0xff]  ;;  %v13592_v34 = vld [vmem:[#allocation78_spill] sm:$0xff] }
 0x467   : > { %5159 = vmatpush2.bf16.msra.mxu0 %v4833_v23  ;;  %v4827_v50 = vpack.c.bf16 %v4687_v43, %v13552_v1  ;;  %v3581_v15 = vmul.f32 %v10954_v58, %v13554_v25  ;;  %v4447_v55 = vadd.f32 %v4223_v48, %v10895_v35  ;;  %v13556_v47 = vmax.f32 %v13555_v6, 0.0  ;;  %v13558_v23 = vld [vmem:[#allocation207_spill] sm:$0xff]  ;;  %v11038_v28 = vpop.permute.xlu0 %3773 }
 0x468   : > { %5047 = vmatprep.subr.bf16.mxu1 %v4825_v3  ;;  %v4686_v51 = vmax.f32 %v4462_v37, 0.0  ;;  %v4440_v17 = vadd.f32 %v4216_v60, %v3992_v42  ;;  %v3994_v56 = vadd.f32 %v10982_v38, %v13557_v46  ;;  %v4449_v61 = vadd.f32 %v4225_v49, %v10899_v32  ;;  %v4217_v3 = vld [vmem:[%s6304_s28 + $0x470] sm:$0xff]  ;;  %v4224_v32 = vld [vmem:[%s6304_s28 + $0x4a8] sm:$0xff] }
 0x469   : > { %5160 = vmatprep.subr.bf16.mxu0 %v4827_v50  ;;  %v4824_v40 = vpack.c.bf16 %v4684_v31, %v13556_v47  ;;  %v4671_v33 = vmax.f32 %v4447_v55, 0.0  ;;  %v3991_v43 = vadd.f32 %v10982_v38, %v13558_v23  ;;  %v4446_v35 = vadd.f32 %v4222_v41, %v10903_v19  ;;  %v13562_v55 = vld [vmem:[#allocation224_spill] sm:$0xff]  ;;  %v4209_v47 = vld [vmem:[%s6304_s28 + $0x430] sm:$0xff]  ;;  %v4211_v23 = vld [vmem:[%s6304_s28 + $0x440] sm:$0xff] }
 0x46a   : > { %v13559_v44 = vmax.f32 %v10666_v57, 0.0  ;;  %v4664_v63 = vmax.f32 %v4440_v17, 0.0  ;;  %v4442_v52 = vadd.f32 %v4218_v7, %v3994_v56  ;;  %v3993_v20 = vadd.f32 %v10982_v38, %v10717_v5  ;;  %v4202_v5 = vld [vmem:[%s6304_s28 + $0x3f8] sm:$0xff]  ;;  %v4204_v7 = vld [vmem:[%s6304_s28 + $0x408] sm:$0xff] }
 0x46b   : > { %5048 = vmatpush2.bf16.msra.mxu1 %v4824_v40  ;;  %v11045_v60 = vadd.f32 %v11010_v24, %v3588_v16  ;;  %v11048_v19 = vadd.f32 %v11038_v28, %v3579_v59  ;;  %v11051_v57 = vadd.f32 %v11038_v28, %v3581_v15  ;;  %v4673_v1 = vmax.f32 %v4449_v61, 0.0  ;;  %v13561_v16 = vld [vmem:[#allocation158_spill] sm:$0xff]  ;;  %v13563_v40 = vld [vmem:[#allocation113_spill] sm:$0xff] }
 0x46c   : > { %v4826_v48 = vpack.c.bf16 %v4686_v51, %v13559_v44  ;;  %v4818_v50 = vpack.c.bf16 %v4671_v33, %v4664_v63  ;;  %v4666_v31 = vmax.f32 %v4442_v52, 0.0  ;;  %v4439_v37 = vadd.f32 %v4215_v9, %v3991_v43  ;;  %v13564_v17 = vld [vmem:[#allocation10_spill] sm:$0xff]  ;;  %v13565_v44 = vld [vmem:[#allocation79_spill] sm:$0xff]  ;;  %v4201_v63 = vld [vmem:[%s6304_s28 + $0x3f0] sm:$0xff] }
 0x46d   : > { %v4670_v42 = vmax.f32 %v4446_v35, 0.0  ;;  %v4441_v49 = vadd.f32 %v4217_v3, %v3993_v20  ;;  %v4448_v41 = vadd.f32 %v4224_v32, %v4000_v4  ;;  %v3601_v25 = vmul.f32 %v13561_v16, %v13560_v29  ;;  %v13566_v32 = vld [vmem:[#allocation214_spill] sm:$0xff] }
 0x46e   : > { %5161 = vmatpush2.bf16.msra.mxu0 %v4826_v48  ;;  %v3978_v59 = vadd.f32 %v10937_v26, %v13562_v55  ;;  %5049 = vmatprep.subr.bf16.mxu1 %v4818_v50  ;;  %v4820_v15 = vpack.c.bf16 %v4673_v1, %v4666_v31  ;;  %v4663_v6 = vmax.f32 %v4439_v37, 0.0  ;;  %v3603_v51 = vmul.f32 %v13561_v16, %v13563_v40  ;;  %v4208_v50 = vld [vmem:[%s6304_s28 + $0x428] sm:$0xff] }
 0x46f   : > { %v3980_v46 = vadd.f32 %v10937_v26, %v13564_v17  ;;  %v4665_v4 = vmax.f32 %v4441_v49, 0.0  ;;  %v4672_v56 = vmax.f32 %v4448_v41, 0.0  ;;  %v3985_v33 = vadd.f32 %v11008_v54, %v3601_v25  ;;  %v4203_v41 = vld [vmem:[%s6304_s28 + $0x400] sm:$0xff]  ;;  %v13568_v55 = vld [vmem:[#allocation188_spill] sm:$0xff]  ;;  %v13570_v17 = vld [vmem:[#allocation73_spill] sm:$0xff] }
 0x470   : > { %v4426_v61 = vadd.f32 %v4202_v5, %v3978_v59  ;;  %5162 = vmatprep.subr.bf16.mxu0 %v4820_v15  ;;  %v4817_v43 = vpack.c.bf16 %v4670_v42, %v4663_v6  ;;  %v3987_v9 = vadd.f32 %v11008_v54, %v3603_v51  ;;  %v3600_v48 = vmul.f32 %v13561_v16, %v13565_v44  ;;  %v13567_v5 = vld [vmem:[#allocation111_spill] sm:$0xff]  ;;  %v13569_v15 = vld [vmem:[#allocation69_spill] sm:$0xff] }
 0x471   : > { %v4428_v35 = vadd.f32 %v4204_v7, %v3980_v46  ;;  %v4819_v52 = vpack.c.bf16 %v4672_v56, %v4665_v4  ;;  %v4433_v20 = vadd.f32 %v4209_v47, %v3985_v33  ;;  %v3977_v1 = vadd.f32 %v10937_v26, %v13566_v32  ;;  %v4210_v7 = vld [vmem:[%s6304_s28 + $0x438] sm:$0xff]  ;;  %v4188_v4 = vld [vmem:[%s6304_s28 + $0x388] sm:$0xff] }
 0x472   : > { %v4650_v3 = vmax.f32 %v4426_v61, 0.0  ;;  %5050 = vmatpush2.bf16.msra.mxu1 %v4817_v43  ;;  %v4435_v31 = vadd.f32 %v4211_v23, %v3987_v9  ;;  %v3984_v42 = vadd.f32 %v11008_v54, %v3600_v48  ;;  %v3602_v49 = vmul.f32 %v13561_v16, %v13567_v5  ;;  %v4195_v43 = vld [vmem:[%s6304_s28 + $0x3c0] sm:$0xff] }
 0x473   : > { %v4652_v37 = vmax.f32 %v4428_v35, 0.0  ;;  %5163 = vmatpush2.bf16.msra.mxu0 %v4819_v52  ;;  %v4657_v29 = vmax.f32 %v4433_v20, 0.0  ;;  %v4425_v25 = vadd.f32 %v4201_v63, %v3977_v1  ;;  %v3979_v59 = vadd.f32 %v10937_v26, %v13568_v55  ;;  %v4187_v9 = vld [vmem:[%s6304_s28 + $0x380] sm:$0xff]  ;;  %v4194_v52 = vld [vmem:[%s6304_s28 + $0x3b8] sm:$0xff]  ;;  %v4196_v55 = vld [vmem:[%s6304_s28 + $0x3c8] sm:$0xff] }
 0x474   : > { %v3580_v6 = vmul.f32 %v10954_v58, %v13569_v15  ;;  %v4659_v47 = vmax.f32 %v4435_v31, 0.0  ;;  %v4432_v40 = vadd.f32 %v4208_v50, %v3984_v42  ;;  %v3986_v51 = vadd.f32 %v11008_v54, %v3602_v49  ;;  %v13572_v50 = vld [vmem:[#allocation105_spill] sm:$0xff] }
 0x475   : > { %v3587_v46 = vmul.f32 %v10976_v62, %v13570_v17  ;;  %v4811_v56 = vpack.c.bf16 %v4657_v29, %v4650_v3  ;;  %v4649_v33 = vmax.f32 %v4425_v25, 0.0  ;;  %v4427_v61 = vadd.f32 %v4203_v41, %v3979_v59  ;;  %v13571_v3 = vld [vmem:[#allocation101_spill] sm:$0xff]  ;;  %v4190_v41 = vld [vmem:[%s6304_s28 + $0x398] sm:$0xff] }
 0x476   : > { %v3964_v23 = vadd.f32 %v11038_v28, %v3580_v6  ;;  %v4813_v35 = vpack.c.bf16 %v4659_v47, %v4652_v37  ;;  %v4656_v44 = vmax.f32 %v4432_v40, 0.0  ;;  %v4434_v48 = vadd.f32 %v4210_v7, %v3986_v51  ;;  %v4189_v42 = vld [vmem:[%s6304_s28 + $0x390] sm:$0xff] }
 0x477   : > { %v3971_v63 = vadd.f32 %v11010_v24, %v3587_v46  ;;  %5051 = vmatprep.subr.bf16.mxu1 %v4811_v56  ;;  %v4651_v20 = vmax.f32 %v4427_v61, 0.0  ;;  %v3582_v1 = vmul.f32 %v10954_v58, %v13571_v3  ;;  %v3589_v31 = vmul.f32 %v10976_v62, %v13572_v50  ;;  %v4197_v29 = vld [vmem:[%s6304_s28 + $0x3d0] sm:$0xff]  ;;  %v13576_v50 = vld [vmem:[#allocation20_spill] sm:$0xff] }
 0x478   : > { %v4412_v32 = vadd.f32 %v4188_v4, %v3964_v23  ;;  %5164 = vmatprep.subr.bf16.mxu0 %v4813_v35  ;;  %v4810_v5 = vpack.c.bf16 %v4656_v44, %v4649_v33  ;;  %v4658_v37 = vmax.f32 %v4434_v48, 0.0  ;;  %v4411_v25 = vadd.f32 %v4187_v9, %v11048_v19  ;;  %v4298_v33 = vld [vmem:[%s6304_s28 + $0x6f8] sm:$0xff]  ;;  %v4277_v61 = vld [vmem:[%s6304_s28 + $0x650] sm:$0xff] }
 0x479   : > { %v4419_v49 = vadd.f32 %v4195_v43, %v3971_v63  ;;  %v3966_v7 = vadd.f32 %v11038_v28, %v3582_v1  ;;  %v3973_v15 = vadd.f32 %v11010_v24, %v3589_v31  ;;  %v4418_v6 = vadd.f32 %v4194_v52, %v11019_v36  ;;  %v13573_v43 = vld [vmem:[#allocation137_spill] sm:$0xff]  ;;  %v13574_v9 = vld [vmem:[#allocation98_spill] sm:$0xff] }
 0x47a   : > { %v4636_v59 = vmax.f32 %v4412_v32, 0.0  ;;  %5052 = vmatpush2.bf16.msra.mxu1 %v4810_v5  ;;  %v4812_v47 = vpack.c.bf16 %v4658_v37, %v4651_v20  ;;  %v4635_v51 = vmax.f32 %v4411_v25, 0.0  ;;  %v4413_v17 = vadd.f32 %v4189_v42, %v11051_v57  ;;  %v13575_v44 = vld [vmem:[#allocation102_spill] sm:$0xff]  ;;  %v4249_v3 = vld [vmem:[%s6304_s28 + $0x570] sm:$0xff]  ;;  %v13577_v42 = vld [vmem:[#allocation128_spill] sm:$0xff] }
 0x47b   : > { %v4643_v40 = vmax.f32 %v4419_v49, 0.0  ;;  %v4414_v46 = vadd.f32 %v4190_v41, %v3966_v7  ;;  %v4421_v4 = vadd.f32 %v4197_v29, %v3973_v15  ;;  %v4642_v19 = vmax.f32 %v4418_v6, 0.0  ;;  %v4270_v32 = vld [vmem:[%s6304_s28 + $0x618] sm:$0xff]  ;;  %v4221_v49 = vld [vmem:[%s6304_s28 + $0x490] sm:$0xff]  ;;  %v13578_v25 = vld [vmem:[#allocation72_spill] sm:$0xff] }
 0x47c   : > { %v4420_v56 = vadd.f32 %v4196_v55, %v11045_v60  ;;  %5165 = vmatpush2.bf16.msra.mxu0 %v4812_v47  ;;  %v4637_v36 = vmax.f32 %v4413_v17, 0.0  ;;  %v4074_v35 = vadd.f32 %v13574_v9, %v13573_v43  ;;  %v4053_v57 = vadd.f32 %v10888_v2, %v13575_v44  ;;  %v4242_v37 = vld [vmem:[%s6304_s28 + $0x538] sm:$0xff]  ;;  %v13580_v15 = vld [vmem:[#allocation43_spill] sm:$0xff]  ;;  %v4228_v17 = vld [vmem:[%s6304_s28 + $0x4c8] sm:$0xff] }
 0x47d   : > { %v4804_v23 = vpack.c.bf16 %v4643_v40, %v4636_v59  ;;  %v4638_v48 = vmax.f32 %v4414_v46, 0.0  ;;  %v4645_v63 = vmax.f32 %v4421_v4, 0.0  ;;  %v4803_v52 = vpack.c.bf16 %v4642_v19, %v4635_v51  ;;  %v13579_v59 = vld [vmem:[#allocation51_spill] sm:$0xff]  ;;  %v13581_v4 = vld [vmem:[#allocation162_spill] sm:$0xff] }
 0x47e   : > { %v4644_v20 = vmax.f32 %v4420_v56, 0.0  ;;  %v4522_v60 = vadd.f32 %v4298_v33, %v4074_v35  ;;  %v4501_v1 = vadd.f32 %v4277_v61, %v4053_v57  ;;  %v4046_v31 = vadd.f32 %v10925_v39, %v13576_v50  ;;  %v13582_v33 = vld [vmem:[#allocation178_spill] sm:$0xff]  ;;  %v13586_v44 = vld [vmem:[#allocation123_spill] sm:$0xff] }
 0x47f   : > { %5053 = vmatprep.subr.bf16.mxu1 %v4804_v23  ;;  %v4025_v5 = vadd.f32 %v10942_v30, %v13577_v42  ;;  %v4806_v41 = vpack.c.bf16 %v4645_v63, %v4638_v48  ;;  %v4018_v55 = vadd.f32 %v10963_v18, %v13578_v25  ;;  %v3997_v7 = vadd.f32 %v10982_v38, %v13579_v59  ;;  %v4102_v25 = vld [vmem:[%s6304_s28 + $0xd8] sm:$0xff]  ;;  %v13596_v59 = vld [vmem:[#allocation156_spill] sm:$0xff] }
 0x480   : > { %5054 = vmatpush2.bf16.msra.mxu1 %v4803_v52  ;;  %v4805_v29 = vpack.c.bf16 %v4644_v20, %v4637_v36  ;;  %v4746_v6 = vmax.f32 %v4522_v60, 0.0  ;;  %v4725_v47 = vmax.f32 %v4501_v1, 0.0  ;;  %v4494_v40 = vadd.f32 %v4270_v32, %v4046_v31  ;;  %v13584_v36 = vld [vmem:[#allocation154_spill] sm:$0xff]  ;;  %v13587_v52 = vld [vmem:[#allocation160_spill] sm:$0xff]  ;;  %v4101_v1 = vld [vmem:[%s6304_s28 + $0xd0] sm:$0xff] }
 0x481   : > { %5249 = vmatprep.subr.bf16.mxu1 %v13580_v15  ;;  %v4473_v51 = vadd.f32 %v4249_v3, %v4025_v5  ;;  %5166 = vmatprep.subr.bf16.mxu0 %v4806_v41  ;;  %v4466_v46 = vadd.f32 %v4242_v37, %v4018_v55  ;;  %v4004_v19 = vadd.f32 %v10859_v22, %v13581_v4  ;;  %v13583_v61 = vmax.f32 %v13582_v33, 0.0  ;;  %v13591_v31 = vld [vmem:[#allocation166_spill] sm:$0xff]  ;;  %v4207_v5 = vld [vmem:[%s6304_s28 + $0x420] sm:$0xff]  ;;  %v13593_v37 = vld [vmem:[#allocation32_spill] sm:$0xff] }
 0x482   : > { %v4445_v56 = vadd.f32 %v4221_v49, %v3997_v7  ;;  %5167 = vmatpush2.bf16.msra.mxu0 %v4805_v29  ;;  %v13585_v43 = vmax.f32 %v13584_v36, 0.0  ;;  %v4851_v57 = vpack.c.bf16 %v4732_v11, %v4725_v47  ;;  %v4718_v48 = vmax.f32 %v4494_v40, 0.0  ;;  %v13595_v29 = vld [vmem:[#allocation150_spill] sm:$0xff]  ;;  %v4080_v55 = vld [vmem:[%s6304_s28 + $0x28] sm:$0xff]  ;;  %v13602_v33 = vld [vmem:[#allocation141_spill] sm:$0xff] }
 0x483   : > { %v11131_v23 = vpack.c.bf16 %v13583_v61, %v4555_v53  ;;  %5056 = vmatmul.mubr.bf16.vlgmr.msra.gmra.mxu1 %v13586_v44  ;;  %v4697_v63 = vmax.f32 %v4473_v51, 0.0  ;;  %v4690_v20 = vmax.f32 %v4466_v46, 0.0  ;;  %v4452_v0 = vadd.f32 %v4228_v17, %v4004_v19  ;;  %v13588_v53 = vld [vmem:[#allocation223_spill] sm:$0xff]  ;;  %v4214_v15 = vld [vmem:[%s6304_s28 + $0x458] sm:$0xff]  ;;  %v13599_v40 = vld [vmem:[#allocation48_spill] sm:$0xff] }
 0x484   : > { %v4858_v35 = vpack.c.bf16 %v4746_v6, %v13585_v43  ;;  %5250 = vmatpush1.bf16.msra.mxu1 %v13587_v52  ;;  %v4669_v32 = vmax.f32 %v4445_v56, 0.0  ;;  %v13589_v3 = vmax.f32 %v13588_v53, 0.0  ;;  %v4844_v11 = vpack.c.bf16 %v4718_v48, %v4711_v12  ;;  %v13597_v6 = vld [vmem:[#allocation227_spill] sm:$0xff]  ;;  %v13600_v51 = vld [vmem:[#allocation136_spill] sm:$0xff]  ;;  %v13603_v36 = vld [vmem:[#allocation37_spill] sm:$0xff] }
 0x485   : > { %5251 = vmatprep.subr.bf16.mxu1 %v13590_v13  ;;  %v11151_v50 = vpack.c.bf16 %v4704_v10, %v4697_v63  ;;  %v3877_v42 = vadd.f32 %v13592_v34, %v13591_v31  ;;  %5169 = vmatmul.mubr.bf16.vlgmr.msra.gmra.mxu0 %v13586_v44  ;;  %v11160_v49 = vpack.c.bf16 %v4690_v20, %v4683_v8  ;;  %v4676_v41 = vmax.f32 %v4452_v0, 0.0  ;;  %v4100_v10 = vld [vmem:[%s6304_s28 + $0xc8] sm:$0xff]  ;;  %v13601_v46 = vld [vmem:[#allocation47_spill] sm:$0xff] }
 0x486   : > { %v11143_v60 = vpack.c.bf16 %v13589_v3, %v4557_v27  ;;  %5948 = vmatprep.subr.bf16.mxu0 %v4858_v35  ;;  %v4534_v27 = vmax.f32 %v13593_v37, 0.0  ;;  %v3606_v12 = vmul.f32 %v13594_v14, %v13561_v16  ;;  %v3983_v45 = vadd.f32 %v10937_v26, %v13595_v29  ;;  %v13604_v20 = vld [vmem:[#allocation183_spill] sm:$0xff]  ;;  %v13606_v3 = vld [vmem:[#allocation80_spill] sm:$0xff]  ;;  %v13609_v29 = vld [vmem:[#allocation70_spill] sm:$0xff] }
 0x487   : > { %5949 = vmatpush3.bf16.msra.mxu0 %v13596_v59  ;;  %v4325_v7 = vadd.f32 %v4101_v1, %v3877_v42  ;;  %v3876_v47 = vadd.f32 %v13592_v34, %v13597_v6  ;;  %v3878_v8 = vadd.f32 %v13592_v34, %v13598_v21  ;;  %v3856_v17 = vadd.f32 %v13600_v51, %v13599_v40  ;;  %v13607_v1 = vld [vmem:[#allocation213_spill] sm:$0xff]  ;;  %v4200_v14 = vld [vmem:[%s6304_s28 + $0x3e8] sm:$0xff] }
 0x488   : > { %5950 = vmatprep.subr.bf16.mxu0 %v4851_v57  ;;  %5252 = vmatpush1.bf16.msra.mxu1 %v13601_v46  ;;  %v11178_v4 = vpack.c.bf16 %v4676_v41, %v4669_v32  ;;  %v3990_v19 = vadd.f32 %v11008_v54, %v3606_v12  ;;  %v4431_v56 = vadd.f32 %v4207_v5, %v3983_v45  ;;  %v4536_v61 = vmax.f32 %v13602_v33, 0.0  ;;  %v13605_v32 = vld [vmem:[#allocation211_spill] sm:$0xff]  ;;  %v4193_v41 = vld [vmem:[%s6304_s28 + $0x3b0] sm:$0xff]  ;;  %v13612_v6 = vld [vmem:[#allocation212_spill] sm:$0xff] }
 0x489   : > { %5253 = vmatprep.subr.bf16.mxu1 %v13603_v36  ;;  %v4549_v43 = vmax.f32 %v4325_v7, 0.0  ;;  %v4324_v35 = vadd.f32 %v4100_v10, %v3876_v47  ;;  %v4326_v48 = vadd.f32 %v4102_v25, %v3878_v8  ;;  %v4304_v63 = vadd.f32 %v4080_v55, %v3856_v17  ;;  %v4079_v12 = vld [vmem:[%s6304_s28 + $0x20] sm:$0xff]  ;;  %v13610_v55 = vld [vmem:[#allocation114_spill] sm:$0xff]  ;;  %v4081_v7 = vld [vmem:[%s6304_s28 + $0x30] sm:$0xff] }
 0x48a   : > { %v4438_v52 = vadd.f32 %v4214_v15, %v3990_v19  ;;  %v4655_v57 = vmax.f32 %v4431_v56, 0.0  ;;  %v3585_v0 = vmul.f32 %v10954_v58, %v13604_v20  ;;  %v3592_v53 = vmul.f32 %v10976_v62, %v13605_v32  ;;  %v13611_v15 = vld [vmem:[#allocation197_spill] sm:$0xff]  ;;  %v13618_v56 = vld [vmem:[#allocation112_spill] sm:$0xff] }
 0x48b   : > { %5951 = vmatpush3.bf16.msra.mxu0 %v13606_v3  ;;  %v13608_v13 = vmax.f32 %v13607_v1, 0.0  ;;  %v4548_v34 = vmax.f32 %v4324_v35, 0.0  ;;  %v4550_v42 = vmax.f32 %v4326_v48, 0.0  ;;  %v4528_v5 = vmax.f32 %v4304_v63, 0.0  ;;  %v13616_v17 = vld [vmem:[#allocation109_spill] sm:$0xff]  ;;  %v13619_v32 = vld [vmem:[#allocation172_spill] sm:$0xff] }
 0x48c   : > { %5952 = vmatprep.subr.bf16.mxu0 %v4844_v11  ;;  %5254 = vmatpush1.bf16.msra.mxu1 %v13609_v29  ;;  %v4662_v45 = vmax.f32 %v4438_v52, 0.0  ;;  %v3969_v10 = vadd.f32 %v11038_v28, %v3585_v0  ;;  %v3976_v25 = vadd.f32 %v11010_v24, %v3592_v53  ;;  %v3855_v59 = vadd.f32 %v13600_v51, %v13610_v55  ;;  %v13614_v11 = vld [vmem:[#allocation26_spill] sm:$0xff]  ;;  %v4297_v20 = vld [vmem:[%s6304_s28 + $0x6f0] sm:$0xff]  ;;  %v13621_v1 = vld [vmem:[#allocation3_spill] sm:$0xff] }
 0x48d   : > { %v11190_v31 = vpack.c.bf16 %v4549_v43, %v13608_v13  ;;  %5255 = vmatprep.subr.bf16.mxu1 %v13611_v15  ;;  %v13613_v47 = vmax.f32 %v13612_v6, 0.0  ;;  %v13615_v8 = vmax.f32 %v13614_v11, 0.0  ;;  %v13617_v46 = vmax.f32 %v13616_v17, 0.0  ;;  %v4290_v52 = vld [vmem:[%s6304_s28 + $0x6b8] sm:$0xff]  ;;  %v4289_v0 = vld [vmem:[%s6304_s28 + $0x6b0] sm:$0xff]  ;;  %v4867_v11 = vld [vmem:[%s10607_s20 + $0x40] sm:$0xff] }
 0x48e   : > { %v3857_v36 = vadd.f32 %v13600_v51, %v13618_v56  ;;  %v11216_v43 = vpack.c.bf16 %v4662_v45, %v4655_v57  ;;  %v4417_v35 = vadd.f32 %v4193_v41, %v3969_v10  ;;  %v4424_v48 = vadd.f32 %v4200_v14, %v3976_v25  ;;  %v13620_v3 = vld [vmem:[#allocation161_spill] sm:$0xff]  ;;  %v4296_v57 = vld [vmem:[%s6304_s28 + $0x6e8] sm:$0xff]  ;;  %v13627_v56 = vld [vmem:[#allocation94_spill] sm:$0xff] }
 0x48f   : > { %v11204_v21 = vpack.c.bf16 %v4548_v34, %v13613_v47  ;;  %v11208_v40 = vpack.c.bf16 %v4550_v42, %v13615_v8  ;;  %v11212_v19 = vpack.c.bf16 %v13617_v46, %v4528_v5  ;;  %v4303_v63 = vadd.f32 %v4079_v12, %v3855_v59  ;;  %5953 = vmatpush3.bf16.msra.mxu0 %v13619_v32  ;;  %v13622_v34 = vld [vmem:[#allocation210_spill] sm:$0xff]  ;;  %v4868_v41 = vld [vmem:[%s10607_s20 + $0x48] sm:$0xff]  ;;  %v13624_v12 = vld [vmem:[#allocation61_spill] sm:$0xff] }
 0x490   : > { %v4305_v53 = vadd.f32 %v4081_v7, %v3857_v36  ;;  %v4066_v13 = vadd.f32 %v13621_v1, %v13620_v3  ;;  %v4073_v42 = vadd.f32 %v13574_v9, %v13622_v34  ;;  %v13623_v5 = vld [vmem:[#allocation46_spill] sm:$0xff]  ;;  %v4870_v14 = vld [vmem:[%s10607_s20 + $0x68] sm:$0xff]  ;;  %5954 = vmatprep.subr.bf16.mxu0 %v11151_v50  ;;  %5256 = vmatpush1.bf16.msra.mxu1 %v13624_v12  ;;  %v4641_v29 = vmax.f32 %v4417_v35, 0.0  ;;  %v13625_v25 = vld [vmem:[#allocation209_spill] sm:$0xff] }
 0x491   : > { %v4065_v51 = vadd.f32 %v13621_v1, %v13623_v5  ;;  %v4648_v45 = vmax.f32 %v4424_v48, 0.0  ;;  %v4527_v10 = vmax.f32 %v4303_v63, 0.0  ;;  %v4072_v55 = vadd.f32 %v13574_v9, %v13625_v25  ;;  %v13626_v59 = vld [vmem:[#allocation59_spill] sm:$0xff]  ;;  %v13628_v37 = vld [vmem:[#allocation205_spill] sm:$0xff]  ;;  %v13631_v3 = vld [vmem:[#allocation148_spill] sm:$0xff] }
 0x492   : > { %5257 = vmatprep.subr.bf16.mxu1 %v13626_v59  ;;  %v4529_v7 = vmax.f32 %v4305_v53, 0.0  ;;  %v4514_v15 = vadd.f32 %v4290_v52, %v4066_v13  ;;  %v4521_v6 = vadd.f32 %v4297_v20, %v4073_v42  ;;  %v4869_v8 = vld [vmem:[%s10607_s20 + $0x60] sm:$0xff]  ;;  %v11244_v9 = vpack.c.bf16 %v4870_v14, %v4868_v41  ;;  %v4276_v52 = vld [vmem:[%s6304_s28 + $0x648] sm:$0xff]  ;;  %v4282_v13 = vld [vmem:[%s6304_s28 + $0x678] sm:$0xff] }
 0x493   : > { %v4513_v47 = vadd.f32 %v4289_v0, %v4065_v51  ;;  %v11238_v17 = vpack.c.bf16 %v4648_v45, %v4641_v29  ;;  %v11242_v50 = vpack.c.bf16 %v4534_v27, %v4527_v10  ;;  %v4520_v46 = vadd.f32 %v4296_v57, %v4072_v55  ;;  %5955 = vmatpush3.bf16.msra.mxu0 %v13627_v56  ;;  %v4283_v20 = vld [vmem:[%s6304_s28 + $0x680] sm:$0xff]  ;;  %v13629_v0 = vld [vmem:[#allocation100_spill] sm:$0xff]  ;;  %v13632_v34 = vld [vmem:[#allocation170_spill] sm:$0xff] }
 0x494   : > { %v11249_v36 = vpack.c.bf16 %v4536_v61, %v4529_v7  ;;  %v4738_v35 = vmax.f32 %v4514_v15, 0.0  ;;  %v4745_v48 = vmax.f32 %v4521_v6, 0.0  ;;  %5956 = vmatprep.subr.bf16.mxu0 %v11160_v49  ;;  %5258 = vmatpush1.bf16.msra.mxu1 %v13628_v37  ;;  %v4052_v32 = vadd.f32 %v10888_v2, %v13629_v0  ;;  %v13630_v53 = vld [vmem:[#allocation8_spill] sm:$0xff]  ;;  %v4275_v1 = vld [vmem:[%s6304_s28 + $0x640] sm:$0xff]  ;;  %v4262_v29 = vld [vmem:[%s6304_s28 + $0x5d8] sm:$0xff] }
 0x495   : > { %v4737_v63 = vmax.f32 %v4513_v47, 0.0  ;;  %v4744_v27 = vmax.f32 %v4520_v46, 0.0  ;;  %v4059_v33 = vadd.f32 %v13631_v3, %v13630_v53  ;;  %v11259_v61 = vpack.c.bf16 %v4869_v8, %v4867_v11  ;;  %5259 = vmatprep.subr.bf16.mxu1 %v13632_v34  ;;  %5178 = vmatprep.mubr.bf16.mxu0 %v11244_v9  ;;  %v13633_v49 = vld [vmem:[#allocation40_spill] sm:$0xff]  ;;  %v13634_v51 = vld [vmem:[#allocation147_spill] sm:$0xff]  ;;  %v4261_v45 = vld [vmem:[%s6304_s28 + $0x5d0] sm:$0xff] }
 0x496   : > { %v11264_v42 = vpack.c.bf16 %v4745_v48, %v4738_v35  ;;  %v4051_v5 = vadd.f32 %v10888_v2, %v13633_v49  ;;  %v4058_v57 = vadd.f32 %v13631_v3, %v13634_v51  ;;  %v4500_v14 = vadd.f32 %v4276_v52, %v4052_v32  ;;  %5065 = vmatprep.mubr.bf16.mxu1 %v11244_v9  ;;  %v13635_v10 = vld [vmem:[#allocation86_spill] sm:$0xff]  ;;  %v13637_v59 = vld [vmem:[#allocation132_spill] sm:$0xff]  ;;  %v4269_v15 = vld [vmem:[%s6304_s28 + $0x610] sm:$0xff] }
 0x497   : > { %v11271_v41 = vpack.c.bf16 %v4744_v27, %v4737_v63  ;;  %v4507_v12 = vadd.f32 %v4283_v20, %v4059_v33  ;;  %5179 = vmatmul.mubr.bf16.gmra.mxu0 %v11259_v61  ;;  %5066 = vmatmul.mubr.bf16.gmra.mxu1 %v11259_v61  ;;  %v13636_v55 = vld [vmem:[#allocation30_spill] sm:$0xff]  ;;  %v4872_v6 = vld [vmem:[%s10607_s20 + $0x88] sm:$0xff]  ;;  %v13638_v46 = vld [vmem:[#allocation11_spill] sm:$0xff] }
 0x498   : > { %5957 = vmatpush3.bf16.msra.mxu0 %v13635_v10  ;;  %v4499_v2 = vadd.f32 %v4275_v1, %v4051_v5  ;;  %v4506_v25 = vadd.f32 %v4282_v13, %v4058_v57  ;;  %v4038_v7 = vadd.f32 %v13637_v59, %v13636_v55  ;;  %v4874_v47 = vld [vmem:[%s10607_s20 + $0xa8] sm:$0xff]  ;;  %5260 = vmatpush1.bf16.msra.mxu1 %v11131_v23  ;;  %v4724_v11 = vmax.f32 %v4500_v14, 0.0  ;;  %v13639_v35 = vld [vmem:[#allocation157_spill] sm:$0xff]  ;;  %v13640_v27 = vld [vmem:[#allocation182_spill] sm:$0xff] }
 0x499   : > { %5958 = vmatprep.subr.bf16.mxu0 %v11178_v4  ;;  %v4731_v8 = vmax.f32 %v4507_v12, 0.0  ;;  %v4045_v56 = vadd.f32 %v10925_v39, %v13638_v46  ;;  %v4037_v48 = vadd.f32 %v13637_v59, %v13639_v35  ;;  %v4268_v63 = vld [vmem:[%s6304_s28 + $0x608] sm:$0xff]  ;;  %5261 = vmatprep.subr.bf16.mxu1 %v11190_v31  ;;  %v4044_v4 = vadd.f32 %v10925_v39, %v13640_v27  ;;  %v4871_v23 = vld [vmem:[%s10607_s20 + $0x80] sm:$0xff]  ;;  %v13643_v12 = vld [vmem:[#allocation38_spill] sm:$0xff] }
 0x49a   : > { %v4723_v52 = vmax.f32 %v4499_v2, 0.0  ;;  %v4730_v20 = vmax.f32 %v4506_v25, 0.0  ;;  %v4486_v37 = vadd.f32 %v4262_v29, %v4038_v7  ;;  %v4873_v0 = vld [vmem:[%s10607_s20 + $0xa0] sm:$0xff]  ;;  %v11298_v33 = vpack.c.bf16 %v4874_v47, %v4872_v6  ;;  %v4248_v1 = vld [vmem:[%s6304_s28 + $0x568] sm:$0xff]  ;;  %v4254_v10 = vld [vmem:[%s6304_s28 + $0x598] sm:$0xff] }
 0x49b   : > { %v11296_v32 = vpack.c.bf16 %v4731_v8, %v4724_v11  ;;  %v4493_v53 = vadd.f32 %v4269_v15, %v4045_v56  ;;  %v4485_v3 = vadd.f32 %v4261_v45, %v4037_v48  ;;  %v4492_v34 = vadd.f32 %v4268_v63, %v4044_v4  ;;  %v13641_v49 = vld [vmem:[#allocation28_spill] sm:$0xff]  ;;  %v4255_v5 = vld [vmem:[%s6304_s28 + $0x5a0] sm:$0xff]  ;;  %v13646_v6 = vld [vmem:[#allocation177_spill] sm:$0xff] }
 0x49c   : > { %5959 = vmatpush3.bf16.msra.mxu0 %v11143_v60  ;;  %v11302_v31 = vpack.c.bf16 %v4730_v20, %v4723_v52  ;;  %v4710_v13 = vmax.f32 %v4486_v37, 0.0  ;;  %v4024_v39 = vadd.f32 %v10942_v30, %v13641_v49  ;;  %5262 = vmatpush1.bf16.msra.mxu1 %v11204_v21  ;;  %v13642_v14 = vld [vmem:[#allocation155_spill] sm:$0xff]  ;;  %v11311_v60 = vpack.c.bf16 %v4873_v0, %v4871_v23  ;;  %v13645_v55 = vld [vmem:[#allocation12_spill] sm:$0xff]  ;;  %v4241_v52 = vld [vmem:[%s6304_s28 + $0x530] sm:$0xff] }
 0x49d   : > { %5960 = vmatprep.subr.bf16.mxu0 %v11216_v43  ;;  %v4717_v51 = vmax.f32 %v4493_v53, 0.0  ;;  %v4709_v57 = vmax.f32 %v4485_v3, 0.0  ;;  %v4031_v29 = vadd.f32 %v13643_v12, %v13642_v14  ;;  %v4247_v45 = vld [vmem:[%s6304_s28 + $0x560] sm:$0xff]  ;;  %5263 = vmatprep.subr.bf16.mxu1 %v11212_v19  ;;  %v4716_v2 = vmax.f32 %v4492_v34, 0.0  ;;  %v13644_v43 = vld [vmem:[#allocation169_spill] sm:$0xff]  ;;  %v4876_v11 = vld [vmem:[%s10607_s20 + $0xc8] sm:$0xff] }
 0x49e   : > { %5188 = vmatprep.mubr.bf16.mxu0 %v11298_v33  ;;  %v4472_v25 = vadd.f32 %v4248_v1, %v4024_v39  ;;  %v4023_v21 = vadd.f32 %v10942_v30, %v13644_v43  ;;  %v4030_v59 = vadd.f32 %v13643_v12, %v13645_v55  ;;  %5075 = vmatprep.mubr.bf16.mxu1 %v11298_v33  ;;  %v13647_v47 = vld [vmem:[#allocation195_spill] sm:$0xff]  ;;  %v4878_v8 = vld [vmem:[%s10607_s20 + $0xe8] sm:$0xff]  ;;  %v4234_v1 = vld [vmem:[%s6304_s28 + $0x4f8] sm:$0xff] }
 0x49f   : > { %v4843_v7 = vpack.c.bf16 %v4717_v51, %v4710_v13  ;;  %v4479_v15 = vadd.f32 %v4255_v5, %v4031_v29  ;;  %5189 = vmatmul.mubr.bf16.gmra.mxu0 %v11311_v60  ;;  %v3633_v19 = vmul.f32 %v13647_v47, %v13646_v6  ;;  %v11328_v46 = vpack.c.bf16 %v4716_v2, %v4709_v57  ;;  %v13648_v20 = vld [vmem:[#allocation208_spill] sm:$0xff]  ;;  %v13650_v23 = vld [vmem:[#allocation139_spill] sm:$0xff]  ;;  %v4233_v57 = vld [vmem:[%s6304_s28 + $0x4f0] sm:$0xff] }
 0x4a0   : > { %5961 = vmatpush3.bf16.msra.mxu0 %v11208_v40  ;;  %v4696_v30 = vmax.f32 %v4472_v25, 0.0  ;;  %5076 = vmatmul.mubr.bf16.gmra.mxu1 %v11311_v60  ;;  %v4471_v56 = vadd.f32 %v4247_v45, %v4023_v21  ;;  %v4478_v35 = vadd.f32 %v4254_v10, %v4030_v59  ;;  %v13649_v40 = vld [vmem:[#allocation44_spill] sm:$0xff]  ;;  %v11340_v3 = vpack.c.bf16 %v4878_v8, %v4876_v11  ;;  %v4875_v34 = vld [vmem:[%s10607_s20 + $0xc0] sm:$0xff]  ;;  %v13653_v14 = vld [vmem:[#allocation202_spill] sm:$0xff] }
 0x4a1   : > { %5962 = vmatprep.subr.bf16.mxu0 %v11238_v17  ;;  %5264 = vmatpush1.bf16.msra.mxu1 %v11242_v50  ;;  %v4703_v48 = vmax.f32 %v4479_v15, 0.0  ;;  %v4017_v63 = vadd.f32 %v10963_v18, %v3633_v19  ;;  %v3625_v37 = vmul.f32 %v13649_v40, %v13648_v20  ;;  %v13651_v0 = vld [vmem:[#allocation64_spill] sm:$0xff]  ;;  %v4877_v49 = vld [vmem:[%s10607_s20 + $0xe0] sm:$0xff]  ;;  %v13654_v12 = vld [vmem:[#allocation193_spill] sm:$0xff] }
 0x4a2   : > { %5265 = vmatprep.subr.bf16.mxu1 %v11264_v42  ;;  %v4695_v27 = vmax.f32 %v4471_v56, 0.0  ;;  %v4702_v4 = vmax.f32 %v4478_v35, 0.0  ;;  %v4010_v53 = vadd.f32 %v13651_v0, %v13650_v23  ;;  %v13652_v50 = vld [vmem:[#allocation176_spill] sm:$0xff]  ;;  %5198 = vmatprep.mubr.bf16.mxu0 %v11340_v3  ;;  %v3612_v29 = vmul.f32 %v13654_v12, %v13653_v14  ;;  %v13655_v2 = vld [vmem:[#allocation206_spill] sm:$0xff]  ;;  %v13656_v25 = vld [vmem:[#allocation45_spill] sm:$0xff] }
 0x4a3   : > { %v4836_v17 = vpack.c.bf16 %v4703_v48, %v4696_v30  ;;  %v3632_v13 = vmul.f32 %v13647_v47, %v13652_v50  ;;  %v4465_v42 = vadd.f32 %v4241_v52, %v4017_v63  ;;  %v4009_v5 = vadd.f32 %v13651_v0, %v3625_v37  ;;  %5085 = vmatprep.mubr.bf16.mxu1 %v11340_v3  ;;  %v4240_v45 = vld [vmem:[%s6304_s28 + $0x528] sm:$0xff]  ;;  %v13658_v21 = vld [vmem:[#allocation121_spill] sm:$0xff]  ;;  %v4206_v19 = vld [vmem:[%s6304_s28 + $0x418] sm:$0xff] }
 0x4a4   : > { %5963 = vmatpush3.bf16.msra.mxu0 %v11249_v36  ;;  %v11348_v39 = vpack.c.bf16 %v4702_v4, %v4695_v27  ;;  %v4458_v36 = vadd.f32 %v4234_v1, %v4010_v53  ;;  %v11360_v10 = vpack.c.bf16 %v4877_v49, %v4875_v34  ;;  %v3619_v43 = vmul.f32 %v13656_v25, %v13655_v2  ;;  %v4220_v6 = vld [vmem:[%s6304_s28 + $0x488] sm:$0xff]  ;;  %v4213_v52 = vld [vmem:[%s6304_s28 + $0x450] sm:$0xff]  ;;  %v4227_v27 = vld [vmem:[%s6304_s28 + $0x4c0] sm:$0xff] }
 0x4a5   : > { %5266 = vmatpush2.bf16.msra.mxu1 %v11271_v41  ;;  %v4016_v51 = vadd.f32 %v10963_v18, %v3632_v13  ;;  %v3996_v41 = vadd.f32 %v10982_v38, %v3612_v29  ;;  %v13657_v18 = vld [vmem:[#allocation194_spill] sm:$0xff]  ;;  %v4689_v59 = vmax.f32 %v4465_v42, 0.0  ;;  %v11367_v15 = vadd.f32 %v4233_v57, %v4009_v5  ;;  %v13660_v11 = vld [vmem:[#allocation192_spill] sm:$0xff]  ;;  %v4205_v1 = vld [vmem:[%s6304_s28 + $0x410] sm:$0xff] }
 0x4a6   : > { %5267 = vmatprep.subr.bf16.mxu1 %v11296_v32  ;;  %v3598_v55 = vmul.f32 %v13658_v21, %v13657_v18  ;;  %v13659_v32 = vld [vmem:[#allocation198_spill] sm:$0xff]  ;;  %v3597_v8 = vmul.f32 %v13658_v21, %v13660_v11  ;;  %v4003_v56 = vadd.f32 %v10859_v22, %v3619_v43  ;;  %v13661_v35 = vld [vmem:[#allocation200_spill] sm:$0xff]  ;;  %v4682_v37 = vmax.f32 %v4458_v36, 0.0  ;;  %v4219_v5 = vld [vmem:[%s6304_s28 + $0x480] sm:$0xff] }
 0x4a7   : > { %5199 = vmatmul.mubr.bf16.gmra.mxu0 %v11360_v10  ;;  %v3605_v47 = vmul.f32 %v13561_v16, %v13659_v32  ;;  %v11378_v30 = vadd.f32 %v4240_v45, %v4016_v51  ;;  %v3611_v48 = vmul.f32 %v13654_v12, %v13661_v35  ;;  %v4880_v20 = vld [vmem:[%s10607_s20 + $0x108] sm:$0xff]  ;;  %v4444_v50 = vadd.f32 %v4220_v6, %v3996_v41  ;;  %v4879_v12 = vld [vmem:[%s10607_s20 + $0x100] sm:$0xff]  ;;  %v4226_v45 = vld [vmem:[%s6304_s28 + $0x4b8] sm:$0xff] }
 0x4a8   : > { %5086 = vmatmul.mubr.bf16.gmra.mxu1 %v11360_v10  ;;  %v3982_v63 = vadd.f32 %v10937_v26, %v3598_v55  ;;  %v4882_v40 = vld [vmem:[%s10607_s20 + $0x128] sm:$0xff]  ;;  %v4829_v42 = vpack.c.bf16 %v4689_v59, %v4682_v37  ;;  %v4451_v29 = vadd.f32 %v4227_v27, %v4003_v56  ;;  %v13665_v59 = vld [vmem:[#allocation189_spill] sm:$0xff] }
 0x4a9   : > { %5268 = vmatpush2.bf16.msra.mxu1 %v11302_v31  ;;  %v13662_v4 = vld [vmem:[#allocation204_spill] sm:$0xff]  ;;  %v3989_v23 = vadd.f32 %v11008_v54, %v3605_v47  ;;  %v3995_v13 = vadd.f32 %v10982_v38, %v3611_v48  ;;  %v11399_v14 = vpack.c.bf16 %v4882_v40, %v4880_v20  ;;  %v4688_v38 = vmax.f32 %v11378_v30, 0.0  ;;  %v13666_v11 = vld [vmem:[#allocation181_spill] sm:$0xff] }
 0x4aa   : > { %5269 = vmatprep.subr.bf16.mxu1 %v4843_v7  ;;  %v3618_v31 = vmul.f32 %v13656_v25, %v13662_v4  ;;  %v13663_v0 = vld [vmem:[#allocation196_spill] sm:$0xff]  ;;  %v4430_v34 = vadd.f32 %v4206_v19, %v3982_v63  ;;  %v3981_v7 = vadd.f32 %v10937_v26, %v3597_v8  ;;  %v3591_v6 = vmul.f32 %v10976_v62, %v13665_v59 }
 0x4ab   : > { %v3604_v53 = vmul.f32 %v13561_v16, %v13663_v0  ;;  %v4212_v49 = vld [vmem:[%s6304_s28 + $0x448] sm:$0xff]  ;;  %v4437_v51 = vadd.f32 %v4213_v52, %v3989_v23  ;;  %v4881_v16 = vld [vmem:[%s10607_s20 + $0x120] sm:$0xff]  ;;  %5208 = vmatprep.mubr.bf16.mxu0 %v11399_v14  ;;  %v4443_v55 = vadd.f32 %v4219_v5, %v3995_v13  ;;  %5095 = vmatprep.mubr.bf16.mxu1 %v11399_v14  ;;  %v4681_v30 = vmax.f32 %v11367_v15, 0.0 }
 0x4ac   : > { %v4002_v36 = vadd.f32 %v10859_v22, %v3618_v31  ;;  %v4429_v26 = vadd.f32 %v4205_v1, %v3981_v7  ;;  %v4654_v2 = vmax.f32 %v4430_v34, 0.0  ;;  %v4884_v18 = vld [vmem:[%s10607_s20 + $0x148] sm:$0xff]  ;;  %v11414_v22 = vpack.c.bf16 %v4881_v16, %v4879_v12  ;;  %v13667_v15 = vld [vmem:[#allocation187_spill] sm:$0xff]  ;;  %v4198_v7 = vld [vmem:[%s6304_s28 + $0x3d8] sm:$0xff] }
 0x4ad   : > { %v3988_v57 = vadd.f32 %v11008_v54, %v3604_v53  ;;  %5270 = vmatpush2.bf16.msra.mxu1 %v11328_v46  ;;  %v4661_v25 = vmax.f32 %v4437_v51, 0.0  ;;  %v13664_v54 = vld [vmem:[#allocation184_spill] sm:$0xff]  ;;  %v4668_v46 = vmax.f32 %v4444_v50, 0.0  ;;  %v3583_v8 = vmul.f32 %v10954_v58, %v13666_v11  ;;  %v4199_v31 = vld [vmem:[%s6304_s28 + $0x3e0] sm:$0xff] }
 0x4ae   : > { %5271 = vmatprep.subr.bf16.mxu1 %v4836_v17  ;;  %v3584_v41 = vmul.f32 %v10954_v58, %v13664_v54  ;;  %v4886_v21 = vld [vmem:[%s10607_s20 + $0x168] sm:$0xff]  ;;  %v4653_v32 = vmax.f32 %v4429_v26, 0.0  ;;  %v4450_v56 = vadd.f32 %v4226_v45, %v4002_v36  ;;  %v4675_v63 = vmax.f32 %v4451_v29, 0.0  ;;  %v4883_v58 = vld [vmem:[%s10607_s20 + $0x140] sm:$0xff] }
 0x4af   : > { %v4436_v43 = vadd.f32 %v4212_v49, %v3988_v57  ;;  %v4815_v17 = vpack.c.bf16 %v4661_v25, %v4654_v2  ;;  %v4192_v35 = vld [vmem:[%s6304_s28 + $0x3a8] sm:$0xff]  ;;  %5209 = vmatmul.mubr.bf16.gmra.mxu0 %v11414_v22  ;;  %v11424_v48 = vpack.c.bf16 %v4886_v21, %v4884_v18  ;;  %v3975_v20 = vadd.f32 %v11010_v24, %v3591_v6  ;;  %v4191_v53 = vld [vmem:[%s6304_s28 + $0x3a0] sm:$0xff]  ;;  %v13668_v21 = vld [vmem:[#allocation41_spill] sm:$0xff] }
 0x4b0   : > { %v3968_v19 = vadd.f32 %v11038_v28, %v3584_v41  ;;  %5096 = vmatmul.mubr.bf16.gmra.mxu1 %v11414_v22  ;;  %v3590_v40 = vmul.f32 %v10976_v62, %v13667_v15  ;;  %v3967_v37 = vadd.f32 %v11038_v28, %v3583_v8  ;;  %v4828_v27 = vpack.c.bf16 %v4688_v38, %v4681_v30  ;;  %v4888_v1 = vld [vmem:[%s10607_s20 + $0x188] sm:$0xff]  ;;  %v4889_v16 = vld [vmem:[%s10607_s20 + $0x1a0] sm:$0xff]  ;;  %v4921_v30 = vld [vmem:[%s12165_s5 + $0x50] sm:$0xff] }
 0x4b1   : > { %v4660_v47 = vmax.f32 %v4436_v43, 0.0  ;;  %5272 = vmatpush2.bf16.msra.mxu1 %v11348_v39  ;;  %v4885_v39 = vld [vmem:[%s10607_s20 + $0x160] sm:$0xff]  ;;  %v4667_v4 = vmax.f32 %v4443_v55, 0.0  ;;  %5218 = vmatprep.mubr.bf16.mxu0 %v11424_v48  ;;  %v4822_v23 = vpack.c.bf16 %v4675_v63, %v4668_v46  ;;  %v4890_v50 = vld [vmem:[%s10607_s20 + $0x1a8] sm:$0xff]  ;;  %v4674_v62 = vmax.f32 %v4450_v56, 0.0  ;;  %v4914_v46 = vld [vmem:[%s12165_s5 + $0x18] sm:$0xff] }
 0x4b2   : > { %5273 = vmatprep.subr.bf16.mxu1 %v4829_v42  ;;  %5105 = vmatprep.mubr.bf16.mxu1 %v11424_v48  ;;  %v4416_v0 = vadd.f32 %v4192_v35, %v3968_v19  ;;  %v3974_v13 = vadd.f32 %v11010_v24, %v3590_v40  ;;  %v4905_v28 = vpack.c.bf16 %v4885_v39, %v4883_v58  ;;  %v4887_v24 = vld [vmem:[%s10607_s20 + $0x180] sm:$0xff]  ;;  %v4892_v29 = vld [vmem:[%s10607_s20 + $0x1c8] sm:$0xff] }
 0x4b3   : > { %v4814_v52 = vpack.c.bf16 %v4660_v47, %v4653_v32  ;;  %v4423_v34 = vadd.f32 %v4199_v31, %v3975_v20  ;;  %v4821_v49 = vpack.c.bf16 %v4674_v62, %v4667_v4  ;;  %v4415_v42 = vadd.f32 %v4191_v53, %v3967_v37  ;;  %v4894_v36 = vld [vmem:[%s10607_s20 + $0x1e8] sm:$0xff]  ;;  %v4891_v54 = vld [vmem:[%s10607_s20 + $0x1c0] sm:$0xff]  ;;  %v4925_v20 = vld [vmem:[%s12165_s5 + $0x70] sm:$0xff] }
 0x4b4   : > { %v4908_v5 = vpack.c.bf16 %v4890_v50, %v4888_v1  ;;  %v4640_v51 = vmax.f32 %v4416_v0, 0.0  ;;  %v4422_v57 = vadd.f32 %v4198_v7, %v3974_v13  ;;  %v4907_v2 = vpack.c.bf16 %v4889_v16, %v4887_v24  ;;  %v4893_v41 = vld [vmem:[%s10607_s20 + $0x1e0] sm:$0xff]  ;;  %v4920_v32 = vld [vmem:[%s12165_s5 + $0x48] sm:$0xff]  ;;  %v4926_v37 = vld [vmem:[%s12165_s5 + $0x78] sm:$0xff] }
 0x4b5   : > { %5274 = vmatpush2.bf16.msra.mxu1 %v4828_v27  ;;  %v4647_v12 = vmax.f32 %v4423_v34, 0.0  ;;  %v4639_v38 = vmax.f32 %v4415_v42, 0.0  ;;  %v4910_v25 = vpack.c.bf16 %v4894_v36, %v4892_v29  ;;  %v4909_v18 = vpack.c.bf16 %v4893_v41, %v4891_v54  ;;  %v4928_v39 = vld [vmem:[%s12165_s5 + $0x88] sm:$0xff]  ;;  %v4934_v31 = vld [vmem:[%s12165_s5 + $0xb8] sm:$0xff]  ;;  %v4935_v13 = vld [vmem:[%s12165_s5 + $0xc0] sm:$0xff] }
 0x4b6   : > { %5275 = vmatprep.subr.bf16.mxu1 %v4822_v23  ;;  %v4646_v45 = vmax.f32 %v4422_v57, 0.0  ;;  %v4932_v53 = vld [vmem:[%s12165_s5 + $0xa8] sm:$0xff]  ;;  %v4933_v34 = vld [vmem:[%s12165_s5 + $0xb0] sm:$0xff]  ;;  %v4939_v57 = vld [vmem:[%s12165_s5 + $0xe0] sm:$0xff] }
 0x4b7   : > { %5219 = vmatmul.mubr.bf16.gmra.mxu0 %v4905_v28  ;;  %v4808_v26 = vpack.c.bf16 %v4647_v12, %v4640_v51  ;;  %v4941_v42 = vld [vmem:[%s12165_s5 + $0xf0] sm:$0xff]  ;;  %v4942_v16 = vld [vmem:[%s12165_s5 + $0xf8] sm:$0xff]  ;;  %v4940_v36 = vld [vmem:[%s12165_s5 + $0xe8] sm:$0xff] }
 0x4b8   : > { %5106 = vmatmul.mubr.bf16.gmra.mxu1 %v4905_v28  ;;  %5228 = vmatprep.mubr.bf16.mxu0 %v4908_v5  ;;  %v4807_v43 = vpack.c.bf16 %v4646_v45, %v4639_v38  ;;  %v4946_v54 = vld [vmem:[%s12165_s5 + $0x118] sm:$0xff] }
 0x4b9   : > { %5276 = vmatpush2.bf16.msra.mxu1 %v4821_v49  ;;  %5115 = vmatprep.mubr.bf16.mxu1 %v4908_v5 }
 0x4ba   : > { %5277 = vmatprep.subr.bf16.mxu1 %v4815_v17 }
 0x4bd   : > { %5278 = vmatpush2.bf16.msra.mxu1 %v4814_v52  ;;  %v4927_v52 = vld [vmem:[%s12165_s5 + $0x80] sm:$0xff] }
 0x4be   : > { %5279 = vmatprep.subr.bf16.mxu1 %v4808_v26 }
 0x4bf   : > { %5229 = vmatmul.mubr.bf16.gmra.mxu0 %v4907_v2 }
 0x4c0   : > { %5116 = vmatmul.mubr.bf16.gmra.mxu1 %v4907_v2  ;;  %5238 = vmatprep.mubr.bf16.mxu0 %v4910_v25 }
 0x4c1   : > { %5280 = vmatpush2.bf16.msra.mxu1 %v4807_v43  ;;  %5125 = vmatprep.mubr.bf16.mxu1 %v4910_v25 }
 0x4c7   : > { %5239 = vmatmul.mubr.bf16.gmra.mxu0 %v4909_v18 }
 0x4c8   : > { %5126 = vmatmul.mubr.bf16.gmra.mxu1 %v4909_v18  ;;  %5394 = vmatprep.mubr.bf16.mxu0 %v13668_v21 }
 0x4c9   : > { %5281 = vmatprep.mubr.bf16.mxu1 %v13668_v21  ;;  %v4949_v21 = vld [vmem:[%s12165_s5 + $0x130] sm:$0xff] }
 0x4cf   : > { %5395 = vmatmul.mubr.bf16.vlgmr.msra.gmra.mxu0 %v13586_v44 }
 0x4d0   : > { %5282 = vmatmul.mubr.bf16.vlgmr.msra.gmra.mxu1 %v13586_v44  ;;  %5402 = vmatprep.mubr.bf16.mxu0 %v11244_v9  ;;  %v4911_v44 = vld [vmem:[%s12165_s5] sm:$0xff] }
 0x4d1   : > { %5291 = vmatprep.mubr.bf16.mxu1 %v11244_v9 }
 0x4d7   : > { %5403 = vmatmul.mubr.bf16.gmra.mxu0 %v11259_v61 }
 0x4d8   : > { %5292 = vmatmul.mubr.bf16.gmra.mxu1 %v11259_v61  ;;  %5410 = vmatprep.mubr.bf16.mxu0 %v11298_v33  ;;  %v4912_v61 = vld [vmem:[%s12165_s5 + $0x8] sm:$0xff] }
 0x4d9   : > { %5301 = vmatprep.mubr.bf16.mxu1 %v11298_v33  ;;  %v4913_v33 = vld [vmem:[%s12165_s5 + $0x10] sm:$0xff] }
 0x4df   : > { %5411 = vmatmul.mubr.bf16.gmra.mxu0 %v11311_v60 }
 0x4e0   : > { %5302 = vmatmul.mubr.bf16.gmra.mxu1 %v11311_v60  ;;  %5418 = vmatprep.mubr.bf16.mxu0 %v11340_v3 }
 0x4e1   : > { %5311 = vmatprep.mubr.bf16.mxu1 %v11340_v3 }
 0x4e7   : > { %5419 = vmatmul.mubr.bf16.gmra.mxu0 %v11360_v10 }
 0x4e8   : > { %5312 = vmatmul.mubr.bf16.gmra.mxu1 %v11360_v10  ;;  %5426 = vmatprep.mubr.bf16.mxu0 %v11399_v14  ;;  %v4918_v10 = vld [vmem:[%s12165_s5 + $0x38] sm:$0xff] }
 0x4e9   : > { %5321 = vmatprep.mubr.bf16.mxu1 %v11399_v14 }
 0x4ef   : > { %5427 = vmatmul.mubr.bf16.gmra.mxu0 %v11414_v22 }
 0x4f0   : > { %5322 = vmatmul.mubr.bf16.gmra.mxu1 %v11414_v22  ;;  %5434 = vmatprep.mubr.bf16.mxu0 %v11424_v48  ;;  %v4919_v22 = vld [vmem:[%s12165_s5 + $0x40] sm:$0xff] }
 0x4f1   : > { %5331 = vmatprep.mubr.bf16.mxu1 %v11424_v48 }
 0x4f7   : > { %5435 = vmatmul.mubr.bf16.gmra.mxu0 %v4905_v28 }
 0x4f8   : > { %5332 = vmatmul.mubr.bf16.gmra.mxu1 %v4905_v28  ;;  %5442 = vmatprep.mubr.bf16.mxu0 %v4908_v5 }
 0x4f9   : > { %5341 = vmatprep.mubr.bf16.mxu1 %v4908_v5 }
 0x4ff   : > { %5443 = vmatmul.mubr.bf16.gmra.mxu0 %v4907_v2 }
 0x500   : > { %5342 = vmatmul.mubr.bf16.gmra.mxu1 %v4907_v2  ;;  %5450 = vmatprep.mubr.bf16.mxu0 %v4910_v25  ;;  %v4948_v2 = vld [vmem:[%s12165_s5 + $0x128] sm:$0xff] }
 0x501   : > { %5351 = vmatprep.mubr.bf16.mxu1 %v4910_v25 }
 0x507   : > { %5451 = vmatmul.mubr.bf16.gmra.mxu0 %v4909_v18 }
 0x508   : > { %5352 = vmatmul.mubr.bf16.gmra.mxu1 %v4909_v18 }
 0x543   : > { %v5057_v9 = vpop.f32.mrf.mxu1 }
 0x544   : > { %v5459_v60 = vadd.f32 %v5057_v9, %v4911_v44 }
 0x545   : > { %v5059_v3 = vpop.f32.mrf.mxu1  ;;  %v5170_v14 = vpop.f32.mrf.mxu0 }
 0x546   : > { %5571 = vst [vmem:[%s12165_s5] sm:$0xff] %v5459_v60  ;;  %v5460_v55 = vadd.f32 %v5059_v3, %v4912_v61  ;;  %v5461_v59 = vadd.f32 %v5170_v14, %v4913_v33  ;;  %v4947_v61 = vld [vmem:[%s12165_s5 + $0x120] sm:$0xff] }
 0x547   : > { %v5061_v6 = vpop.f32.mrf.mxu1  ;;  %v5172_v17 = vpop.f32.mrf.mxu0  ;;  %v4955_v14 = vld [vmem:[%s12165_s5 + $0x160] sm:$0xff] }
 0x548   : > { %5572 = vst [vmem:[%s12165_s5 + $0x8] sm:$0xff] %v5460_v55  ;;  %v5466_v47 = vadd.f32 %v5061_v6, %v4918_v10  ;;  %5573 = vst [vmem:[%s12165_s5 + $0x10] sm:$0xff] %v5461_v59  ;;  %v5462_v19 = vadd.f32 %v5172_v17, %v4914_v46  ;;  %v4953_v46 = vld [vmem:[%s12165_s5 + $0x150] sm:$0xff]  ;;  %v4954_v17 = vld [vmem:[%s12165_s5 + $0x158] sm:$0xff] }
 0x549   : > { %v5063_v11 = vpop.f32.mrf.mxu1  ;;  %v5174_v8 = vpop.f32.mrf.mxu0 }
 0x54a   : > { %5578 = vst [vmem:[%s12165_s5 + $0x38] sm:$0xff] %v5466_v47  ;;  %v5467_v56 = vadd.f32 %v5063_v11, %v4919_v22  ;;  %5574 = vst [vmem:[%s12165_s5 + $0x18] sm:$0xff] %v5462_v19  ;;  %v5468_v35 = vadd.f32 %v5174_v8, %v4920_v32  ;;  %v4956_v22 = vld [vmem:[%s12165_s5 + $0x168] sm:$0xff]  ;;  %v4962_v8 = vld [vmem:[%s12165_s5 + $0x198] sm:$0xff] }
 0x54b   : > { %v5176_v48 = vpop.f32.mrf.mxu0 }
 0x54c   : > { %5579 = vst [vmem:[%s12165_s5 + $0x40] sm:$0xff] %v5467_v56  ;;  %5580 = vst [vmem:[%s12165_s5 + $0x48] sm:$0xff] %v5468_v35  ;;  %v5469_v63 = vadd.f32 %v5176_v48, %v4921_v30  ;;  %v4960_v30 = vld [vmem:[%s12165_s5 + $0x188] sm:$0xff] }
 0x54e   : > { %5581 = vst [vmem:[%s12165_s5 + $0x50] sm:$0xff] %v5469_v63 }
 0x557   : > { %v5180_v58 = vpop.f32.mrf.mxu0  ;;  %v5067_v40 = vpop.f32.mrf.mxu1 }
 0x558   : > { %v5475_v15 = vadd.f32 %v5180_v58, %v4927_v52  ;;  %v5473_v27 = vadd.f32 %v5067_v40, %v4925_v20  ;;  %v4963_v52 = vld [vmem:[%s12165_s5 + $0x1a0] sm:$0xff]  ;;  %v4961_v20 = vld [vmem:[%s12165_s5 + $0x190] sm:$0xff] }
 0x559   : > { %v5182_v4 = vpop.f32.mrf.mxu0  ;;  %v5069_v0 = vpop.f32.mrf.mxu1 }
 0x55a   : > { %5587 = vst [vmem:[%s12165_s5 + $0x80] sm:$0xff] %v5475_v15  ;;  %v5476_v23 = vadd.f32 %v5182_v4, %v4928_v39  ;;  %5585 = vst [vmem:[%s12165_s5 + $0x70] sm:$0xff] %v5473_v27  ;;  %v5474_v1 = vadd.f32 %v5069_v0, %v4926_v37  ;;  %v4969_v4 = vld [vmem:[%s12165_s5 + $0x1d0] sm:$0xff]  ;;  %v4970_v0 = vld [vmem:[%s12165_s5 + $0x1d8] sm:$0xff] }
 0x55b   : > { %v5184_v50 = vpop.f32.mrf.mxu0  ;;  %v5071_v28 = vpop.f32.mrf.mxu1 }
 0x55c   : > { %5588 = vst [vmem:[%s12165_s5 + $0x88] sm:$0xff] %v5476_v23  ;;  %v5482_v62 = vadd.f32 %v5184_v50, %v4934_v31  ;;  %5586 = vst [vmem:[%s12165_s5 + $0x78] sm:$0xff] %v5474_v1  ;;  %v5480_v7 = vadd.f32 %v5071_v28, %v4932_v53  ;;  %v4967_v31 = vld [vmem:[%s12165_s5 + $0x1c0] sm:$0xff]  ;;  %v4968_v50 = vld [vmem:[%s12165_s5 + $0x1c8] sm:$0xff] }
 0x55d   : > { %v5186_v49 = vpop.f32.mrf.mxu0  ;;  %v5073_v51 = vpop.f32.mrf.mxu1  ;;  %v4976_v28 = vld [vmem:[%s12165_s5 + $0x208] sm:$0xff] }
 0x55e   : > { %5594 = vst [vmem:[%s12165_s5 + $0xb8] sm:$0xff] %v5482_v62  ;;  %v5483_v5 = vadd.f32 %v5186_v49, %v4935_v13  ;;  %5592 = vst [vmem:[%s12165_s5 + $0xa8] sm:$0xff] %v5480_v7  ;;  %v5481_v12 = vadd.f32 %v5073_v51, %v4933_v34  ;;  %v4974_v49 = vld [vmem:[%s12165_s5 + $0x1f8] sm:$0xff]  ;;  %v4977_v51 = vld [vmem:[%s12165_s5 + $0x210] sm:$0xff] }
 0x55f   : > { %v5190_v24 = vpop.f32.mrf.mxu0 }
 0x560   : > { %5595 = vst [vmem:[%s12165_s5 + $0xc0] sm:$0xff] %v5483_v5  ;;  %v5489_v38 = vadd.f32 %v5190_v24, %v4941_v42  ;;  %v5077_v29 = vpop.f32.mrf.mxu1  ;;  %5593 = vst [vmem:[%s12165_s5 + $0xb0] sm:$0xff] %v5481_v12  ;;  %v4975_v24 = vld [vmem:[%s12165_s5 + $0x200] sm:$0xff] }
 0x561   : > { %v5487_v26 = vadd.f32 %v5077_v29, %v4939_v57  ;;  %v5192_v45 = vpop.f32.mrf.mxu0  ;;  %v4983_v29 = vld [vmem:[%s12165_s5 + $0x240] sm:$0xff] }
 0x562   : > { %5601 = vst [vmem:[%s12165_s5 + $0xf0] sm:$0xff] %v5489_v38  ;;  %v5490_v25 = vadd.f32 %v5192_v45, %v4942_v16  ;;  %v5079_v43 = vpop.f32.mrf.mxu1  ;;  %v4981_v45 = vld [vmem:[%s12165_s5 + $0x230] sm:$0xff] }
 0x563   : > { %5599 = vst [vmem:[%s12165_s5 + $0xe0] sm:$0xff] %v5487_v26  ;;  %v5488_v41 = vadd.f32 %v5079_v43, %v4940_v36  ;;  %v5194_v18 = vpop.f32.mrf.mxu0  ;;  %v4984_v43 = vld [vmem:[%s12165_s5 + $0x248] sm:$0xff] }
 0x564   : > { %5602 = vst [vmem:[%s12165_s5 + $0xf8] sm:$0xff] %v5490_v25  ;;  %v5496_v44 = vadd.f32 %v5194_v18, %v4948_v2  ;;  %v5081_v9 = vpop.f32.mrf.mxu1  ;;  %v4982_v18 = vld [vmem:[%s12165_s5 + $0x238] sm:$0xff] }
 0x565   : > { %5600 = vst [vmem:[%s12165_s5 + $0xe8] sm:$0xff] %v5488_v41  ;;  %v5494_v33 = vadd.f32 %v5081_v9, %v4946_v54  ;;  %v5196_v60 = vpop.f32.mrf.mxu0  ;;  %v4990_v9 = vld [vmem:[%s12165_s5 + $0x278] sm:$0xff] }
 0x566   : > { %5608 = vst [vmem:[%s12165_s5 + $0x128] sm:$0xff] %v5496_v44  ;;  %v5497_v3 = vadd.f32 %v5196_v60, %v4949_v21  ;;  %v5083_v10 = vpop.f32.mrf.mxu1  ;;  %v4988_v60 = vld [vmem:[%s12165_s5 + $0x268] sm:$0xff] }
 0x567   : > { %5606 = vst [vmem:[%s12165_s5 + $0x118] sm:$0xff] %v5494_v33  ;;  %v5495_v55 = vadd.f32 %v5083_v10, %v4947_v61  ;;  %v5200_v59 = vpop.f32.mrf.mxu0 }
 0x568   : > { %5609 = vst [vmem:[%s12165_s5 + $0x130] sm:$0xff] %v5497_v3  ;;  %v5087_v6 = vpop.f32.mrf.mxu1  ;;  %v5503_v32 = vadd.f32 %v5200_v59, %v4955_v14  ;;  %v4991_v14 = vld [vmem:[%s12165_s5 + $0x280] sm:$0xff]  ;;  %v4989_v59 = vld [vmem:[%s12165_s5 + $0x270] sm:$0xff] }
 0x569   : > { %5607 = vst [vmem:[%s12165_s5 + $0x120] sm:$0xff] %v5495_v55  ;;  %v5501_v47 = vadd.f32 %v5087_v6, %v4953_v46  ;;  %v5202_v19 = vpop.f32.mrf.mxu0 }
 0x56a   : > { %v5089_v11 = vpop.f32.mrf.mxu1  ;;  %5615 = vst [vmem:[%s12165_s5 + $0x160] sm:$0xff] %v5503_v32  ;;  %v5504_v56 = vadd.f32 %v5202_v19, %v4956_v22  ;;  %v4995_v19 = vld [vmem:[%s12165_s5 + $0x2a0] sm:$0xff] }
 0x56b   : > { %5613 = vst [vmem:[%s12165_s5 + $0x150] sm:$0xff] %v5501_v47  ;;  %v5502_v35 = vadd.f32 %v5089_v11, %v4954_v17  ;;  %v5204_v48 = vpop.f32.mrf.mxu0  ;;  %v4997_v17 = vld [vmem:[%s12165_s5 + $0x2b0] sm:$0xff] }
 0x56c   : > { %v5091_v63 = vpop.f32.mrf.mxu1  ;;  %5616 = vst [vmem:[%s12165_s5 + $0x168] sm:$0xff] %v5504_v56  ;;  %v5510_v58 = vadd.f32 %v5204_v48, %v4962_v8  ;;  %v4996_v48 = vld [vmem:[%s12165_s5 + $0x2a8] sm:$0xff] }
 0x56d   : > { %5614 = vst [vmem:[%s12165_s5 + $0x158] sm:$0xff] %v5502_v35  ;;  %v5508_v39 = vadd.f32 %v5091_v63, %v4960_v30  ;;  %v5206_v15 = vpop.f32.mrf.mxu0  ;;  %v4998_v30 = vld [vmem:[%s12165_s5 + $0x2b8] sm:$0xff] }
 0x56e   : > { %v5093_v40 = vpop.f32.mrf.mxu1  ;;  %5622 = vst [vmem:[%s12165_s5 + $0x198] sm:$0xff] %v5510_v58  ;;  %v5511_v37 = vadd.f32 %v5206_v15, %v4963_v52  ;;  %v5002_v15 = vld [vmem:[%s12165_s5 + $0x2d8] sm:$0xff] }
 0x56f   : > { %5620 = vst [vmem:[%s12165_s5 + $0x188] sm:$0xff] %v5508_v39  ;;  %v5509_v27 = vadd.f32 %v5093_v40, %v4961_v20  ;;  %v5210_v23 = vpop.f32.mrf.mxu0  ;;  %v5004_v20 = vld [vmem:[%s12165_s5 + $0x2e8] sm:$0xff] }
 0x570   : > { %5623 = vst [vmem:[%s12165_s5 + $0x1a0] sm:$0xff] %v5511_v37  ;;  %v5517_v53 = vadd.f32 %v5210_v23, %v4969_v4  ;;  %v5097_v1 = vpop.f32.mrf.mxu1  ;;  %v5003_v23 = vld [vmem:[%s12165_s5 + $0x2e0] sm:$0xff] }
 0x571   : > { %5621 = vst [vmem:[%s12165_s5 + $0x190] sm:$0xff] %v5509_v27  ;;  %v5515_v13 = vadd.f32 %v5097_v1, %v4967_v31  ;;  %v5212_v62 = vpop.f32.mrf.mxu0  ;;  %v5005_v27 = vld [vmem:[%s12165_s5 + $0x2f0] sm:$0xff]  ;;  %v5011_v1 = vld [vmem:[%s12165_s5 + $0x320] sm:$0xff] }
 0x572   : > { %5629 = vst [vmem:[%s12165_s5 + $0x1d0] sm:$0xff] %v5517_v53  ;;  %v5518_v34 = vadd.f32 %v5212_v62, %v4970_v0  ;;  %v5099_v7 = vpop.f32.mrf.mxu1  ;;  %v5009_v62 = vld [vmem:[%s12165_s5 + $0x310] sm:$0xff] }
 0x573   : > { %5627 = vst [vmem:[%s12165_s5 + $0x1c0] sm:$0xff] %v5515_v13  ;;  %v5516_v42 = vadd.f32 %v5099_v7, %v4968_v50  ;;  %v5214_v5 = vpop.f32.mrf.mxu0  ;;  %v5012_v7 = vld [vmem:[%s12165_s5 + $0x328] sm:$0xff] }
 0x574   : > { %5630 = vst [vmem:[%s12165_s5 + $0x1d8] sm:$0xff] %v5518_v34  ;;  %v5524_v57 = vadd.f32 %v5214_v5, %v4976_v28  ;;  %v5101_v12 = vpop.f32.mrf.mxu1  ;;  %v5010_v5 = vld [vmem:[%s12165_s5 + $0x318] sm:$0xff] }
 0x575   : > { %5628 = vst [vmem:[%s12165_s5 + $0x1c8] sm:$0xff] %v5516_v42  ;;  %v5522_v16 = vadd.f32 %v5101_v12, %v4974_v49  ;;  %v5216_v38 = vpop.f32.mrf.mxu0  ;;  %v5018_v12 = vld [vmem:[%s12165_s5 + $0x358] sm:$0xff] }
 0x576   : > { %5636 = vst [vmem:[%s12165_s5 + $0x208] sm:$0xff] %v5524_v57  ;;  %v5525_v36 = vadd.f32 %v5216_v38, %v4977_v51  ;;  %v5103_v26 = vpop.f32.mrf.mxu1  ;;  %v5016_v38 = vld [vmem:[%s12165_s5 + $0x348] sm:$0xff] }
 0x577   : > { %5634 = vst [vmem:[%s12165_s5 + $0x1f8] sm:$0xff] %v5522_v16  ;;  %v5523_v2 = vadd.f32 %v5103_v26, %v4975_v24  ;;  %v5220_v25 = vpop.f32.mrf.mxu0  ;;  %v5019_v26 = vld [vmem:[%s12165_s5 + $0x360] sm:$0xff] }
 0x578   : > { %5637 = vst [vmem:[%s12165_s5 + $0x210] sm:$0xff] %v5525_v36  ;;  %v5531_v54 = vadd.f32 %v5220_v25, %v4983_v29  ;;  %v5107_v41 = vpop.f32.mrf.mxu1  ;;  %v5017_v25 = vld [vmem:[%s12165_s5 + $0x350] sm:$0xff] }
 0x579   : > { %5635 = vst [vmem:[%s12165_s5 + $0x200] sm:$0xff] %v5523_v2  ;;  %v5529_v21 = vadd.f32 %v5107_v41, %v4981_v45  ;;  %v5222_v44 = vpop.f32.mrf.mxu0 }
 0x57a   : > { %5643 = vst [vmem:[%s12165_s5 + $0x240] sm:$0xff] %v5531_v54  ;;  %v5532_v61 = vadd.f32 %v5222_v44, %v4984_v43  ;;  %v5109_v33 = vpop.f32.mrf.mxu1 }
 0x57b   : > { %5641 = vst [vmem:[%s12165_s5 + $0x230] sm:$0xff] %v5529_v21  ;;  %v5530_v3 = vadd.f32 %v5109_v33, %v4982_v18  ;;  %v5224_v10 = vpop.f32.mrf.mxu0  ;;  %v4915_v21 = vld [vmem:[%s12165_s5 + $0x20] sm:$0xff]  ;;  %v4916_v33 = vld [vmem:[%s12165_s5 + $0x28] sm:$0xff] }
 0x57c   : > { %5644 = vst [vmem:[%s12165_s5 + $0x248] sm:$0xff] %v5532_v61  ;;  %v5538_v46 = vadd.f32 %v5224_v10, %v4990_v9  ;;  %v5111_v55 = vpop.f32.mrf.mxu1 }
 0x57d   : > { %5642 = vst [vmem:[%s12165_s5 + $0x238] sm:$0xff] %v5530_v3  ;;  %v5536_v6 = vadd.f32 %v5111_v55, %v4988_v60  ;;  %v5226_v22 = vpop.f32.mrf.mxu0  ;;  %v4917_v3 = vld [vmem:[%s12165_s5 + $0x30] sm:$0xff]  ;;  %v4922_v55 = vld [vmem:[%s12165_s5 + $0x58] sm:$0xff] }
 0x57e   : > { %5650 = vst [vmem:[%s12165_s5 + $0x278] sm:$0xff] %v5538_v46  ;;  %v5539_v32 = vadd.f32 %v5226_v22, %v4991_v14  ;;  %v5113_v47 = vpop.f32.mrf.mxu1 }
 0x57f   : > { %5648 = vst [vmem:[%s12165_s5 + $0x268] sm:$0xff] %v5536_v6  ;;  %v5537_v11 = vadd.f32 %v5113_v47, %v4989_v59  ;;  %v5230_v8 = vpop.f32.mrf.mxu0 }
 0x580   : > { %5651 = vst [vmem:[%s12165_s5 + $0x280] sm:$0xff] %v5539_v32  ;;  %v5545_v56 = vadd.f32 %v5230_v8, %v4997_v17  ;;  %v5117_v35 = vpop.f32.mrf.mxu1  ;;  %v4923_v32 = vld [vmem:[%s12165_s5 + $0x60] sm:$0xff] }
 0x581   : > { %5649 = vst [vmem:[%s12165_s5 + $0x270] sm:$0xff] %v5537_v11  ;;  %v5543_v63 = vadd.f32 %v5117_v35, %v4995_v19  ;;  %v5232_v52 = vpop.f32.mrf.mxu0  ;;  %v4924_v19 = vld [vmem:[%s12165_s5 + $0x68] sm:$0xff] }
 0x582   : > { %5657 = vst [vmem:[%s12165_s5 + $0x2b0] sm:$0xff] %v5545_v56  ;;  %v5546_v58 = vadd.f32 %v5232_v52, %v4998_v30  ;;  %v5119_v39 = vpop.f32.mrf.mxu1  ;;  %v4929_v56 = vld [vmem:[%s12165_s5 + $0x90] sm:$0xff] }
 0x583   : > { %5655 = vst [vmem:[%s12165_s5 + $0x2a0] sm:$0xff] %v5543_v63  ;;  %v5544_v40 = vadd.f32 %v5119_v39, %v4996_v48  ;;  %v5234_v37 = vpop.f32.mrf.mxu0  ;;  %v4931_v39 = vld [vmem:[%s12165_s5 + $0xa0] sm:$0xff] }
 0x584   : > { %5658 = vst [vmem:[%s12165_s5 + $0x2b8] sm:$0xff] %v5546_v58  ;;  %v5552_v4 = vadd.f32 %v5234_v37, %v5004_v20  ;;  %v5121_v31 = vpop.f32.mrf.mxu1  ;;  %v4930_v20 = vld [vmem:[%s12165_s5 + $0x98] sm:$0xff] }
 0x585   : > { %5656 = vst [vmem:[%s12165_s5 + $0x2a8] sm:$0xff] %v5544_v40  ;;  %v5550_v0 = vadd.f32 %v5121_v31, %v5002_v15  ;;  %v5236_v53 = vpop.f32.mrf.mxu0 }
 0x586   : > { %5664 = vst [vmem:[%s12165_s5 + $0x2e8] sm:$0xff] %v5552_v4  ;;  %v5553_v50 = vadd.f32 %v5236_v53, %v5005_v27  ;;  %v5123_v13 = vpop.f32.mrf.mxu1  ;;  %v4936_v27 = vld [vmem:[%s12165_s5 + $0xc8] sm:$0xff]  ;;  %v4937_v53 = vld [vmem:[%s12165_s5 + $0xd0] sm:$0xff] }
 0x587   : > { %5662 = vst [vmem:[%s12165_s5 + $0x2d8] sm:$0xff] %v5550_v0  ;;  %v5551_v28 = vadd.f32 %v5123_v13, %v5003_v23  ;;  %v5240_v34 = vpop.f32.mrf.mxu0 }
 0x588   : > { %5665 = vst [vmem:[%s12165_s5 + $0x2f0] sm:$0xff] %v5553_v50  ;;  %v5559_v49 = vadd.f32 %v5240_v34, %v5011_v1  ;;  %v5127_v42 = vpop.f32.mrf.mxu1  ;;  %v4938_v50 = vld [vmem:[%s12165_s5 + $0xd8] sm:$0xff]  ;;  %v4943_v34 = vld [vmem:[%s12165_s5 + $0x100] sm:$0xff] }
 0x589   : > { %5663 = vst [vmem:[%s12165_s5 + $0x2e0] sm:$0xff] %v5551_v28  ;;  %v5557_v51 = vadd.f32 %v5127_v42, %v5009_v62  ;;  %v5242_v57 = vpop.f32.mrf.mxu0 }
 0x58a   : > { %5671 = vst [vmem:[%s12165_s5 + $0x320] sm:$0xff] %v5559_v49  ;;  %v5560_v24 = vadd.f32 %v5242_v57, %v5012_v7  ;;  %v5129_v16 = vpop.f32.mrf.mxu1 }
 0x58b   : > { %5669 = vst [vmem:[%s12165_s5 + $0x310] sm:$0xff] %v5557_v51  ;;  %v5558_v29 = vadd.f32 %v5129_v16, %v5010_v5  ;;  %v5244_v36 = vpop.f32.mrf.mxu0  ;;  %v4944_v51 = vld [vmem:[%s12165_s5 + $0x108] sm:$0xff] }
 0x58c   : > { %5672 = vst [vmem:[%s12165_s5 + $0x328] sm:$0xff] %v5560_v24  ;;  %v5566_v45 = vadd.f32 %v5244_v36, %v5018_v12  ;;  %v5131_v2 = vpop.f32.mrf.mxu1  ;;  %v4945_v12 = vld [vmem:[%s12165_s5 + $0x110] sm:$0xff] }
 0x58d   : > { %5670 = vst [vmem:[%s12165_s5 + $0x318] sm:$0xff] %v5558_v29  ;;  %v5564_v43 = vadd.f32 %v5131_v2, %v5016_v38  ;;  %v5246_v54 = vpop.f32.mrf.mxu0  ;;  %v4950_v29 = vld [vmem:[%s12165_s5 + $0x138] sm:$0xff] }
 0x58e   : > { %5678 = vst [vmem:[%s12165_s5 + $0x358] sm:$0xff] %v5566_v45  ;;  %v5567_v41 = vadd.f32 %v5246_v54, %v5019_v26  ;;  %v5133_v18 = vpop.f32.mrf.mxu1  ;;  %v4952_v54 = vld [vmem:[%s12165_s5 + $0x148] sm:$0xff] }
 0x58f   : > { %5676 = vst [vmem:[%s12165_s5 + $0x348] sm:$0xff] %v5564_v43  ;;  %v5565_v44 = vadd.f32 %v5133_v18, %v5017_v25  ;;  %v5964_v9 = vpop.f32.mrf.mxu0  ;;  %v4951_v25 = vld [vmem:[%s12165_s5 + $0x140] sm:$0xff] }
 0x590   : > { %5679 = vst [vmem:[%s12165_s5 + $0x360] sm:$0xff] %v5567_v41  ;;  %v5283_v61 = vpop.f32.mrf.mxu1 }
 0x591   : > { %5677 = vst [vmem:[%s12165_s5 + $0x350] sm:$0xff] %v5565_v44  ;;  %v5463_v60 = vadd.f32 %v5283_v61, %v4915_v21  ;;  %v5965_v10 = vpop.f32.mrf.mxu0  ;;  %v4957_v44 = vld [vmem:[%s12165_s5 + $0x170] sm:$0xff] }
 0x592   : > { %v5966_v14 = vadd.f32 %v5965_v10, %v5964_v9  ;;  %v5285_v46 = vpop.f32.mrf.mxu1 }
 0x593   : > { %5575 = vst [vmem:[%s12165_s5 + $0x20] sm:$0xff] %v5463_v60  ;;  %v5464_v59 = vadd.f32 %v5285_v46, %v4916_v33  ;;  %v5967_v6 = vpop.f32.mrf.mxu0 }
 0x594   : > { %v5465_v22 = vadd.f32 %v5966_v14, %v4917_v3  ;;  %v5287_v17 = vpop.f32.mrf.mxu1  ;;  %v4958_v3 = vld [vmem:[%s12165_s5 + $0x178] sm:$0xff]  ;;  %v4959_v14 = vld [vmem:[%s12165_s5 + $0x180] sm:$0xff] }
 0x595   : > { %5576 = vst [vmem:[%s12165_s5 + $0x28] sm:$0xff] %v5464_v59  ;;  %v5470_v47 = vadd.f32 %v5287_v17, %v4922_v55  ;;  %v5968_v11 = vpop.f32.mrf.mxu0 }
 0x596   : > { %5577 = vst.msk [vmem:[%s12165_s5 + $0x30] sm:$0xff] %vm2029_vm2, %v5465_v22  ;;  %v5969_v8 = vadd.f32 %v5968_v11, %v5967_v6  ;;  %v5289_v30 = vpop.f32.mrf.mxu1  ;;  %v4964_v6 = vld [vmem:[%s12165_s5 + $0x1a8] sm:$0xff] }
 0x597   : > { %5582 = vst [vmem:[%s12165_s5 + $0x58] sm:$0xff] %v5470_v47  ;;  %v5471_v35 = vadd.f32 %v5289_v30, %v4923_v32  ;;  %v5970_v48 = vpop.f32.mrf.mxu0 }
 0x598   : > { %v5472_v63 = vadd.f32 %v5969_v8, %v4924_v19  ;;  %v5293_v52 = vpop.f32.mrf.mxu1  ;;  %v4965_v19 = vld [vmem:[%s12165_s5 + $0x1b0] sm:$0xff]  ;;  %v4966_v8 = vld [vmem:[%s12165_s5 + $0x1b8] sm:$0xff] }
 0x599   : > { %5583 = vst [vmem:[%s12165_s5 + $0x60] sm:$0xff] %v5471_v35  ;;  %v5477_v58 = vadd.f32 %v5293_v52, %v4929_v56  ;;  %v5971_v15 = vpop.f32.mrf.mxu0 }
 0x59a   : > { %5584 = vst.msk [vmem:[%s12165_s5 + $0x68] sm:$0xff] %vm2029_vm2, %v5472_v63  ;;  %v5972_v40 = vadd.f32 %v5971_v15, %v5970_v48  ;;  %v5295_v37 = vpop.f32.mrf.mxu1  ;;  %v4971_v48 = vld [vmem:[%s12165_s5 + $0x1e0] sm:$0xff] }
 0x59b   : > { %5589 = vst [vmem:[%s12165_s5 + $0x90] sm:$0xff] %v5477_v58  ;;  %v5478_v4 = vadd.f32 %v5295_v37, %v4930_v20  ;;  %v5973_v31 = vpop.f32.mrf.mxu0 }
 0x59c   : > { %v5479_v23 = vadd.f32 %v5972_v40, %v4931_v39  ;;  %v5297_v0 = vpop.f32.mrf.mxu1  ;;  %v4972_v39 = vld [vmem:[%s12165_s5 + $0x1e8] sm:$0xff]  ;;  %v4973_v40 = vld [vmem:[%s12165_s5 + $0x1f0] sm:$0xff] }
 0x59d   : > { %5590 = vst [vmem:[%s12165_s5 + $0x98] sm:$0xff] %v5478_v4  ;;  %v5484_v1 = vadd.f32 %v5297_v0, %v4936_v27  ;;  %v5974_v13 = vpop.f32.mrf.mxu0 }
 0x59e   : > { %5591 = vst.msk [vmem:[%s12165_s5 + $0xa0] sm:$0xff] %vm2029_vm2, %v5479_v23  ;;  %v5975_v62 = vadd.f32 %v5974_v13, %v5973_v31  ;;  %v5299_v28 = vpop.f32.mrf.mxu1  ;;  %v4978_v31 = vld [vmem:[%s12165_s5 + $0x218] sm:$0xff] }
 0x59f   : > { %5596 = vst [vmem:[%s12165_s5 + $0xc8] sm:$0xff] %v5484_v1  ;;  %v5485_v7 = vadd.f32 %v5299_v28, %v4937_v53  ;;  %v5976_v49 = vpop.f32.mrf.mxu0 }
 0x5a0   : > { %v5486_v42 = vadd.f32 %v5975_v62, %v4938_v50  ;;  %v5303_v5 = vpop.f32.mrf.mxu1  ;;  %v4979_v50 = vld [vmem:[%s12165_s5 + $0x220] sm:$0xff]  ;;  %v4980_v62 = vld [vmem:[%s12165_s5 + $0x228] sm:$0xff] }
 0x5a1   : > { %5597 = vst [vmem:[%s12165_s5 + $0xd0] sm:$0xff] %v5485_v7  ;;  %v5491_v57 = vadd.f32 %v5303_v5, %v4943_v34  ;;  %v5977_v24 = vpop.f32.mrf.mxu0 }
 0x5a2   : > { %5598 = vst.msk [vmem:[%s12165_s5 + $0xd8] sm:$0xff] %vm2029_vm2, %v5486_v42  ;;  %v5978_v16 = vadd.f32 %v5977_v24, %v5976_v49  ;;  %v5305_v38 = vpop.f32.mrf.mxu1  ;;  %v4985_v49 = vld [vmem:[%s12165_s5 + $0x250] sm:$0xff] }
 0x5a3   : > { %5603 = vst [vmem:[%s12165_s5 + $0x100] sm:$0xff] %v5491_v57  ;;  %v5492_v36 = vadd.f32 %v5305_v38, %v4944_v51  ;;  %v5979_v26 = vpop.f32.mrf.mxu0 }
 0x5a4   : > { %v5493_v45 = vadd.f32 %v5978_v16, %v4945_v12  ;;  %v5307_v2 = vpop.f32.mrf.mxu1  ;;  %v4986_v12 = vld [vmem:[%s12165_s5 + $0x258] sm:$0xff]  ;;  %v4987_v16 = vld [vmem:[%s12165_s5 + $0x260] sm:$0xff] }
 0x5a5   : > { %5604 = vst [vmem:[%s12165_s5 + $0x108] sm:$0xff] %v5492_v36  ;;  %v5498_v43 = vadd.f32 %v5307_v2, %v4950_v29  ;;  %v5980_v41 = vpop.f32.mrf.mxu0 }
 0x5a6   : > { %5605 = vst.msk [vmem:[%s12165_s5 + $0x110] sm:$0xff] %vm2029_vm2, %v5493_v45  ;;  %v5981_v18 = vadd.f32 %v5980_v41, %v5979_v26  ;;  %v5309_v21 = vpop.f32.mrf.mxu1  ;;  %v4992_v26 = vld [vmem:[%s12165_s5 + $0x288] sm:$0xff] }
 0x5a7   : > { %5610 = vst [vmem:[%s12165_s5 + $0x138] sm:$0xff] %v5498_v43  ;;  %v5499_v9 = vadd.f32 %v5309_v21, %v4951_v25  ;;  %v5982_v61 = vpop.f32.mrf.mxu0 }
 0x5a8   : > { %v5500_v33 = vadd.f32 %v5981_v18, %v4952_v54  ;;  %v5313_v60 = vpop.f32.mrf.mxu1  ;;  %v4993_v54 = vld [vmem:[%s12165_s5 + $0x290] sm:$0xff]  ;;  %v4994_v18 = vld [vmem:[%s12165_s5 + $0x298] sm:$0xff] }
 0x5a9   : > { %5611 = vst [vmem:[%s12165_s5 + $0x140] sm:$0xff] %v5499_v9  ;;  %v5505_v10 = vadd.f32 %v5313_v60, %v4957_v44  ;;  %v5983_v46 = vpop.f32.mrf.mxu0 }
 0x5aa   : > { %5612 = vst.msk [vmem:[%s12165_s5 + $0x148] sm:$0xff] %vm2029_vm2, %v5500_v33  ;;  %v5984_v55 = vadd.f32 %v5983_v46, %v5982_v61  ;;  %v5315_v59 = vpop.f32.mrf.mxu1  ;;  %v4999_v61 = vld [vmem:[%s12165_s5 + $0x2c0] sm:$0xff] }
 0x5ab   : > { %5617 = vst [vmem:[%s12165_s5 + $0x170] sm:$0xff] %v5505_v10  ;;  %v5506_v22 = vadd.f32 %v5315_v59, %v4958_v3  ;;  %v5985_v17 = vpop.f32.mrf.mxu0 }
 0x5ac   : > { %v5507_v32 = vadd.f32 %v5984_v55, %v4959_v14  ;;  %v5317_v47 = vpop.f32.mrf.mxu1  ;;  %v5000_v14 = vld [vmem:[%s12165_s5 + $0x2c8] sm:$0xff]  ;;  %v5001_v55 = vld [vmem:[%s12165_s5 + $0x2d0] sm:$0xff] }
 0x5ad   : > { %5618 = vst [vmem:[%s12165_s5 + $0x178] sm:$0xff] %v5506_v22  ;;  %v5512_v11 = vadd.f32 %v5317_v47, %v4964_v6  ;;  %v5986_v30 = vpop.f32.mrf.mxu0 }
 0x5ae   : > { %5619 = vst.msk [vmem:[%s12165_s5 + $0x180] sm:$0xff] %vm2029_vm2, %v5507_v32  ;;  %v5987_v56 = vadd.f32 %v5986_v30, %v5985_v17  ;;  %v5319_v35 = vpop.f32.mrf.mxu1  ;;  %v5006_v17 = vld [vmem:[%s12165_s5 + $0x2f8] sm:$0xff] }
 0x5af   : > { %5624 = vst [vmem:[%s12165_s5 + $0x1a8] sm:$0xff] %v5512_v11  ;;  %v5513_v63 = vadd.f32 %v5319_v35, %v4965_v19  ;;  %v5988_v52 = vpop.f32.mrf.mxu0 }
 0x5b0   : > { %v5514_v20 = vadd.f32 %v5987_v56, %v4966_v8  ;;  %v5323_v58 = vpop.f32.mrf.mxu1  ;;  %v5007_v8 = vld [vmem:[%s12165_s5 + $0x300] sm:$0xff]  ;;  %v5008_v56 = vld [vmem:[%s12165_s5 + $0x308] sm:$0xff] }
 0x5b1   : > { %5625 = vst [vmem:[%s12165_s5 + $0x1b0] sm:$0xff] %v5513_v63  ;;  %v5519_v15 = vadd.f32 %v5323_v58, %v4971_v48  ;;  %v5989_v37 = vpop.f32.mrf.mxu0 }
 0x5b2   : > { %5626 = vst.msk [vmem:[%s12165_s5 + $0x1b8] sm:$0xff] %vm2029_vm2, %v5514_v20  ;;  %v5990_v27 = vadd.f32 %v5989_v37, %v5988_v52  ;;  %v5325_v4 = vpop.f32.mrf.mxu1  ;;  %v5013_v52 = vld [vmem:[%s12165_s5 + $0x330] sm:$0xff] }
 0x5b3   : > { %5631 = vst [vmem:[%s12165_s5 + $0x1e0] sm:$0xff] %v5519_v15  ;;  %v5520_v23 = vadd.f32 %v5325_v4, %v4972_v39  ;;  %v5991_v0 = vpop.f32.mrf.mxu0 }
 0x5b4   : > { %v5521_v53 = vadd.f32 %v5990_v27, %v4973_v40  ;;  %v5327_v1 = vpop.f32.mrf.mxu1  ;;  %v5014_v40 = vld [vmem:[%s12165_s5 + $0x338] sm:$0xff]  ;;  %v5015_v27 = vld [vmem:[%s12165_s5 + $0x340] sm:$0xff] }
 0x5b5   : > { %5632 = vst [vmem:[%s12165_s5 + $0x1e8] sm:$0xff] %v5520_v23  ;;  %v5526_v13 = vadd.f32 %v5327_v1, %v4978_v31  ;;  %v5992_v28 = vpop.f32.mrf.mxu0 }
 0x5b6   : > { %5633 = vst.msk [vmem:[%s12165_s5 + $0x1f0] sm:$0xff] %vm2029_vm2, %v5521_v53  ;;  %v5993_v34 = vadd.f32 %v5992_v28, %v5991_v0  ;;  %v5329_v7 = vpop.f32.mrf.mxu1  ;;  %v5020_v0 = vld [vmem:[%s12165_s5 + $0x368] sm:$0xff] }
 0x5b7   : > { %5638 = vst [vmem:[%s12165_s5 + $0x218] sm:$0xff] %v5526_v13  ;;  %v5527_v42 = vadd.f32 %v5329_v7, %v4979_v50  ;;  %v5994_v5 = vpop.f32.mrf.mxu0 }
 0x5b8   : > { %v5528_v51 = vadd.f32 %v5993_v34, %v4980_v62  ;;  %v5333_v57 = vpop.f32.mrf.mxu1  ;;  %v5021_v62 = vld [vmem:[%s12165_s5 + $0x370] sm:$0xff]  ;;  %v5022_v34 = vld [vmem:[%s12165_s5 + $0x378] sm:$0xff] }
 0x5b9   : > { %5639 = vst [vmem:[%s12165_s5 + $0x220] sm:$0xff] %v5527_v42  ;;  %v5533_v24 = vadd.f32 %v5333_v57, %v4985_v49  ;;  %v5995_v38 = vpop.f32.mrf.mxu0 }
 0x5ba   : > { %5640 = vst.msk [vmem:[%s12165_s5 + $0x228] sm:$0xff] %vm2029_vm2, %v5528_v51  ;;  %v5996_v29 = vadd.f32 %v5995_v38, %v5994_v5  ;;  %v5335_v36 = vpop.f32.mrf.mxu1 }
 0x5bb   : > { %5645 = vst [vmem:[%s12165_s5 + $0x250] sm:$0xff] %v5533_v24  ;;  %v5534_v45 = vadd.f32 %v5335_v36, %v4986_v12  ;;  %v5997_v2 = vpop.f32.mrf.mxu0 }
 0x5bc   : > { %v5535_v25 = vadd.f32 %v5996_v29, %v4987_v16  ;;  %v5337_v43 = vpop.f32.mrf.mxu1 }
 0x5bd   : > { %5646 = vst [vmem:[%s12165_s5 + $0x258] sm:$0xff] %v5534_v45  ;;  %v5540_v41 = vadd.f32 %v5337_v43, %v4992_v26  ;;  %v5998_v21 = vpop.f32.mrf.mxu0 }
 0x5be   : > { %5647 = vst.msk [vmem:[%s12165_s5 + $0x260] sm:$0xff] %vm2029_vm2, %v5535_v25  ;;  %v5999_v44 = vadd.f32 %v5998_v21, %v5997_v2  ;;  %v5339_v9 = vpop.f32.mrf.mxu1 }
 0x5bf   : > { %5652 = vst [vmem:[%s12165_s5 + $0x288] sm:$0xff] %v5540_v41  ;;  %v5541_v33 = vadd.f32 %v5339_v9, %v4993_v54  ;;  %v6000_v60 = vpop.f32.mrf.mxu0 }
 0x5c0   : > { %v5542_v3 = vadd.f32 %v5999_v44, %v4994_v18  ;;  %v5343_v10 = vpop.f32.mrf.mxu1 }
 0x5c1   : > { %5653 = vst [vmem:[%s12165_s5 + $0x290] sm:$0xff] %v5541_v33  ;;  %v5547_v46 = vadd.f32 %v5343_v10, %v4999_v61  ;;  %v6001_v59 = vpop.f32.mrf.mxu0 }
 0x5c2   : > { %5654 = vst.msk [vmem:[%s12165_s5 + $0x298] sm:$0xff] %vm2029_vm2, %v5542_v3  ;;  %v6002_v6 = vadd.f32 %v6001_v59, %v6000_v60  ;;  %v5345_v22 = vpop.f32.mrf.mxu1 }
 0x5c3   : > { %5659 = vst [vmem:[%s12165_s5 + $0x2c0] sm:$0xff] %v5547_v46  ;;  %v5548_v32 = vadd.f32 %v5345_v22, %v5000_v14  ;;  %v6003_v47 = vpop.f32.mrf.mxu0 }
 0x5c4   : > { %v5549_v19 = vadd.f32 %v6002_v6, %v5001_v55  ;;  %v5347_v11 = vpop.f32.mrf.mxu1 }
 0x5c5   : > { %5660 = vst [vmem:[%s12165_s5 + $0x2c8] sm:$0xff] %v5548_v32  ;;  %v5554_v30 = vadd.f32 %v5347_v11, %v5006_v17  ;;  %v6004_v35 = vpop.f32.mrf.mxu0 }
 0x5c6   : > { %5661 = vst.msk [vmem:[%s12165_s5 + $0x2d0] sm:$0xff] %vm2029_vm2, %v5549_v19  ;;  %v6005_v48 = vadd.f32 %v6004_v35, %v6003_v47  ;;  %v5349_v63 = vpop.f32.mrf.mxu1 }
 0x5c7   : > { %5666 = vst [vmem:[%s12165_s5 + $0x2f8] sm:$0xff] %v5554_v30  ;;  %v5555_v20 = vadd.f32 %v5349_v63, %v5007_v8  ;;  %v6006_v58 = vpop.f32.mrf.mxu0 }
 0x5c8   : > { %v5556_v39 = vadd.f32 %v6005_v48, %v5008_v56  ;;  %v5353_v15 = vpop.f32.mrf.mxu1 }
 0x5c9   : > { %5667 = vst [vmem:[%s12165_s5 + $0x300] sm:$0xff] %v5555_v20  ;;  %v5561_v37 = vadd.f32 %v5353_v15, %v5013_v52  ;;  %v6007_v4 = vpop.f32.mrf.mxu0 }
 0x5ca   : > { %5668 = vst.msk [vmem:[%s12165_s5 + $0x308] sm:$0xff] %vm2029_vm2, %v5556_v39  ;;  %v6008_v31 = vadd.f32 %v6007_v4, %v6006_v58  ;;  %v5355_v23 = vpop.f32.mrf.mxu1 }
 0x5cb   : > { %5673 = vst [vmem:[%s12165_s5 + $0x330] sm:$0xff] %v5561_v37  ;;  %v5562_v53 = vadd.f32 %v5355_v23, %v5014_v40  ;;  %v6009_v1 = vpop.f32.mrf.mxu0 }
 0x5cc   : > { %v5563_v50 = vadd.f32 %v6008_v31, %v5015_v27  ;;  %v5357_v13 = vpop.f32.mrf.mxu1 }
 0x5cd   : > { %5674 = vst [vmem:[%s12165_s5 + $0x338] sm:$0xff] %v5562_v53  ;;  %v5568_v28 = vadd.f32 %v5357_v13, %v5020_v0  ;;  %v6010_v7 = vpop.f32.mrf.mxu0 }
 0x5ce   : > { %5675 = vst.msk [vmem:[%s12165_s5 + $0x340] sm:$0xff] %vm2029_vm2, %v5563_v50  ;;  %v6011_v49 = vadd.f32 %v6010_v7, %v6009_v1  ;;  %v5359_v42 = vpop.f32.mrf.mxu1 }
 0x5cf   : > { %5680 = vst [vmem:[%s12165_s5 + $0x368] sm:$0xff] %v5568_v28  ;;  %v5569_v5 = vadd.f32 %v5359_v42, %v5021_v62 }
 0x5d0   : > { %v5570_v51 = vadd.f32 %v6011_v49, %v5022_v34 }
 0x5d1   : > { %5681 = vst [vmem:[%s12165_s5 + $0x370] sm:$0xff] %v5569_v5 }
 0x5d2   : > { %5682 = vst.msk [vmem:[%s12165_s5 + $0x378] sm:$0xff] %vm2029_vm2, %v5570_v51 }
 0x5d3 PF: > { %s15_s18 = sadd.s32 1, %s6249_s18  }
 0x5d4   : > { %p12_p5 = scmp.ge.s32.totalorder %s15_s18, 4  }
 0x5d6   :  { %14 = sbr.rel (!%p12_p5) target bundleno = 1 (0x1), region = 75 }

</bundles_post_ra>
